<compile_context>
chip_gen: v7x
topology: tpu7x:2x2x1
jax: 0.10.0
libtpu: 0.0.40
codegen_flags: <defaults>
</compile_context>

<pallas_src>
import jax
import jax.numpy as jnp
from jax import lax
from jax.experimental import pallas as pl
from jax.experimental.pallas import tpu as pltpu

# All per-call VMEM footprints (blocks + double buffering) are <= ~12 MB, so a
# single conservative limit works on every generation (v7x physical = 64 MB).
_VMEM_LIMIT = 32 * 1024 * 1024


# ---------------------------------------------------------------------------
# Kernel 1: conv1 (1->32) as an im2col matmul + bias + ReLU, tiled over M.
# ---------------------------------------------------------------------------
def _mm_bias_relu_kernel(x_ref, w_ref, b_ref, o_ref):
    acc = jnp.dot(x_ref[...], w_ref[...], preferred_element_type=jnp.float32)
    o_ref[...] = jnp.maximum(acc + b_ref[...], 0.0).astype(o_ref.dtype)


def conv1_im2col_matmul(patches, w, b, *, bm=4096):
    M, K = patches.shape
    _, N = w.shape
    bm = M if M <= bm else bm          # full-extent block is legal for any M
    return pl.pallas_call(
        _mm_bias_relu_kernel,
        out_shape=jax.ShapeDtypeStruct((M, N), jnp.bfloat16),
        grid=(pl.cdiv(M, bm),),
        in_specs=[
            pl.BlockSpec((bm, K), lambda i: (i, 0)),
            pl.BlockSpec((K, N), lambda i: (0, 0)),
            pl.BlockSpec((1, N), lambda i: (0, 0)),
        ],
        out_specs=pl.BlockSpec((bm, N), lambda i: (i, 0)),
        compiler_params=pltpu.CompilerParams(
            dimension_semantics=("parallel",),
            vmem_limit_bytes=_VMEM_LIMIT),
    )(patches, w, b)


# ---------------------------------------------------------------------------
# Kernel 2: conv2 (32->64, K=288 im2col) + bias + ReLU + fused 2x2 max-pool.
# Input rows per image are pre-ordered (hbit, wbit, hp, wp) so the pool is a
# max of four contiguous 144-row slices; the pooled output rows come out in
# (hp, wp) order with channels in lanes == NHWC flatten of the pooled map.
# ---------------------------------------------------------------------------
def _conv2_pool_kernel(a_ref, w_ref, b_ref, o_ref):
    bt = a_ref.shape[0]
    x = a_ref[...].reshape(bt * 576, 288)                      # leading-dim merge (free)
    acc = jnp.dot(x, w_ref[...], preferred_element_type=jnp.float32)
    acc = jnp.maximum(acc + b_ref[...], 0.0).reshape(bt, 576, 64)
    pooled = jnp.maximum(
        jnp.maximum(acc[:, 0:144, :], acc[:, 144:288, :]),     # (hbit,wbit)=(0,0),(0,1)
        jnp.maximum(acc[:, 288:432, :], acc[:, 432:576, :]))   # (1,0),(1,1)
    o_ref[...] = pooled.astype(o_ref.dtype)


def conv2_relu_pool(adx9, w2, b2, *, bt=8):
    B = adx9.shape[0]
    bt = B if B <= bt else bt
    return pl.pallas_call(
        _conv2_pool_kernel,
        out_shape=jax.ShapeDtypeStruct((B, 144, 64), jnp.bfloat16),
        grid=(pl.cdiv(B, bt),),
        in_specs=[
            pl.BlockSpec((bt, 576, 288), lambda b: (b, 0, 0)),
            pl.BlockSpec((288, 64), lambda b: (0, 0)),
            pl.BlockSpec((1, 64), lambda b: (0, 0)),
        ],
        out_specs=pl.BlockSpec((bt, 144, 64), lambda b: (b, 0, 0)),
        compiler_params=pltpu.CompilerParams(
            dimension_semantics=("parallel",),
            vmem_limit_bytes=_VMEM_LIMIT),
    )(adx9, w2, b2)


# ---------------------------------------------------------------------------
# Kernel 3: fused fc1 + ReLU + fc2 + log_softmax, one grid step per m-tile.
# fc1w / fc2w stay VMEM-resident (constant index_map); no K streaming.
# ---------------------------------------------------------------------------
def _fc_tail_kernel(x_ref, w1_ref, b1_ref, w2_ref, b2_ref, o_ref):
    h = jnp.dot(x_ref[...], w1_ref[...], preferred_element_type=jnp.float32)
    h = jnp.maximum(h + b1_ref[...], 0.0)
    logits = jnp.dot(h.astype(w2_ref.dtype), w2_ref[...],
                     preferred_element_type=jnp.float32) + b2_ref[...]
    m = jnp.max(logits, axis=-1, keepdims=True)
    s = logits - m
    lse = jnp.log(jnp.sum(jnp.exp(s), axis=-1, keepdims=True))
    o_ref[...] = (s - lse).astype(o_ref.dtype)


def fc1_relu_fc2_logsoftmax(x, w1, b1, w2, b2, *, bm=128):
    B, K = x.shape
    _, H = w1.shape
    _, N = w2.shape
    bm = B if B <= bm else bm          # bm=128 is a multiple of 8; partial tail masked
    return pl.pallas_call(
        _fc_tail_kernel,
        out_shape=jax.ShapeDtypeStruct((B, N), jnp.float32),
        grid=(pl.cdiv(B, bm),),
        in_specs=[
            pl.BlockSpec((bm, K), lambda m: (m, 0)),
            pl.BlockSpec((K, H), lambda m: (0, 0)),
            pl.BlockSpec((1, H), lambda m: (0, 0)),
            pl.BlockSpec((H, N), lambda m: (0, 0)),
            pl.BlockSpec((1, N), lambda m: (0, 0)),
        ],
        out_specs=pl.BlockSpec((bm, N), lambda m: (m, 0)),
        compiler_params=pltpu.CompilerParams(
            dimension_semantics=("parallel",),
            vmem_limit_bytes=_VMEM_LIMIT),
    )(x, w1, b1, w2, b2)


# ---------------------------------------------------------------------------
# Parameters (PyTorch layout) + one-time relayout into kernel-ready form.
# ---------------------------------------------------------------------------
def init_params(key):
    ks = jax.random.split(key, 8)

    def u(k, shape, fan_in):
        bound = 1.0 / jnp.sqrt(float(fan_in))
        return jax.random.uniform(k, shape, jnp.float32, -bound, bound)

    return {
        "conv1_w": u(ks[0], (32, 1, 3, 3), 1 * 9),
        "conv1_b": u(ks[1], (32,), 1 * 9),
        "conv2_w": u(ks[2], (64, 32, 3, 3), 32 * 9),
        "conv2_b": u(ks[3], (64,), 32 * 9),
        "fc1_w":   u(ks[4], (128, 9216), 9216),   # PyTorch (out, in)
        "fc1_b":   u(ks[5], (128,), 9216),
        "fc2_w":   u(ks[6], (10, 128), 128),
        "fc2_b":   u(ks[7], (10,), 128),
    }


def prepare_params(p):
    """One-time relayout: fold all transposes / flatten permutation into init."""
    # conv weights -> (tap*cin, cout) matmul matrices, tap index = dy*3+dx
    w1m = jnp.transpose(p["conv1_w"], (2, 3, 1, 0)).reshape(9, 32)
    w2m = jnp.transpose(p["conv2_w"], (2, 3, 1, 0)).reshape(288, 64)
    # fold the NHWC flatten order of the pooled map into fc1's row order so
    # flat_NHWC @ fc1w == flat_NCHW @ fc1_w.T  (matches torch.flatten(x, 1))
    fc1w = (p["fc1_w"].reshape(128, 64, 12, 12)
            .transpose(2, 3, 1, 0).reshape(9216, 128))
    return {
        "w1m": w1m.astype(jnp.bfloat16),
        "b1": p["conv1_b"].reshape(1, 32).astype(jnp.float32),
        "w2m": w2m.astype(jnp.bfloat16),
        "b2": p["conv2_b"].reshape(1, 64).astype(jnp.float32),
        "fc1w": fc1w.astype(jnp.bfloat16),
        "fc1b": p["fc1_b"].reshape(1, 128).astype(jnp.float32),
        "fc2w": p["fc2_w"].T.astype(jnp.bfloat16),
        "fc2b": p["fc2_b"].reshape(1, 10).astype(jnp.float32),
    }


# ---------------------------------------------------------------------------
# Forward pass (eval mode).
# ---------------------------------------------------------------------------
def net_forward(prep, x_nchw):
    x = jnp.transpose(x_nchw, (0, 2, 3, 1)).astype(jnp.bfloat16)   # (B,28,28,1) bf16
    B = x.shape[0]

    # conv1 + ReLU: im2col (9 taps of a 1-channel image) built in XLA glue.
    cols = [x[:, dy:dy + 26, dx:dx + 26, :] for dy in range(3) for dx in range(3)]
    patches = jnp.stack(cols, axis=3).reshape(B * 26 * 26, 9)
    a1 = conv1_im2col_matmul(patches, prep["w1m"], prep["b1"])
    a1 = a1.reshape(B, 26, 26, 32)                                  # bf16 NHWC

    # conv2 im2col: 9 taps concatenated into a K=288 bf16 tensor; rows permuted
    # to (hbit, wbit, hp, wp) so the in-kernel 2x2 pool is 4 contiguous slices.
    taps = [a1[:, dy:dy + 24, dx:dx + 24, :] for dy in range(3) for dx in range(3)]
    adx9 = jnp.concatenate(taps, axis=3)                            # (B,24,24,288)
    adx9 = (adx9.reshape(B, 12, 2, 12, 2, 288)
                 .transpose(0, 2, 4, 1, 3, 5)
                 .reshape(B, 576, 288))
    # conv2 + bias + ReLU + maxpool(2), pooled output already in NHWC-flatten order
    pooled = conv2_relu_pool(adx9, prep["w2m"], prep["b2"])         # (B,144,64) bf16

    # TODO(synk): dropout1/dropout2 are identity here (eval/inference mode).
    flat = pooled.reshape(B, 12 * 12 * 64)                          # free view, bf16

    # fused fc1 -> ReLU -> fc2 -> log_softmax
    return fc1_relu_fc2_logsoftmax(flat, prep["fc1w"], prep["fc1b"],
                                   prep["fc2w"], prep["fc2b"])


# ---------------------------------------------------------------------------
# Pure-JAX reference (f32) with the original PyTorch layouts, for validation.
# ---------------------------------------------------------------------------
def reference_forward(params, x_nchw):
    x = x_nchw.astype(jnp.float32)
    y = lax.conv_general_dilated(x, params["conv1_w"], (1, 1), "VALID",
                                 dimension_numbers=("NCHW", "OIHW", "NCHW"))
    y = jnp.maximum(y + params["conv1_b"].reshape(1, 32, 1, 1), 0.0)
    y = lax.conv_general_dilated(y, params["conv2_w"], (1, 1), "VALID",
                                 dimension_numbers=("NCHW", "OIHW", "NCHW"))
    y = jnp.maximum(y + params["conv2_b"].reshape(1, 64, 1, 1), 0.0)
    B = y.shape[0]
    y = y.reshape(B, 64, 12, 2, 12, 2).max(axis=(3, 5))           # maxpool(2)
    y = y.reshape(B, 9216)                                        # NCHW flatten
    y = jnp.maximum(y @ params["fc1_w"].T + params["fc1_b"], 0.0)
    logits = y @ params["fc2_w"].T + params["fc2_b"]
    return jax.nn.log_softmax(logits, axis=-1)


if __name__ == "__main__":
    key = jax.random.PRNGKey(0)
    pkey, xkey = jax.random.split(key)
    params = init_params(pkey)
    prep = prepare_params(params)
    # fc1 expects 9216 = 64*12*12 features -> input spatial size must be 28x28.
    x = jax.random.normal(xkey, (2, 1, 28, 28), jnp.float32)

    out = jax.jit(net_forward)(prep, x)
    out = jax.block_until_ready(out)

    assert out.shape == (2, 10)
    # rows of log_softmax exponentiate to ~1
    assert bool(jnp.allclose(jnp.exp(out).sum(axis=1), 1.0, atol=1e-3))
    # matches the eval-mode PyTorch semantics (bf16 activation/MXU tolerance)
    ref = reference_forward(params, x)
    err = float(jnp.max(jnp.abs(out - ref)))
    assert err < 2e-2, err
    print("KERNEL_OK")
</pallas_src>

<mosaic_0001>
module attributes {stable_mosaic.version = 11 : i64} {
  func.func @_mm_bias_relu_kernel(%arg0: i32, %arg1: memref<1352x9xbf16, #tpu.memory_space<vmem>>, %arg2: memref<9x32xbf16, #tpu.memory_space<vmem>>, %arg3: memref<1x32xf32, #tpu.memory_space<vmem>>, %arg4: memref<1352x32xbf16, #tpu.memory_space<vmem>>) attributes {dimension_semantics = [#tpu.dimension_semantics<parallel>], iteration_bounds = array<i64: 1>, scalar_prefetch = 0 : i64, scratch_operands = 0 : i64, tpu.core_type = #tpu.core_type<tc>, window_params = [{transform_indices = @transform_0, window_bounds = array<i64: 1352, 9>}, {pipeline_mode = #tpu.pipeline_mode<synchronous>, transform_indices = @transform_1, window_bounds = array<i64: 9, 32>}, {pipeline_mode = #tpu.pipeline_mode<synchronous>, transform_indices = @transform_2, window_bounds = array<i64: 1, 32>}, {transform_indices = @transform_3, window_bounds = array<i64: 1352, 32>}]} {
    %c0 = arith.constant 0 : index
    %c0_0 = arith.constant 0 : index
    %0 = vector.load %arg1[%c0, %c0_0] : memref<1352x9xbf16, #tpu.memory_space<vmem>>, vector<1352x9xbf16>
    %c0_1 = arith.constant 0 : index
    %c0_2 = arith.constant 0 : index
    %1 = vector.load %arg2[%c0_1, %c0_2] : memref<9x32xbf16, #tpu.memory_space<vmem>>, vector<9x32xbf16>
    %cst = arith.constant dense<0.000000e+00> : vector<1352x32xf32>
    %2 = tpu.matmul %0, %1, %cst {dimension_numbers = #tpu.dot_dimension_numbers<[1], [0], [0], [1], [0, 0, 1, 1], [], []>} : vector<1352x9xbf16>, vector<9x32xbf16>, vector<1352x32xf32> -> vector<1352x32xf32>
    %c0_3 = arith.constant 0 : index
    %c0_4 = arith.constant 0 : index
    %3 = vector.load %arg3[%c0_3, %c0_4] : memref<1x32xf32, #tpu.memory_space<vmem>>, vector<1x32xf32>
    %4 = vector.broadcast %3 : vector<1x32xf32> to vector<1352x32xf32>
    %5 = arith.addf %2, %4 : vector<1352x32xf32>
    %cst_5 = arith.constant 0.000000e+00 : f32
    %6 = vector.broadcast %cst_5 : f32 to vector<1352x32xf32>
    %7 = arith.maximumf %5, %6 : vector<1352x32xf32>
    %8 = arith.truncf %7 : vector<1352x32xf32> to vector<1352x32xbf16>
    %c0_6 = arith.constant 0 : index
    %c0_7 = arith.constant 0 : index
    %9 = vector.load %arg4[%c0_6, %c0_7] : memref<1352x32xbf16, #tpu.memory_space<vmem>>, vector<1352x32xbf16>
    tpu.vector_store %arg4[%c0_6, %c0_7], %8 {strides = array<i32>} : memref<1352x32xbf16, #tpu.memory_space<vmem>>, vector<1352x32xbf16>,
    return
  }
  func.func @transform_0(%arg0: i32) -> (i32, i32) {
    %c0_i32 = arith.constant 0 : i32
    %c0_i32_0 = arith.constant 0 : i32
    return %arg0, %c0_i32 : i32, i32
  }
  func.func @transform_1(%arg0: i32) -> (i32, i32) {
    %c0_i32 = arith.constant 0 : i32
    %c0_i32_0 = arith.constant 0 : i32
    %c0_i32_1 = arith.constant 0 : i32
    return %c0_i32, %c0_i32_0 : i32, i32
  }
  func.func @transform_2(%arg0: i32) -> (i32, i32) {
    %c0_i32 = arith.constant 0 : i32
    %c0_i32_0 = arith.constant 0 : i32
    %c0_i32_1 = arith.constant 0 : i32
    return %c0_i32, %c0_i32_0 : i32, i32
  }
  func.func @transform_3(%arg0: i32) -> (i32, i32) {
    %c0_i32 = arith.constant 0 : i32
    %c0_i32_0 = arith.constant 0 : i32
    return %arg0, %c0_i32 : i32, i32
  }
}

module attributes {stable_mosaic.version = 11 : i64} {
  func.func @_conv2_pool_kernel(%arg0: i32, %arg1: memref<2x576x288xbf16, #tpu.memory_space<vmem>>, %arg2: memref<288x64xbf16, #tpu.memory_space<vmem>>, %arg3: memref<1x64xf32, #tpu.memory_space<vmem>>, %arg4: memref<2x144x64xbf16, #tpu.memory_space<vmem>>) attributes {dimension_semantics = [#tpu.dimension_semantics<parallel>], iteration_bounds = array<i64: 1>, scalar_prefetch = 0 : i64, scratch_operands = 0 : i64, tpu.core_type = #tpu.core_type<tc>, window_params = [{transform_indices = @transform_0, window_bounds = array<i64: 2, 576, 288>}, {pipeline_mode = #tpu.pipeline_mode<synchronous>, transform_indices = @transform_1, window_bounds = array<i64: 288, 64>}, {pipeline_mode = #tpu.pipeline_mode<synchronous>, transform_indices = @transform_2, window_bounds = array<i64: 1, 64>}, {transform_indices = @transform_3, window_bounds = array<i64: 2, 144, 64>}]} {
    %c0 = arith.constant 0 : index
    %c0_0 = arith.constant 0 : index
    %c0_1 = arith.constant 0 : index
    %0 = vector.load %arg1[%c0, %c0_0, %c0_1] : memref<2x576x288xbf16, #tpu.memory_space<vmem>>, vector<2x576x288xbf16>
    %1 = vector.shape_cast %0 : vector<2x576x288xbf16> to vector<1152x288xbf16>
    %c0_2 = arith.constant 0 : index
    %c0_3 = arith.constant 0 : index
    %2 = vector.load %arg2[%c0_2, %c0_3] : memref<288x64xbf16, #tpu.memory_space<vmem>>, vector<288x64xbf16>
    %cst = arith.constant dense<0.000000e+00> : vector<1152x64xf32>
    %3 = tpu.matmul %1, %2, %cst {dimension_numbers = #tpu.dot_dimension_numbers<[1], [0], [0], [1], [0, 0, 1, 1], [], []>} : vector<1152x288xbf16>, vector<288x64xbf16>, vector<1152x64xf32> -> vector<1152x64xf32>
    %c0_4 = arith.constant 0 : index
    %c0_5 = arith.constant 0 : index
    %4 = vector.load %arg3[%c0_4, %c0_5] : memref<1x64xf32, #tpu.memory_space<vmem>>, vector<1x64xf32>
    %5 = vector.broadcast %4 : vector<1x64xf32> to vector<1152x64xf32>
    %6 = arith.addf %3, %5 : vector<1152x64xf32>
    %cst_6 = arith.constant 0.000000e+00 : f32
    %7 = vector.broadcast %cst_6 : f32 to vector<1152x64xf32>
    %8 = arith.maximumf %6, %7 : vector<1152x64xf32>
    %9 = vector.shape_cast %8 : vector<1152x64xf32> to vector<2x576x64xf32>
    %10 = vector.extract_strided_slice %9 {offsets = [0, 0, 0], sizes = [2, 144, 64], strides = [1, 1, 1]} : vector<2x576x64xf32> to vector<2x144x64xf32>
    %11 = vector.extract_strided_slice %9 {offsets = [0, 144, 0], sizes = [2, 144, 64], strides = [1, 1, 1]} : vector<2x576x64xf32> to vector<2x144x64xf32>
    %12 = arith.maximumf %10, %11 : vector<2x144x64xf32>
    %13 = vector.extract_strided_slice %9 {offsets = [0, 288, 0], sizes = [2, 144, 64], strides = [1, 1, 1]} : vector<2x576x64xf32> to vector<2x144x64xf32>
    %14 = vector.extract_strided_slice %9 {offsets = [0, 432, 0], sizes = [2, 144, 64], strides = [1, 1, 1]} : vector<2x576x64xf32> to vector<2x144x64xf32>
    %15 = arith.maximumf %13, %14 : vector<2x144x64xf32>
    %16 = arith.maximumf %12, %15 : vector<2x144x64xf32>
    %17 = arith.truncf %16 : vector<2x144x64xf32> to vector<2x144x64xbf16>
    %c0_7 = arith.constant 0 : index
    %c0_8 = arith.constant 0 : index
    %c0_9 = arith.constant 0 : index
    %18 = vector.load %arg4[%c0_7, %c0_8, %c0_9] : memref<2x144x64xbf16, #tpu.memory_space<vmem>>, vector<2x144x64xbf16>
    tpu.vector_store %arg4[%c0_7, %c0_8, %c0_9], %17 {strides = array<i32>} : memref<2x144x64xbf16, #tpu.memory_space<vmem>>, vector<2x144x64xbf16>,
    return
  }
  func.func @transform_0(%arg0: i32) -> (i32, i32, i32) {
    %c0_i32 = arith.constant 0 : i32
    %c0_i32_0 = arith.constant 0 : i32
    %c0_i32_1 = arith.constant 0 : i32
    return %arg0, %c0_i32, %c0_i32_0 : i32, i32, i32
  }
  func.func @transform_1(%arg0: i32) -> (i32, i32) {
    %c0_i32 = arith.constant 0 : i32
    %c0_i32_0 = arith.constant 0 : i32
    %c0_i32_1 = arith.constant 0 : i32
    return %c0_i32, %c0_i32_0 : i32, i32
  }
  func.func @transform_2(%arg0: i32) -> (i32, i32) {
    %c0_i32 = arith.constant 0 : i32
    %c0_i32_0 = arith.constant 0 : i32
    %c0_i32_1 = arith.constant 0 : i32
    return %c0_i32, %c0_i32_0 : i32, i32
  }
  func.func @transform_3(%arg0: i32) -> (i32, i32, i32) {
    %c0_i32 = arith.constant 0 : i32
    %c0_i32_0 = arith.constant 0 : i32
    %c0_i32_1 = arith.constant 0 : i32
    return %arg0, %c0_i32, %c0_i32_0 : i32, i32, i32
  }
}

module attributes {stable_mosaic.version = 11 : i64} {
  func.func @_fc_tail_kernel(%arg0: i32, %arg1: memref<2x9216xbf16, #tpu.memory_space<vmem>>, %arg2: memref<9216x128xbf16, #tpu.memory_space<vmem>>, %arg3: memref<1x128xf32, #tpu.memory_space<vmem>>, %arg4: memref<128x10xbf16, #tpu.memory_space<vmem>>, %arg5: memref<1x10xf32, #tpu.memory_space<vmem>>, %arg6: memref<2x10xf32, #tpu.memory_space<vmem>>) attributes {dimension_semantics = [#tpu.dimension_semantics<parallel>], iteration_bounds = array<i64: 1>, scalar_prefetch = 0 : i64, scratch_operands = 0 : i64, tpu.core_type = #tpu.core_type<tc>, window_params = [{transform_indices = @transform_0, window_bounds = array<i64: 2, 9216>}, {pipeline_mode = #tpu.pipeline_mode<synchronous>, transform_indices = @transform_1, window_bounds = array<i64: 9216, 128>}, {pipeline_mode = #tpu.pipeline_mode<synchronous>, transform_indices = @transform_2, window_bounds = array<i64: 1, 128>}, {pipeline_mode = #tpu.pipeline_mode<synchronous>, transform_indices = @transform_3, window_bounds = array<i64: 128, 10>}, {pipeline_mode = #tpu.pipeline_mode<synchronous>, transform_indices = @transform_4, window_bounds = array<i64: 1, 10>}, {transform_indices = @transform_5, window_bounds = array<i64: 2, 10>}]} {
    %c0 = arith.constant 0 : index
    %c0_0 = arith.constant 0 : index
    %0 = vector.load %arg1[%c0, %c0_0] : memref<2x9216xbf16, #tpu.memory_space<vmem>>, vector<2x9216xbf16>
    %c0_1 = arith.constant 0 : index
    %c0_2 = arith.constant 0 : index
    %1 = vector.load %arg2[%c0_1, %c0_2] : memref<9216x128xbf16, #tpu.memory_space<vmem>>, vector<9216x128xbf16>
    %cst = arith.constant dense<0.000000e+00> : vector<2x128xf32>
    %2 = tpu.matmul %0, %1, %cst {dimension_numbers = #tpu.dot_dimension_numbers<[1], [0], [0], [1], [0, 0, 1, 1], [], []>} : vector<2x9216xbf16>, vector<9216x128xbf16>, vector<2x128xf32> -> vector<2x128xf32>
    %c0_3 = arith.constant 0 : index
    %c0_4 = arith.constant 0 : index
    %3 = vector.load %arg3[%c0_3, %c0_4] : memref<1x128xf32, #tpu.memory_space<vmem>>, vector<1x128xf32>
    %4 = vector.broadcast %3 : vector<1x128xf32> to vector<2x128xf32>
    %5 = arith.addf %2, %4 : vector<2x128xf32>
    %cst_5 = arith.constant 0.000000e+00 : f32
    %6 = vector.broadcast %cst_5 : f32 to vector<2x128xf32>
    %7 = arith.maximumf %5, %6 : vector<2x128xf32>
    %8 = arith.truncf %7 : vector<2x128xf32> to vector<2x128xbf16>
    %c0_6 = arith.constant 0 : index
    %c0_7 = arith.constant 0 : index
    %9 = vector.load %arg4[%c0_6, %c0_7] : memref<128x10xbf16, #tpu.memory_space<vmem>>, vector<128x10xbf16>
    %cst_8 = arith.constant dense<0.000000e+00> : vector<2x10xf32>
    %10 = tpu.matmul %8, %9, %cst_8 {dimension_numbers = #tpu.dot_dimension_numbers<[1], [0], [0], [1], [0, 0, 1, 1], [], []>} : vector<2x128xbf16>, vector<128x10xbf16>, vector<2x10xf32> -> vector<2x10xf32>
    %c0_9 = arith.constant 0 : index
    %c0_10 = arith.constant 0 : index
    %11 = vector.load %arg5[%c0_9, %c0_10] : memref<1x10xf32, #tpu.memory_space<vmem>>, vector<1x10xf32>
    %12 = vector.broadcast %11 : vector<1x10xf32> to vector<2x10xf32>
    %13 = arith.addf %10, %12 : vector<2x10xf32>
    %cst_11 = arith.constant dense<0xFF800000> : vector<2xf32>
    %14 = vector.multi_reduction <maximumf>, %13, %cst_11 [1] : vector<2x10xf32> to vector<2xf32>
    %15 = vector.shape_cast %14 : vector<2xf32> to vector<2x1xf32>
    %16 = vector.broadcast %15 : vector<2x1xf32> to vector<2x10xf32>
    %17 = arith.subf %13, %16 : vector<2x10xf32>
    %18 = math.exp %17 : vector<2x10xf32>
    %cst_12 = arith.constant dense<0.000000e+00> : vector<2xf32>
    %19 = vector.multi_reduction <add>, %18, %cst_12 [1] : vector<2x10xf32> to vector<2xf32>
    %20 = vector.shape_cast %19 : vector<2xf32> to vector<2x1xf32>
    %21 = math.log %20 : vector<2x1xf32>
    %22 = vector.broadcast %21 : vector<2x1xf32> to vector<2x10xf32>
    %23 = arith.subf %17, %22 : vector<2x10xf32>
    %c0_13 = arith.constant 0 : index
    %c0_14 = arith.constant 0 : index
    %24 = vector.load %arg6[%c0_13, %c0_14] : memref<2x10xf32, #tpu.memory_space<vmem>>, vector<2x10xf32>
    tpu.vector_store %arg6[%c0_13, %c0_14], %23 {strides = array<i32>} : memref<2x10xf32, #tpu.memory_space<vmem>>, vector<2x10xf32>,
    return
  }
  func.func @transform_0(%arg0: i32) -> (i32, i32) {
    %c0_i32 = arith.constant 0 : i32
    %c0_i32_0 = arith.constant 0 : i32
    return %arg0, %c0_i32 : i32, i32
  }
  func.func @transform_1(%arg0: i32) -> (i32, i32) {
    %c0_i32 = arith.constant 0 : i32
    %c0_i32_0 = arith.constant 0 : i32
    %c0_i32_1 = arith.constant 0 : i32
    return %c0_i32, %c0_i32_0 : i32, i32
  }
  func.func @transform_2(%arg0: i32) -> (i32, i32) {
    %c0_i32 = arith.constant 0 : i32
    %c0_i32_0 = arith.constant 0 : i32
    %c0_i32_1 = arith.constant 0 : i32
    return %c0_i32, %c0_i32_0 : i32, i32
  }
  func.func @transform_3(%arg0: i32) -> (i32, i32) {
    %c0_i32 = arith.constant 0 : i32
    %c0_i32_0 = arith.constant 0 : i32
    %c0_i32_1 = arith.constant 0 : i32
    return %c0_i32, %c0_i32_0 : i32, i32
  }
  func.func @transform_4(%arg0: i32) -> (i32, i32) {
    %c0_i32 = arith.constant 0 : i32
    %c0_i32_0 = arith.constant 0 : i32
    %c0_i32_1 = arith.constant 0 : i32
    return %c0_i32, %c0_i32_0 : i32, i32
  }
  func.func @transform_5(%arg0: i32) -> (i32, i32) {
    %c0_i32 = arith.constant 0 : i32
    %c0_i32_0 = arith.constant 0 : i32
    return %arg0, %c0_i32 : i32, i32
  }
}

</mosaic_0001>

<bundles_post_ra>
// kernel: net_forward.3
= control target key start
LH: loop header
LB: loop body
LE: loop exit
PB: predicated region body
PF: predicated region fallthrough
CT: control target
= control target key end

     0   :  { %8 = vsyncpa [#allocation3], 0  ;;  %s5141_s0 = inlined_call_operand.vmem [shape: bf16[1352,9], index: 0, kind: input, shape index: {}]   ;;  %s5142_s1 = inlined_call_operand.hbm [shape: bf16[9,32], index: 1, kind: input, shape index: {}]   ;;  %s5143_s2 = inlined_call_operand.hbm [shape: f32[1,32], index: 2, kind: input, shape index: {}]   ;;  %s5144_s3 = inlined_call_operand.vmem [shape: bf16[1352,32], index: 3, kind: output, shape index: {}]  }
   0x1   :  { %9 = vsyncpa [#allocation5], 0  ;;  %s3727_s12 = smov [#allocation2]   ;;  %s3679_s16 = scalar_lea.hbm %s5142_s1, 128 }
   0x2   :  { %s17_s13 = sshll.u32 %s3727_s12, 4  ;;  %p3680_p0 = scmp.ne.s32.totalorder %s5142_s1, %s3679_s16  ;;  %s18_s13 = int_to_ptr.vmem [resolvable:$true] %s17_s13 }
   0x3   :  { %p3683_p1 = scmp.lt.u32.totalorder %s3679_s16, %s5142_s1 }
   0x5   :  { %p3685_p2 = pnand %p3683_p1, %p3680_p0 }
   0x7   :  { %3688 = shalt.err (!%p3685_p2)
}
   0x8   :  { %s3689_s21 = scalar_lea.vmem %s18_s13, 128  ;;  %p3694_p4 = scmp.lt.s32.totalorder %s18_s13, %s18_s13 }
   0x9   :  { %p3690_p3 = scmp.ne.s32.totalorder %s18_s13, %s3689_s21  ;;  %p3695_p5 = scmp.lt.s32.totalorder %s3689_s21, %s3689_s21 }
   0xb   :  { %p3696_p6 = por %p3695_p5, %p3694_p4 }
   0xd   :  { %p3697_p7 = pnand %p3696_p6, %p3690_p3 }
   0xf   :  { %3700 = shalt.err (!%p3697_p7)
}
  0x10   :  { %s3728_s22 = smov 64   ;;  %s3729_s23 = smov 4  }
  0x11   :  { %23 = dma.hbm_to_vmem [thread:$0]  %s5142_s1, 128, %s18_s13, [#allocation3], %s3728_s22, %s3728_s22, %s3729_s23  }
  0x12   :  { %s3730_s26 = smov [#allocation4]   ;;  %s3701_s30 = scalar_lea.hbm %s5143_s2, 16 }
  0x13   :  { %s30_s27 = sshll.u32 %s3730_s26, 4  ;;  %p3702_p8 = scmp.ne.s32.totalorder %s5143_s2, %s3701_s30  ;;  %s31_s27 = int_to_ptr.vmem [resolvable:$true] %s30_s27 }
  0x14   :  { %p3705_p9 = scmp.lt.u32.totalorder %s3701_s30, %s5143_s2 }
  0x16   :  { %p3707_p10 = pnand %p3705_p9, %p3702_p8 }
  0x18   :  { %3710 = shalt.err (!%p3707_p10)
}
  0x19   :  { %s3711_s8 = scalar_lea.vmem %s31_s27, 16  ;;  %s3715_s1 = scalar_lea.vmem %s31_s27, 32 }
  0x1a   :  { %p3712_p11 = scmp.ne.s32.totalorder %s31_s27, %s3711_s8  ;;  %p3716_p12 = scmp.lt.s32.totalorder %s31_s27, %s31_s27 }
  0x1b   :  { %p3717_p13 = scmp.lt.s32.totalorder %s3715_s1, %s3711_s8 }
  0x1d   :  { %p3718_p0 = por %p3717_p13, %p3716_p12 }
  0x1f   :  { %p3719_p1 = pnand %p3718_p0, %p3712_p11 }
  0x21   :  { %3722 = shalt.err (!%p3719_p1)
}
  0x22   :  { %33 = dma.hbm_to_vmem [thread:$0]  %s5143_s2, 16, %s31_s27, [#allocation5]  }
  0x23   :  { %3723 = dma.done.wait [#allocation3], 128  }
  0x24   :  { %3724 = vsyncadd [#allocation3], 4294967168 }
  0x25   :  { %3725 = dma.done.wait [#allocation5], 16  }
  0x26   :  { %3726 = vsyncadd [#allocation5], 4294967280  ;;  %vm903_vm0 = vcmask 1043456   ;;  %v3731_v0 = vmov 0.0   ;;  %vm3732_vm1 = vmmov 0   ;;  %vm904_vm2 = vcmask 1044480  }
  0x27   :  { %3240 = vmatprep.subr.bf16.mxu0 %v3731_v0  ;;  %3582 = vmatprep.subr.bf16.mxu1 %v3731_v0  ;;  %v3733_v1 = vmov 65535   ;;  %v3591_v4 = vld [vmem:[#allocation2] sm:$0x1f]   ;;  %v3593_v7 = vld [vmem:[%s5141_s0 + $0x158] sm:$0xff]   ;;  %vm647_vm3 = vcmask 72704   ;;  %v3594_v8 = vld [vmem:[%s5141_s0 + $0x8] sm:$0xff]  }
  0x28   :  { %3242 = vmatprep.mubr.msk.bf16.mxu0 %vm3732_vm1, %v3731_v0  ;;  %3414 = vmatprep.mubr.msk.bf16.mxu1 %vm3732_vm1, %v3731_v0  ;;  %v905_v2 = vsel %vm903_vm0, 4294967295, %v3733_v1  ;;  %v3592_v6 = vld [vmem:[%s5141_s0] sm:$0xff]   ;;  %v3596_v10 = vld [vmem:[%s5141_s0 + $0x10] sm:$0xff]   ;;  %v3597_v11 = vld [vmem:[%s5141_s0 + $0x168] sm:$0xff]   ;;  %vm2468_vm4 = vcmask 257024  }
  0x29   :  { %v906_v3 = vsel %vm904_vm2, %v905_v2, 0  ;;  %v3595_v9 = vld [vmem:[%s5141_s0 + $0x160] sm:$0xff]   ;;  %v3598_v12 = vld [vmem:[%s5141_s0 + $0x18] sm:$0xff]   ;;  %v3599_v13 = vld [vmem:[%s5141_s0 + $0x170] sm:$0xff]  }
  0x2a   :  { %v908_v5 = vand.u32 %v3591_v4, %v906_v3  ;;  %v3600_v14 = vld [vmem:[%s5141_s0 + $0x20] sm:$0xff]   ;;  %v3601_v15 = vld [vmem:[%s5141_s0 + $0x178] sm:$0xff]   ;;  %v3602_v16 = vld [vmem:[%s5141_s0 + $0x28] sm:$0xff]  }
  0x2b   :  { %v3603_v17 = vld [vmem:[%s5141_s0 + $0x180] sm:$0xff]   ;;  %v3604_v18 = vld [vmem:[%s5141_s0 + $0x30] sm:$0xff]   ;;  %v3605_v19 = vld [vmem:[%s5141_s0 + $0x188] sm:$0xff]  }
  0x2c   :  { %3241 = vmatpush3.bf16.msra.mxu0 %v908_v5  ;;  %3583 = vmatpush3.bf16.msra.mxu1 %v908_v5  ;;  %v3606_v20 = vld [vmem:[%s5141_s0 + $0x38] sm:$0xff]   ;;  %v3607_v21 = vld [vmem:[%s5141_s0 + $0x190] sm:$0xff]   ;;  %v3608_v22 = vld [vmem:[%s5141_s0 + $0x40] sm:$0xff]  }
  0x2d   :  { %v3609_v23 = vld [vmem:[%s5141_s0 + $0x198] sm:$0xff]   ;;  %v3610_v24 = vld [vmem:[%s5141_s0 + $0x48] sm:$0xff]   ;;  %v3611_v25 = vld [vmem:[%s5141_s0 + $0x1a0] sm:$0xff]  }
  0x2e   :  { %v3612_v26 = vld [vmem:[%s5141_s0 + $0x50] sm:$0xff]   ;;  %v3613_v27 = vld [vmem:[%s5141_s0 + $0x1a8] sm:$0xff]   ;;  %v3614_v28 = vld [vmem:[%s5141_s0 + $0x58] sm:$0xff]  }
  0x2f   :  { %3243 = vmatmul.mubr.msk.bf16.vlgmr.msra.gmra.mrb[0].mxu0 %vm647_vm3, %v3592_v6  ;;  %3415 = vmatmul.mubr.msk.bf16.vlgmr.msra.gmra.mrb[0].mxu1 %vm647_vm3, %v3593_v7  ;;  %v3615_v29 = vld [vmem:[%s5141_s0 + $0x1b0] sm:$0xff]   ;;  %v3616_v30 = vld [vmem:[%s5141_s0 + $0x60] sm:$0xff]   ;;  %v3617_v31 = vld [vmem:[%s5141_s0 + $0x1b8] sm:$0xff]  }
  0x30   :  { %3246 = vmatprep.mubr.msk.bf16.mxu0 %vm3732_vm1, %v3731_v0  ;;  %3418 = vmatprep.mubr.msk.bf16.mxu1 %vm3732_vm1, %v3731_v0  ;;  %v3618_v32 = vld [vmem:[%s5141_s0 + $0x68] sm:$0xff]   ;;  %v3619_v33 = vld [vmem:[%s5141_s0 + $0x1c0] sm:$0xff]   ;;  %v3620_v34 = vld [vmem:[%s5141_s0 + $0x70] sm:$0xff]  }
  0x31   :  { %v3621_v35 = vld [vmem:[%s5141_s0 + $0x1c8] sm:$0xff]   ;;  %v3622_v36 = vld [vmem:[%s5141_s0 + $0x78] sm:$0xff]   ;;  %v3623_v37 = vld [vmem:[%s5141_s0 + $0x1d0] sm:$0xff]  }
  0x32   :  { %v3624_v38 = vld [vmem:[%s5141_s0 + $0x80] sm:$0xff]   ;;  %v3625_v39 = vld [vmem:[%s5141_s0 + $0x1d8] sm:$0xff]   ;;  %v3626_v40 = vld [vmem:[%s5141_s0 + $0x88] sm:$0xff]  }
  0x33   :  { %v3627_v41 = vld [vmem:[%s5141_s0 + $0x1e0] sm:$0xff]   ;;  %v3628_v42 = vld [vmem:[%s5141_s0 + $0x90] sm:$0xff]   ;;  %v3629_v43 = vld [vmem:[%s5141_s0 + $0x1e8] sm:$0xff]  }
  0x34   :  { %v3630_v44 = vld [vmem:[%s5141_s0 + $0x98] sm:$0xff]   ;;  %v3631_v45 = vld [vmem:[%s5141_s0 + $0x1f0] sm:$0xff]   ;;  %v3632_v46 = vld [vmem:[%s5141_s0 + $0xa0] sm:$0xff]  }
  0x35   :  { %v3633_v47 = vld [vmem:[%s5141_s0 + $0x1f8] sm:$0xff]   ;;  %v3634_v48 = vld [vmem:[%s5141_s0 + $0xa8] sm:$0xff]   ;;  %v3635_v49 = vld [vmem:[%s5141_s0 + $0x200] sm:$0xff]  }
  0x36   :  { %v3636_v50 = vld [vmem:[%s5141_s0 + $0xb0] sm:$0xff]   ;;  %v3637_v51 = vld [vmem:[%s5141_s0 + $0x208] sm:$0xff]   ;;  %v3638_v52 = vld [vmem:[%s5141_s0 + $0xb8] sm:$0xff]  }
  0x37   :  { %3247 = vmatmul.mubr.msk.bf16.gmra.mrb[4].mxu0 %vm647_vm3, %v3594_v8  ;;  %3419 = vmatmul.mubr.msk.bf16.gmra.mrb[4].mxu1 %vm647_vm3, %v3595_v9  ;;  %v3639_v53 = vld [vmem:[%s5141_s0 + $0x210] sm:$0xff]   ;;  %v3640_v54 = vld [vmem:[%s5141_s0 + $0xc0] sm:$0xff]   ;;  %v3641_v55 = vld [vmem:[%s5141_s0 + $0x218] sm:$0xff]  }
  0x38   :  { %3250 = vmatprep.mubr.msk.bf16.mxu0 %vm3732_vm1, %v3731_v0  ;;  %3422 = vmatprep.mubr.msk.bf16.mxu1 %vm3732_vm1, %v3731_v0  ;;  %v3642_v56 = vld [vmem:[%s5141_s0 + $0xc8] sm:$0xff]   ;;  %v3643_v57 = vld [vmem:[%s5141_s0 + $0x220] sm:$0xff]   ;;  %v3644_v58 = vld [vmem:[%s5141_s0 + $0xd0] sm:$0xff]  }
  0x39   :  { %v3645_v59 = vld [vmem:[%s5141_s0 + $0x228] sm:$0xff]   ;;  %v3646_v2 = vld [vmem:[%s5141_s0 + $0xd8] sm:$0xff]   ;;  %v3647_v5 = vld [vmem:[%s5141_s0 + $0x230] sm:$0xff]  }
  0x3a   :  { %v4104_v60 = vld [vmem:[#allocation4] ss:$0 sm:$0xff] }
  0x3f   :  { %3251 = vmatmul.mubr.msk.bf16.gmra.mrb[8].mxu0 %vm647_vm3, %v3596_v10  ;;  %3423 = vmatmul.mubr.msk.bf16.gmra.mrb[8].mxu1 %vm647_vm3, %v3597_v11 }
  0x40   :  { %3254 = vmatprep.mubr.msk.bf16.mxu0 %vm3732_vm1, %v3731_v0  ;;  %3426 = vmatprep.mubr.msk.bf16.mxu1 %vm3732_vm1, %v3731_v0 }
  0x47   :  { %3255 = vmatmul.mubr.msk.bf16.gmra.mrb[12].mxu0 %vm647_vm3, %v3598_v12  ;;  %3427 = vmatmul.mubr.msk.bf16.gmra.mrb[12].mxu1 %vm647_vm3, %v3599_v13 }
  0x48   :  { %3258 = vmatprep.mubr.msk.bf16.mxu0 %vm3732_vm1, %v3731_v0  ;;  %3430 = vmatprep.mubr.msk.bf16.mxu1 %vm3732_vm1, %v3731_v0 }
  0x4f   :  { %3259 = vmatmul.mubr.msk.bf16.gmra.mrb[16].mxu0 %vm647_vm3, %v3600_v14  ;;  %3431 = vmatmul.mubr.msk.bf16.gmra.mrb[16].mxu1 %vm647_vm3, %v3601_v15 }
  0x50   :  { %3262 = vmatprep.mubr.msk.bf16.mxu0 %vm3732_vm1, %v3731_v0  ;;  %3434 = vmatprep.mubr.msk.bf16.mxu1 %vm3732_vm1, %v3731_v0 }
  0x57   :  { %3263 = vmatmul.mubr.msk.bf16.gmra.mrb[20].mxu0 %vm647_vm3, %v3602_v16  ;;  %3435 = vmatmul.mubr.msk.bf16.gmra.mrb[20].mxu1 %vm647_vm3, %v3603_v17 }
  0x58   :  { %3266 = vmatprep.mubr.msk.bf16.mxu0 %vm3732_vm1, %v3731_v0  ;;  %3438 = vmatprep.mubr.msk.bf16.mxu1 %vm3732_vm1, %v3731_v0 }
  0x5f   :  { %3267 = vmatmul.mubr.msk.bf16.gmra.mrb[24].mxu0 %vm647_vm3, %v3604_v18  ;;  %3439 = vmatmul.mubr.msk.bf16.gmra.mrb[24].mxu1 %vm647_vm3, %v3605_v19 }
  0x60   :  { %3270 = vmatprep.mubr.msk.bf16.mxu0 %vm3732_vm1, %v3731_v0  ;;  %3442 = vmatprep.mubr.msk.bf16.mxu1 %vm3732_vm1, %v3731_v0 }
  0x67   :  { %3271 = vmatmul.mubr.msk.bf16.gmra.mrb[28].mxu0 %vm647_vm3, %v3606_v20  ;;  %3443 = vmatmul.mubr.msk.bf16.gmra.mrb[28].mxu1 %vm647_vm3, %v3607_v21 }
  0x68   :  { %3274 = vmatprep.mubr.msk.bf16.mxu0 %vm3732_vm1, %v3731_v0  ;;  %3446 = vmatprep.mubr.msk.bf16.mxu1 %vm3732_vm1, %v3731_v0 }
  0x6f   :  { %3275 = vmatmul.mubr.msk.bf16.gmra.mrb[32].mxu0 %vm647_vm3, %v3608_v22  ;;  %3447 = vmatmul.mubr.msk.bf16.gmra.mrb[32].mxu1 %vm647_vm3, %v3609_v23 }
  0x70   :  { %3278 = vmatprep.mubr.msk.bf16.mxu0 %vm3732_vm1, %v3731_v0  ;;  %3450 = vmatprep.mubr.msk.bf16.mxu1 %vm3732_vm1, %v3731_v0 }
  0x77   :  { %3279 = vmatmul.mubr.msk.bf16.gmra.mrb[36].mxu0 %vm647_vm3, %v3610_v24  ;;  %3451 = vmatmul.mubr.msk.bf16.gmra.mrb[36].mxu1 %vm647_vm3, %v3611_v25  ;;  %v3648_v24 = vld [vmem:[%s5141_s0 + $0xe0] sm:$0xff]  }
  0x78   :  { %3282 = vmatprep.mubr.msk.bf16.mxu0 %vm3732_vm1, %v3731_v0  ;;  %3454 = vmatprep.mubr.msk.bf16.mxu1 %vm3732_vm1, %v3731_v0 }
  0x7f   :  { %3283 = vmatmul.mubr.msk.bf16.gmra.mrb[40].mxu0 %vm647_vm3, %v3612_v26  ;;  %3455 = vmatmul.mubr.msk.bf16.gmra.mrb[40].mxu1 %vm647_vm3, %v3613_v27  ;;  %v3649_v27 = vld [vmem:[%s5141_s0 + $0x238] sm:$0xff]  }
  0x80   :  { %3286 = vmatprep.mubr.msk.bf16.mxu0 %vm3732_vm1, %v3731_v0  ;;  %3458 = vmatprep.mubr.msk.bf16.mxu1 %vm3732_vm1, %v3731_v0 }
  0x87   :  { %3287 = vmatmul.mubr.msk.bf16.gmra.mrb[44].mxu0 %vm647_vm3, %v3614_v28  ;;  %3459 = vmatmul.mubr.msk.bf16.gmra.mrb[44].mxu1 %vm647_vm3, %v3615_v29 }
  0x88   :  { %3290 = vmatprep.mubr.msk.bf16.mxu0 %vm3732_vm1, %v3731_v0  ;;  %3462 = vmatprep.mubr.msk.bf16.mxu1 %vm3732_vm1, %v3731_v0 }
  0x8f   :  { %3291 = vmatmul.mubr.msk.bf16.gmra.mrb[48].mxu0 %vm647_vm3, %v3616_v30  ;;  %3463 = vmatmul.mubr.msk.bf16.gmra.mrb[48].mxu1 %vm647_vm3, %v3617_v31 }
  0x90   :  { %3294 = vmatprep.mubr.msk.bf16.mxu0 %vm3732_vm1, %v3731_v0  ;;  %3466 = vmatprep.mubr.msk.bf16.mxu1 %vm3732_vm1, %v3731_v0 }
  0x97   :  { %3295 = vmatmul.mubr.msk.bf16.gmra.mrb[52].mxu0 %vm647_vm3, %v3618_v32  ;;  %3467 = vmatmul.mubr.msk.bf16.gmra.mrb[52].mxu1 %vm647_vm3, %v3619_v33 }
  0x98   :  { %3298 = vmatprep.mubr.msk.bf16.mxu0 %vm3732_vm1, %v3731_v0  ;;  %3470 = vmatprep.mubr.msk.bf16.mxu1 %vm3732_vm1, %v3731_v0 }
  0x9f   :  { %3299 = vmatmul.mubr.msk.bf16.gmra.mrb[56].mxu0 %vm647_vm3, %v3620_v34  ;;  %3471 = vmatmul.mubr.msk.bf16.gmra.mrb[56].mxu1 %vm647_vm3, %v3621_v35 }
  0xa0   :  { %3302 = vmatprep.mubr.msk.bf16.mxu0 %vm3732_vm1, %v3731_v0  ;;  %3474 = vmatprep.mubr.msk.bf16.mxu1 %vm3732_vm1, %v3731_v0 }
  0xa7   :  { %3303 = vmatmul.mubr.msk.bf16.gmra.mrb[60].mxu0 %vm647_vm3, %v3622_v36  ;;  %3475 = vmatmul.mubr.msk.bf16.gmra.mrb[60].mxu1 %vm647_vm3, %v3623_v37 }
  0xa8   :  { %3306 = vmatprep.mubr.msk.bf16.mxu0 %vm3732_vm1, %v3731_v0  ;;  %3478 = vmatprep.mubr.msk.bf16.mxu1 %vm3732_vm1, %v3731_v0 }
  0xaf   :  { %3307 = vmatmul.mubr.msk.bf16.gmra.mrb[64].mxu0 %vm647_vm3, %v3624_v38  ;;  %3479 = vmatmul.mubr.msk.bf16.gmra.mrb[64].mxu1 %vm647_vm3, %v3625_v39 }
  0xb0   :  { %3310 = vmatprep.mubr.msk.bf16.mxu0 %vm3732_vm1, %v3731_v0  ;;  %3482 = vmatprep.mubr.msk.bf16.mxu1 %vm3732_vm1, %v3731_v0 }
  0xb7   :  { %3311 = vmatmul.mubr.msk.bf16.gmra.mrb[68].mxu0 %vm647_vm3, %v3626_v40  ;;  %3483 = vmatmul.mubr.msk.bf16.gmra.mrb[68].mxu1 %vm647_vm3, %v3627_v41 }
  0xb8   :  { %3314 = vmatprep.mubr.msk.bf16.mxu0 %vm3732_vm1, %v3731_v0  ;;  %3486 = vmatprep.mubr.msk.bf16.mxu1 %vm3732_vm1, %v3731_v0 }
  0xbf   :  { %3315 = vmatmul.mubr.msk.bf16.gmra.mrb[72].mxu0 %vm647_vm3, %v3628_v42  ;;  %3487 = vmatmul.mubr.msk.bf16.gmra.mrb[72].mxu1 %vm647_vm3, %v3629_v43 }
  0xc0   :  { %3318 = vmatprep.mubr.msk.bf16.mxu0 %vm3732_vm1, %v3731_v0  ;;  %3490 = vmatprep.mubr.msk.bf16.mxu1 %vm3732_vm1, %v3731_v0 }
  0xc7   :  { %3319 = vmatmul.mubr.msk.bf16.gmra.mrb[76].mxu0 %vm647_vm3, %v3630_v44  ;;  %3491 = vmatmul.mubr.msk.bf16.gmra.mrb[76].mxu1 %vm647_vm3, %v3631_v45 }
  0xc8   :  { %3322 = vmatprep.mubr.msk.bf16.mxu0 %vm3732_vm1, %v3731_v0  ;;  %3494 = vmatprep.mubr.msk.bf16.mxu1 %vm3732_vm1, %v3731_v0 }
  0xcf   :  { %3323 = vmatmul.mubr.msk.bf16.gmra.mrb[80].mxu0 %vm647_vm3, %v3632_v46  ;;  %3495 = vmatmul.mubr.msk.bf16.gmra.mrb[80].mxu1 %vm647_vm3, %v3633_v47  ;;  %v3650_v46 = vld [vmem:[%s5141_s0 + $0xe8] sm:$0xff]  }
  0xd0   :  { %3326 = vmatprep.mubr.msk.bf16.mxu0 %vm3732_vm1, %v3731_v0  ;;  %3498 = vmatprep.mubr.msk.bf16.mxu1 %vm3732_vm1, %v3731_v0 }
  0xd7   :  { %3327 = vmatmul.mubr.msk.bf16.gmra.mrb[84].mxu0 %vm647_vm3, %v3634_v48  ;;  %3499 = vmatmul.mubr.msk.bf16.gmra.mrb[84].mxu1 %vm647_vm3, %v3635_v49  ;;  %v3651_v49 = vld [vmem:[%s5141_s0 + $0x240] sm:$0xff]  }
  0xd8   :  { %3330 = vmatprep.mubr.msk.bf16.mxu0 %vm3732_vm1, %v3731_v0  ;;  %3502 = vmatprep.mubr.msk.bf16.mxu1 %vm3732_vm1, %v3731_v0 }
  0xdf   :  { %3331 = vmatmul.mubr.msk.bf16.gmra.mrb[88].mxu0 %vm647_vm3, %v3636_v50  ;;  %3503 = vmatmul.mubr.msk.bf16.gmra.mrb[88].mxu1 %vm647_vm3, %v3637_v51 }
  0xe0   :  { %3334 = vmatprep.mubr.msk.bf16.mxu0 %vm3732_vm1, %v3731_v0  ;;  %3506 = vmatprep.mubr.msk.bf16.mxu1 %vm3732_vm1, %v3731_v0 }
  0xe7   :  { %3335 = vmatmul.mubr.msk.bf16.gmra.mrb[92].mxu0 %vm647_vm3, %v3638_v52  ;;  %3507 = vmatmul.mubr.msk.bf16.gmra.mrb[92].mxu1 %vm647_vm3, %v3639_v53 }
  0xe8   :  { %3338 = vmatprep.mubr.msk.bf16.mxu0 %vm3732_vm1, %v3731_v0  ;;  %3510 = vmatprep.mubr.msk.bf16.mxu1 %vm3732_vm1, %v3731_v0 }
  0xef   :  { %3339 = vmatmul.mubr.msk.bf16.gmra.mrb[96].mxu0 %vm647_vm3, %v3640_v54  ;;  %3511 = vmatmul.mubr.msk.bf16.gmra.mrb[96].mxu1 %vm647_vm3, %v3641_v55 }
  0xf0   :  { %3342 = vmatprep.mubr.msk.bf16.mxu0 %vm3732_vm1, %v3731_v0  ;;  %3514 = vmatprep.mubr.msk.bf16.mxu1 %vm3732_vm1, %v3731_v0 }
  0xf7   :  { %3343 = vmatmul.mubr.msk.bf16.gmra.mrb[100].mxu0 %vm647_vm3, %v3642_v56  ;;  %3515 = vmatmul.mubr.msk.bf16.gmra.mrb[100].mxu1 %vm647_vm3, %v3643_v57 }
  0xf8   :  { %3346 = vmatprep.mubr.msk.bf16.mxu0 %vm3732_vm1, %v3731_v0  ;;  %3518 = vmatprep.mubr.msk.bf16.mxu1 %vm3732_vm1, %v3731_v0 }
  0xff   :  { %3347 = vmatmul.mubr.msk.bf16.gmra.mrb[104].mxu0 %vm647_vm3, %v3644_v58  ;;  %3519 = vmatmul.mubr.msk.bf16.gmra.mrb[104].mxu1 %vm647_vm3, %v3645_v59 }
 0x100   :  { %3350 = vmatprep.mubr.msk.bf16.mxu0 %vm3732_vm1, %v3731_v0  ;;  %3522 = vmatprep.mubr.msk.bf16.mxu1 %vm3732_vm1, %v3731_v0 }
 0x102   :  { %v944_v61 = vpop.f32.mrb[0].mxu0  ;;  %v1288_v62 = vpop.f32.mrb[0].mxu1 }
 0x103   :  { %v945_v63 = vadd.f32 %v4104_v60, %v944_v61  ;;  %v3244_v1 = vpop.f32.mrb[1].mxu0  ;;  %v1289_v3 = vadd.f32 %v4104_v60, %v1288_v62  ;;  %v3416_v4 = vpop.f32.mrb[1].mxu1 }
 0x104   :  { %v947_v6 = vpop.f32.mrb[2].mxu0  ;;  %v1291_v7 = vpop.f32.mrb[2].mxu1 }
 0x105   :  { %v1622_v8 = vmax.f32 %v945_v63, 0.0  ;;  %v948_v9 = vadd.f32 %v4104_v60, %v947_v6  ;;  %v3245_v10 = vpop.f32.mrb[3].mxu0  ;;  %v1708_v11 = vmax.f32 %v1289_v3, 0.0  ;;  %v1292_v12 = vadd.f32 %v4104_v60, %v1291_v7  ;;  %v3417_v13 = vpop.f32.mrb[3].mxu1  ;;  %v3652_v6 = vld [vmem:[%s5141_s0 + $0xf0] sm:$0xff]  }
 0x107   :  { %v2985_v14 = vpack.c.bf16 %v1622_v8, %v1622_v8  ;;  %v1623_v15 = vmax.f32 %v948_v9, 0.0  ;;  %3351 = vmatmul.mubr.msk.bf16.gmra.mrb[108].mxu0 %vm647_vm3, %v3646_v2  ;;  %v3071_v16 = vpack.c.bf16 %v1708_v11, %v1708_v11  ;;  %v1709_v17 = vmax.f32 %v1292_v12, 0.0  ;;  %3523 = vmatmul.mubr.msk.bf16.gmra.mrb[108].mxu1 %vm647_vm3, %v3647_v5  ;;  %v3653_v9 = vld [vmem:[%s5141_s0 + $0x248] sm:$0xff]  }
 0x108   :  { %3354 = vmatprep.mubr.msk.bf16.mxu0 %vm3732_vm1, %v3731_v0  ;;  %3526 = vmatprep.mubr.msk.bf16.mxu1 %vm3732_vm1, %v3731_v0 }
 0x109   :  { %2469 = vst.msk [vmem:[%s5144_s3] sm:$0xf] %vm2468_vm4, %v2985_v14  ;;  %v2986_v18 = vpack.c.bf16 %v1623_v15, %v1623_v15  ;;  %2555 = vst.msk [vmem:[%s5144_s3 + $0x158] sm:$0xf] %vm2468_vm4, %v3071_v16  ;;  %v3072_v19 = vpack.c.bf16 %v1709_v17, %v1709_v17 }
 0x10a   :  { %v952_v20 = vpop.f32.mrb[4].mxu0  ;;  %v1296_v21 = vpop.f32.mrb[4].mxu1 }
 0x10b   :  { %2470 = vst.msk [vmem:[%s5144_s3 + $0x4] sm:$0xf] %vm2468_vm4, %v2986_v18  ;;  %v953_v22 = vadd.f32 %v4104_v60, %v952_v20  ;;  %v3248_v23 = vpop.f32.mrb[5].mxu0  ;;  %2556 = vst.msk [vmem:[%s5144_s3 + $0x15c] sm:$0xf] %vm2468_vm4, %v3072_v19  ;;  %v1297_v25 = vadd.f32 %v4104_v60, %v1296_v21  ;;  %v3420_v26 = vpop.f32.mrb[5].mxu1 }
 0x10c   :  { %v955_v28 = vpop.f32.mrb[6].mxu0  ;;  %v1299_v29 = vpop.f32.mrb[6].mxu1 }
 0x10d   :  { %v1624_v30 = vmax.f32 %v953_v22, 0.0  ;;  %v956_v31 = vadd.f32 %v4104_v60, %v955_v28  ;;  %v3249_v32 = vpop.f32.mrb[7].mxu0  ;;  %v1710_v33 = vmax.f32 %v1297_v25, 0.0  ;;  %v1300_v34 = vadd.f32 %v4104_v60, %v1299_v29  ;;  %v3421_v35 = vpop.f32.mrb[7].mxu1  ;;  %v3654_v28 = vld [vmem:[%s5141_s0 + $0xf8] sm:$0xff]  }
 0x10f   :  { %v2987_v36 = vpack.c.bf16 %v1624_v30, %v1624_v30  ;;  %v1625_v37 = vmax.f32 %v956_v31, 0.0  ;;  %3355 = vmatmul.mubr.msk.bf16.gmra.mrb[112].mxu0 %vm647_vm3, %v3648_v24  ;;  %v3073_v38 = vpack.c.bf16 %v1710_v33, %v1710_v33  ;;  %v1711_v39 = vmax.f32 %v1300_v34, 0.0  ;;  %3527 = vmatmul.mubr.msk.bf16.gmra.mrb[112].mxu1 %vm647_vm3, %v3649_v27  ;;  %v3655_v31 = vld [vmem:[%s5141_s0 + $0x250] sm:$0xff]  }
 0x110   :  { %3358 = vmatprep.mubr.msk.bf16.mxu0 %vm3732_vm1, %v3731_v0  ;;  %3530 = vmatprep.mubr.msk.bf16.mxu1 %vm3732_vm1, %v3731_v0 }
 0x111   :  { %2471 = vst.msk [vmem:[%s5144_s3 + $0x8] sm:$0xf] %vm2468_vm4, %v2987_v36  ;;  %v2988_v40 = vpack.c.bf16 %v1625_v37, %v1625_v37  ;;  %2557 = vst.msk [vmem:[%s5144_s3 + $0x160] sm:$0xf] %vm2468_vm4, %v3073_v38  ;;  %v3074_v41 = vpack.c.bf16 %v1711_v39, %v1711_v39 }
 0x112   :  { %v960_v42 = vpop.f32.mrb[8].mxu0  ;;  %v1304_v43 = vpop.f32.mrb[8].mxu1 }
 0x113   :  { %2472 = vst.msk [vmem:[%s5144_s3 + $0xc] sm:$0xf] %vm2468_vm4, %v2988_v40  ;;  %v961_v44 = vadd.f32 %v4104_v60, %v960_v42  ;;  %v3252_v45 = vpop.f32.mrb[9].mxu0  ;;  %2558 = vst.msk [vmem:[%s5144_s3 + $0x164] sm:$0xf] %vm2468_vm4, %v3074_v41  ;;  %v1305_v47 = vadd.f32 %v4104_v60, %v1304_v43  ;;  %v3424_v48 = vpop.f32.mrb[9].mxu1 }
 0x114   :  { %v963_v50 = vpop.f32.mrb[10].mxu0  ;;  %v1307_v51 = vpop.f32.mrb[10].mxu1 }
 0x115   :  { %v1626_v52 = vmax.f32 %v961_v44, 0.0  ;;  %v964_v53 = vadd.f32 %v4104_v60, %v963_v50  ;;  %v3253_v54 = vpop.f32.mrb[11].mxu0  ;;  %v1712_v55 = vmax.f32 %v1305_v47, 0.0  ;;  %v1308_v56 = vadd.f32 %v4104_v60, %v1307_v51  ;;  %v3425_v57 = vpop.f32.mrb[11].mxu1  ;;  %v3656_v50 = vld [vmem:[%s5141_s0 + $0x100] sm:$0xff]  }
 0x117   :  { %v2989_v58 = vpack.c.bf16 %v1626_v52, %v1626_v52  ;;  %v1627_v59 = vmax.f32 %v964_v53, 0.0  ;;  %3359 = vmatmul.mubr.msk.bf16.gmra.mrb[116].mxu0 %vm647_vm3, %v3650_v46  ;;  %v3075_v61 = vpack.c.bf16 %v1712_v55, %v1712_v55  ;;  %v1713_v62 = vmax.f32 %v1308_v56, 0.0  ;;  %3531 = vmatmul.mubr.msk.bf16.gmra.mrb[116].mxu1 %vm647_vm3, %v3651_v49  ;;  %v3657_v53 = vld [vmem:[%s5141_s0 + $0x258] sm:$0xff]  }
 0x118   :  { %3362 = vmatprep.mubr.msk.bf16.mxu0 %vm3732_vm1, %v3731_v0  ;;  %3534 = vmatprep.mubr.msk.bf16.mxu1 %vm3732_vm1, %v3731_v0 }
 0x119   :  { %2473 = vst.msk [vmem:[%s5144_s3 + $0x10] sm:$0xf] %vm2468_vm4, %v2989_v58  ;;  %v2990_v63 = vpack.c.bf16 %v1627_v59, %v1627_v59  ;;  %2559 = vst.msk [vmem:[%s5144_s3 + $0x168] sm:$0xf] %vm2468_vm4, %v3075_v61  ;;  %v3076_v1 = vpack.c.bf16 %v1713_v62, %v1713_v62 }
 0x11a   :  { %v968_v2 = vpop.f32.mrb[12].mxu0  ;;  %v1312_v3 = vpop.f32.mrb[12].mxu1 }
 0x11b   :  { %2474 = vst.msk [vmem:[%s5144_s3 + $0x14] sm:$0xf] %vm2468_vm4, %v2990_v63  ;;  %v969_v4 = vadd.f32 %v4104_v60, %v968_v2  ;;  %v3256_v5 = vpop.f32.mrb[13].mxu0  ;;  %2560 = vst.msk [vmem:[%s5144_s3 + $0x16c] sm:$0xf] %vm2468_vm4, %v3076_v1  ;;  %v1313_v7 = vadd.f32 %v4104_v60, %v1312_v3  ;;  %v3428_v8 = vpop.f32.mrb[13].mxu1 }
 0x11c   :  { %v971_v10 = vpop.f32.mrb[14].mxu0  ;;  %v1315_v11 = vpop.f32.mrb[14].mxu1 }
 0x11d   :  { %v1628_v12 = vmax.f32 %v969_v4, 0.0  ;;  %v972_v13 = vadd.f32 %v4104_v60, %v971_v10  ;;  %v3257_v14 = vpop.f32.mrb[15].mxu0  ;;  %v1714_v15 = vmax.f32 %v1313_v7, 0.0  ;;  %v1316_v16 = vadd.f32 %v4104_v60, %v1315_v11  ;;  %v3429_v17 = vpop.f32.mrb[15].mxu1  ;;  %v3658_v10 = vld [vmem:[%s5141_s0 + $0x108] sm:$0xff]  }
 0x11f   :  { %v2991_v18 = vpack.c.bf16 %v1628_v12, %v1628_v12  ;;  %v1629_v19 = vmax.f32 %v972_v13, 0.0  ;;  %3363 = vmatmul.mubr.msk.bf16.gmra.mrb[120].mxu0 %vm647_vm3, %v3652_v6  ;;  %v3077_v20 = vpack.c.bf16 %v1714_v15, %v1714_v15  ;;  %v1715_v21 = vmax.f32 %v1316_v16, 0.0  ;;  %3535 = vmatmul.mubr.msk.bf16.gmra.mrb[120].mxu1 %vm647_vm3, %v3653_v9  ;;  %v3659_v13 = vld [vmem:[%s5141_s0 + $0x260] sm:$0xff]  }
 0x120   :  { %3366 = vmatprep.mubr.msk.bf16.mxu0 %vm3732_vm1, %v3731_v0  ;;  %3538 = vmatprep.mubr.msk.bf16.mxu1 %vm3732_vm1, %v3731_v0 }
 0x121   :  { %2475 = vst.msk [vmem:[%s5144_s3 + $0x18] sm:$0xf] %vm2468_vm4, %v2991_v18  ;;  %v2992_v22 = vpack.c.bf16 %v1629_v19, %v1629_v19  ;;  %2561 = vst.msk [vmem:[%s5144_s3 + $0x170] sm:$0xf] %vm2468_vm4, %v3077_v20  ;;  %v3078_v23 = vpack.c.bf16 %v1715_v21, %v1715_v21 }
 0x122   :  { %v976_v24 = vpop.f32.mrb[16].mxu0  ;;  %v1320_v25 = vpop.f32.mrb[16].mxu1 }
 0x123   :  { %2476 = vst.msk [vmem:[%s5144_s3 + $0x1c] sm:$0xf] %vm2468_vm4, %v2992_v22  ;;  %v977_v26 = vadd.f32 %v4104_v60, %v976_v24  ;;  %v3260_v27 = vpop.f32.mrb[17].mxu0  ;;  %2562 = vst.msk [vmem:[%s5144_s3 + $0x174] sm:$0xf] %vm2468_vm4, %v3078_v23  ;;  %v1321_v29 = vadd.f32 %v4104_v60, %v1320_v25  ;;  %v3432_v30 = vpop.f32.mrb[17].mxu1 }
 0x124   :  { %v979_v32 = vpop.f32.mrb[18].mxu0  ;;  %v1323_v33 = vpop.f32.mrb[18].mxu1 }
 0x125   :  { %v1630_v34 = vmax.f32 %v977_v26, 0.0  ;;  %v980_v35 = vadd.f32 %v4104_v60, %v979_v32  ;;  %v3261_v36 = vpop.f32.mrb[19].mxu0  ;;  %v1716_v37 = vmax.f32 %v1321_v29, 0.0  ;;  %v1324_v38 = vadd.f32 %v4104_v60, %v1323_v33  ;;  %v3433_v39 = vpop.f32.mrb[19].mxu1  ;;  %v3660_v32 = vld [vmem:[%s5141_s0 + $0x110] sm:$0xff]  }
 0x127   :  { %v2993_v40 = vpack.c.bf16 %v1630_v34, %v1630_v34  ;;  %v1631_v41 = vmax.f32 %v980_v35, 0.0  ;;  %3367 = vmatmul.mubr.msk.bf16.gmra.mrb[124].mxu0 %vm647_vm3, %v3654_v28  ;;  %v3079_v42 = vpack.c.bf16 %v1716_v37, %v1716_v37  ;;  %v1717_v43 = vmax.f32 %v1324_v38, 0.0  ;;  %3539 = vmatmul.mubr.msk.bf16.gmra.mrb[124].mxu1 %vm647_vm3, %v3655_v31  ;;  %v3661_v35 = vld [vmem:[%s5141_s0 + $0x268] sm:$0xff]  }
 0x128   :  { %3370 = vmatprep.mubr.msk.bf16.mxu0 %vm3732_vm1, %v3731_v0  ;;  %3542 = vmatprep.mubr.msk.bf16.mxu1 %vm3732_vm1, %v3731_v0 }
 0x129   :  { %2477 = vst.msk [vmem:[%s5144_s3 + $0x20] sm:$0xf] %vm2468_vm4, %v2993_v40  ;;  %v2994_v44 = vpack.c.bf16 %v1631_v41, %v1631_v41  ;;  %2563 = vst.msk [vmem:[%s5144_s3 + $0x178] sm:$0xf] %vm2468_vm4, %v3079_v42  ;;  %v3080_v45 = vpack.c.bf16 %v1717_v43, %v1717_v43 }
 0x12a   :  { %v984_v46 = vpop.f32.mrb[20].mxu0  ;;  %v1328_v47 = vpop.f32.mrb[20].mxu1 }
 0x12b   :  { %2478 = vst.msk [vmem:[%s5144_s3 + $0x24] sm:$0xf] %vm2468_vm4, %v2994_v44  ;;  %v985_v48 = vadd.f32 %v4104_v60, %v984_v46  ;;  %v3264_v49 = vpop.f32.mrb[21].mxu0  ;;  %2564 = vst.msk [vmem:[%s5144_s3 + $0x17c] sm:$0xf] %vm2468_vm4, %v3080_v45  ;;  %v1329_v51 = vadd.f32 %v4104_v60, %v1328_v47  ;;  %v3436_v52 = vpop.f32.mrb[21].mxu1 }
 0x12c   :  { %v987_v54 = vpop.f32.mrb[22].mxu0  ;;  %v1331_v55 = vpop.f32.mrb[22].mxu1 }
 0x12d   :  { %v1632_v56 = vmax.f32 %v985_v48, 0.0  ;;  %v988_v57 = vadd.f32 %v4104_v60, %v987_v54  ;;  %v3265_v58 = vpop.f32.mrb[23].mxu0  ;;  %v1718_v59 = vmax.f32 %v1329_v51, 0.0  ;;  %v1332_v61 = vadd.f32 %v4104_v60, %v1331_v55  ;;  %v3437_v62 = vpop.f32.mrb[23].mxu1  ;;  %v3662_v54 = vld [vmem:[%s5141_s0 + $0x118] sm:$0xff]  }
 0x12f   :  { %v2995_v63 = vpack.c.bf16 %v1632_v56, %v1632_v56  ;;  %v1633_v1 = vmax.f32 %v988_v57, 0.0  ;;  %3371 = vmatmul.mubr.msk.bf16.gmra.mrb[128].mxu0 %vm647_vm3, %v3656_v50  ;;  %v3081_v2 = vpack.c.bf16 %v1718_v59, %v1718_v59  ;;  %v1719_v3 = vmax.f32 %v1332_v61, 0.0  ;;  %3543 = vmatmul.mubr.msk.bf16.gmra.mrb[128].mxu1 %vm647_vm3, %v3657_v53  ;;  %v3663_v57 = vld [vmem:[%s5141_s0 + $0x270] sm:$0xff]  }
 0x130   :  { %3374 = vmatprep.mubr.msk.bf16.mxu0 %vm3732_vm1, %v3731_v0  ;;  %3546 = vmatprep.mubr.msk.bf16.mxu1 %vm3732_vm1, %v3731_v0 }
 0x131   :  { %2479 = vst.msk [vmem:[%s5144_s3 + $0x28] sm:$0xf] %vm2468_vm4, %v2995_v63  ;;  %v2996_v4 = vpack.c.bf16 %v1633_v1, %v1633_v1  ;;  %2565 = vst.msk [vmem:[%s5144_s3 + $0x180] sm:$0xf] %vm2468_vm4, %v3081_v2  ;;  %v3082_v5 = vpack.c.bf16 %v1719_v3, %v1719_v3 }
 0x132   :  { %v992_v6 = vpop.f32.mrb[24].mxu0  ;;  %v1336_v7 = vpop.f32.mrb[24].mxu1 }
 0x133   :  { %2480 = vst.msk [vmem:[%s5144_s3 + $0x2c] sm:$0xf] %vm2468_vm4, %v2996_v4  ;;  %v993_v8 = vadd.f32 %v4104_v60, %v992_v6  ;;  %v3268_v9 = vpop.f32.mrb[25].mxu0  ;;  %2566 = vst.msk [vmem:[%s5144_s3 + $0x184] sm:$0xf] %vm2468_vm4, %v3082_v5  ;;  %v1337_v11 = vadd.f32 %v4104_v60, %v1336_v7  ;;  %v3440_v12 = vpop.f32.mrb[25].mxu1 }
 0x134   :  { %v995_v14 = vpop.f32.mrb[26].mxu0  ;;  %v1339_v15 = vpop.f32.mrb[26].mxu1 }
 0x135   :  { %v1634_v16 = vmax.f32 %v993_v8, 0.0  ;;  %v996_v17 = vadd.f32 %v4104_v60, %v995_v14  ;;  %v3269_v18 = vpop.f32.mrb[27].mxu0  ;;  %v1720_v19 = vmax.f32 %v1337_v11, 0.0  ;;  %v1340_v20 = vadd.f32 %v4104_v60, %v1339_v15  ;;  %v3441_v21 = vpop.f32.mrb[27].mxu1  ;;  %v3664_v14 = vld [vmem:[%s5141_s0 + $0x120] sm:$0xff]  }
 0x137   :  { %v2997_v22 = vpack.c.bf16 %v1634_v16, %v1634_v16  ;;  %v1635_v23 = vmax.f32 %v996_v17, 0.0  ;;  %3375 = vmatmul.mubr.msk.bf16.gmra.mrb[132].mxu0 %vm647_vm3, %v3658_v10  ;;  %v3083_v24 = vpack.c.bf16 %v1720_v19, %v1720_v19  ;;  %v1721_v25 = vmax.f32 %v1340_v20, 0.0  ;;  %3547 = vmatmul.mubr.msk.bf16.gmra.mrb[132].mxu1 %vm647_vm3, %v3659_v13  ;;  %v3665_v17 = vld [vmem:[%s5141_s0 + $0x278] sm:$0xff]  }
 0x138   :  { %3378 = vmatprep.mubr.msk.bf16.mxu0 %vm3732_vm1, %v3731_v0  ;;  %3550 = vmatprep.mubr.msk.bf16.mxu1 %vm3732_vm1, %v3731_v0 }
 0x139   :  { %2481 = vst.msk [vmem:[%s5144_s3 + $0x30] sm:$0xf] %vm2468_vm4, %v2997_v22  ;;  %v2998_v26 = vpack.c.bf16 %v1635_v23, %v1635_v23  ;;  %2567 = vst.msk [vmem:[%s5144_s3 + $0x188] sm:$0xf] %vm2468_vm4, %v3083_v24  ;;  %v3084_v27 = vpack.c.bf16 %v1721_v25, %v1721_v25 }
 0x13a   :  { %v1000_v28 = vpop.f32.mrb[28].mxu0  ;;  %v1344_v29 = vpop.f32.mrb[28].mxu1 }
 0x13b   :  { %2482 = vst.msk [vmem:[%s5144_s3 + $0x34] sm:$0xf] %vm2468_vm4, %v2998_v26  ;;  %v1001_v30 = vadd.f32 %v4104_v60, %v1000_v28  ;;  %v3272_v31 = vpop.f32.mrb[29].mxu0  ;;  %2568 = vst.msk [vmem:[%s5144_s3 + $0x18c] sm:$0xf] %vm2468_vm4, %v3084_v27  ;;  %v1345_v33 = vadd.f32 %v4104_v60, %v1344_v29  ;;  %v3444_v34 = vpop.f32.mrb[29].mxu1 }
 0x13c   :  { %v1003_v36 = vpop.f32.mrb[30].mxu0  ;;  %v1347_v37 = vpop.f32.mrb[30].mxu1 }
 0x13d   :  { %v1636_v38 = vmax.f32 %v1001_v30, 0.0  ;;  %v1004_v39 = vadd.f32 %v4104_v60, %v1003_v36  ;;  %v3273_v40 = vpop.f32.mrb[31].mxu0  ;;  %v1722_v41 = vmax.f32 %v1345_v33, 0.0  ;;  %v1348_v42 = vadd.f32 %v4104_v60, %v1347_v37  ;;  %v3445_v43 = vpop.f32.mrb[31].mxu1  ;;  %v3666_v36 = vld [vmem:[%s5141_s0 + $0x128] sm:$0xff]  }
 0x13f   :  { %v2999_v44 = vpack.c.bf16 %v1636_v38, %v1636_v38  ;;  %v1637_v45 = vmax.f32 %v1004_v39, 0.0  ;;  %3379 = vmatmul.mubr.msk.bf16.gmra.mrb[136].mxu0 %vm647_vm3, %v3660_v32  ;;  %v3085_v46 = vpack.c.bf16 %v1722_v41, %v1722_v41  ;;  %v1723_v47 = vmax.f32 %v1348_v42, 0.0  ;;  %3551 = vmatmul.mubr.msk.bf16.gmra.mrb[136].mxu1 %vm647_vm3, %v3661_v35  ;;  %v3667_v39 = vld [vmem:[%s5141_s0 + $0x280] sm:$0xff]  }
 0x140   :  { %3382 = vmatprep.mubr.msk.bf16.mxu0 %vm3732_vm1, %v3731_v0  ;;  %3554 = vmatprep.mubr.msk.bf16.mxu1 %vm3732_vm1, %v3731_v0 }
 0x141   :  { %2483 = vst.msk [vmem:[%s5144_s3 + $0x38] sm:$0xf] %vm2468_vm4, %v2999_v44  ;;  %v3000_v48 = vpack.c.bf16 %v1637_v45, %v1637_v45  ;;  %2569 = vst.msk [vmem:[%s5144_s3 + $0x190] sm:$0xf] %vm2468_vm4, %v3085_v46  ;;  %v3086_v49 = vpack.c.bf16 %v1723_v47, %v1723_v47 }
 0x142   :  { %v1008_v50 = vpop.f32.mrb[32].mxu0  ;;  %v1352_v51 = vpop.f32.mrb[32].mxu1 }
 0x143   :  { %2484 = vst.msk [vmem:[%s5144_s3 + $0x3c] sm:$0xf] %vm2468_vm4, %v3000_v48  ;;  %v1009_v52 = vadd.f32 %v4104_v60, %v1008_v50  ;;  %v3276_v53 = vpop.f32.mrb[33].mxu0  ;;  %2570 = vst.msk [vmem:[%s5144_s3 + $0x194] sm:$0xf] %vm2468_vm4, %v3086_v49  ;;  %v1353_v55 = vadd.f32 %v4104_v60, %v1352_v51  ;;  %v3448_v56 = vpop.f32.mrb[33].mxu1 }
 0x144   :  { %v1011_v58 = vpop.f32.mrb[34].mxu0  ;;  %v1355_v59 = vpop.f32.mrb[34].mxu1 }
 0x145   :  { %v1638_v61 = vmax.f32 %v1009_v52, 0.0  ;;  %v1012_v62 = vadd.f32 %v4104_v60, %v1011_v58  ;;  %v3277_v63 = vpop.f32.mrb[35].mxu0  ;;  %v1724_v1 = vmax.f32 %v1353_v55, 0.0  ;;  %v1356_v2 = vadd.f32 %v4104_v60, %v1355_v59  ;;  %v3449_v3 = vpop.f32.mrb[35].mxu1  ;;  %v3668_v58 = vld [vmem:[%s5141_s0 + $0x130] sm:$0xff]  }
 0x147   :  { %v3001_v4 = vpack.c.bf16 %v1638_v61, %v1638_v61  ;;  %v1639_v5 = vmax.f32 %v1012_v62, 0.0  ;;  %3383 = vmatmul.mubr.msk.bf16.gmra.mrb[140].mxu0 %vm647_vm3, %v3662_v54  ;;  %v3087_v6 = vpack.c.bf16 %v1724_v1, %v1724_v1  ;;  %v1725_v7 = vmax.f32 %v1356_v2, 0.0  ;;  %3555 = vmatmul.mubr.msk.bf16.gmra.mrb[140].mxu1 %vm647_vm3, %v3663_v57  ;;  %v3669_v62 = vld [vmem:[%s5141_s0 + $0x288] sm:$0xff]  }
 0x148   :  { %3386 = vmatprep.mubr.msk.bf16.mxu0 %vm3732_vm1, %v3731_v0  ;;  %3558 = vmatprep.mubr.msk.bf16.mxu1 %vm3732_vm1, %v3731_v0 }
 0x149   :  { %2485 = vst.msk [vmem:[%s5144_s3 + $0x40] sm:$0xf] %vm2468_vm4, %v3001_v4  ;;  %v3002_v8 = vpack.c.bf16 %v1639_v5, %v1639_v5  ;;  %2571 = vst.msk [vmem:[%s5144_s3 + $0x198] sm:$0xf] %vm2468_vm4, %v3087_v6  ;;  %v3088_v9 = vpack.c.bf16 %v1725_v7, %v1725_v7 }
 0x14a   :  { %v1016_v10 = vpop.f32.mrb[36].mxu0  ;;  %v1360_v11 = vpop.f32.mrb[36].mxu1 }
 0x14b   :  { %2486 = vst.msk [vmem:[%s5144_s3 + $0x44] sm:$0xf] %vm2468_vm4, %v3002_v8  ;;  %v1017_v12 = vadd.f32 %v4104_v60, %v1016_v10  ;;  %v3280_v13 = vpop.f32.mrb[37].mxu0  ;;  %2572 = vst.msk [vmem:[%s5144_s3 + $0x19c] sm:$0xf] %vm2468_vm4, %v3088_v9  ;;  %v1361_v15 = vadd.f32 %v4104_v60, %v1360_v11  ;;  %v3452_v16 = vpop.f32.mrb[37].mxu1 }
 0x14c   :  { %v1019_v18 = vpop.f32.mrb[38].mxu0  ;;  %v1363_v19 = vpop.f32.mrb[38].mxu1 }
 0x14d   :  { %v1640_v20 = vmax.f32 %v1017_v12, 0.0  ;;  %v1020_v21 = vadd.f32 %v4104_v60, %v1019_v18  ;;  %v3281_v22 = vpop.f32.mrb[39].mxu0  ;;  %v1726_v23 = vmax.f32 %v1361_v15, 0.0  ;;  %v1364_v24 = vadd.f32 %v4104_v60, %v1363_v19  ;;  %v3453_v25 = vpop.f32.mrb[39].mxu1  ;;  %v3670_v18 = vld [vmem:[%s5141_s0 + $0x138] sm:$0xff]  }
 0x14f   :  { %v3003_v26 = vpack.c.bf16 %v1640_v20, %v1640_v20  ;;  %v1641_v27 = vmax.f32 %v1020_v21, 0.0  ;;  %3387 = vmatmul.mubr.msk.bf16.gmra.mrb[144].mxu0 %vm647_vm3, %v3664_v14  ;;  %v3089_v28 = vpack.c.bf16 %v1726_v23, %v1726_v23  ;;  %v1727_v29 = vmax.f32 %v1364_v24, 0.0  ;;  %3559 = vmatmul.mubr.msk.bf16.gmra.mrb[144].mxu1 %vm647_vm3, %v3665_v17  ;;  %v3671_v21 = vld [vmem:[%s5141_s0 + $0x290] sm:$0xff]  }
 0x150   :  { %3390 = vmatprep.mubr.msk.bf16.mxu0 %vm3732_vm1, %v3731_v0  ;;  %3562 = vmatprep.mubr.msk.bf16.mxu1 %vm3732_vm1, %v3731_v0 }
 0x151   :  { %2487 = vst.msk [vmem:[%s5144_s3 + $0x48] sm:$0xf] %vm2468_vm4, %v3003_v26  ;;  %v3004_v30 = vpack.c.bf16 %v1641_v27, %v1641_v27  ;;  %2573 = vst.msk [vmem:[%s5144_s3 + $0x1a0] sm:$0xf] %vm2468_vm4, %v3089_v28  ;;  %v3090_v31 = vpack.c.bf16 %v1727_v29, %v1727_v29 }
 0x152   :  { %v1024_v32 = vpop.f32.mrb[40].mxu0  ;;  %v1368_v33 = vpop.f32.mrb[40].mxu1 }
 0x153   :  { %2488 = vst.msk [vmem:[%s5144_s3 + $0x4c] sm:$0xf] %vm2468_vm4, %v3004_v30  ;;  %v1025_v34 = vadd.f32 %v4104_v60, %v1024_v32  ;;  %v3284_v35 = vpop.f32.mrb[41].mxu0  ;;  %2574 = vst.msk [vmem:[%s5144_s3 + $0x1a4] sm:$0xf] %vm2468_vm4, %v3090_v31  ;;  %v1369_v37 = vadd.f32 %v4104_v60, %v1368_v33  ;;  %v3456_v38 = vpop.f32.mrb[41].mxu1 }
 0x154   :  { %v1027_v40 = vpop.f32.mrb[42].mxu0  ;;  %v1371_v41 = vpop.f32.mrb[42].mxu1 }
 0x155   :  { %v1642_v42 = vmax.f32 %v1025_v34, 0.0  ;;  %v1028_v43 = vadd.f32 %v4104_v60, %v1027_v40  ;;  %v3285_v44 = vpop.f32.mrb[43].mxu0  ;;  %v1728_v45 = vmax.f32 %v1369_v37, 0.0  ;;  %v1372_v46 = vadd.f32 %v4104_v60, %v1371_v41  ;;  %v3457_v47 = vpop.f32.mrb[43].mxu1  ;;  %v3672_v40 = vld [vmem:[%s5141_s0 + $0x140] sm:$0xff]  }
 0x157   :  { %v3005_v48 = vpack.c.bf16 %v1642_v42, %v1642_v42  ;;  %v1643_v49 = vmax.f32 %v1028_v43, 0.0  ;;  %3391 = vmatmul.mubr.msk.bf16.gmra.mrb[148].mxu0 %vm647_vm3, %v3666_v36  ;;  %v3091_v50 = vpack.c.bf16 %v1728_v45, %v1728_v45  ;;  %v1729_v51 = vmax.f32 %v1372_v46, 0.0  ;;  %3563 = vmatmul.mubr.msk.bf16.gmra.mrb[148].mxu1 %vm647_vm3, %v3667_v39  ;;  %v3673_v43 = vld [vmem:[%s5141_s0 + $0x298] sm:$0xff]  }
 0x158   :  { %3394 = vmatprep.mubr.msk.bf16.mxu0 %vm3732_vm1, %v3731_v0  ;;  %3566 = vmatprep.mubr.msk.bf16.mxu1 %vm3732_vm1, %v3731_v0 }
 0x159   :  { %2489 = vst.msk [vmem:[%s5144_s3 + $0x50] sm:$0xf] %vm2468_vm4, %v3005_v48  ;;  %v3006_v52 = vpack.c.bf16 %v1643_v49, %v1643_v49  ;;  %2575 = vst.msk [vmem:[%s5144_s3 + $0x1a8] sm:$0xf] %vm2468_vm4, %v3091_v50  ;;  %v3092_v53 = vpack.c.bf16 %v1729_v51, %v1729_v51 }
 0x15a   :  { %v1032_v54 = vpop.f32.mrb[44].mxu0  ;;  %v1376_v55 = vpop.f32.mrb[44].mxu1 }
 0x15b   :  { %2490 = vst.msk [vmem:[%s5144_s3 + $0x54] sm:$0xf] %vm2468_vm4, %v3006_v52  ;;  %v1033_v56 = vadd.f32 %v4104_v60, %v1032_v54  ;;  %v3288_v57 = vpop.f32.mrb[45].mxu0  ;;  %2576 = vst.msk [vmem:[%s5144_s3 + $0x1ac] sm:$0xf] %vm2468_vm4, %v3092_v53  ;;  %v1377_v59 = vadd.f32 %v4104_v60, %v1376_v55  ;;  %v3460_v61 = vpop.f32.mrb[45].mxu1 }
 0x15c   :  { %v1035_v63 = vpop.f32.mrb[46].mxu0  ;;  %v1379_v1 = vpop.f32.mrb[46].mxu1 }
 0x15d   :  { %v1644_v2 = vmax.f32 %v1033_v56, 0.0  ;;  %v1036_v3 = vadd.f32 %v4104_v60, %v1035_v63  ;;  %v3289_v4 = vpop.f32.mrb[47].mxu0  ;;  %v1730_v5 = vmax.f32 %v1377_v59, 0.0  ;;  %v1380_v6 = vadd.f32 %v4104_v60, %v1379_v1  ;;  %v3461_v7 = vpop.f32.mrb[47].mxu1  ;;  %v3674_v63 = vld [vmem:[%s5141_s0 + $0x148] sm:$0xff]  }
 0x15f   :  { %v3007_v8 = vpack.c.bf16 %v1644_v2, %v1644_v2  ;;  %v1645_v9 = vmax.f32 %v1036_v3, 0.0  ;;  %3395 = vmatmul.mubr.msk.bf16.gmra.mrb[152].mxu0 %vm647_vm3, %v3668_v58  ;;  %v3093_v10 = vpack.c.bf16 %v1730_v5, %v1730_v5  ;;  %v1731_v11 = vmax.f32 %v1380_v6, 0.0  ;;  %3567 = vmatmul.mubr.msk.bf16.gmra.mrb[152].mxu1 %vm647_vm3, %v3669_v62  ;;  %v3675_v3 = vld [vmem:[%s5141_s0 + $0x2a0] ss:$0 sps:$4 sm:$0xff]  }
 0x160   :  { %3398 = vmatprep.mubr.msk.bf16.mxu0 %vm3732_vm1, %v3731_v0  ;;  %3570 = vmatprep.mubr.msk.bf16.mxu1 %vm3732_vm1, %v3731_v0 }
 0x161   :  { %2491 = vst.msk [vmem:[%s5144_s3 + $0x58] sm:$0xf] %vm2468_vm4, %v3007_v8  ;;  %v3008_v12 = vpack.c.bf16 %v1645_v9, %v1645_v9  ;;  %2577 = vst.msk [vmem:[%s5144_s3 + $0x1b0] sm:$0xf] %vm2468_vm4, %v3093_v10  ;;  %v3094_v13 = vpack.c.bf16 %v1731_v11, %v1731_v11 }
 0x162   :  { %v1040_v14 = vpop.f32.mrb[48].mxu0  ;;  %v1384_v15 = vpop.f32.mrb[48].mxu1 }
 0x163   :  { %2492 = vst.msk [vmem:[%s5144_s3 + $0x5c] sm:$0xf] %vm2468_vm4, %v3008_v12  ;;  %v1041_v16 = vadd.f32 %v4104_v60, %v1040_v14  ;;  %v3292_v17 = vpop.f32.mrb[49].mxu0  ;;  %2578 = vst.msk [vmem:[%s5144_s3 + $0x1b4] sm:$0xf] %vm2468_vm4, %v3094_v13  ;;  %v1385_v19 = vadd.f32 %v4104_v60, %v1384_v15  ;;  %v3464_v20 = vpop.f32.mrb[49].mxu1 }
 0x164   :  { %v1043_v22 = vpop.f32.mrb[50].mxu0  ;;  %v1387_v23 = vpop.f32.mrb[50].mxu1 }
 0x165   :  { %v1646_v24 = vmax.f32 %v1041_v16, 0.0  ;;  %v1044_v25 = vadd.f32 %v4104_v60, %v1043_v22  ;;  %v3293_v26 = vpop.f32.mrb[51].mxu0  ;;  %v1732_v27 = vmax.f32 %v1385_v19, 0.0  ;;  %v1388_v28 = vadd.f32 %v4104_v60, %v1387_v23  ;;  %v3465_v29 = vpop.f32.mrb[51].mxu1 }
 0x167   :  { %v3009_v30 = vpack.c.bf16 %v1646_v24, %v1646_v24  ;;  %v1647_v31 = vmax.f32 %v1044_v25, 0.0  ;;  %3399 = vmatmul.mubr.msk.bf16.gmra.mrb[156].mxu0 %vm647_vm3, %v3670_v18  ;;  %v3095_v32 = vpack.c.bf16 %v1732_v27, %v1732_v27  ;;  %v1733_v33 = vmax.f32 %v1388_v28, 0.0  ;;  %3571 = vmatmul.mubr.msk.bf16.gmra.mrb[156].mxu1 %vm647_vm3, %v3671_v21  ;;  %v3676_v21 = vld [vmem:[%s5141_s0 + $0x150] sm:$0xff]  }
 0x168   :  { %3402 = vmatprep.mubr.msk.bf16.mxu0 %vm3732_vm1, %v3731_v0  ;;  %3574 = vmatprep.mubr.msk.bf16.mxu1 %vm3732_vm1, %v3731_v0 }
 0x169   :  { %2493 = vst.msk [vmem:[%s5144_s3 + $0x60] sm:$0xf] %vm2468_vm4, %v3009_v30  ;;  %v3010_v34 = vpack.c.bf16 %v1647_v31, %v1647_v31  ;;  %2579 = vst.msk [vmem:[%s5144_s3 + $0x1b8] sm:$0xf] %vm2468_vm4, %v3095_v32  ;;  %v3096_v35 = vpack.c.bf16 %v1733_v33, %v1733_v33 }
 0x16a   :  { %v1048_v36 = vpop.f32.mrb[52].mxu0  ;;  %v1392_v37 = vpop.f32.mrb[52].mxu1 }
 0x16b   :  { %2494 = vst.msk [vmem:[%s5144_s3 + $0x64] sm:$0xf] %vm2468_vm4, %v3010_v34  ;;  %v1049_v38 = vadd.f32 %v4104_v60, %v1048_v36  ;;  %v3296_v39 = vpop.f32.mrb[53].mxu0  ;;  %2580 = vst.msk [vmem:[%s5144_s3 + $0x1bc] sm:$0xf] %vm2468_vm4, %v3096_v35  ;;  %v1393_v41 = vadd.f32 %v4104_v60, %v1392_v37  ;;  %v3468_v42 = vpop.f32.mrb[53].mxu1 }
 0x16c   :  { %v1051_v44 = vpop.f32.mrb[54].mxu0  ;;  %v1395_v45 = vpop.f32.mrb[54].mxu1 }
 0x16d   :  { %v1648_v46 = vmax.f32 %v1049_v38, 0.0  ;;  %v1052_v47 = vadd.f32 %v4104_v60, %v1051_v44  ;;  %v3297_v48 = vpop.f32.mrb[55].mxu0  ;;  %v1734_v49 = vmax.f32 %v1393_v41, 0.0  ;;  %v1396_v50 = vadd.f32 %v4104_v60, %v1395_v45  ;;  %v3469_v51 = vpop.f32.mrb[55].mxu1 }
 0x16f   :  { %v3011_v52 = vpack.c.bf16 %v1648_v46, %v1648_v46  ;;  %v1649_v53 = vmax.f32 %v1052_v47, 0.0  ;;  %3403 = vmatmul.mubr.msk.bf16.gmra.mrb[160].mxu0 %vm647_vm3, %v3672_v40  ;;  %v3097_v54 = vpack.c.bf16 %v1734_v49, %v1734_v49  ;;  %v1735_v55 = vmax.f32 %v1396_v50, 0.0  ;;  %3575 = vmatmul.mubr.msk.bf16.gmra.mrb[160].mxu1 %vm647_vm3, %v3673_v43 }
 0x170   :  { %3406 = vmatprep.mubr.msk.bf16.mxu0 %vm3732_vm1, %v3731_v0  ;;  %3578 = vmatprep.mubr.msk.bf16.mxu1 %vm3732_vm1, %v3731_v0 }
 0x171   :  { %2495 = vst.msk [vmem:[%s5144_s3 + $0x68] sm:$0xf] %vm2468_vm4, %v3011_v52  ;;  %v3012_v56 = vpack.c.bf16 %v1649_v53, %v1649_v53  ;;  %2581 = vst.msk [vmem:[%s5144_s3 + $0x1c0] sm:$0xf] %vm2468_vm4, %v3097_v54  ;;  %v3098_v57 = vpack.c.bf16 %v1735_v55, %v1735_v55 }
 0x172   :  { %v1056_v58 = vpop.f32.mrb[56].mxu0  ;;  %v1400_v59 = vpop.f32.mrb[56].mxu1 }
 0x173   :  { %2496 = vst.msk [vmem:[%s5144_s3 + $0x6c] sm:$0xf] %vm2468_vm4, %v3012_v56  ;;  %v1057_v61 = vadd.f32 %v4104_v60, %v1056_v58  ;;  %v3300_v62 = vpop.f32.mrb[57].mxu0  ;;  %2582 = vst.msk [vmem:[%s5144_s3 + $0x1c4] sm:$0xf] %vm2468_vm4, %v3098_v57  ;;  %v1401_v1 = vadd.f32 %v4104_v60, %v1400_v59  ;;  %v3472_v2 = vpop.f32.mrb[57].mxu1 }
 0x174   :  { %v1059_v4 = vpop.f32.mrb[58].mxu0  ;;  %v1403_v5 = vpop.f32.mrb[58].mxu1 }
 0x175   :  { %v1650_v6 = vmax.f32 %v1057_v61, 0.0  ;;  %v1060_v7 = vadd.f32 %v4104_v60, %v1059_v4  ;;  %v3301_v8 = vpop.f32.mrb[59].mxu0  ;;  %v1736_v9 = vmax.f32 %v1401_v1, 0.0  ;;  %v1404_v10 = vadd.f32 %v4104_v60, %v1403_v5  ;;  %v3473_v11 = vpop.f32.mrb[59].mxu1  ;;  %v4634_v5 = vld [vmem:[#allocation4] ss:$0 sm:$0xff] }
 0x177   :  { %v3013_v12 = vpack.c.bf16 %v1650_v6, %v1650_v6  ;;  %v1651_v13 = vmax.f32 %v1060_v7, 0.0  ;;  %3407 = vmatmul.mubr.msk.bf16.gmra.mrb[164].mxu0 %vm647_vm3, %v3674_v63  ;;  %v3099_v14 = vpack.c.bf16 %v1736_v9, %v1736_v9  ;;  %v1737_v15 = vmax.f32 %v1404_v10, 0.0  ;;  %3579 = vmatmul.mubr.msk.bf16.gmra.mrb[164].mxu1 %vm647_vm3, %v3675_v3 }
 0x178   :  { %3410 = vmatprep.mubr.msk.bf16.mxu0 %vm3732_vm1, %v3731_v0 }
 0x179   :  { %2497 = vst.msk [vmem:[%s5144_s3 + $0x70] sm:$0xf] %vm2468_vm4, %v3013_v12  ;;  %v3014_v16 = vpack.c.bf16 %v1651_v13, %v1651_v13  ;;  %2583 = vst.msk [vmem:[%s5144_s3 + $0x1c8] sm:$0xf] %vm2468_vm4, %v3099_v14  ;;  %v3100_v17 = vpack.c.bf16 %v1737_v15, %v1737_v15 }
 0x17a   :  { %v1064_v18 = vpop.f32.mrb[60].mxu0  ;;  %v1408_v19 = vpop.f32.mrb[60].mxu1 }
 0x17b   :  { %2498 = vst.msk [vmem:[%s5144_s3 + $0x74] sm:$0xf] %vm2468_vm4, %v3014_v16  ;;  %v1065_v0 = vadd.f32 %v4104_v60, %v1064_v18  ;;  %v3304_v20 = vpop.f32.mrb[61].mxu0  ;;  %2584 = vst.msk [vmem:[%s5144_s3 + $0x1cc] sm:$0xf] %vm2468_vm4, %v3100_v17  ;;  %v1409_v22 = vadd.f32 %v4104_v60, %v1408_v19  ;;  %v3476_v23 = vpop.f32.mrb[61].mxu1 }
 0x17c   :  { %v1067_v24 = vpop.f32.mrb[62].mxu0  ;;  %v1411_v25 = vpop.f32.mrb[62].mxu1 }
 0x17d   :  { %v1652_v26 = vmax.f32 %v1065_v0, 0.0  ;;  %v1068_v27 = vadd.f32 %v4104_v60, %v1067_v24  ;;  %v3305_v28 = vpop.f32.mrb[63].mxu0  ;;  %v1738_v29 = vmax.f32 %v1409_v22, 0.0  ;;  %v1412_v30 = vadd.f32 %v4104_v60, %v1411_v25  ;;  %v3477_v31 = vpop.f32.mrb[63].mxu1 }
 0x17f   :  { %v3015_v32 = vpack.c.bf16 %v1652_v26, %v1652_v26  ;;  %v1653_v33 = vmax.f32 %v1068_v27, 0.0  ;;  %3411 = vmatmul.mubr.msk.bf16.gmra.mrb[168].mxu0 %vm647_vm3, %v3676_v21  ;;  %v3101_v34 = vpack.c.bf16 %v1738_v29, %v1738_v29  ;;  %v1739_v35 = vmax.f32 %v1412_v30, 0.0 }
 0x181   :  { %2499 = vst.msk [vmem:[%s5144_s3 + $0x78] sm:$0xf] %vm2468_vm4, %v3015_v32  ;;  %v3016_v36 = vpack.c.bf16 %v1653_v33, %v1653_v33  ;;  %2585 = vst.msk [vmem:[%s5144_s3 + $0x1d0] sm:$0xf] %vm2468_vm4, %v3101_v34  ;;  %v3102_v37 = vpack.c.bf16 %v1739_v35, %v1739_v35 }
 0x182   :  { %v1072_v38 = vpop.f32.mrb[64].mxu0  ;;  %v1416_v39 = vpop.f32.mrb[64].mxu1 }
 0x183   :  { %2500 = vst.msk [vmem:[%s5144_s3 + $0x7c] sm:$0xf] %vm2468_vm4, %v3016_v36  ;;  %v1073_v40 = vadd.f32 %v4104_v60, %v1072_v38  ;;  %v3308_v41 = vpop.f32.mrb[65].mxu0  ;;  %2586 = vst.msk [vmem:[%s5144_s3 + $0x1d4] sm:$0xf] %vm2468_vm4, %v3102_v37  ;;  %v1417_v42 = vadd.f32 %v4104_v60, %v1416_v39  ;;  %v3480_v43 = vpop.f32.mrb[65].mxu1 }
 0x184   :  { %v1075_v44 = vpop.f32.mrb[66].mxu0  ;;  %v1419_v45 = vpop.f32.mrb[66].mxu1 }
 0x185   :  { %v1654_v46 = vmax.f32 %v1073_v40, 0.0  ;;  %v1076_v47 = vadd.f32 %v4104_v60, %v1075_v44  ;;  %v3309_v48 = vpop.f32.mrb[67].mxu0  ;;  %v1740_v49 = vmax.f32 %v1417_v42, 0.0  ;;  %v1420_v50 = vadd.f32 %v4104_v60, %v1419_v45  ;;  %v3481_v51 = vpop.f32.mrb[67].mxu1 }
 0x187   :  { %v3017_v52 = vpack.c.bf16 %v1654_v46, %v1654_v46  ;;  %v1655_v53 = vmax.f32 %v1076_v47, 0.0  ;;  %v3103_v54 = vpack.c.bf16 %v1740_v49, %v1740_v49  ;;  %v1741_v55 = vmax.f32 %v1420_v50, 0.0 }
 0x189   :  { %2501 = vst.msk [vmem:[%s5144_s3 + $0x80] sm:$0xf] %vm2468_vm4, %v3017_v52  ;;  %v3018_v56 = vpack.c.bf16 %v1655_v53, %v1655_v53  ;;  %2587 = vst.msk [vmem:[%s5144_s3 + $0x1d8] sm:$0xf] %vm2468_vm4, %v3103_v54  ;;  %v3104_v57 = vpack.c.bf16 %v1741_v55, %v1741_v55 }
 0x18a   :  { %v1080_v58 = vpop.f32.mrb[68].mxu0  ;;  %v1424_v59 = vpop.f32.mrb[68].mxu1 }
 0x18b   :  { %2502 = vst.msk [vmem:[%s5144_s3 + $0x84] sm:$0xf] %vm2468_vm4, %v3018_v56  ;;  %v1081_v61 = vadd.f32 %v4104_v60, %v1080_v58  ;;  %v3312_v62 = vpop.f32.mrb[69].mxu0  ;;  %2588 = vst.msk [vmem:[%s5144_s3 + $0x1dc] sm:$0xf] %vm2468_vm4, %v3104_v57  ;;  %v1425_v63 = vadd.f32 %v4104_v60, %v1424_v59  ;;  %v3484_v1 = vpop.f32.mrb[69].mxu1 }
 0x18c   :  { %v1083_v2 = vpop.f32.mrb[70].mxu0  ;;  %v1427_v3 = vpop.f32.mrb[70].mxu1 }
 0x18d   :  { %v1656_v4 = vmax.f32 %v1081_v61, 0.0  ;;  %v1084_v6 = vadd.f32 %v4634_v5, %v1083_v2  ;;  %v3313_v7 = vpop.f32.mrb[71].mxu0  ;;  %v1742_v8 = vmax.f32 %v1425_v63, 0.0  ;;  %v1428_v9 = vadd.f32 %v4634_v5, %v1427_v3  ;;  %v3485_v10 = vpop.f32.mrb[71].mxu1 }
 0x18f   :  { %v3019_v11 = vpack.c.bf16 %v1656_v4, %v1656_v4  ;;  %v1657_v12 = vmax.f32 %v1084_v6, 0.0  ;;  %v3105_v13 = vpack.c.bf16 %v1742_v8, %v1742_v8  ;;  %v1743_v14 = vmax.f32 %v1428_v9, 0.0 }
 0x191   :  { %2503 = vst.msk [vmem:[%s5144_s3 + $0x88] sm:$0xf] %vm2468_vm4, %v3019_v11  ;;  %v3020_v60 = vpack.c.bf16 %v1657_v12, %v1657_v12  ;;  %2589 = vst.msk [vmem:[%s5144_s3 + $0x1e0] sm:$0xf] %vm2468_vm4, %v3105_v13  ;;  %v3106_v15 = vpack.c.bf16 %v1743_v14, %v1743_v14 }
 0x192   :  { %v1088_v16 = vpop.f32.mrb[72].mxu0  ;;  %v1432_v17 = vpop.f32.mrb[72].mxu1 }
 0x193   :  { %2504 = vst.msk [vmem:[%s5144_s3 + $0x8c] sm:$0xf] %vm2468_vm4, %v3020_v60  ;;  %v1089_v18 = vadd.f32 %v4634_v5, %v1088_v16  ;;  %v3316_v19 = vpop.f32.mrb[73].mxu0  ;;  %2590 = vst.msk [vmem:[%s5144_s3 + $0x1e4] sm:$0xf] %vm2468_vm4, %v3106_v15  ;;  %v1433_v0 = vadd.f32 %v4634_v5, %v1432_v17  ;;  %v3488_v20 = vpop.f32.mrb[73].mxu1 }
 0x194   :  { %v1091_v21 = vpop.f32.mrb[74].mxu0  ;;  %v1435_v22 = vpop.f32.mrb[74].mxu1 }
 0x195   :  { %v1658_v23 = vmax.f32 %v1089_v18, 0.0  ;;  %v1092_v24 = vadd.f32 %v4634_v5, %v1091_v21  ;;  %v3317_v25 = vpop.f32.mrb[75].mxu0  ;;  %v1744_v26 = vmax.f32 %v1433_v0, 0.0  ;;  %v1436_v27 = vadd.f32 %v4634_v5, %v1435_v22  ;;  %v3489_v28 = vpop.f32.mrb[75].mxu1 }
 0x197   :  { %v3021_v29 = vpack.c.bf16 %v1658_v23, %v1658_v23  ;;  %v1659_v30 = vmax.f32 %v1092_v24, 0.0  ;;  %v3107_v31 = vpack.c.bf16 %v1744_v26, %v1744_v26  ;;  %v1745_v32 = vmax.f32 %v1436_v27, 0.0 }
 0x199   :  { %2505 = vst.msk [vmem:[%s5144_s3 + $0x90] sm:$0xf] %vm2468_vm4, %v3021_v29  ;;  %v3022_v33 = vpack.c.bf16 %v1659_v30, %v1659_v30  ;;  %2591 = vst.msk [vmem:[%s5144_s3 + $0x1e8] sm:$0xf] %vm2468_vm4, %v3107_v31  ;;  %v3108_v34 = vpack.c.bf16 %v1745_v32, %v1745_v32 }
 0x19a   :  { %v1096_v35 = vpop.f32.mrb[76].mxu0  ;;  %v1440_v36 = vpop.f32.mrb[76].mxu1 }
 0x19b   :  { %2506 = vst.msk [vmem:[%s5144_s3 + $0x94] sm:$0xf] %vm2468_vm4, %v3022_v33  ;;  %v1097_v37 = vadd.f32 %v4634_v5, %v1096_v35  ;;  %v3320_v38 = vpop.f32.mrb[77].mxu0  ;;  %2592 = vst.msk [vmem:[%s5144_s3 + $0x1ec] sm:$0xf] %vm2468_vm4, %v3108_v34  ;;  %v1441_v39 = vadd.f32 %v4634_v5, %v1440_v36  ;;  %v3492_v40 = vpop.f32.mrb[77].mxu1 }
 0x19c   :  { %v1099_v41 = vpop.f32.mrb[78].mxu0  ;;  %v1443_v42 = vpop.f32.mrb[78].mxu1 }
 0x19d   :  { %v1660_v43 = vmax.f32 %v1097_v37, 0.0  ;;  %v1100_v44 = vadd.f32 %v4634_v5, %v1099_v41  ;;  %v3321_v45 = vpop.f32.mrb[79].mxu0  ;;  %v1746_v46 = vmax.f32 %v1441_v39, 0.0  ;;  %v1444_v47 = vadd.f32 %v4634_v5, %v1443_v42  ;;  %v3493_v48 = vpop.f32.mrb[79].mxu1 }
 0x19f   :  { %v3023_v49 = vpack.c.bf16 %v1660_v43, %v1660_v43  ;;  %v1661_v50 = vmax.f32 %v1100_v44, 0.0  ;;  %v3109_v51 = vpack.c.bf16 %v1746_v46, %v1746_v46  ;;  %v1747_v52 = vmax.f32 %v1444_v47, 0.0 }
 0x1a1   :  { %2507 = vst.msk [vmem:[%s5144_s3 + $0x98] sm:$0xf] %vm2468_vm4, %v3023_v49  ;;  %v3024_v53 = vpack.c.bf16 %v1661_v50, %v1661_v50  ;;  %2593 = vst.msk [vmem:[%s5144_s3 + $0x1f0] sm:$0xf] %vm2468_vm4, %v3109_v51  ;;  %v3110_v54 = vpack.c.bf16 %v1747_v52, %v1747_v52 }
 0x1a2   :  { %v1104_v55 = vpop.f32.mrb[80].mxu0  ;;  %v1448_v56 = vpop.f32.mrb[80].mxu1 }
 0x1a3   :  { %2508 = vst.msk [vmem:[%s5144_s3 + $0x9c] sm:$0xf] %vm2468_vm4, %v3024_v53  ;;  %v1105_v57 = vadd.f32 %v4634_v5, %v1104_v55  ;;  %v3324_v58 = vpop.f32.mrb[81].mxu0  ;;  %2594 = vst.msk [vmem:[%s5144_s3 + $0x1f4] sm:$0xf] %vm2468_vm4, %v3110_v54  ;;  %v1449_v59 = vadd.f32 %v4634_v5, %v1448_v56  ;;  %v3496_v61 = vpop.f32.mrb[81].mxu1 }
 0x1a4   :  { %v1107_v62 = vpop.f32.mrb[82].mxu0  ;;  %v1451_v63 = vpop.f32.mrb[82].mxu1 }
 0x1a5   :  { %v1662_v1 = vmax.f32 %v1105_v57, 0.0  ;;  %v1108_v2 = vadd.f32 %v4634_v5, %v1107_v62  ;;  %v3325_v3 = vpop.f32.mrb[83].mxu0  ;;  %v1748_v4 = vmax.f32 %v1449_v59, 0.0  ;;  %v1452_v6 = vadd.f32 %v4634_v5, %v1451_v63  ;;  %v3497_v7 = vpop.f32.mrb[83].mxu1 }
 0x1a7   :  { %v3025_v8 = vpack.c.bf16 %v1662_v1, %v1662_v1  ;;  %v1663_v9 = vmax.f32 %v1108_v2, 0.0  ;;  %v3111_v10 = vpack.c.bf16 %v1748_v4, %v1748_v4  ;;  %v1749_v11 = vmax.f32 %v1452_v6, 0.0 }
 0x1a9   :  { %2509 = vst.msk [vmem:[%s5144_s3 + $0xa0] sm:$0xf] %vm2468_vm4, %v3025_v8  ;;  %v3026_v12 = vpack.c.bf16 %v1663_v9, %v1663_v9  ;;  %2595 = vst.msk [vmem:[%s5144_s3 + $0x1f8] sm:$0xf] %vm2468_vm4, %v3111_v10  ;;  %v3112_v13 = vpack.c.bf16 %v1749_v11, %v1749_v11 }
 0x1aa   :  { %v1112_v14 = vpop.f32.mrb[84].mxu0  ;;  %v1456_v60 = vpop.f32.mrb[84].mxu1 }
 0x1ab   :  { %2510 = vst.msk [vmem:[%s5144_s3 + $0xa4] sm:$0xf] %vm2468_vm4, %v3026_v12  ;;  %v1113_v15 = vadd.f32 %v4634_v5, %v1112_v14  ;;  %v3328_v16 = vpop.f32.mrb[85].mxu0  ;;  %2596 = vst.msk [vmem:[%s5144_s3 + $0x1fc] sm:$0xf] %vm2468_vm4, %v3112_v13  ;;  %v1457_v17 = vadd.f32 %v4634_v5, %v1456_v60  ;;  %v3500_v18 = vpop.f32.mrb[85].mxu1 }
 0x1ac   :  { %v1115_v19 = vpop.f32.mrb[86].mxu0  ;;  %v1459_v0 = vpop.f32.mrb[86].mxu1 }
 0x1ad   :  { %v1664_v20 = vmax.f32 %v1113_v15, 0.0  ;;  %v1116_v21 = vadd.f32 %v4634_v5, %v1115_v19  ;;  %v3329_v22 = vpop.f32.mrb[87].mxu0  ;;  %v1750_v23 = vmax.f32 %v1457_v17, 0.0  ;;  %v1460_v24 = vadd.f32 %v4634_v5, %v1459_v0  ;;  %v3501_v25 = vpop.f32.mrb[87].mxu1 }
 0x1af   :  { %v3027_v26 = vpack.c.bf16 %v1664_v20, %v1664_v20  ;;  %v1665_v27 = vmax.f32 %v1116_v21, 0.0  ;;  %v3113_v28 = vpack.c.bf16 %v1750_v23, %v1750_v23  ;;  %v1751_v29 = vmax.f32 %v1460_v24, 0.0 }
 0x1b1   :  { %2511 = vst.msk [vmem:[%s5144_s3 + $0xa8] sm:$0xf] %vm2468_vm4, %v3027_v26  ;;  %v3028_v30 = vpack.c.bf16 %v1665_v27, %v1665_v27  ;;  %2597 = vst.msk [vmem:[%s5144_s3 + $0x200] sm:$0xf] %vm2468_vm4, %v3113_v28  ;;  %v3114_v31 = vpack.c.bf16 %v1751_v29, %v1751_v29 }
 0x1b2   :  { %v1120_v32 = vpop.f32.mrb[88].mxu0  ;;  %v1464_v33 = vpop.f32.mrb[88].mxu1 }
 0x1b3   :  { %2512 = vst.msk [vmem:[%s5144_s3 + $0xac] sm:$0xf] %vm2468_vm4, %v3028_v30  ;;  %v1121_v34 = vadd.f32 %v4634_v5, %v1120_v32  ;;  %v3332_v35 = vpop.f32.mrb[89].mxu0  ;;  %2598 = vst.msk [vmem:[%s5144_s3 + $0x204] sm:$0xf] %vm2468_vm4, %v3114_v31  ;;  %v1465_v36 = vadd.f32 %v4634_v5, %v1464_v33  ;;  %v3504_v37 = vpop.f32.mrb[89].mxu1 }
 0x1b4   :  { %v1123_v38 = vpop.f32.mrb[90].mxu0  ;;  %v1467_v39 = vpop.f32.mrb[90].mxu1 }
 0x1b5   :  { %v1666_v40 = vmax.f32 %v1121_v34, 0.0  ;;  %v1124_v41 = vadd.f32 %v4634_v5, %v1123_v38  ;;  %v3333_v42 = vpop.f32.mrb[91].mxu0  ;;  %v1752_v43 = vmax.f32 %v1465_v36, 0.0  ;;  %v1468_v44 = vadd.f32 %v4634_v5, %v1467_v39  ;;  %v3505_v45 = vpop.f32.mrb[91].mxu1 }
 0x1b7   :  { %v3029_v46 = vpack.c.bf16 %v1666_v40, %v1666_v40  ;;  %v1667_v47 = vmax.f32 %v1124_v41, 0.0  ;;  %v3115_v48 = vpack.c.bf16 %v1752_v43, %v1752_v43  ;;  %v1753_v49 = vmax.f32 %v1468_v44, 0.0 }
 0x1b9   :  { %2513 = vst.msk [vmem:[%s5144_s3 + $0xb0] sm:$0xf] %vm2468_vm4, %v3029_v46  ;;  %v3030_v50 = vpack.c.bf16 %v1667_v47, %v1667_v47  ;;  %2599 = vst.msk [vmem:[%s5144_s3 + $0x208] sm:$0xf] %vm2468_vm4, %v3115_v48  ;;  %v3116_v51 = vpack.c.bf16 %v1753_v49, %v1753_v49 }
 0x1ba   :  { %v1128_v52 = vpop.f32.mrb[92].mxu0  ;;  %v1472_v53 = vpop.f32.mrb[92].mxu1 }
 0x1bb   :  { %2514 = vst.msk [vmem:[%s5144_s3 + $0xb4] sm:$0xf] %vm2468_vm4, %v3030_v50  ;;  %v1129_v54 = vadd.f32 %v4634_v5, %v1128_v52  ;;  %v3336_v55 = vpop.f32.mrb[93].mxu0  ;;  %2600 = vst.msk [vmem:[%s5144_s3 + $0x20c] sm:$0xf] %vm2468_vm4, %v3116_v51  ;;  %v1473_v56 = vadd.f32 %v4634_v5, %v1472_v53  ;;  %v3508_v57 = vpop.f32.mrb[93].mxu1 }
 0x1bc   :  { %v1131_v58 = vpop.f32.mrb[94].mxu0  ;;  %v1475_v59 = vpop.f32.mrb[94].mxu1 }
 0x1bd   :  { %v1668_v61 = vmax.f32 %v1129_v54, 0.0  ;;  %v1132_v62 = vadd.f32 %v4634_v5, %v1131_v58  ;;  %v3337_v63 = vpop.f32.mrb[95].mxu0  ;;  %v1754_v1 = vmax.f32 %v1473_v56, 0.0  ;;  %v1476_v2 = vadd.f32 %v4634_v5, %v1475_v59  ;;  %v3509_v3 = vpop.f32.mrb[95].mxu1 }
 0x1bf   :  { %v3031_v4 = vpack.c.bf16 %v1668_v61, %v1668_v61  ;;  %v1669_v6 = vmax.f32 %v1132_v62, 0.0  ;;  %v3117_v7 = vpack.c.bf16 %v1754_v1, %v1754_v1  ;;  %v1755_v8 = vmax.f32 %v1476_v2, 0.0 }
 0x1c1   :  { %2515 = vst.msk [vmem:[%s5144_s3 + $0xb8] sm:$0xf] %vm2468_vm4, %v3031_v4  ;;  %v3032_v9 = vpack.c.bf16 %v1669_v6, %v1669_v6  ;;  %2601 = vst.msk [vmem:[%s5144_s3 + $0x210] sm:$0xf] %vm2468_vm4, %v3117_v7  ;;  %v3118_v10 = vpack.c.bf16 %v1755_v8, %v1755_v8 }
 0x1c2   :  { %v1136_v11 = vpop.f32.mrb[96].mxu0  ;;  %v1480_v12 = vpop.f32.mrb[96].mxu1 }
 0x1c3   :  { %2516 = vst.msk [vmem:[%s5144_s3 + $0xbc] sm:$0xf] %vm2468_vm4, %v3032_v9  ;;  %v1137_v13 = vadd.f32 %v4634_v5, %v1136_v11  ;;  %v3340_v14 = vpop.f32.mrb[97].mxu0  ;;  %2602 = vst.msk [vmem:[%s5144_s3 + $0x214] sm:$0xf] %vm2468_vm4, %v3118_v10  ;;  %v1481_v60 = vadd.f32 %v4634_v5, %v1480_v12  ;;  %v3512_v15 = vpop.f32.mrb[97].mxu1 }
 0x1c4   :  { %v1139_v16 = vpop.f32.mrb[98].mxu0  ;;  %v1483_v17 = vpop.f32.mrb[98].mxu1 }
 0x1c5   :  { %v1670_v18 = vmax.f32 %v1137_v13, 0.0  ;;  %v1140_v19 = vadd.f32 %v4634_v5, %v1139_v16  ;;  %v3341_v0 = vpop.f32.mrb[99].mxu0  ;;  %v1756_v20 = vmax.f32 %v1481_v60, 0.0  ;;  %v1484_v21 = vadd.f32 %v4634_v5, %v1483_v17  ;;  %v3513_v22 = vpop.f32.mrb[99].mxu1 }
 0x1c7   :  { %v3033_v23 = vpack.c.bf16 %v1670_v18, %v1670_v18  ;;  %v1671_v24 = vmax.f32 %v1140_v19, 0.0  ;;  %v3119_v25 = vpack.c.bf16 %v1756_v20, %v1756_v20  ;;  %v1757_v26 = vmax.f32 %v1484_v21, 0.0 }
 0x1c9   :  { %2517 = vst.msk [vmem:[%s5144_s3 + $0xc0] sm:$0xf] %vm2468_vm4, %v3033_v23  ;;  %v3034_v27 = vpack.c.bf16 %v1671_v24, %v1671_v24  ;;  %2603 = vst.msk [vmem:[%s5144_s3 + $0x218] sm:$0xf] %vm2468_vm4, %v3119_v25  ;;  %v3120_v28 = vpack.c.bf16 %v1757_v26, %v1757_v26 }
 0x1ca   :  { %v1144_v29 = vpop.f32.mrb[100].mxu0  ;;  %v1488_v30 = vpop.f32.mrb[100].mxu1 }
 0x1cb   :  { %2518 = vst.msk [vmem:[%s5144_s3 + $0xc4] sm:$0xf] %vm2468_vm4, %v3034_v27  ;;  %v1145_v31 = vadd.f32 %v4634_v5, %v1144_v29  ;;  %v3344_v32 = vpop.f32.mrb[101].mxu0  ;;  %2604 = vst.msk [vmem:[%s5144_s3 + $0x21c] sm:$0xf] %vm2468_vm4, %v3120_v28  ;;  %v1489_v33 = vadd.f32 %v4634_v5, %v1488_v30  ;;  %v3516_v34 = vpop.f32.mrb[101].mxu1 }
 0x1cc   :  { %v1147_v35 = vpop.f32.mrb[102].mxu0  ;;  %v1491_v36 = vpop.f32.mrb[102].mxu1 }
 0x1cd   :  { %v1672_v37 = vmax.f32 %v1145_v31, 0.0  ;;  %v1148_v38 = vadd.f32 %v4634_v5, %v1147_v35  ;;  %v3345_v39 = vpop.f32.mrb[103].mxu0  ;;  %v1758_v40 = vmax.f32 %v1489_v33, 0.0  ;;  %v1492_v41 = vadd.f32 %v4634_v5, %v1491_v36  ;;  %v3517_v42 = vpop.f32.mrb[103].mxu1 }
 0x1cf   :  { %v3035_v43 = vpack.c.bf16 %v1672_v37, %v1672_v37  ;;  %v1673_v44 = vmax.f32 %v1148_v38, 0.0  ;;  %v3121_v45 = vpack.c.bf16 %v1758_v40, %v1758_v40  ;;  %v1759_v46 = vmax.f32 %v1492_v41, 0.0 }
 0x1d1   :  { %2519 = vst.msk [vmem:[%s5144_s3 + $0xc8] sm:$0xf] %vm2468_vm4, %v3035_v43  ;;  %v3036_v47 = vpack.c.bf16 %v1673_v44, %v1673_v44  ;;  %2605 = vst.msk [vmem:[%s5144_s3 + $0x220] sm:$0xf] %vm2468_vm4, %v3121_v45  ;;  %v3122_v48 = vpack.c.bf16 %v1759_v46, %v1759_v46 }
 0x1d2   :  { %v1152_v49 = vpop.f32.mrb[104].mxu0  ;;  %v1496_v50 = vpop.f32.mrb[104].mxu1 }
 0x1d3   :  { %2520 = vst.msk [vmem:[%s5144_s3 + $0xcc] sm:$0xf] %vm2468_vm4, %v3036_v47  ;;  %v1153_v51 = vadd.f32 %v4634_v5, %v1152_v49  ;;  %v3348_v52 = vpop.f32.mrb[105].mxu0  ;;  %2606 = vst.msk [vmem:[%s5144_s3 + $0x224] sm:$0xf] %vm2468_vm4, %v3122_v48  ;;  %v1497_v53 = vadd.f32 %v4634_v5, %v1496_v50  ;;  %v3520_v54 = vpop.f32.mrb[105].mxu1 }
 0x1d4   :  { %v1155_v55 = vpop.f32.mrb[106].mxu0  ;;  %v1499_v56 = vpop.f32.mrb[106].mxu1 }
 0x1d5   :  { %v1674_v57 = vmax.f32 %v1153_v51, 0.0  ;;  %v1156_v58 = vadd.f32 %v4634_v5, %v1155_v55  ;;  %v3349_v59 = vpop.f32.mrb[107].mxu0  ;;  %v1760_v61 = vmax.f32 %v1497_v53, 0.0  ;;  %v1500_v62 = vadd.f32 %v4634_v5, %v1499_v56  ;;  %v3521_v63 = vpop.f32.mrb[107].mxu1 }
 0x1d7   :  { %v3037_v1 = vpack.c.bf16 %v1674_v57, %v1674_v57  ;;  %v1675_v2 = vmax.f32 %v1156_v58, 0.0  ;;  %v3123_v3 = vpack.c.bf16 %v1760_v61, %v1760_v61  ;;  %v1761_v4 = vmax.f32 %v1500_v62, 0.0 }
 0x1d9   :  { %2521 = vst.msk [vmem:[%s5144_s3 + $0xd0] sm:$0xf] %vm2468_vm4, %v3037_v1  ;;  %v3038_v6 = vpack.c.bf16 %v1675_v2, %v1675_v2  ;;  %2607 = vst.msk [vmem:[%s5144_s3 + $0x228] sm:$0xf] %vm2468_vm4, %v3123_v3  ;;  %v3124_v7 = vpack.c.bf16 %v1761_v4, %v1761_v4 }
 0x1da   :  { %v1160_v8 = vpop.f32.mrb[108].mxu0  ;;  %v1504_v9 = vpop.f32.mrb[108].mxu1 }
 0x1db   :  { %2522 = vst.msk [vmem:[%s5144_s3 + $0xd4] sm:$0xf] %vm2468_vm4, %v3038_v6  ;;  %v1161_v10 = vadd.f32 %v4634_v5, %v1160_v8  ;;  %v3352_v11 = vpop.f32.mrb[109].mxu0  ;;  %2608 = vst.msk [vmem:[%s5144_s3 + $0x22c] sm:$0xf] %vm2468_vm4, %v3124_v7  ;;  %v1505_v12 = vadd.f32 %v4634_v5, %v1504_v9  ;;  %v3524_v13 = vpop.f32.mrb[109].mxu1 }
 0x1dc   :  { %v1163_v14 = vpop.f32.mrb[110].mxu0  ;;  %v1507_v60 = vpop.f32.mrb[110].mxu1 }
 0x1dd   :  { %v1676_v15 = vmax.f32 %v1161_v10, 0.0  ;;  %v1164_v16 = vadd.f32 %v4634_v5, %v1163_v14  ;;  %v3353_v17 = vpop.f32.mrb[111].mxu0  ;;  %v1762_v18 = vmax.f32 %v1505_v12, 0.0  ;;  %v1508_v19 = vadd.f32 %v4634_v5, %v1507_v60  ;;  %v3525_v0 = vpop.f32.mrb[111].mxu1 }
 0x1df   :  { %v3039_v20 = vpack.c.bf16 %v1676_v15, %v1676_v15  ;;  %v1677_v21 = vmax.f32 %v1164_v16, 0.0  ;;  %v3125_v22 = vpack.c.bf16 %v1762_v18, %v1762_v18  ;;  %v1763_v23 = vmax.f32 %v1508_v19, 0.0 }
 0x1e1   :  { %2523 = vst.msk [vmem:[%s5144_s3 + $0xd8] sm:$0xf] %vm2468_vm4, %v3039_v20  ;;  %v3040_v24 = vpack.c.bf16 %v1677_v21, %v1677_v21  ;;  %2609 = vst.msk [vmem:[%s5144_s3 + $0x230] sm:$0xf] %vm2468_vm4, %v3125_v22  ;;  %v3126_v25 = vpack.c.bf16 %v1763_v23, %v1763_v23 }
 0x1e2   :  { %v1168_v26 = vpop.f32.mrb[112].mxu0  ;;  %v1512_v27 = vpop.f32.mrb[112].mxu1 }
 0x1e3   :  { %2524 = vst.msk [vmem:[%s5144_s3 + $0xdc] sm:$0xf] %vm2468_vm4, %v3040_v24  ;;  %v1169_v28 = vadd.f32 %v4634_v5, %v1168_v26  ;;  %v3356_v29 = vpop.f32.mrb[113].mxu0  ;;  %2610 = vst.msk [vmem:[%s5144_s3 + $0x234] sm:$0xf] %vm2468_vm4, %v3126_v25  ;;  %v1513_v30 = vadd.f32 %v4634_v5, %v1512_v27  ;;  %v3528_v31 = vpop.f32.mrb[113].mxu1 }
 0x1e4   :  { %v1171_v32 = vpop.f32.mrb[114].mxu0  ;;  %v1515_v33 = vpop.f32.mrb[114].mxu1 }
 0x1e5   :  { %v1678_v34 = vmax.f32 %v1169_v28, 0.0  ;;  %v1172_v35 = vadd.f32 %v4634_v5, %v1171_v32  ;;  %v3357_v36 = vpop.f32.mrb[115].mxu0  ;;  %v1764_v37 = vmax.f32 %v1513_v30, 0.0  ;;  %v1516_v38 = vadd.f32 %v4634_v5, %v1515_v33  ;;  %v3529_v39 = vpop.f32.mrb[115].mxu1 }
 0x1e7   :  { %v3041_v40 = vpack.c.bf16 %v1678_v34, %v1678_v34  ;;  %v1679_v41 = vmax.f32 %v1172_v35, 0.0  ;;  %v3127_v42 = vpack.c.bf16 %v1764_v37, %v1764_v37  ;;  %v1765_v43 = vmax.f32 %v1516_v38, 0.0 }
 0x1e9   :  { %2525 = vst.msk [vmem:[%s5144_s3 + $0xe0] sm:$0xf] %vm2468_vm4, %v3041_v40  ;;  %v3042_v44 = vpack.c.bf16 %v1679_v41, %v1679_v41  ;;  %2611 = vst.msk [vmem:[%s5144_s3 + $0x238] sm:$0xf] %vm2468_vm4, %v3127_v42  ;;  %v3128_v45 = vpack.c.bf16 %v1765_v43, %v1765_v43 }
 0x1ea   :  { %v1176_v46 = vpop.f32.mrb[116].mxu0  ;;  %v1520_v47 = vpop.f32.mrb[116].mxu1 }
 0x1eb   :  { %2526 = vst.msk [vmem:[%s5144_s3 + $0xe4] sm:$0xf] %vm2468_vm4, %v3042_v44  ;;  %v1177_v48 = vadd.f32 %v4634_v5, %v1176_v46  ;;  %v3360_v49 = vpop.f32.mrb[117].mxu0  ;;  %2612 = vst.msk [vmem:[%s5144_s3 + $0x23c] sm:$0xf] %vm2468_vm4, %v3128_v45  ;;  %v1521_v50 = vadd.f32 %v4634_v5, %v1520_v47  ;;  %v3532_v51 = vpop.f32.mrb[117].mxu1 }
 0x1ec   :  { %v1179_v52 = vpop.f32.mrb[118].mxu0  ;;  %v1523_v53 = vpop.f32.mrb[118].mxu1 }
 0x1ed   :  { %v1680_v54 = vmax.f32 %v1177_v48, 0.0  ;;  %v1180_v55 = vadd.f32 %v4634_v5, %v1179_v52  ;;  %v3361_v56 = vpop.f32.mrb[119].mxu0  ;;  %v1766_v57 = vmax.f32 %v1521_v50, 0.0  ;;  %v1524_v58 = vadd.f32 %v4634_v5, %v1523_v53  ;;  %v3533_v59 = vpop.f32.mrb[119].mxu1 }
 0x1ef   :  { %v3043_v61 = vpack.c.bf16 %v1680_v54, %v1680_v54  ;;  %v1681_v62 = vmax.f32 %v1180_v55, 0.0  ;;  %v3129_v63 = vpack.c.bf16 %v1766_v57, %v1766_v57  ;;  %v1767_v1 = vmax.f32 %v1524_v58, 0.0 }
 0x1f1   :  { %2527 = vst.msk [vmem:[%s5144_s3 + $0xe8] sm:$0xf] %vm2468_vm4, %v3043_v61  ;;  %v3044_v2 = vpack.c.bf16 %v1681_v62, %v1681_v62  ;;  %2613 = vst.msk [vmem:[%s5144_s3 + $0x240] sm:$0xf] %vm2468_vm4, %v3129_v63  ;;  %v3130_v3 = vpack.c.bf16 %v1767_v1, %v1767_v1 }
 0x1f2   :  { %v1184_v4 = vpop.f32.mrb[120].mxu0  ;;  %v1528_v6 = vpop.f32.mrb[120].mxu1 }
 0x1f3   :  { %2528 = vst.msk [vmem:[%s5144_s3 + $0xec] sm:$0xf] %vm2468_vm4, %v3044_v2  ;;  %v1185_v7 = vadd.f32 %v4634_v5, %v1184_v4  ;;  %v3364_v8 = vpop.f32.mrb[121].mxu0  ;;  %2614 = vst.msk [vmem:[%s5144_s3 + $0x244] sm:$0xf] %vm2468_vm4, %v3130_v3  ;;  %v1529_v9 = vadd.f32 %v4634_v5, %v1528_v6  ;;  %v3536_v10 = vpop.f32.mrb[121].mxu1 }
 0x1f4   :  { %v1187_v11 = vpop.f32.mrb[122].mxu0  ;;  %v1531_v12 = vpop.f32.mrb[122].mxu1 }
 0x1f5   :  { %v1682_v13 = vmax.f32 %v1185_v7, 0.0  ;;  %v1188_v14 = vadd.f32 %v4634_v5, %v1187_v11  ;;  %v3365_v60 = vpop.f32.mrb[123].mxu0  ;;  %v1768_v15 = vmax.f32 %v1529_v9, 0.0  ;;  %v1532_v16 = vadd.f32 %v4634_v5, %v1531_v12  ;;  %v3537_v17 = vpop.f32.mrb[123].mxu1 }
 0x1f7   :  { %v3045_v18 = vpack.c.bf16 %v1682_v13, %v1682_v13  ;;  %v1683_v19 = vmax.f32 %v1188_v14, 0.0  ;;  %v3131_v0 = vpack.c.bf16 %v1768_v15, %v1768_v15  ;;  %v1769_v20 = vmax.f32 %v1532_v16, 0.0 }
 0x1f9   :  { %2529 = vst.msk [vmem:[%s5144_s3 + $0xf0] sm:$0xf] %vm2468_vm4, %v3045_v18  ;;  %v3046_v21 = vpack.c.bf16 %v1683_v19, %v1683_v19  ;;  %2615 = vst.msk [vmem:[%s5144_s3 + $0x248] sm:$0xf] %vm2468_vm4, %v3131_v0  ;;  %v3132_v22 = vpack.c.bf16 %v1769_v20, %v1769_v20 }
 0x1fa   :  { %v1192_v23 = vpop.f32.mrb[124].mxu0  ;;  %v1536_v24 = vpop.f32.mrb[124].mxu1 }
 0x1fb   :  { %2530 = vst.msk [vmem:[%s5144_s3 + $0xf4] sm:$0xf] %vm2468_vm4, %v3046_v21  ;;  %v1193_v25 = vadd.f32 %v4634_v5, %v1192_v23  ;;  %v3368_v26 = vpop.f32.mrb[125].mxu0  ;;  %2616 = vst.msk [vmem:[%s5144_s3 + $0x24c] sm:$0xf] %vm2468_vm4, %v3132_v22  ;;  %v1537_v27 = vadd.f32 %v4634_v5, %v1536_v24  ;;  %v3540_v28 = vpop.f32.mrb[125].mxu1 }
 0x1fc   :  { %v1195_v29 = vpop.f32.mrb[126].mxu0  ;;  %v1539_v30 = vpop.f32.mrb[126].mxu1 }
 0x1fd   :  { %v1684_v31 = vmax.f32 %v1193_v25, 0.0  ;;  %v1196_v32 = vadd.f32 %v4634_v5, %v1195_v29  ;;  %v3369_v33 = vpop.f32.mrb[127].mxu0  ;;  %v1770_v34 = vmax.f32 %v1537_v27, 0.0  ;;  %v1540_v35 = vadd.f32 %v4634_v5, %v1539_v30  ;;  %v3541_v36 = vpop.f32.mrb[127].mxu1 }
 0x1ff   :  { %v3047_v37 = vpack.c.bf16 %v1684_v31, %v1684_v31  ;;  %v1685_v38 = vmax.f32 %v1196_v32, 0.0  ;;  %v3133_v39 = vpack.c.bf16 %v1770_v34, %v1770_v34  ;;  %v1771_v40 = vmax.f32 %v1540_v35, 0.0 }
 0x201   :  { %2531 = vst.msk [vmem:[%s5144_s3 + $0xf8] sm:$0xf] %vm2468_vm4, %v3047_v37  ;;  %v3048_v41 = vpack.c.bf16 %v1685_v38, %v1685_v38  ;;  %2617 = vst.msk [vmem:[%s5144_s3 + $0x250] sm:$0xf] %vm2468_vm4, %v3133_v39  ;;  %v3134_v42 = vpack.c.bf16 %v1771_v40, %v1771_v40 }
 0x202   :  { %v1200_v43 = vpop.f32.mrb[128].mxu0  ;;  %v1544_v44 = vpop.f32.mrb[128].mxu1 }
 0x203   :  { %2532 = vst.msk [vmem:[%s5144_s3 + $0xfc] sm:$0xf] %vm2468_vm4, %v3048_v41  ;;  %v1201_v45 = vadd.f32 %v4634_v5, %v1200_v43  ;;  %v3372_v46 = vpop.f32.mrb[129].mxu0  ;;  %2618 = vst.msk [vmem:[%s5144_s3 + $0x254] sm:$0xf] %vm2468_vm4, %v3134_v42  ;;  %v1545_v47 = vadd.f32 %v4634_v5, %v1544_v44  ;;  %v3544_v48 = vpop.f32.mrb[129].mxu1 }
 0x204   :  { %v1203_v49 = vpop.f32.mrb[130].mxu0  ;;  %v1547_v50 = vpop.f32.mrb[130].mxu1 }
 0x205   :  { %v1686_v51 = vmax.f32 %v1201_v45, 0.0  ;;  %v1204_v52 = vadd.f32 %v4634_v5, %v1203_v49  ;;  %v3373_v53 = vpop.f32.mrb[131].mxu0  ;;  %v1772_v54 = vmax.f32 %v1545_v47, 0.0  ;;  %v1548_v55 = vadd.f32 %v4634_v5, %v1547_v50  ;;  %v3545_v56 = vpop.f32.mrb[131].mxu1 }
 0x207   :  { %v3049_v57 = vpack.c.bf16 %v1686_v51, %v1686_v51  ;;  %v1687_v58 = vmax.f32 %v1204_v52, 0.0  ;;  %v3135_v59 = vpack.c.bf16 %v1772_v54, %v1772_v54  ;;  %v1773_v61 = vmax.f32 %v1548_v55, 0.0 }
 0x209   :  { %2533 = vst.msk [vmem:[%s5144_s3 + $0x100] sm:$0xf] %vm2468_vm4, %v3049_v57  ;;  %v3050_v62 = vpack.c.bf16 %v1687_v58, %v1687_v58  ;;  %2619 = vst.msk [vmem:[%s5144_s3 + $0x258] sm:$0xf] %vm2468_vm4, %v3135_v59  ;;  %v3136_v63 = vpack.c.bf16 %v1773_v61, %v1773_v61 }
 0x20a   :  { %v1208_v1 = vpop.f32.mrb[132].mxu0  ;;  %v1552_v2 = vpop.f32.mrb[132].mxu1 }
 0x20b   :  { %2534 = vst.msk [vmem:[%s5144_s3 + $0x104] sm:$0xf] %vm2468_vm4, %v3050_v62  ;;  %v1209_v3 = vadd.f32 %v4634_v5, %v1208_v1  ;;  %v3376_v4 = vpop.f32.mrb[133].mxu0  ;;  %2620 = vst.msk [vmem:[%s5144_s3 + $0x25c] sm:$0xf] %vm2468_vm4, %v3136_v63  ;;  %v1553_v6 = vadd.f32 %v4634_v5, %v1552_v2  ;;  %v3548_v7 = vpop.f32.mrb[133].mxu1 }
 0x20c   :  { %v1211_v8 = vpop.f32.mrb[134].mxu0  ;;  %v1555_v9 = vpop.f32.mrb[134].mxu1 }
 0x20d   :  { %v1688_v10 = vmax.f32 %v1209_v3, 0.0  ;;  %v1212_v11 = vadd.f32 %v4634_v5, %v1211_v8  ;;  %v3377_v12 = vpop.f32.mrb[135].mxu0  ;;  %v1774_v13 = vmax.f32 %v1553_v6, 0.0  ;;  %v1556_v14 = vadd.f32 %v4634_v5, %v1555_v9  ;;  %v3549_v60 = vpop.f32.mrb[135].mxu1 }
 0x20f   :  { %v3051_v15 = vpack.c.bf16 %v1688_v10, %v1688_v10  ;;  %v1689_v16 = vmax.f32 %v1212_v11, 0.0  ;;  %v3137_v17 = vpack.c.bf16 %v1774_v13, %v1774_v13  ;;  %v1775_v18 = vmax.f32 %v1556_v14, 0.0 }
 0x211   :  { %2535 = vst.msk [vmem:[%s5144_s3 + $0x108] sm:$0xf] %vm2468_vm4, %v3051_v15  ;;  %v3052_v19 = vpack.c.bf16 %v1689_v16, %v1689_v16  ;;  %2621 = vst.msk [vmem:[%s5144_s3 + $0x260] sm:$0xf] %vm2468_vm4, %v3137_v17  ;;  %v3138_v0 = vpack.c.bf16 %v1775_v18, %v1775_v18 }
 0x212   :  { %v1216_v20 = vpop.f32.mrb[136].mxu0  ;;  %v1560_v21 = vpop.f32.mrb[136].mxu1 }
 0x213   :  { %2536 = vst.msk [vmem:[%s5144_s3 + $0x10c] sm:$0xf] %vm2468_vm4, %v3052_v19  ;;  %v1217_v22 = vadd.f32 %v4634_v5, %v1216_v20  ;;  %v3380_v23 = vpop.f32.mrb[137].mxu0  ;;  %2622 = vst.msk [vmem:[%s5144_s3 + $0x264] sm:$0xf] %vm2468_vm4, %v3138_v0  ;;  %v1561_v24 = vadd.f32 %v4634_v5, %v1560_v21  ;;  %v3552_v25 = vpop.f32.mrb[137].mxu1 }
 0x214   :  { %v1219_v26 = vpop.f32.mrb[138].mxu0  ;;  %v1563_v27 = vpop.f32.mrb[138].mxu1 }
 0x215   :  { %v1690_v28 = vmax.f32 %v1217_v22, 0.0  ;;  %v1220_v29 = vadd.f32 %v4634_v5, %v1219_v26  ;;  %v3381_v30 = vpop.f32.mrb[139].mxu0  ;;  %v1776_v31 = vmax.f32 %v1561_v24, 0.0  ;;  %v1564_v32 = vadd.f32 %v4634_v5, %v1563_v27  ;;  %v3553_v33 = vpop.f32.mrb[139].mxu1 }
 0x217   :  { %v3053_v34 = vpack.c.bf16 %v1690_v28, %v1690_v28  ;;  %v1691_v35 = vmax.f32 %v1220_v29, 0.0  ;;  %v3139_v36 = vpack.c.bf16 %v1776_v31, %v1776_v31  ;;  %v1777_v37 = vmax.f32 %v1564_v32, 0.0 }
 0x219   :  { %2537 = vst.msk [vmem:[%s5144_s3 + $0x110] sm:$0xf] %vm2468_vm4, %v3053_v34  ;;  %v3054_v38 = vpack.c.bf16 %v1691_v35, %v1691_v35  ;;  %2623 = vst.msk [vmem:[%s5144_s3 + $0x268] sm:$0xf] %vm2468_vm4, %v3139_v36  ;;  %v3140_v39 = vpack.c.bf16 %v1777_v37, %v1777_v37 }
 0x21a   :  { %v1224_v40 = vpop.f32.mrb[140].mxu0  ;;  %v1568_v41 = vpop.f32.mrb[140].mxu1 }
 0x21b   :  { %2538 = vst.msk [vmem:[%s5144_s3 + $0x114] sm:$0xf] %vm2468_vm4, %v3054_v38  ;;  %v1225_v42 = vadd.f32 %v4634_v5, %v1224_v40  ;;  %v3384_v43 = vpop.f32.mrb[141].mxu0  ;;  %2624 = vst.msk [vmem:[%s5144_s3 + $0x26c] sm:$0xf] %vm2468_vm4, %v3140_v39  ;;  %v1569_v44 = vadd.f32 %v4634_v5, %v1568_v41  ;;  %v3556_v45 = vpop.f32.mrb[141].mxu1 }
 0x21c   :  { %v1227_v46 = vpop.f32.mrb[142].mxu0  ;;  %v1571_v47 = vpop.f32.mrb[142].mxu1 }
 0x21d   :  { %v1692_v48 = vmax.f32 %v1225_v42, 0.0  ;;  %v1228_v49 = vadd.f32 %v4634_v5, %v1227_v46  ;;  %v3385_v50 = vpop.f32.mrb[143].mxu0  ;;  %v1778_v51 = vmax.f32 %v1569_v44, 0.0  ;;  %v1572_v52 = vadd.f32 %v4634_v5, %v1571_v47  ;;  %v3557_v53 = vpop.f32.mrb[143].mxu1 }
 0x21f   :  { %v3055_v54 = vpack.c.bf16 %v1692_v48, %v1692_v48  ;;  %v1693_v55 = vmax.f32 %v1228_v49, 0.0  ;;  %v3141_v56 = vpack.c.bf16 %v1778_v51, %v1778_v51  ;;  %v1779_v57 = vmax.f32 %v1572_v52, 0.0 }
 0x221   :  { %2539 = vst.msk [vmem:[%s5144_s3 + $0x118] sm:$0xf] %vm2468_vm4, %v3055_v54  ;;  %v3056_v58 = vpack.c.bf16 %v1693_v55, %v1693_v55  ;;  %2625 = vst.msk [vmem:[%s5144_s3 + $0x270] sm:$0xf] %vm2468_vm4, %v3141_v56  ;;  %v3142_v59 = vpack.c.bf16 %v1779_v57, %v1779_v57 }
 0x222   :  { %v1232_v61 = vpop.f32.mrb[144].mxu0  ;;  %v1576_v62 = vpop.f32.mrb[144].mxu1 }
 0x223   :  { %2540 = vst.msk [vmem:[%s5144_s3 + $0x11c] sm:$0xf] %vm2468_vm4, %v3056_v58  ;;  %v1233_v63 = vadd.f32 %v4634_v5, %v1232_v61  ;;  %v3388_v1 = vpop.f32.mrb[145].mxu0  ;;  %2626 = vst.msk [vmem:[%s5144_s3 + $0x274] sm:$0xf] %vm2468_vm4, %v3142_v59  ;;  %v1577_v2 = vadd.f32 %v4634_v5, %v1576_v62  ;;  %v3560_v3 = vpop.f32.mrb[145].mxu1 }
 0x224   :  { %v1235_v4 = vpop.f32.mrb[146].mxu0  ;;  %v1579_v6 = vpop.f32.mrb[146].mxu1 }
 0x225   :  { %v1694_v7 = vmax.f32 %v1233_v63, 0.0  ;;  %v1236_v8 = vadd.f32 %v4634_v5, %v1235_v4  ;;  %v3389_v9 = vpop.f32.mrb[147].mxu0  ;;  %v1780_v10 = vmax.f32 %v1577_v2, 0.0  ;;  %v1580_v11 = vadd.f32 %v4634_v5, %v1579_v6  ;;  %v3561_v12 = vpop.f32.mrb[147].mxu1 }
 0x227   :  { %v3057_v13 = vpack.c.bf16 %v1694_v7, %v1694_v7  ;;  %v1695_v14 = vmax.f32 %v1236_v8, 0.0  ;;  %v3143_v60 = vpack.c.bf16 %v1780_v10, %v1780_v10  ;;  %v1781_v15 = vmax.f32 %v1580_v11, 0.0 }
 0x229   :  { %2541 = vst.msk [vmem:[%s5144_s3 + $0x120] sm:$0xf] %vm2468_vm4, %v3057_v13  ;;  %v3058_v16 = vpack.c.bf16 %v1695_v14, %v1695_v14  ;;  %2627 = vst.msk [vmem:[%s5144_s3 + $0x278] sm:$0xf] %vm2468_vm4, %v3143_v60  ;;  %v3144_v17 = vpack.c.bf16 %v1781_v15, %v1781_v15 }
 0x22a   :  { %v1240_v18 = vpop.f32.mrb[148].mxu0  ;;  %v1584_v19 = vpop.f32.mrb[148].mxu1 }
 0x22b   :  { %2542 = vst.msk [vmem:[%s5144_s3 + $0x124] sm:$0xf] %vm2468_vm4, %v3058_v16  ;;  %v1241_v0 = vadd.f32 %v4634_v5, %v1240_v18  ;;  %v3392_v20 = vpop.f32.mrb[149].mxu0  ;;  %2628 = vst.msk [vmem:[%s5144_s3 + $0x27c] sm:$0xf] %vm2468_vm4, %v3144_v17  ;;  %v1585_v21 = vadd.f32 %v4634_v5, %v1584_v19  ;;  %v3564_v22 = vpop.f32.mrb[149].mxu1 }
 0x22c   :  { %v1243_v23 = vpop.f32.mrb[150].mxu0  ;;  %v1587_v24 = vpop.f32.mrb[150].mxu1 }
 0x22d   :  { %v1696_v25 = vmax.f32 %v1241_v0, 0.0  ;;  %v1244_v26 = vadd.f32 %v4634_v5, %v1243_v23  ;;  %v3393_v27 = vpop.f32.mrb[151].mxu0  ;;  %v1782_v28 = vmax.f32 %v1585_v21, 0.0  ;;  %v1588_v29 = vadd.f32 %v4634_v5, %v1587_v24  ;;  %v3565_v30 = vpop.f32.mrb[151].mxu1 }
 0x22f   :  { %v3059_v31 = vpack.c.bf16 %v1696_v25, %v1696_v25  ;;  %v1697_v32 = vmax.f32 %v1244_v26, 0.0  ;;  %v3145_v33 = vpack.c.bf16 %v1782_v28, %v1782_v28  ;;  %v1783_v34 = vmax.f32 %v1588_v29, 0.0 }
 0x231   :  { %2543 = vst.msk [vmem:[%s5144_s3 + $0x128] sm:$0xf] %vm2468_vm4, %v3059_v31  ;;  %v3060_v35 = vpack.c.bf16 %v1697_v32, %v1697_v32  ;;  %2629 = vst.msk [vmem:[%s5144_s3 + $0x280] sm:$0xf] %vm2468_vm4, %v3145_v33  ;;  %v3146_v36 = vpack.c.bf16 %v1783_v34, %v1783_v34 }
 0x232   :  { %v1248_v37 = vpop.f32.mrb[152].mxu0  ;;  %v1592_v38 = vpop.f32.mrb[152].mxu1 }
 0x233   :  { %2544 = vst.msk [vmem:[%s5144_s3 + $0x12c] sm:$0xf] %vm2468_vm4, %v3060_v35  ;;  %v1249_v39 = vadd.f32 %v4634_v5, %v1248_v37  ;;  %v3396_v40 = vpop.f32.mrb[153].mxu0  ;;  %2630 = vst.msk [vmem:[%s5144_s3 + $0x284] sm:$0xf] %vm2468_vm4, %v3146_v36  ;;  %v1593_v41 = vadd.f32 %v4634_v5, %v1592_v38  ;;  %v3568_v42 = vpop.f32.mrb[153].mxu1 }
 0x234   :  { %v1251_v43 = vpop.f32.mrb[154].mxu0  ;;  %v1595_v44 = vpop.f32.mrb[154].mxu1 }
 0x235   :  { %v1698_v45 = vmax.f32 %v1249_v39, 0.0  ;;  %v1252_v46 = vadd.f32 %v4634_v5, %v1251_v43  ;;  %v3397_v47 = vpop.f32.mrb[155].mxu0  ;;  %v1784_v48 = vmax.f32 %v1593_v41, 0.0  ;;  %v1596_v49 = vadd.f32 %v4634_v5, %v1595_v44  ;;  %v3569_v50 = vpop.f32.mrb[155].mxu1  ;;  %v5070_v5 = vld [vmem:[#allocation4] ss:$0 sm:$0xff] }
 0x237   :  { %v3061_v51 = vpack.c.bf16 %v1698_v45, %v1698_v45  ;;  %v1699_v52 = vmax.f32 %v1252_v46, 0.0  ;;  %v3147_v53 = vpack.c.bf16 %v1784_v48, %v1784_v48  ;;  %v1785_v54 = vmax.f32 %v1596_v49, 0.0 }
 0x239   :  { %2545 = vst.msk [vmem:[%s5144_s3 + $0x130] sm:$0xf] %vm2468_vm4, %v3061_v51  ;;  %v3062_v55 = vpack.c.bf16 %v1699_v52, %v1699_v52  ;;  %2631 = vst.msk [vmem:[%s5144_s3 + $0x288] sm:$0xf] %vm2468_vm4, %v3147_v53  ;;  %v3148_v56 = vpack.c.bf16 %v1785_v54, %v1785_v54 }
 0x23a   :  { %v1256_v57 = vpop.f32.mrb[156].mxu0  ;;  %v1600_v58 = vpop.f32.mrb[156].mxu1 }
 0x23b   :  { %2546 = vst.msk [vmem:[%s5144_s3 + $0x134] sm:$0xf] %vm2468_vm4, %v3062_v55  ;;  %v1257_v59 = vadd.f32 %v5070_v5, %v1256_v57  ;;  %v3400_v61 = vpop.f32.mrb[157].mxu0  ;;  %2632 = vst.msk [vmem:[%s5144_s3 + $0x28c] sm:$0xf] %vm2468_vm4, %v3148_v56  ;;  %v1601_v62 = vadd.f32 %v5070_v5, %v1600_v58  ;;  %v3572_v63 = vpop.f32.mrb[157].mxu1 }
 0x23c   :  { %v1259_v1 = vpop.f32.mrb[158].mxu0  ;;  %v1603_v2 = vpop.f32.mrb[158].mxu1 }
 0x23d   :  { %v1700_v3 = vmax.f32 %v1257_v59, 0.0  ;;  %v1260_v4 = vadd.f32 %v5070_v5, %v1259_v1  ;;  %v3401_v6 = vpop.f32.mrb[159].mxu0  ;;  %v1786_v7 = vmax.f32 %v1601_v62, 0.0  ;;  %v1604_v8 = vadd.f32 %v5070_v5, %v1603_v2  ;;  %v3573_v9 = vpop.f32.mrb[159].mxu1 }
 0x23f   :  { %v3063_v10 = vpack.c.bf16 %v1700_v3, %v1700_v3  ;;  %v1701_v11 = vmax.f32 %v1260_v4, 0.0  ;;  %v3149_v12 = vpack.c.bf16 %v1786_v7, %v1786_v7  ;;  %v1787_v13 = vmax.f32 %v1604_v8, 0.0 }
 0x241   :  { %2547 = vst.msk [vmem:[%s5144_s3 + $0x138] sm:$0xf] %vm2468_vm4, %v3063_v10  ;;  %v3064_v14 = vpack.c.bf16 %v1701_v11, %v1701_v11  ;;  %2633 = vst.msk [vmem:[%s5144_s3 + $0x290] sm:$0xf] %vm2468_vm4, %v3149_v12  ;;  %v3150_v60 = vpack.c.bf16 %v1787_v13, %v1787_v13 }
 0x242   :  { %v1264_v15 = vpop.f32.mrb[160].mxu0  ;;  %v1608_v16 = vpop.f32.mrb[160].mxu1 }
 0x243   :  { %2548 = vst.msk [vmem:[%s5144_s3 + $0x13c] sm:$0xf] %vm2468_vm4, %v3064_v14  ;;  %v1265_v17 = vadd.f32 %v5070_v5, %v1264_v15  ;;  %v3404_v18 = vpop.f32.mrb[161].mxu0  ;;  %2634 = vst.msk [vmem:[%s5144_s3 + $0x294] sm:$0xf] %vm2468_vm4, %v3150_v60  ;;  %v1609_v19 = vadd.f32 %v5070_v5, %v1608_v16  ;;  %v3576_v0 = vpop.f32.mrb[161].mxu1 }
 0x244   :  { %v1267_v20 = vpop.f32.mrb[162].mxu0  ;;  %v1611_v21 = vpop.f32.mrb[162].mxu1 }
 0x245   :  { %v1702_v22 = vmax.f32 %v1265_v17, 0.0  ;;  %v1268_v23 = vadd.f32 %v5070_v5, %v1267_v20  ;;  %v3405_v24 = vpop.f32.mrb[163].mxu0  ;;  %v1788_v25 = vmax.f32 %v1609_v19, 0.0  ;;  %v1612_v26 = vadd.f32 %v5070_v5, %v1611_v21  ;;  %v3577_v27 = vpop.f32.mrb[163].mxu1 }
 0x247   :  { %v3065_v28 = vpack.c.bf16 %v1702_v22, %v1702_v22  ;;  %v1703_v29 = vmax.f32 %v1268_v23, 0.0  ;;  %v3151_v30 = vpack.c.bf16 %v1788_v25, %v1788_v25  ;;  %v1789_v31 = vmax.f32 %v1612_v26, 0.0 }
 0x249   :  { %2549 = vst.msk [vmem:[%s5144_s3 + $0x140] sm:$0xf] %vm2468_vm4, %v3065_v28  ;;  %v3066_v32 = vpack.c.bf16 %v1703_v29, %v1703_v29  ;;  %2635 = vst.msk [vmem:[%s5144_s3 + $0x298] sm:$0xf] %vm2468_vm4, %v3151_v30  ;;  %v3152_v33 = vpack.c.bf16 %v1789_v31, %v1789_v31 }
 0x24a   :  { %v1272_v34 = vpop.f32.mrb[164].mxu0  ;;  %v1616_v35 = vpop.f32.mrb[164].mxu1 }
 0x24b   :  { %2550 = vst.msk [vmem:[%s5144_s3 + $0x144] sm:$0xf] %vm2468_vm4, %v3066_v32  ;;  %v1273_v36 = vadd.f32 %v5070_v5, %v1272_v34  ;;  %v3408_v37 = vpop.f32.mrb[165].mxu0  ;;  %2636 = vst.msk [vmem:[%s5144_s3 + $0x29c] sm:$0xf] %vm2468_vm4, %v3152_v33  ;;  %v1617_v38 = vadd.f32 %v5070_v5, %v1616_v35  ;;  %v3580_v39 = vpop.f32.mrb[165].mxu1 }
 0x24c   :  { %v1275_v40 = vpop.f32.mrb[166].mxu0  ;;  %v1619_v41 = vpop.f32.mrb[166].mxu1 }
 0x24d   :  { %v1704_v42 = vmax.f32 %v1273_v36, 0.0  ;;  %v1276_v43 = vadd.f32 %v5070_v5, %v1275_v40  ;;  %v3409_v44 = vpop.f32.mrb[167].mxu0  ;;  %v1790_v45 = vmax.f32 %v1617_v38, 0.0  ;;  %v3581_v46 = vpop.f32.mrb[167].mxu1 }
 0x24f   :  { %v3067_v47 = vpack.c.bf16 %v1704_v42, %v1704_v42  ;;  %v1705_v48 = vmax.f32 %v1276_v43, 0.0  ;;  %v3153_v49 = vpack.c.bf16 %v1790_v45, %v1790_v45 }
 0x251   :  { %2551 = vst.msk [vmem:[%s5144_s3 + $0x148] sm:$0xf] %vm2468_vm4, %v3067_v47  ;;  %v3068_v50 = vpack.c.bf16 %v1705_v48, %v1705_v48  ;;  %2637 = vst.msk [vmem:[%s5144_s3 + $0x2a0] sm:$0xf] %vm2468_vm4, %v3153_v49 }
 0x252   :  { %v1280_v51 = vpop.f32.mrb[168].mxu0 }
 0x253   :  { %2552 = vst.msk [vmem:[%s5144_s3 + $0x14c] sm:$0xf] %vm2468_vm4, %v3068_v50  ;;  %v1281_v52 = vadd.f32 %v5070_v5, %v1280_v51  ;;  %v3412_v53 = vpop.f32.mrb[169].mxu0 }
 0x254   :  { %v1283_v54 = vpop.f32.mrb[170].mxu0 }
 0x255   :  { %v1706_v55 = vmax.f32 %v1281_v52, 0.0  ;;  %v1284_v56 = vadd.f32 %v5070_v5, %v1283_v54  ;;  %v3413_v57 = vpop.f32.mrb[171].mxu0 }
 0x257   :  { %v3069_v58 = vpack.c.bf16 %v1706_v55, %v1706_v55  ;;  %v1707_v59 = vmax.f32 %v1284_v56, 0.0 }
 0x259   :  { %2553 = vst.msk [vmem:[%s5144_s3 + $0x150] sm:$0xf] %vm2468_vm4, %v3069_v58  ;;  %v3070_v61 = vpack.c.bf16 %v1707_v59, %v1707_v59 }
 0x25b   :  { %2554 = vst.msk [vmem:[%s5144_s3 + $0x154] sm:$0xf] %vm2468_vm4, %v3070_v61 }
 0x25c   :  { %2642 = vsyncpa [#allocation3], 1 }
 0x25d   :  { %2643 = vsyncpa [#allocation5], 1 }

// kernel: net_forward.4
= control target key start
LH: loop header
LB: loop body
LE: loop exit
PB: predicated region body
PF: predicated region fallthrough
CT: control target
= control target key end

     0   :  { %v4347_v0 = vmov 0   ;;  %vm1534_vm0 = vcmask 261120   ;;  %vm3365_vm1 = vcmask 519168   ;;  %s6173_s1 = inlined_call_operand.vmem [shape: bf16[288,64], index: 1, kind: input, shape index: {}]   ;;  %s6174_s0 = inlined_call_operand.vmem [shape: bf16[2,576,288], index: 0, kind: input, shape index: {}]   ;;  %s6175_s2 = inlined_call_operand.vmem [shape: f32[1,64], index: 2, kind: input, shape index: {}]   ;;  %s6176_s3 = inlined_call_operand.vmem [shape: bf16[2,144,64], index: 3, kind: output, shape index: {}]  }
   0x1   :  { %1751 = vmatprep.subr.bf16.mxu0 %v4347_v0  ;;  %4007 = vmatprep.subr.bf16.mxu1 %v4347_v0  ;;  %v4040_v1 = vld [vmem:[%s6173_s1] sm:$0xff]   ;;  %v4041_v2 = vld [vmem:[%s6173_s1 + $0x8] sm:$0xff]   ;;  %v4042_v3 = vld [vmem:[%s6173_s1 + $0x10] sm:$0xff]  }
   0x2   :  { %1752 = vmatpush1.bf16.msra.mxu0 %v4040_v1  ;;  %4023 = vmatpush1.bf16.msra.mxu1 %v4040_v1  ;;  %v4043_v4 = vld [vmem:[%s6173_s1 + $0x18] sm:$0xff]   ;;  %v4044_v5 = vld [vmem:[%s6173_s1 + $0x20] sm:$0xff]   ;;  %v4045_v7 = vld [vmem:[%s6173_s1 + $0x28] sm:$0xff]  }
   0x3   :  { %1753 = vmatprep.subr.bf16.mxu0 %v4347_v0  ;;  %4008 = vmatprep.subr.bf16.mxu1 %v4347_v0  ;;  %v4058_v6 = vld [vmem:[%s6174_s0 + $0x4] ss:$12 sps:$4 sm:$0xff]   ;;  %v4061_v8 = vld [vmem:[%s6174_s0 + $0x514] ss:$12 sps:$4 sm:$0xff]   ;;  %v4047_v10 = vld [vmem:[%s6173_s1 + $0x38] sm:$0xff]  }
   0x4   :  { %1783 = vmatprep.mubr.bf16.mxu0 %v4058_v6  ;;  %2215 = vmatprep.mubr.bf16.mxu1 %v4061_v8  ;;  %v4046_v9 = vld [vmem:[%s6173_s1 + $0x30] sm:$0xff]   ;;  %v4048_v11 = vld [vmem:[%s6173_s1 + $0x40] sm:$0xff]   ;;  %v4049_v12 = vld [vmem:[%s6173_s1 + $0x48] sm:$0xff]  }
   0x5   :  { %v4050_v13 = vld [vmem:[%s6173_s1 + $0x50] sm:$0xff]   ;;  %v4051_v14 = vld [vmem:[%s6173_s1 + $0x58] sm:$0xff]   ;;  %v4052_v15 = vld [vmem:[%s6173_s1 + $0x60] sm:$0xff]  }
   0x6   :  { %1754 = vmatpush1.bf16.msra.mxu0 %v4041_v2  ;;  %4024 = vmatpush1.bf16.msra.mxu1 %v4041_v2  ;;  %v4053_v16 = vld [vmem:[%s6173_s1 + $0x68] sm:$0xff]   ;;  %v4054_v17 = vld [vmem:[%s6173_s1 + $0x70] sm:$0xff]   ;;  %v4055_v18 = vld [vmem:[%s6173_s1 + $0x78] sm:$0xff]  }
   0x7   :  { %1755 = vmatprep.subr.bf16.mxu0 %v4347_v0  ;;  %4009 = vmatprep.subr.bf16.mxu1 %v4347_v0  ;;  %v4062_v19 = vld [vmem:[%s6173_s1 + $0x80] sm:$0xff]   ;;  %v4059_v21 = vld [vmem:[%s6174_s0 + $0x510] ss:$12 sps:$4 sm:$0xff]   ;;  %v4065_v23 = vld [vmem:[%s6174_s0 + $0x52c] ss:$12 sps:$4 sm:$0xff]  }
   0x8   :  { %v4056_v20 = vld [vmem:[%s6174_s0] ss:$12 sps:$4 sm:$0xff]   ;;  %v4063_v22 = vld [vmem:[%s6174_s0 + $0x1c] ss:$12 sps:$4 sm:$0xff]   ;;  %v4067_v25 = vld [vmem:[%s6174_s0 + $0x18] ss:$12 sps:$4 sm:$0xff]  }
   0x9   :  { %v4117_v24 = vld [vmem:[%s6173_s1 + $0x88] sm:$0xff]   ;;  %v4069_v27 = vld [vmem:[%s6174_s0 + $0x34] ss:$12 sps:$4 sm:$0xff]   ;;  %v4071_v28 = vld [vmem:[%s6174_s0 + $0x544] ss:$12 sps:$4 sm:$0xff]  }
   0xa   :  { %1756 = vmatpush1.bf16.msra.mxu0 %v4042_v3  ;;  %4025 = vmatpush1.bf16.msra.mxu1 %v4042_v3  ;;  %v4068_v26 = vld [vmem:[%s6174_s0 + $0x528] ss:$12 sps:$4 sm:$0xff]   ;;  %v4073_v29 = vld [vmem:[%s6174_s0 + $0x30] ss:$12 sps:$4 sm:$0xff]   ;;  %v4074_v30 = vld [vmem:[%s6174_s0 + $0x540] ss:$12 sps:$4 sm:$0xff]  }
   0xb   :  { %1757 = vmatprep.subr.bf16.mxu0 %v4347_v0  ;;  %4010 = vmatprep.subr.bf16.mxu1 %v4347_v0  ;;  %v4075_v31 = vld [vmem:[%s6174_s0 + $0x4c] ss:$12 sps:$4 sm:$0xff]   ;;  %v4077_v32 = vld [vmem:[%s6174_s0 + $0x55c] ss:$12 sps:$4 sm:$0xff]   ;;  %v4081_v35 = vld [vmem:[%s6174_s0 + $0x64] ss:$12 sps:$4 sm:$0xff]  }
   0xc   :  { %v4079_v33 = vld [vmem:[%s6174_s0 + $0x48] ss:$12 sps:$4 sm:$0xff]   ;;  %v4080_v34 = vld [vmem:[%s6174_s0 + $0x558] ss:$12 sps:$4 sm:$0xff]   ;;  %v4085_v37 = vld [vmem:[%s6174_s0 + $0x60] ss:$12 sps:$4 sm:$0xff]  }
   0xd   :  { %v4083_v36 = vld [vmem:[%s6174_s0 + $0x574] ss:$12 sps:$4 sm:$0xff]   ;;  %v4086_v38 = vld [vmem:[%s6174_s0 + $0x570] ss:$12 sps:$4 sm:$0xff]   ;;  %v4089_v40 = vld [vmem:[%s6174_s0 + $0x58c] ss:$12 sps:$4 sm:$0xff]  }
   0xe   :  { %1758 = vmatpush1.bf16.msra.mxu0 %v4043_v4  ;;  %4026 = vmatpush1.bf16.msra.mxu1 %v4043_v4  ;;  %v4087_v39 = vld [vmem:[%s6174_s0 + $0x7c] ss:$12 sps:$4 sm:$0xff]   ;;  %v4091_v41 = vld [vmem:[%s6174_s0 + $0x78] ss:$12 sps:$4 sm:$0xff]   ;;  %v4093_v43 = vld [vmem:[%s6174_s0 + $0x94] ss:$12 sps:$4 sm:$0xff]  }
   0xf   :  { %1759 = vmatprep.subr.bf16.mxu0 %v4347_v0  ;;  %4011 = vmatprep.subr.bf16.mxu1 %v4347_v0  ;;  %v4092_v42 = vld [vmem:[%s6174_s0 + $0x588] ss:$12 sps:$4 sm:$0xff]   ;;  %v4095_v44 = vld [vmem:[%s6174_s0 + $0x5a4] ss:$12 sps:$4 sm:$0xff]   ;;  %v4098_v46 = vld [vmem:[%s6174_s0 + $0x5a0] ss:$12 sps:$4 sm:$0xff]  }
  0x10   :  { %v4097_v45 = vld [vmem:[%s6174_s0 + $0x90] ss:$12 sps:$4 sm:$0xff]   ;;  %v4099_v47 = vld [vmem:[%s6174_s0 + $0xac] ss:$12 sps:$4 sm:$0xff]   ;;  %v4103_v49 = vld [vmem:[%s6174_s0 + $0xa8] ss:$12 sps:$4 sm:$0xff]  }
  0x11   :  { %v4101_v48 = vld [vmem:[%s6174_s0 + $0x5bc] ss:$12 sps:$4 sm:$0xff]   ;;  %v4104_v50 = vld [vmem:[%s6174_s0 + $0x5b8] ss:$12 sps:$4 sm:$0xff]   ;;  %v4107_v52 = vld [vmem:[%s6174_s0 + $0x5d4] ss:$12 sps:$4 sm:$0xff]  }
  0x12   :  { %1760 = vmatpush1.bf16.msra.mxu0 %v4044_v5  ;;  %4027 = vmatpush1.bf16.msra.mxu1 %v4044_v5  ;;  %v4105_v51 = vld [vmem:[%s6174_s0 + $0xc4] ss:$12 sps:$4 sm:$0xff]   ;;  %v4109_v53 = vld [vmem:[%s6174_s0 + $0xc0] ss:$12 sps:$4 sm:$0xff]   ;;  %v4111_v55 = vld [vmem:[%s6174_s0 + $0xdc] ss:$12 sps:$4 sm:$0xff]  }
  0x13   :  { %1761 = vmatprep.subr.bf16.mxu0 %v4347_v0  ;;  %4012 = vmatprep.subr.bf16.mxu1 %v4347_v0  ;;  %v4110_v54 = vld [vmem:[%s6174_s0 + $0x5d0] ss:$12 sps:$4 sm:$0xff]   ;;  %v4113_v56 = vld [vmem:[%s6174_s0 + $0x5ec] ss:$12 sps:$4 sm:$0xff]   ;;  %v4116_v58 = vld [vmem:[%s6174_s0 + $0x5e8] ss:$12 sps:$4 sm:$0xff]  }
  0x14   :  { %v4115_v57 = vld [vmem:[%s6174_s0 + $0xd8] ss:$12 sps:$4 sm:$0xff]   ;;  %v4118_v59 = vld [vmem:[%s6174_s0 + $0xf4] ss:$12 sps:$4 sm:$0xff]   ;;  %v4122_v61 = vld [vmem:[%s6174_s0 + $0xf0] ss:$12 sps:$4 sm:$0xff]  }
  0x15   :  { %v4120_v60 = vld [vmem:[%s6174_s0 + $0x604] ss:$12 sps:$4 sm:$0xff]   ;;  %v4123_v62 = vld [vmem:[%s6174_s0 + $0x600] ss:$12 sps:$4 sm:$0xff]   ;;  %v4128_v1 = vld [vmem:[%s6174_s0 + $0x108] ss:$12 sps:$4 sm:$0xff]  }
  0x16   :  { %1762 = vmatpush1.bf16.msra.mxu0 %v4045_v7  ;;  %4028 = vmatpush1.bf16.msra.mxu1 %v4045_v7  ;;  %v4124_v63 = vld [vmem:[%s6174_s0 + $0x10c] ss:$12 sps:$4 sm:$0xff]   ;;  %v4130_v3 = vld [vmem:[%s6174_s0 + $0x124] ss:$12 sps:$4 sm:$0xff]   ;;  %v4132_v4 = vld [vmem:[%s6174_s0 + $0x634] ss:$12 sps:$4 sm:$0xff]  }
  0x17   :  { %1763 = vmatprep.subr.bf16.mxu0 %v4347_v0  ;;  %4013 = vmatprep.subr.bf16.mxu1 %v4347_v0  ;;  %v4129_v2 = vld [vmem:[%s6174_s0 + $0x618] ss:$12 sps:$4 sm:$0xff]   ;;  %v4134_v5 = vld [vmem:[%s6174_s0 + $0x120] ss:$12 sps:$4 sm:$0xff]   ;;  %v4135_v6 = vld [vmem:[%s6174_s0 + $0x630] ss:$12 sps:$4 sm:$0xff]  }
  0x18   :  { %v4136_v7 = vld [vmem:[%s6174_s0 + $0x13c] ss:$12 sps:$4 sm:$0xff]   ;;  %v4138_v8 = vld [vmem:[%s6174_s0 + $0x64c] ss:$12 sps:$4 sm:$0xff]  }
  0x1a   :  { %1764 = vmatpush1.bf16.msra.mxu0 %v4046_v9  ;;  %4029 = vmatpush1.bf16.msra.mxu1 %v4046_v9  ;;  %v4140_v9 = vld [vmem:[%s6174_s0 + $0x138] ss:$12 sps:$4 sm:$0xff]  }
  0x1b   :  { %1765 = vmatprep.subr.bf16.mxu0 %v4347_v0  ;;  %4014 = vmatprep.subr.bf16.mxu1 %v4347_v0 }
  0x1e   :  { %1766 = vmatpush1.bf16.msra.mxu0 %v4047_v10  ;;  %4030 = vmatpush1.bf16.msra.mxu1 %v4047_v10  ;;  %v4141_v10 = vld [vmem:[%s6174_s0 + $0x648] ss:$12 sps:$4 sm:$0xff]  }
  0x1f   :  { %1767 = vmatprep.subr.bf16.mxu0 %v4347_v0  ;;  %4015 = vmatprep.subr.bf16.mxu1 %v4347_v0 }
  0x22   :  { %1768 = vmatpush1.bf16.msra.mxu0 %v4048_v11  ;;  %4031 = vmatpush1.bf16.msra.mxu1 %v4048_v11  ;;  %v4142_v11 = vld [vmem:[%s6174_s0 + $0x154] ss:$12 sps:$4 sm:$0xff]  }
  0x23   :  { %1769 = vmatprep.subr.bf16.mxu0 %v4347_v0  ;;  %4016 = vmatprep.subr.bf16.mxu1 %v4347_v0 }
  0x26   :  { %1770 = vmatpush1.bf16.msra.mxu0 %v4049_v12  ;;  %4032 = vmatpush1.bf16.msra.mxu1 %v4049_v12  ;;  %v4144_v12 = vld [vmem:[%s6174_s0 + $0x664] ss:$12 sps:$4 sm:$0xff]  }
  0x27   :  { %1771 = vmatprep.subr.bf16.mxu0 %v4347_v0  ;;  %4017 = vmatprep.subr.bf16.mxu1 %v4347_v0 }
  0x2a   :  { %1772 = vmatpush1.bf16.msra.mxu0 %v4050_v13  ;;  %4033 = vmatpush1.bf16.msra.mxu1 %v4050_v13  ;;  %v4146_v13 = vld [vmem:[%s6174_s0 + $0x150] ss:$12 sps:$4 sm:$0xff]  }
  0x2b   :  { %1773 = vmatprep.subr.bf16.mxu0 %v4347_v0  ;;  %4018 = vmatprep.subr.bf16.mxu1 %v4347_v0 }
  0x2e   :  { %1774 = vmatpush1.bf16.msra.mxu0 %v4051_v14  ;;  %4034 = vmatpush1.bf16.msra.mxu1 %v4051_v14  ;;  %v4147_v14 = vld [vmem:[%s6174_s0 + $0x660] ss:$12 sps:$4 sm:$0xff]  }
  0x2f   :  { %1775 = vmatprep.subr.bf16.mxu0 %v4347_v0  ;;  %4019 = vmatprep.subr.bf16.mxu1 %v4347_v0 }
  0x32   :  { %1776 = vmatpush1.bf16.msra.mxu0 %v4052_v15  ;;  %4035 = vmatpush1.bf16.msra.mxu1 %v4052_v15  ;;  %v4148_v15 = vld [vmem:[%s6174_s0 + $0x16c] ss:$12 sps:$4 sm:$0xff]  }
  0x33   :  { %1777 = vmatprep.subr.bf16.mxu0 %v4347_v0  ;;  %4020 = vmatprep.subr.bf16.mxu1 %v4347_v0 }
  0x36   :  { %1778 = vmatpush1.bf16.msra.mxu0 %v4053_v16  ;;  %4036 = vmatpush1.bf16.msra.mxu1 %v4053_v16  ;;  %v4150_v16 = vld [vmem:[%s6174_s0 + $0x67c] ss:$12 sps:$4 sm:$0xff]  }
  0x37   :  { %1779 = vmatprep.subr.bf16.mxu0 %v4347_v0  ;;  %4021 = vmatprep.subr.bf16.mxu1 %v4347_v0 }
  0x3a   :  { %1780 = vmatpush1.bf16.msra.mxu0 %v4054_v17  ;;  %4037 = vmatpush1.bf16.msra.mxu1 %v4054_v17  ;;  %v4152_v17 = vld [vmem:[%s6174_s0 + $0x168] ss:$12 sps:$4 sm:$0xff]  }
  0x3b   :  { %1781 = vmatprep.subr.bf16.mxu0 %v4347_v0  ;;  %4022 = vmatprep.subr.bf16.mxu1 %v4347_v0  ;;  %v4126_v0 = vld [vmem:[%s6174_s0 + $0x61c] ss:$12 sps:$4 sm:$0xff]  }
  0x3e   :  { %1782 = vmatpush1.bf16.msra.mxu0 %v4055_v18  ;;  %4038 = vmatpush1.bf16.msra.mxu1 %v4055_v18  ;;  %v4153_v18 = vld [vmem:[%s6174_s0 + $0x678] ss:$12 sps:$4 sm:$0xff]  }
  0x3f   :  { %3859 = vmatprep.subr.bf16.mxu1 %v4062_v19 }
  0x41   :  { %1784 = vmatmul.mubr.bf16.vlgmr.msra.gmra.mrb[0].mxu0 %v4056_v20  ;;  %2216 = vmatmul.mubr.bf16.vlgmr.msra.gmra.mrb[0].mxu1 %v4059_v21  ;;  %v4156_v20 = vld [vmem:[%s6174_s0 + $0x694] ss:$12 sps:$4 sm:$0xff]  }
  0x42   :  { %3860 = vmatpush3.bf16.msra.mxu1 %v4062_v19  ;;  %1791 = vmatprep.mubr.bf16.mxu0 %v4063_v22  ;;  %v4154_v19 = vld [vmem:[%s6174_s0 + $0x184] ss:$12 sps:$4 sm:$0xff]   ;;  %v4158_v21 = vld [vmem:[%s6174_s0 + $0x180] ss:$12 sps:$4 sm:$0xff]  }
  0x43   :  { %2223 = vmatprep.mubr.bf16.mxu1 %v4065_v23  ;;  %3861 = vmatprep.subr.bf16.mxu1 %v4117_v24  ;;  %v4159_v22 = vld [vmem:[%s6174_s0 + $0x690] ss:$12 sps:$4 sm:$0xff]  }
  0x44   :  { %v4160_v23 = vld [vmem:[%s6174_s0 + $0x19c] ss:$12 sps:$4 sm:$0xff]  }
  0x46   :  { %3862 = vmatpush3.bf16.msra.mxu1 %v4117_v24  ;;  %v4162_v24 = vld [vmem:[%s6174_s0 + $0x6ac] ss:$12 sps:$4 sm:$0xff]  }
  0x49   :  { %1792 = vmatmul.mubr.bf16.gmra.mrb[4].mxu0 %v4067_v25  ;;  %2224 = vmatmul.mubr.bf16.gmra.mrb[4].mxu1 %v4068_v26  ;;  %v4164_v25 = vld [vmem:[%s6174_s0 + $0x198] ss:$12 sps:$4 sm:$0xff]   ;;  %v4165_v26 = vld [vmem:[%s6174_s0 + $0x6a8] ss:$12 sps:$4 sm:$0xff]  }
  0x4a   :  { %1799 = vmatprep.mubr.bf16.mxu0 %v4069_v27  ;;  %2231 = vmatprep.mubr.bf16.mxu1 %v4071_v28  ;;  %v4166_v27 = vld [vmem:[%s6174_s0 + $0x1b4] ss:$12 sps:$4 sm:$0xff]  }
  0x4b   :  { %v4168_v28 = vld [vmem:[%s6174_s0 + $0x8] ss:$12 sps:$4 sm:$0xff]  }
  0x51   :  { %1800 = vmatmul.mubr.bf16.gmra.mrb[8].mxu0 %v4073_v29  ;;  %2232 = vmatmul.mubr.bf16.gmra.mrb[8].mxu1 %v4074_v30  ;;  %v4169_v29 = vld [vmem:[%s6174_s0 + $0x1b0] ss:$12 sps:$4 sm:$0xff]   ;;  %v4170_v30 = vld [vmem:[%s6174_s0 + $0x20] ss:$12 sps:$4 sm:$0xff]  }
  0x52   :  { %1807 = vmatprep.mubr.bf16.mxu0 %v4075_v31  ;;  %2239 = vmatprep.mubr.bf16.mxu1 %v4077_v32  ;;  %v4171_v31 = vld [vmem:[%s6174_s0 + $0x1cc] ss:$12 sps:$4 sm:$0xff]  }
  0x53   :  { %v4173_v32 = vld [vmem:[%s6174_s0 + $0x38] ss:$12 sps:$4 sm:$0xff]  }
  0x59   :  { %1808 = vmatmul.mubr.bf16.gmra.mrb[12].mxu0 %v4079_v33  ;;  %2240 = vmatmul.mubr.bf16.gmra.mrb[12].mxu1 %v4080_v34  ;;  %v4174_v33 = vld [vmem:[%s6174_s0 + $0x1c8] ss:$12 sps:$4 sm:$0xff]   ;;  %v4175_v34 = vld [vmem:[%s6174_s0 + $0x50] ss:$12 sps:$4 sm:$0xff]  }
  0x5a   :  { %1815 = vmatprep.mubr.bf16.mxu0 %v4081_v35  ;;  %2247 = vmatprep.mubr.bf16.mxu1 %v4083_v36  ;;  %v4176_v35 = vld [vmem:[%s6174_s0 + $0x1e4] ss:$12 sps:$4 sm:$0xff]   ;;  %v4178_v36 = vld [vmem:[%s6174_s0 + $0x68] ss:$12 sps:$4 sm:$0xff]  }
  0x61   :  { %1816 = vmatmul.mubr.bf16.gmra.mrb[16].mxu0 %v4085_v37  ;;  %2248 = vmatmul.mubr.bf16.gmra.mrb[16].mxu1 %v4086_v38  ;;  %v4179_v37 = vld [vmem:[%s6174_s0 + $0x1e0] ss:$12 sps:$4 sm:$0xff]  }
  0x62   :  { %1823 = vmatprep.mubr.bf16.mxu0 %v4087_v39  ;;  %2255 = vmatprep.mubr.bf16.mxu1 %v4089_v40  ;;  %v4180_v38 = vld [vmem:[%s6174_s0 + $0x80] ss:$12 sps:$4 sm:$0xff]   ;;  %v4181_v39 = vld [vmem:[%s6174_s0 + $0x1fc] ss:$12 sps:$4 sm:$0xff]   ;;  %v4183_v40 = vld [vmem:[%s6174_s0 + $0x98] ss:$12 sps:$4 sm:$0xff]  }
  0x69   :  { %1824 = vmatmul.mubr.bf16.gmra.mrb[20].mxu0 %v4091_v41  ;;  %2256 = vmatmul.mubr.bf16.gmra.mrb[20].mxu1 %v4092_v42  ;;  %v4184_v41 = vld [vmem:[%s6174_s0 + $0x1f8] ss:$12 sps:$4 sm:$0xff]   ;;  %v4185_v42 = vld [vmem:[%s6174_s0 + $0xb0] ss:$12 sps:$4 sm:$0xff]  }
  0x6a   :  { %1831 = vmatprep.mubr.bf16.mxu0 %v4093_v43  ;;  %2263 = vmatprep.mubr.bf16.mxu1 %v4095_v44  ;;  %v4186_v43 = vld [vmem:[%s6174_s0 + $0x214] ss:$12 sps:$4 sm:$0xff]  }
  0x6b   :  { %v4188_v44 = vld [vmem:[%s6174_s0 + $0xc8] ss:$12 sps:$4 sm:$0xff]  }
  0x71   :  { %1832 = vmatmul.mubr.bf16.gmra.mrb[24].mxu0 %v4097_v45  ;;  %2264 = vmatmul.mubr.bf16.gmra.mrb[24].mxu1 %v4098_v46  ;;  %v4189_v45 = vld [vmem:[%s6174_s0 + $0x210] ss:$12 sps:$4 sm:$0xff]   ;;  %v4190_v46 = vld [vmem:[%s6174_s0 + $0xe0] ss:$12 sps:$4 sm:$0xff]  }
  0x72   :  { %1839 = vmatprep.mubr.bf16.mxu0 %v4099_v47  ;;  %2271 = vmatprep.mubr.bf16.mxu1 %v4101_v48  ;;  %v4191_v47 = vld [vmem:[%s6174_s0 + $0x22c] ss:$12 sps:$4 sm:$0xff]  }
  0x73   :  { %v4193_v48 = vld [vmem:[%s6174_s0 + $0xf8] ss:$12 sps:$4 sm:$0xff]  }
  0x79   :  { %1840 = vmatmul.mubr.bf16.gmra.mrb[28].mxu0 %v4103_v49  ;;  %2272 = vmatmul.mubr.bf16.gmra.mrb[28].mxu1 %v4104_v50  ;;  %v4194_v49 = vld [vmem:[%s6174_s0 + $0x228] ss:$12 sps:$4 sm:$0xff]   ;;  %v4195_v50 = vld [vmem:[%s6174_s0 + $0x110] ss:$12 sps:$4 sm:$0xff]  }
  0x7a   :  { %1847 = vmatprep.mubr.bf16.mxu0 %v4105_v51  ;;  %2279 = vmatprep.mubr.bf16.mxu1 %v4107_v52  ;;  %v4196_v51 = vld [vmem:[%s6174_s0 + $0x244] ss:$12 sps:$4 sm:$0xff]   ;;  %v4198_v52 = vld [vmem:[%s6174_s0 + $0x128] ss:$12 sps:$4 sm:$0xff]  }
  0x81   :  { %1848 = vmatmul.mubr.bf16.gmra.mrb[32].mxu0 %v4109_v53  ;;  %2280 = vmatmul.mubr.bf16.gmra.mrb[32].mxu1 %v4110_v54  ;;  %v4199_v53 = vld [vmem:[%s6174_s0 + $0x240] ss:$12 sps:$4 sm:$0xff]  }
  0x82   :  { %1855 = vmatprep.mubr.bf16.mxu0 %v4111_v55  ;;  %2287 = vmatprep.mubr.bf16.mxu1 %v4113_v56  ;;  %v4200_v54 = vld [vmem:[%s6174_s0 + $0x140] ss:$12 sps:$4 sm:$0xff]   ;;  %v4201_v55 = vld [vmem:[%s6174_s0 + $0x25c] ss:$12 sps:$4 sm:$0xff]   ;;  %v4203_v56 = vld [vmem:[%s6174_s0 + $0x158] ss:$12 sps:$4 sm:$0xff]  }
  0x89   :  { %1856 = vmatmul.mubr.bf16.gmra.mrb[36].mxu0 %v4115_v57  ;;  %2288 = vmatmul.mubr.bf16.gmra.mrb[36].mxu1 %v4116_v58  ;;  %v4204_v57 = vld [vmem:[%s6174_s0 + $0x258] ss:$12 sps:$4 sm:$0xff]   ;;  %v4205_v58 = vld [vmem:[%s6174_s0 + $0x170] ss:$12 sps:$4 sm:$0xff]  }
  0x8a   :  { %1863 = vmatprep.mubr.bf16.mxu0 %v4118_v59  ;;  %2295 = vmatprep.mubr.bf16.mxu1 %v4120_v60  ;;  %v4206_v59 = vld [vmem:[%s6174_s0 + $0x274] ss:$12 sps:$4 sm:$0xff]  }
  0x8b   :  { %v4208_v60 = vld [vmem:[%s6174_s0 + $0x188] ss:$12 sps:$4 sm:$0xff]  }
  0x91   :  { %1864 = vmatmul.mubr.bf16.gmra.mrb[40].mxu0 %v4122_v61  ;;  %2296 = vmatmul.mubr.bf16.gmra.mrb[40].mxu1 %v4123_v62  ;;  %v4209_v61 = vld [vmem:[%s6174_s0 + $0x270] ss:$12 sps:$4 sm:$0xff]   ;;  %v4210_v62 = vld [vmem:[%s6174_s0 + $0x1a0] ss:$12 sps:$4 sm:$0xff]  }
  0x92   :  { %1871 = vmatprep.mubr.bf16.mxu0 %v4124_v63  ;;  %2303 = vmatprep.mubr.bf16.mxu1 %v4126_v0  ;;  %v4211_v63 = vld [vmem:[%s6174_s0 + $0x28c] ss:$12 sps:$4 sm:$0xff]  }
  0x93   :  { %v4213_v0 = vld [vmem:[%s6174_s0 + $0x1b8] ss:$12 sps:$4 sm:$0xff]  }
  0x99   :  { %1872 = vmatmul.mubr.bf16.gmra.mrb[44].mxu0 %v4128_v1  ;;  %2304 = vmatmul.mubr.bf16.gmra.mrb[44].mxu1 %v4129_v2 }
  0x9a   :  { %1879 = vmatprep.mubr.bf16.mxu0 %v4130_v3  ;;  %2311 = vmatprep.mubr.bf16.mxu1 %v4132_v4 }
  0xa1   :  { %1880 = vmatmul.mubr.bf16.gmra.mrb[48].mxu0 %v4134_v5  ;;  %2312 = vmatmul.mubr.bf16.gmra.mrb[48].mxu1 %v4135_v6  ;;  %v4214_v5 = vld [vmem:[%s6174_s0 + $0x288] ss:$12 sps:$4 sm:$0xff]   ;;  %v4215_v6 = vld [vmem:[%s6174_s0 + $0x1d0] ss:$12 sps:$4 sm:$0xff]  }
  0xa2   :  { %1887 = vmatprep.mubr.bf16.mxu0 %v4136_v7  ;;  %2319 = vmatprep.mubr.bf16.mxu1 %v4138_v8 }
  0xa9   :  { %1888 = vmatmul.mubr.bf16.gmra.mrb[52].mxu0 %v4140_v9  ;;  %2320 = vmatmul.mubr.bf16.gmra.mrb[52].mxu1 %v4141_v10  ;;  %v4216_v9 = vld [vmem:[%s6174_s0 + $0x2a4] ss:$12 sps:$4 sm:$0xff]   ;;  %v4218_v10 = vld [vmem:[%s6174_s0 + $0x1e8] ss:$12 sps:$4 sm:$0xff]  }
  0xaa   :  { %1895 = vmatprep.mubr.bf16.mxu0 %v4142_v11  ;;  %2327 = vmatprep.mubr.bf16.mxu1 %v4144_v12 }
  0xb1   :  { %1896 = vmatmul.mubr.bf16.gmra.mrb[56].mxu0 %v4146_v13  ;;  %2328 = vmatmul.mubr.bf16.gmra.mrb[56].mxu1 %v4147_v14 }
  0xb2   :  { %1903 = vmatprep.mubr.bf16.mxu0 %v4148_v15  ;;  %2335 = vmatprep.mubr.bf16.mxu1 %v4150_v16 }
  0xb9   :  { %1904 = vmatmul.mubr.bf16.gmra.mrb[60].mxu0 %v4152_v17  ;;  %2336 = vmatmul.mubr.bf16.gmra.mrb[60].mxu1 %v4153_v18  ;;  %v4219_v17 = vld [vmem:[%s6174_s0 + $0x2a0] ss:$12 sps:$4 sm:$0xff]  }
  0xba   :  { %1911 = vmatprep.mubr.bf16.mxu0 %v4154_v19  ;;  %2343 = vmatprep.mubr.bf16.mxu1 %v4156_v20  ;;  %v4220_v18 = vld [vmem:[%s6174_s0 + $0x200] ss:$12 sps:$4 sm:$0xff]  }
  0xc1   :  { %1912 = vmatmul.mubr.bf16.gmra.mrb[64].mxu0 %v4158_v21  ;;  %2344 = vmatmul.mubr.bf16.gmra.mrb[64].mxu1 %v4159_v22  ;;  %v4221_v21 = vld [vmem:[%s6174_s0 + $0x2bc] ss:$12 sps:$4 sm:$0xff]   ;;  %v4223_v22 = vld [vmem:[%s6174_s0 + $0x218] ss:$12 sps:$4 sm:$0xff]  }
  0xc2   :  { %1919 = vmatprep.mubr.bf16.mxu0 %v4160_v23  ;;  %2351 = vmatprep.mubr.bf16.mxu1 %v4162_v24 }
  0xc9   :  { %1920 = vmatmul.mubr.bf16.gmra.mrb[68].mxu0 %v4164_v25  ;;  %2352 = vmatmul.mubr.bf16.gmra.mrb[68].mxu1 %v4165_v26 }
  0xca   :  { %1927 = vmatprep.mubr.bf16.mxu0 %v4166_v27  ;;  %3863 = vmatprep.mubr.msk.bf16.mxu1 %vm1534_vm0, %v4168_v28 }
  0xd1   :  { %1928 = vmatmul.mubr.bf16.gmra.mrb[72].mxu0 %v4169_v29  ;;  %3864 = vmatmul.mubr.msk.bf16.vlgmr.msra.gmra.mrb[72].mxu1 %vm1534_vm0, %v4170_v30  ;;  %v4224_v29 = vld [vmem:[%s6174_s0 + $0x2b8] ss:$12 sps:$4 sm:$0xff]   ;;  %v4225_v30 = vld [vmem:[%s6174_s0 + $0x230] ss:$12 sps:$4 sm:$0xff]  }
  0xd2   :  { %1935 = vmatprep.mubr.bf16.mxu0 %v4171_v31  ;;  %3867 = vmatprep.mubr.msk.bf16.mxu1 %vm1534_vm0, %v4173_v32 }
  0xd9   :  { %1936 = vmatmul.mubr.bf16.gmra.mrb[76].mxu0 %v4174_v33  ;;  %3868 = vmatmul.mubr.msk.bf16.gmra.mrb[76].mxu1 %vm1534_vm0, %v4175_v34  ;;  %v4226_v33 = vld [vmem:[%s6174_s0 + $0x2d4] ss:$12 sps:$4 sm:$0xff]  }
  0xda   :  { %1943 = vmatprep.mubr.bf16.mxu0 %v4176_v35  ;;  %3871 = vmatprep.mubr.msk.bf16.mxu1 %vm1534_vm0, %v4178_v36  ;;  %v4228_v34 = vld [vmem:[%s6174_s0 + $0x248] ss:$12 sps:$4 sm:$0xff]  }
  0xe1   :  { %1944 = vmatmul.mubr.bf16.gmra.mrb[80].mxu0 %v4179_v37  ;;  %3872 = vmatmul.mubr.msk.bf16.gmra.mrb[80].mxu1 %vm1534_vm0, %v4180_v38 }
  0xe2   :  { %1951 = vmatprep.mubr.bf16.mxu0 %v4181_v39  ;;  %3875 = vmatprep.mubr.msk.bf16.mxu1 %vm1534_vm0, %v4183_v40 }
  0xe9   :  { %1952 = vmatmul.mubr.bf16.gmra.mrb[84].mxu0 %v4184_v41  ;;  %3876 = vmatmul.mubr.msk.bf16.gmra.mrb[84].mxu1 %vm1534_vm0, %v4185_v42  ;;  %v4229_v41 = vld [vmem:[%s6174_s0 + $0x2d0] ss:$12 sps:$4 sm:$0xff]   ;;  %v4230_v42 = vld [vmem:[%s6174_s0 + $0x260] ss:$12 sps:$4 sm:$0xff]  }
  0xea   :  { %1959 = vmatprep.mubr.bf16.mxu0 %v4186_v43  ;;  %3879 = vmatprep.mubr.msk.bf16.mxu1 %vm1534_vm0, %v4188_v44 }
  0xf1   :  { %1960 = vmatmul.mubr.bf16.gmra.mrb[88].mxu0 %v4189_v45  ;;  %3880 = vmatmul.mubr.msk.bf16.gmra.mrb[88].mxu1 %vm1534_vm0, %v4190_v46  ;;  %v4231_v45 = vld [vmem:[%s6174_s0 + $0x2ec] ss:$12 sps:$4 sm:$0xff]  }
  0xf2   :  { %1967 = vmatprep.mubr.bf16.mxu0 %v4191_v47  ;;  %3883 = vmatprep.mubr.msk.bf16.mxu1 %vm1534_vm0, %v4193_v48  ;;  %v4233_v46 = vld [vmem:[%s6174_s0 + $0x278] ss:$12 sps:$4 sm:$0xff]  }
  0xf9   :  { %1968 = vmatmul.mubr.bf16.gmra.mrb[92].mxu0 %v4194_v49  ;;  %3884 = vmatmul.mubr.msk.bf16.gmra.mrb[92].mxu1 %vm1534_vm0, %v4195_v50 }
  0xfa   :  { %1975 = vmatprep.mubr.bf16.mxu0 %v4196_v51  ;;  %3887 = vmatprep.mubr.msk.bf16.mxu1 %vm1534_vm0, %v4198_v52 }
 0x101   :  { %1976 = vmatmul.mubr.bf16.gmra.mrb[96].mxu0 %v4199_v53  ;;  %3888 = vmatmul.mubr.msk.bf16.gmra.mrb[96].mxu1 %vm1534_vm0, %v4200_v54  ;;  %v4234_v53 = vld [vmem:[%s6174_s0 + $0x2e8] ss:$12 sps:$4 sm:$0xff]   ;;  %v4235_v54 = vld [vmem:[%s6174_s0 + $0x290] ss:$12 sps:$4 sm:$0xff]  }
 0x102   :  { %1983 = vmatprep.mubr.bf16.mxu0 %v4201_v55  ;;  %3891 = vmatprep.mubr.msk.bf16.mxu1 %vm1534_vm0, %v4203_v56 }
 0x109   :  { %1984 = vmatmul.mubr.bf16.gmra.mrb[100].mxu0 %v4204_v57  ;;  %3892 = vmatmul.mubr.msk.bf16.gmra.mrb[100].mxu1 %vm1534_vm0, %v4205_v58  ;;  %v4236_v57 = vld [vmem:[%s6174_s0 + $0x304] ss:$12 sps:$4 sm:$0xff]   ;;  %v4238_v58 = vld [vmem:[%s6174_s0 + $0x2a8] ss:$12 sps:$4 sm:$0xff]  }
 0x10a   :  { %1991 = vmatprep.mubr.bf16.mxu0 %v4206_v59  ;;  %3895 = vmatprep.mubr.msk.bf16.mxu1 %vm1534_vm0, %v4208_v60 }
 0x111   :  { %1992 = vmatmul.mubr.bf16.gmra.mrb[104].mxu0 %v4209_v61  ;;  %3896 = vmatmul.mubr.msk.bf16.gmra.mrb[104].mxu1 %vm1534_vm0, %v4210_v62 }
 0x112   :  { %1999 = vmatprep.mubr.bf16.mxu0 %v4211_v63  ;;  %3899 = vmatprep.mubr.msk.bf16.mxu1 %vm1534_vm0, %v4213_v0 }
 0x114   :  { %v4803_v1 = vpop.f32.mrb[0].mxu0  ;;  %v4805_v2 = vpop.f32.mrb[0].mxu1 }
 0x115   :  { %6177 = vst [vmem:[#allocation2_spill] sm:$0xff] %v4805_v2  ;;  %v1787_v3 = vpop.f32.mrb[1].mxu0  ;;  %v2219_v4 = vpop.f32.mrb[1].mxu1 }
 0x116   :  { %v4813_v7 = vpop.f32.mrb[2].mxu0  ;;  %v4815_v8 = vpop.f32.mrb[2].mxu1  ;;  %v4239_v3 = vld [vmem:[%s6174_s0 + $0x300] ss:$12 sps:$4 sm:$0xff]  }
 0x117   :  { %6178 = vst [vmem:[#allocation3_spill] sm:$0xff] %v4815_v8  ;;  %v1790_v11 = vpop.f32.mrb[3].mxu0  ;;  %v2222_v12 = vpop.f32.mrb[3].mxu1  ;;  %v4240_v4 = vld [vmem:[%s6174_s0 + $0x2c0] ss:$12 sps:$4 sm:$0xff]  }
 0x119   :  { %2000 = vmatmul.mubr.bf16.gmra.mrb[108].mxu0 %v4214_v5  ;;  %3900 = vmatmul.mubr.msk.bf16.gmra.mrb[108].mxu1 %vm1534_vm0, %v4215_v6 }
 0x11a   :  { %2007 = vmatprep.mubr.bf16.mxu0 %v4216_v9  ;;  %3903 = vmatprep.mubr.msk.bf16.mxu1 %vm1534_vm0, %v4218_v10  ;;  %v4241_v9 = vld [vmem:[%s6174_s0 + $0x31c] ss:$12 sps:$4 sm:$0xff]   ;;  %v4243_v10 = vld [vmem:[%s6174_s0 + $0x2d8] ss:$12 sps:$4 sm:$0xff]  }
 0x11c   :  { %v4825_v13 = vpop.f32.mrb[4].mxu0  ;;  %v4827_v14 = vpop.f32.mrb[4].mxu1 }
 0x11d   :  { %6179 = vst [vmem:[#allocation4_spill] sm:$0xff] %v4827_v14  ;;  %v1795_v15 = vpop.f32.mrb[5].mxu0  ;;  %v2227_v16 = vpop.f32.mrb[5].mxu1 }
 0x11e   :  { %v4835_v19 = vpop.f32.mrb[6].mxu0  ;;  %v4837_v20 = vpop.f32.mrb[6].mxu1 }
 0x11f   :  { %6180 = vst [vmem:[#allocation5_spill] sm:$0xff] %v4837_v20  ;;  %v1798_v23 = vpop.f32.mrb[7].mxu0  ;;  %v2230_v24 = vpop.f32.mrb[7].mxu1 }
 0x121   :  { %2008 = vmatmul.mubr.bf16.gmra.mrb[112].mxu0 %v4219_v17  ;;  %3904 = vmatmul.mubr.msk.bf16.gmra.mrb[112].mxu1 %vm1534_vm0, %v4220_v18 }
 0x122   :  { %2015 = vmatprep.mubr.bf16.mxu0 %v4221_v21  ;;  %3907 = vmatprep.mubr.msk.bf16.mxu1 %vm1534_vm0, %v4223_v22  ;;  %v4244_v21 = vld [vmem:[%s6174_s0 + $0x318] ss:$12 sps:$4 sm:$0xff]   ;;  %v4245_v22 = vld [vmem:[%s6174_s0 + $0x2f0] ss:$12 sps:$4 sm:$0xff]  }
 0x124   :  { %v4847_v25 = vpop.f32.mrb[8].mxu0  ;;  %v4849_v26 = vpop.f32.mrb[8].mxu1 }
 0x125   :  { %6181 = vst [vmem:[#allocation6_spill] sm:$0xff] %v4849_v26  ;;  %v1803_v27 = vpop.f32.mrb[9].mxu0  ;;  %v2235_v28 = vpop.f32.mrb[9].mxu1 }
 0x126   :  { %v4857_v31 = vpop.f32.mrb[10].mxu0  ;;  %v4859_v32 = vpop.f32.mrb[10].mxu1  ;;  %v4246_v27 = vld [vmem:[%s6174_s0 + $0x334] ss:$12 sps:$4 sm:$0xff]  }
 0x127   :  { %6182 = vst [vmem:[#allocation7_spill] sm:$0xff] %v4859_v32  ;;  %v1806_v35 = vpop.f32.mrb[11].mxu0  ;;  %v2238_v36 = vpop.f32.mrb[11].mxu1  ;;  %v4248_v28 = vld [vmem:[%s6174_s0 + $0x308] ss:$12 sps:$4 sm:$0xff]  }
 0x129   :  { %2016 = vmatmul.mubr.bf16.gmra.mrb[116].mxu0 %v4224_v29  ;;  %3908 = vmatmul.mubr.msk.bf16.gmra.mrb[116].mxu1 %vm1534_vm0, %v4225_v30 }
 0x12a   :  { %2023 = vmatprep.mubr.bf16.mxu0 %v4226_v33  ;;  %3911 = vmatprep.mubr.msk.bf16.mxu1 %vm1534_vm0, %v4228_v34 }
 0x12c   :  { %v4869_v37 = vpop.f32.mrb[12].mxu0  ;;  %v4871_v38 = vpop.f32.mrb[12].mxu1 }
 0x12d   :  { %6183 = vst [vmem:[#allocation8_spill] sm:$0xff] %v4871_v38  ;;  %v1811_v39 = vpop.f32.mrb[13].mxu0  ;;  %v2243_v40 = vpop.f32.mrb[13].mxu1 }
 0x12e   :  { %v4879_v43 = vpop.f32.mrb[14].mxu0  ;;  %v4881_v44 = vpop.f32.mrb[14].mxu1  ;;  %v4249_v39 = vld [vmem:[%s6174_s0 + $0x330] ss:$12 sps:$4 sm:$0xff]   ;;  %v4250_v40 = vld [vmem:[%s6174_s0 + $0x320] ss:$12 sps:$4 sm:$0xff]  }
 0x12f   :  { %6184 = vst [vmem:[#allocation9_spill] sm:$0xff] %v4881_v44  ;;  %v1814_v47 = vpop.f32.mrb[15].mxu0  ;;  %v2246_v48 = vpop.f32.mrb[15].mxu1 }
 0x131   :  { %2024 = vmatmul.mubr.bf16.gmra.mrb[120].mxu0 %v4229_v41  ;;  %3912 = vmatmul.mubr.msk.bf16.gmra.mrb[120].mxu1 %vm1534_vm0, %v4230_v42 }
 0x132   :  { %2031 = vmatprep.mubr.bf16.mxu0 %v4231_v45  ;;  %3915 = vmatprep.mubr.msk.bf16.mxu1 %vm1534_vm0, %v4233_v46  ;;  %v4251_v45 = vld [vmem:[%s6174_s0 + $0x34c] ss:$12 sps:$4 sm:$0xff]  }
 0x133   :  { %v4253_v46 = vld [vmem:[%s6174_s0 + $0x338] ss:$12 sps:$4 sm:$0xff]  }
 0x134   :  { %v4891_v49 = vpop.f32.mrb[16].mxu0  ;;  %v4893_v50 = vpop.f32.mrb[16].mxu1 }
 0x135   :  { %6185 = vst [vmem:[#allocation10_spill] sm:$0xff] %v4893_v50  ;;  %v1819_v51 = vpop.f32.mrb[17].mxu0  ;;  %v2251_v52 = vpop.f32.mrb[17].mxu1 }
 0x136   :  { %v4901_v55 = vpop.f32.mrb[18].mxu0  ;;  %v4903_v56 = vpop.f32.mrb[18].mxu1 }
 0x137   :  { %6186 = vst [vmem:[#allocation11_spill] sm:$0xff] %v4903_v56  ;;  %v1822_v59 = vpop.f32.mrb[19].mxu0  ;;  %v2254_v60 = vpop.f32.mrb[19].mxu1 }
 0x139   :  { %2032 = vmatmul.mubr.bf16.gmra.mrb[124].mxu0 %v4234_v53  ;;  %3916 = vmatmul.mubr.msk.bf16.gmra.mrb[124].mxu1 %vm1534_vm0, %v4235_v54 }
 0x13a   :  { %2039 = vmatprep.mubr.bf16.mxu0 %v4236_v57  ;;  %3919 = vmatprep.mubr.msk.bf16.mxu1 %vm1534_vm0, %v4238_v58  ;;  %v4254_v57 = vld [vmem:[%s6174_s0 + $0x348] ss:$12 sps:$4 sm:$0xff]   ;;  %v4255_v58 = vld [vmem:[%s6174_s0 + $0x350] ss:$12 sps:$4 sm:$0xff]  }
 0x13c   :  { %v4913_v61 = vpop.f32.mrb[20].mxu0  ;;  %v4915_v62 = vpop.f32.mrb[20].mxu1 }
 0x13d   :  { %6187 = vst [vmem:[#allocation12_spill] sm:$0xff] %v4915_v62  ;;  %v1827_v63 = vpop.f32.mrb[21].mxu0  ;;  %v2259_v0 = vpop.f32.mrb[21].mxu1 }
 0x13e   :  { %v4923_v5 = vpop.f32.mrb[22].mxu0  ;;  %v4925_v6 = vpop.f32.mrb[22].mxu1  ;;  %v4256_v63 = vld [vmem:[%s6174_s0 + $0x364] ss:$12 sps:$4 sm:$0xff]   ;;  %v4258_v0 = vld [vmem:[%s6174_s0 + $0x368] ss:$12 sps:$4 sm:$0xff]  }
 0x13f   :  { %6188 = vst [vmem:[#allocation13_spill] sm:$0xff] %v4925_v6  ;;  %v1830_v11 = vpop.f32.mrb[23].mxu0  ;;  %v2262_v12 = vpop.f32.mrb[23].mxu1 }
 0x141   :  { %2040 = vmatmul.mubr.bf16.gmra.mrb[128].mxu0 %v4239_v3  ;;  %3920 = vmatmul.mubr.msk.bf16.gmra.mrb[128].mxu1 %vm1534_vm0, %v4240_v4 }
 0x142   :  { %2047 = vmatprep.mubr.bf16.mxu0 %v4241_v9  ;;  %3923 = vmatprep.mubr.msk.bf16.mxu1 %vm1534_vm0, %v4243_v10 }
 0x144   :  { %v4935_v15 = vpop.f32.mrb[24].mxu0  ;;  %v4937_v16 = vpop.f32.mrb[24].mxu1 }
 0x145   :  { %6189 = vst [vmem:[#allocation14_spill] sm:$0xff] %v4937_v16  ;;  %v1835_v17 = vpop.f32.mrb[25].mxu0  ;;  %v2267_v18 = vpop.f32.mrb[25].mxu1 }
 0x146   :  { %v4945_v23 = vpop.f32.mrb[26].mxu0  ;;  %v4947_v24 = vpop.f32.mrb[26].mxu1  ;;  %v4259_v17 = vld [vmem:[%s6174_s0 + $0x360] ss:$12 sps:$4 sm:$0xff]  }
 0x147   :  { %6190 = vst [vmem:[#allocation15_spill] sm:$0xff] %v4947_v24  ;;  %v1838_v29 = vpop.f32.mrb[27].mxu0  ;;  %v2270_v30 = vpop.f32.mrb[27].mxu1  ;;  %v4260_v18 = vld [vmem:[%s6174_s0 + $0x380] ss:$12 sps:$4 sm:$0xff]  }
 0x149   :  { %2048 = vmatmul.mubr.bf16.gmra.mrb[132].mxu0 %v4244_v21  ;;  %3924 = vmatmul.mubr.msk.bf16.gmra.mrb[132].mxu1 %vm1534_vm0, %v4245_v22 }
 0x14a   :  { %2055 = vmatprep.mubr.bf16.mxu0 %v4246_v27  ;;  %3927 = vmatprep.mubr.msk.bf16.mxu1 %vm1534_vm0, %v4248_v28  ;;  %v4261_v27 = vld [vmem:[%s6174_s0 + $0x37c] ss:$12 sps:$4 sm:$0xff]   ;;  %v4263_v28 = vld [vmem:[%s6174_s0 + $0x398] ss:$12 sps:$4 sm:$0xff]  }
 0x14c   :  { %v4957_v33 = vpop.f32.mrb[28].mxu0  ;;  %v4959_v34 = vpop.f32.mrb[28].mxu1 }
 0x14d   :  { %6191 = vst [vmem:[#allocation16_spill] sm:$0xff] %v4959_v34  ;;  %v1843_v35 = vpop.f32.mrb[29].mxu0  ;;  %v2275_v36 = vpop.f32.mrb[29].mxu1 }
 0x14e   :  { %v4967_v41 = vpop.f32.mrb[30].mxu0  ;;  %v4969_v42 = vpop.f32.mrb[30].mxu1 }
 0x14f   :  { %6192 = vst [vmem:[#allocation17_spill] sm:$0xff] %v4969_v42  ;;  %v1846_v47 = vpop.f32.mrb[31].mxu0  ;;  %v2278_v48 = vpop.f32.mrb[31].mxu1 }
 0x151   :  { %2056 = vmatmul.mubr.bf16.gmra.mrb[136].mxu0 %v4249_v39  ;;  %3928 = vmatmul.mubr.msk.bf16.gmra.mrb[136].mxu1 %vm1534_vm0, %v4250_v40 }
 0x152   :  { %2063 = vmatprep.mubr.bf16.mxu0 %v4251_v45  ;;  %3931 = vmatprep.mubr.msk.bf16.mxu1 %vm1534_vm0, %v4253_v46  ;;  %v4264_v45 = vld [vmem:[%s6174_s0 + $0x378] ss:$12 sps:$4 sm:$0xff]   ;;  %v4265_v46 = vld [vmem:[%s6174_s0 + $0x3b0] ss:$12 sps:$4 sm:$0xff]  }
 0x154   :  { %v4979_v51 = vpop.f32.mrb[32].mxu0  ;;  %v4981_v52 = vpop.f32.mrb[32].mxu1 }
 0x155   :  { %6193 = vst [vmem:[#allocation18_spill] sm:$0xff] %v4981_v52  ;;  %v1851_v53 = vpop.f32.mrb[33].mxu0  ;;  %v2283_v54 = vpop.f32.mrb[33].mxu1 }
 0x156   :  { %v4989_v59 = vpop.f32.mrb[34].mxu0  ;;  %v4991_v60 = vpop.f32.mrb[34].mxu1  ;;  %v4266_v53 = vld [vmem:[%s6174_s0 + $0x394] ss:$12 sps:$4 sm:$0xff]  }
 0x157   :  { %6194 = vst [vmem:[#allocation19_spill] sm:$0xff] %v4991_v60  ;;  %v1854_v3 = vpop.f32.mrb[35].mxu0  ;;  %v2286_v4 = vpop.f32.mrb[35].mxu1  ;;  %v4268_v54 = vld [vmem:[%s6174_s0 + $0x3c8] ss:$12 sps:$4 sm:$0xff]  }
 0x159   :  { %2064 = vmatmul.mubr.bf16.gmra.mrb[140].mxu0 %v4254_v57  ;;  %3932 = vmatmul.mubr.msk.bf16.gmra.mrb[140].mxu1 %vm1534_vm0, %v4255_v58 }
 0x15a   :  { %2071 = vmatprep.mubr.bf16.mxu0 %v4256_v63  ;;  %3935 = vmatprep.mubr.msk.bf16.mxu1 %vm1534_vm0, %v4258_v0 }
 0x15c   :  { %v5001_v9 = vpop.f32.mrb[36].mxu0  ;;  %v5003_v10 = vpop.f32.mrb[36].mxu1 }
 0x15d   :  { %6195 = vst [vmem:[#allocation20_spill] sm:$0xff] %v5003_v10  ;;  %v1859_v11 = vpop.f32.mrb[37].mxu0  ;;  %v2291_v12 = vpop.f32.mrb[37].mxu1 }
 0x15e   :  { %v5011_v21 = vpop.f32.mrb[38].mxu0  ;;  %v5013_v22 = vpop.f32.mrb[38].mxu1  ;;  %v4269_v11 = vld [vmem:[%s6174_s0 + $0x390] ss:$12 sps:$4 sm:$0xff]   ;;  %v4270_v12 = vld [vmem:[%s6174_s0 + $0x3e0] ss:$12 sps:$4 sm:$0xff]  }
 0x15f   :  { %6196 = vst [vmem:[#allocation21_spill] sm:$0xff] %v5013_v22  ;;  %v1862_v29 = vpop.f32.mrb[39].mxu0  ;;  %v2294_v30 = vpop.f32.mrb[39].mxu1  ;;  %v4299_v22 = vld [vmem:[%s6174_s0 + $0x420] ss:$12 sps:$4 sm:$0xff]  }
 0x161   :  { %2072 = vmatmul.mubr.bf16.gmra.mrb[144].mxu0 %v4259_v17  ;;  %3936 = vmatmul.mubr.msk.bf16.gmra.mrb[144].mxu1 %vm1534_vm0, %v4260_v18 }
 0x162   :  { %2079 = vmatprep.mubr.bf16.mxu0 %v4261_v27  ;;  %3939 = vmatprep.mubr.msk.bf16.mxu1 %vm1534_vm0, %v4263_v28  ;;  %v4271_v27 = vld [vmem:[%s6174_s0 + $0x3ac] ss:$12 sps:$4 sm:$0xff]  }
 0x163   :  { %v4273_v28 = vld [vmem:[%s6174_s0 + $0x3f8] ss:$12 sps:$4 sm:$0xff]  }
 0x164   :  { %v5023_v35 = vpop.f32.mrb[40].mxu0  ;;  %v5025_v36 = vpop.f32.mrb[40].mxu1 }
 0x165   :  { %6197 = vst [vmem:[#allocation22_spill] sm:$0xff] %v5025_v36  ;;  %v1867_v39 = vpop.f32.mrb[41].mxu0  ;;  %v2299_v40 = vpop.f32.mrb[41].mxu1 }
 0x166   :  { %v5033_v47 = vpop.f32.mrb[42].mxu0  ;;  %v5035_v48 = vpop.f32.mrb[42].mxu1 }
 0x167   :  { %6198 = vst [vmem:[#allocation23_spill] sm:$0xff] %v5035_v48  ;;  %v1870_v57 = vpop.f32.mrb[43].mxu0  ;;  %v2302_v58 = vpop.f32.mrb[43].mxu1  ;;  %v4294_v48 = vld [vmem:[%s6174_s0 + $0x408] ss:$12 sps:$4 sm:$0xff]  }
 0x169   :  { %2080 = vmatmul.mubr.bf16.gmra.mrb[148].mxu0 %v4264_v45  ;;  %3940 = vmatmul.mubr.msk.bf16.gmra.mrb[148].mxu1 %vm1534_vm0, %v4265_v46 }
 0x16a   :  { %2087 = vmatprep.mubr.bf16.mxu0 %v4266_v53  ;;  %3943 = vmatprep.mubr.msk.bf16.mxu1 %vm1534_vm0, %v4268_v54  ;;  %v4274_v53 = vld [vmem:[%s6174_s0 + $0x3a8] ss:$12 sps:$4 sm:$0xff]   ;;  %v4275_v54 = vld [vmem:[%s6174_s0 + $0x410] ss:$12 sps:$4 sm:$0xff]  }
 0x16c   :  { %v5045_v63 = vpop.f32.mrb[44].mxu0  ;;  %v5047_v0 = vpop.f32.mrb[44].mxu1 }
 0x16d   :  { %6199 = vst [vmem:[#allocation24_spill] sm:$0xff] %v5047_v0  ;;  %v1875_v3 = vpop.f32.mrb[45].mxu0  ;;  %v2307_v4 = vpop.f32.mrb[45].mxu1 }
 0x16e   :  { %v5055_v17 = vpop.f32.mrb[46].mxu0  ;;  %v5057_v18 = vpop.f32.mrb[46].mxu1  ;;  %v4276_v3 = vld [vmem:[%s6174_s0 + $0x3c4] ss:$12 sps:$4 sm:$0xff]   ;;  %v4278_v4 = vld [vmem:[%s6174_s0 + $0x428] ss:$12 sps:$4 sm:$0xff]  }
 0x16f   :  { %6200 = vst [vmem:[#allocation25_spill] sm:$0xff] %v5057_v18  ;;  %v1878_v29 = vpop.f32.mrb[47].mxu0  ;;  %v2310_v30 = vpop.f32.mrb[47].mxu1  ;;  %v4289_v18 = vld [vmem:[%s6174_s0 + $0x3f0] ss:$12 sps:$4 sm:$0xff]  }
 0x171   :  { %2088 = vmatmul.mubr.bf16.gmra.mrb[152].mxu0 %v4269_v11  ;;  %3944 = vmatmul.mubr.msk.bf16.gmra.mrb[152].mxu1 %vm1534_vm0, %v4270_v12 }
 0x172   :  { %2095 = vmatprep.mubr.bf16.mxu0 %v4271_v27  ;;  %3947 = vmatprep.mubr.msk.bf16.mxu1 %vm1534_vm0, %v4273_v28 }
 0x174   :  { %v5067_v39 = vpop.f32.mrb[48].mxu0  ;;  %v5069_v40 = vpop.f32.mrb[48].mxu1 }
 0x175   :  { %6201 = vst [vmem:[#allocation26_spill] sm:$0xff] %v5069_v40  ;;  %v1883_v45 = vpop.f32.mrb[49].mxu0  ;;  %v2315_v46 = vpop.f32.mrb[49].mxu1 }
 0x176   :  { %v5077_v57 = vpop.f32.mrb[50].mxu0  ;;  %v5079_v58 = vpop.f32.mrb[50].mxu1  ;;  %v4279_v45 = vld [vmem:[%s6174_s0 + $0x3c0] ss:$12 sps:$4 sm:$0xff]  }
 0x177   :  { %6202 = vst [vmem:[#allocation27_spill] sm:$0xff] %v5079_v58  ;;  %v1886_v11 = vpop.f32.mrb[51].mxu0  ;;  %v2318_v12 = vpop.f32.mrb[51].mxu1  ;;  %v4280_v46 = vld [vmem:[%s6174_s0 + $0x440] ss:$12 sps:$4 sm:$0xff]  }
 0x178   :  { %v4284_v58 = vld [vmem:[%s6174_s0 + $0x3d8] ss:$12 sps:$4 sm:$0xff]  }
 0x179   :  { %2096 = vmatmul.mubr.bf16.gmra.mrb[156].mxu0 %v4274_v53  ;;  %3948 = vmatmul.mubr.msk.bf16.gmra.mrb[156].mxu1 %vm1534_vm0, %v4275_v54 }
 0x17a   :  { %2103 = vmatprep.mubr.bf16.mxu0 %v4276_v3  ;;  %3951 = vmatprep.mubr.msk.bf16.mxu1 %vm1534_vm0, %v4278_v4  ;;  %v4281_v3 = vld [vmem:[%s6174_s0 + $0x3dc] ss:$12 sps:$4 sm:$0xff]   ;;  %v4283_v4 = vld [vmem:[%s6174_s0 + $0x458] ss:$12 sps:$4 sm:$0xff]  }
 0x17c   :  { %v5089_v27 = vpop.f32.mrb[52].mxu0  ;;  %v5091_v28 = vpop.f32.mrb[52].mxu1 }
 0x17d   :  { %6203 = vst [vmem:[#allocation28_spill] sm:$0xff] %v5091_v28  ;;  %v1891_v29 = vpop.f32.mrb[53].mxu0  ;;  %v2323_v30 = vpop.f32.mrb[53].mxu1 }
 0x17e   :  { %v5099_v53 = vpop.f32.mrb[54].mxu0  ;;  %v5101_v54 = vpop.f32.mrb[54].mxu1 }
 0x17f   :  { %6204 = vst [vmem:[#allocation29_spill] sm:$0xff] %v5101_v54  ;;  %v1894_v11 = vpop.f32.mrb[55].mxu0  ;;  %v2326_v12 = vpop.f32.mrb[55].mxu1 }
 0x180   :  { %v4285_v11 = vld [vmem:[%s6174_s0 + $0x470] ss:$12 sps:$4 sm:$0xff]  }
 0x181   :  { %2104 = vmatmul.mubr.bf16.gmra.mrb[160].mxu0 %v4279_v45  ;;  %3952 = vmatmul.mubr.msk.bf16.gmra.mrb[160].mxu1 %vm1534_vm0, %v4280_v46 }
 0x182   :  { %2111 = vmatprep.mubr.bf16.mxu0 %v4281_v3  ;;  %3955 = vmatprep.mubr.msk.bf16.mxu1 %vm1534_vm0, %v4283_v4  ;;  %v4286_v3 = vld [vmem:[%s6174_s0 + $0x3f4] ss:$12 sps:$4 sm:$0xff]  }
 0x184   :  { %v5111_v29 = vpop.f32.mrb[56].mxu0  ;;  %v5113_v30 = vpop.f32.mrb[56].mxu1 }
 0x185   :  { %6205 = vst [vmem:[#allocation30_spill] sm:$0xff] %v5113_v30  ;;  %v1899_v54 = vpop.f32.mrb[57].mxu0  ;;  %v2331_v28 = vpop.f32.mrb[57].mxu1 }
 0x186   :  { %v5121_v45 = vpop.f32.mrb[58].mxu0  ;;  %v5123_v46 = vpop.f32.mrb[58].mxu1  ;;  %v4288_v28 = vld [vmem:[%s6174_s0 + $0x488] ss:$12 sps:$4 sm:$0xff]  }
 0x187   :  { %6206 = vst [vmem:[#allocation31_spill] sm:$0xff] %v5123_v46  ;;  %v1902_v54 = vpop.f32.mrb[59].mxu0  ;;  %v2334_v4 = vpop.f32.mrb[59].mxu1 }
 0x188   :  { %v4290_v54 = vld [vmem:[%s6174_s0 + $0x4a0] ss:$12 sps:$4 sm:$0xff]  }
 0x189   :  { %2112 = vmatmul.mubr.bf16.gmra.mrb[164].mxu0 %v4284_v58  ;;  %3956 = vmatmul.mubr.msk.bf16.gmra.mrb[164].mxu1 %vm1534_vm0, %v4285_v11 }
 0x18a   :  { %2119 = vmatprep.mubr.bf16.mxu0 %v4286_v3  ;;  %3959 = vmatprep.mubr.msk.bf16.mxu1 %vm1534_vm0, %v4288_v28  ;;  %v4291_v3 = vld [vmem:[%s6174_s0 + $0x40c] ss:$12 sps:$4 sm:$0xff]  }
 0x18c   :  { %v5133_v12 = vpop.f32.mrb[60].mxu0  ;;  %v5135_v30 = vpop.f32.mrb[60].mxu1 }
 0x18d   :  { %6207 = vst [vmem:[#allocation32_spill] sm:$0xff] %v5135_v30  ;;  %v1907_v46 = vpop.f32.mrb[61].mxu0  ;;  %v2339_v40 = vpop.f32.mrb[61].mxu1 }
 0x18e   :  { %v5143_v58 = vpop.f32.mrb[62].mxu0  ;;  %v5145_v11 = vpop.f32.mrb[62].mxu1  ;;  %v4293_v40 = vld [vmem:[%s6174_s0 + $0x4b8] ss:$12 sps:$4 sm:$0xff]  }
 0x18f   :  { %6208 = vst [vmem:[#allocation33_spill] sm:$0xff] %v5145_v11  ;;  %v1910_v46 = vpop.f32.mrb[63].mxu0  ;;  %v2342_v28 = vpop.f32.mrb[63].mxu1 }
 0x190   :  { %v4295_v46 = vld [vmem:[%s6174_s0 + $0x4d0] ss:$12 sps:$4 sm:$0xff]  }
 0x191   :  { %2120 = vmatmul.mubr.bf16.gmra.mrb[168].mxu0 %v4289_v18  ;;  %3960 = vmatmul.mubr.msk.bf16.gmra.mrb[168].mxu1 %vm1534_vm0, %v4290_v54 }
 0x192   :  { %2127 = vmatprep.mubr.bf16.mxu0 %v4291_v3  ;;  %3963 = vmatprep.mubr.msk.bf16.mxu1 %vm1534_vm0, %v4293_v40  ;;  %v4296_v3 = vld [vmem:[%s6174_s0 + $0x424] ss:$12 sps:$4 sm:$0xff]  }
 0x194   :  { %v5155_v4 = vpop.f32.mrb[64].mxu0  ;;  %v5157_v30 = vpop.f32.mrb[64].mxu1 }
 0x195   :  { %6209 = vst [vmem:[#allocation34_spill] sm:$0xff] %v5157_v30  ;;  %v1915_v11 = vpop.f32.mrb[65].mxu0  ;;  %v2347_v0 = vpop.f32.mrb[65].mxu1 }
 0x196   :  { %v5165_v18 = vpop.f32.mrb[66].mxu0  ;;  %v5167_v54 = vpop.f32.mrb[66].mxu1  ;;  %v4298_v0 = vld [vmem:[%s6174_s0 + $0x4e8] ss:$12 sps:$4 sm:$0xff]  }
 0x197   :  { %6210 = vst [vmem:[#allocation35_spill] sm:$0xff] %v5167_v54  ;;  %v1918_v11 = vpop.f32.mrb[67].mxu0  ;;  %v2350_v40 = vpop.f32.mrb[67].mxu1 }
 0x198   :  { %v4300_v11 = vld [vmem:[%s6174_s0 + $0x500] ss:$12 sps:$4 sm:$0xff]  }
 0x199   :  { %2128 = vmatmul.mubr.bf16.gmra.mrb[172].mxu0 %v4294_v48  ;;  %3964 = vmatmul.mubr.msk.bf16.gmra.mrb[172].mxu1 %vm1534_vm0, %v4295_v46  ;;  %v5200_v40 = vld [vmem:[%s6175_s2] ss:$0 sm:$0xff] }
 0x19a   :  { %2135 = vmatprep.mubr.bf16.mxu0 %v4296_v3  ;;  %3967 = vmatprep.mubr.msk.bf16.mxu1 %vm1534_vm0, %v4298_v0  ;;  %v4301_v3 = vld [vmem:[%s6174_s0 + $0x43c] ss:$12 sps:$4 sm:$0xff]  }
 0x19c   :  { %v5177_v28 = vpop.f32.mrb[68].mxu0  ;;  %v5179_v30 = vpop.f32.mrb[68].mxu1 }
 0x19d   :  { %6211 = vst [vmem:[#allocation36_spill] sm:$0xff] %v5179_v30  ;;  %v1923_v54 = vpop.f32.mrb[69].mxu0  ;;  %v2355_v36 = vpop.f32.mrb[69].mxu1  ;;  %v1786_v30 = vadd.f32 %v5200_v40, %v4803_v1  ;;  %v1789_v1 = vadd.f32 %v5200_v40, %v4813_v7  ;;  %v1810_v7 = vadd.f32 %v5200_v40, %v4869_v37  ;;  %v4310_v37 = vld [vmem:[%s6174_s0 + $0x560] ss:$12 sps:$4 sm:$0xff]  }
 0x19e   :  { %v5187_v48 = vpop.f32.mrb[70].mxu0  ;;  %v5189_v46 = vpop.f32.mrb[70].mxu1  ;;  %v4303_v36 = vld [vmem:[%s6174_s0 + $0x518] ss:$12 sps:$4 sm:$0xff]  }
 0x19f   :  { %6212 = vst [vmem:[#allocation37_spill] sm:$0xff] %v5189_v46  ;;  %v1926_v54 = vpop.f32.mrb[71].mxu0  ;;  %v2358_v0 = vpop.f32.mrb[71].mxu1  ;;  %v1794_v46 = vadd.f32 %v5200_v40, %v4825_v13  ;;  %v4305_v13 = vld [vmem:[%s6174_s0 + $0x530] ss:$12 sps:$4 sm:$0xff]  }
 0x1a0   :  { %v1797_v0 = vadd.f32 %v5200_v40, %v4835_v19 }
 0x1a1   :  { %2136 = vmatmul.mubr.bf16.gmra.mrb[176].mxu0 %v4299_v22  ;;  %3968 = vmatmul.mubr.msk.bf16.gmra.mrb[176].mxu1 %vm1534_vm0, %v4300_v11  ;;  %v4304_v11 = vld [vmem:[%s6174_s0 + $0x438] ss:$12 sps:$4 sm:$0xff]  }
 0x1a2   :  { %2143 = vmatprep.mubr.bf16.mxu0 %v4301_v3  ;;  %3971 = vmatprep.mubr.msk.bf16.mxu1 %vm1534_vm0, %v4303_v36 }
 0x1a4   :  { %v5208_v10 = vpop.f32.mrb[72].mxu0  ;;  %v3865_v54 = vpop.f32.mrb[72].mxu1 }
 0x1a5   :  { %v5212_v60 = vadd.f32 %v3865_v54, %v1794_v46  ;;  %v1931_v22 = vpop.f32.mrb[73].mxu0  ;;  %v2394_v52 = vpop.f32.mrb[73].mxu1  ;;  %v4306_v46 = vld [vmem:[%s6174_s0 + $0x454] ss:$12 sps:$4 sm:$0xff]  }
 0x1a6   :  { %v5222_v3 = vadd.f32 %v2394_v52, %v1786_v30  ;;  %v5224_v36 = vpop.f32.mrb[74].mxu0  ;;  %v3866_v19 = vpop.f32.mrb[74].mxu1  ;;  %v4308_v54 = vld [vmem:[%s6174_s0 + $0x548] ss:$12 sps:$4 sm:$0xff]   ;;  %v1802_v52 = vadd.f32 %v5200_v40, %v4847_v25  ;;  %v1805_v25 = vadd.f32 %v5200_v40, %v4857_v31  ;;  %v1826_v31 = vadd.f32 %v5200_v40, %v4913_v61  ;;  %v4315_v61 = vld [vmem:[%s6174_s0 + $0x590] ss:$12 sps:$4 sm:$0xff]  }
 0x1a7   :  { %v5232_v22 = vadd.f32 %v3866_v19, %v1797_v0  ;;  %v1934_v24 = vpop.f32.mrb[75].mxu0  ;;  %v2397_v42 = vpop.f32.mrb[75].mxu1 }
 0x1a8   :  { %v5234_v16 = vadd.f32 %v2397_v42, %v1789_v1  ;;  %v1813_v24 = vadd.f32 %v5200_v40, %v4879_v43 }
 0x1a9   :  { %2144 = vmatmul.mubr.bf16.gmra.mrb[180].mxu0 %v4304_v11  ;;  %3972 = vmatmul.mubr.msk.bf16.gmra.mrb[180].mxu1 %vm1534_vm0, %v4305_v13  ;;  %v4309_v13 = vld [vmem:[%s6174_s0 + $0x450] ss:$12 sps:$4 sm:$0xff]   ;;  %v2972_v14 = vmax.f32 %v5232_v22, 0.0  ;;  %v1893_v22 = vadd.f32 %v5200_v40, %v5099_v53 }
 0x1aa   :  { %2151 = vmatprep.mubr.bf16.mxu0 %v4306_v46  ;;  %3975 = vmatprep.mubr.msk.bf16.mxu1 %vm1534_vm0, %v4308_v54  ;;  %v4311_v54 = vld [vmem:[%s6174_s0 + $0x46c] ss:$12 sps:$4 sm:$0xff]   ;;  %v4336_v53 = vld [vmem:[%s6174_s0 + $0x4e4] ss:$12 sps:$4 sm:$0xff]  }
 0x1ac   :  { %v5242_v30 = vpop.f32.mrb[76].mxu0  ;;  %v3869_v0 = vpop.f32.mrb[76].mxu1 }
 0x1ad   :  { %v5246_v42 = vadd.f32 %v3869_v0, %v1810_v7  ;;  %v1939_v11 = vpop.f32.mrb[77].mxu0  ;;  %v2410_v1 = vpop.f32.mrb[77].mxu1  ;;  %v4313_v7 = vld [vmem:[%s6174_s0 + $0x578] ss:$12 sps:$4 sm:$0xff]  }
 0x1ae   :  { %v5256_v19 = vadd.f32 %v2410_v1, %v1802_v52  ;;  %v5258_v46 = vpop.f32.mrb[78].mxu0  ;;  %v3870_v43 = vpop.f32.mrb[78].mxu1  ;;  %v1818_v52 = vadd.f32 %v5200_v40, %v4891_v49  ;;  %v1821_v49 = vadd.f32 %v5200_v40, %v4901_v55  ;;  %v1842_v55 = vadd.f32 %v5200_v40, %v4957_v33  ;;  %v4320_v33 = vld [vmem:[%s6174_s0 + $0x5c0] ss:$12 sps:$4 sm:$0xff]  }
 0x1af   :  { %v5266_v0 = vadd.f32 %v3870_v43, %v1813_v24  ;;  %v1942_v11 = vpop.f32.mrb[79].mxu0  ;;  %v2413_v34 = vpop.f32.mrb[79].mxu1  ;;  %v1829_v43 = vadd.f32 %v5200_v40, %v4923_v5 }
 0x1b0   :  { %v5268_v56 = vadd.f32 %v2413_v34, %v1805_v25  ;;  %v4316_v11 = vld [vmem:[%s6174_s0 + $0x484] ss:$12 sps:$4 sm:$0xff]  }
 0x1b1   :  { %2152 = vmatmul.mubr.bf16.gmra.mrb[184].mxu0 %v4309_v13  ;;  %3976 = vmatmul.mubr.msk.bf16.gmra.mrb[184].mxu1 %vm1534_vm0, %v4310_v37  ;;  %v4314_v37 = vld [vmem:[%s6174_s0 + $0x468] ss:$12 sps:$4 sm:$0xff]  }
 0x1b2   :  { %2159 = vmatprep.mubr.bf16.mxu0 %v4311_v54  ;;  %3979 = vmatprep.mubr.msk.bf16.mxu1 %vm1534_vm0, %v4313_v7 }
 0x1b4   :  { %v5276_v1 = vpop.f32.mrb[80].mxu0  ;;  %v3873_v24 = vpop.f32.mrb[80].mxu1 }
 0x1b5   :  { %v5280_v34 = vadd.f32 %v3873_v24, %v1826_v31  ;;  %v1947_v13 = vpop.f32.mrb[81].mxu0  ;;  %v2426_v25 = vpop.f32.mrb[81].mxu1  ;;  %v4318_v31 = vld [vmem:[%s6174_s0 + $0x5a8] ss:$12 sps:$4 sm:$0xff]  }
 0x1b6   :  { %v5290_v54 = vadd.f32 %v2426_v25, %v1818_v52  ;;  %v5292_v7 = vpop.f32.mrb[82].mxu0  ;;  %v3874_v5 = vpop.f32.mrb[82].mxu1  ;;  %v1834_v52 = vadd.f32 %v5200_v40, %v4935_v15  ;;  %v1837_v15 = vadd.f32 %v5200_v40, %v4945_v23  ;;  %v1858_v23 = vadd.f32 %v5200_v40, %v5001_v9  ;;  %v4325_v9 = vld [vmem:[%s6174_s0 + $0x5f0] ss:$12 sps:$4 sm:$0xff]  }
 0x1b7   :  { %v5300_v24 = vadd.f32 %v3874_v5, %v1829_v43  ;;  %v1950_v13 = vpop.f32.mrb[83].mxu0  ;;  %v2429_v6 = vpop.f32.mrb[83].mxu1  ;;  %v1845_v5 = vadd.f32 %v5200_v40, %v4967_v41 }
 0x1b8   :  { %v5302_v50 = vadd.f32 %v2429_v6, %v1821_v49  ;;  %v4321_v13 = vld [vmem:[%s6174_s0 + $0x49c] ss:$12 sps:$4 sm:$0xff]  }
 0x1b9   :  { %2160 = vmatmul.mubr.bf16.gmra.mrb[188].mxu0 %v4314_v37  ;;  %3980 = vmatmul.mubr.msk.bf16.gmra.mrb[188].mxu1 %vm1534_vm0, %v4315_v61  ;;  %v4319_v61 = vld [vmem:[%s6174_s0 + $0x480] ss:$12 sps:$4 sm:$0xff]  }
 0x1ba   :  { %2167 = vmatprep.mubr.bf16.mxu0 %v4316_v11  ;;  %3983 = vmatprep.mubr.msk.bf16.mxu1 %vm1534_vm0, %v4318_v31 }
 0x1bc   :  { %v5310_v25 = vpop.f32.mrb[84].mxu0  ;;  %v3877_v43 = vpop.f32.mrb[84].mxu1 }
 0x1bd   :  { %v5314_v6 = vadd.f32 %v3877_v43, %v1842_v55  ;;  %v1955_v37 = vpop.f32.mrb[85].mxu0  ;;  %v2442_v49 = vpop.f32.mrb[85].mxu1  ;;  %v4323_v55 = vld [vmem:[%s6174_s0 + $0x5d8] ss:$12 sps:$4 sm:$0xff]  }
 0x1be   :  { %v5324_v11 = vadd.f32 %v2442_v49, %v1834_v52  ;;  %v5326_v31 = vpop.f32.mrb[86].mxu0  ;;  %v3878_v41 = vpop.f32.mrb[86].mxu1  ;;  %v1850_v52 = vadd.f32 %v5200_v40, %v4979_v51  ;;  %v1853_v51 = vadd.f32 %v5200_v40, %v4989_v59 }
 0x1bf   :  { %v5334_v43 = vadd.f32 %v3878_v41, %v1845_v5  ;;  %v1958_v37 = vpop.f32.mrb[87].mxu0  ;;  %v2445_v62 = vpop.f32.mrb[87].mxu1  ;;  %v1861_v41 = vadd.f32 %v5200_v40, %v5011_v21  ;;  %v4326_v21 = vld [vmem:[%s6174_s0 + $0x4b4] ss:$12 sps:$4 sm:$0xff]  }
 0x1c0   :  { %v5336_v32 = vadd.f32 %v2445_v62, %v1837_v15 }
 0x1c1   :  { %2168 = vmatmul.mubr.bf16.gmra.mrb[192].mxu0 %v4319_v61  ;;  %3984 = vmatmul.mubr.msk.bf16.gmra.mrb[192].mxu1 %vm1534_vm0, %v4320_v33  ;;  %v4324_v33 = vld [vmem:[%s6174_s0 + $0x498] ss:$12 sps:$4 sm:$0xff]  }
 0x1c2   :  { %2175 = vmatprep.mubr.bf16.mxu0 %v4321_v13  ;;  %3987 = vmatprep.mubr.msk.bf16.mxu1 %vm1534_vm0, %v4323_v55 }
 0x1c4   :  { %v5344_v49 = vpop.f32.mrb[88].mxu0  ;;  %v3881_v5 = vpop.f32.mrb[88].mxu1 }
 0x1c5   :  { %v2467_v62 = vadd.f32 %v3881_v5, %v1858_v23  ;;  %v1963_v15 = vpop.f32.mrb[89].mxu0  ;;  %v2458_v61 = vpop.f32.mrb[89].mxu1  ;;  %v4328_v23 = vld [vmem:[%s6174_s0 + $0x608] ss:$12 sps:$4 sm:$0xff]   ;;  %v2969_v5 = vmax.f32 %v5222_v3, 0.0  ;;  %v1874_v3 = vadd.f32 %v5200_v40, %v5045_v63 }
 0x1c6   :  { %v5356_v13 = vadd.f32 %v2458_v61, %v1850_v52  ;;  %v5358_v55 = vpop.f32.mrb[90].mxu0  ;;  %v3882_v37 = vpop.f32.mrb[90].mxu1  ;;  %v2970_v52 = vmax.f32 %v5234_v16, 0.0 }
 0x1c7   :  { %v2987_v15 = vmax.f32 %v2467_v62, 0.0  ;;  %v2470_v44 = vadd.f32 %v3882_v37, %v1861_v41  ;;  %v1966_v26 = vpop.f32.mrb[91].mxu0  ;;  %v2461_v38 = vpop.f32.mrb[91].mxu1 }
 0x1c8   :  { %v5367_v59 = vadd.f32 %v2461_v38, %v1853_v51  ;;  %v1866_v26 = vadd.f32 %v5200_v40, %v5023_v35  ;;  %v4329_v51 = vld [vmem:[%s6174_s0 + $0x4b0] ss:$12 sps:$4 sm:$0xff]   ;;  %v1869_v35 = vadd.f32 %v5200_v40, %v5033_v47  ;;  %v2971_v47 = vmax.f32 %v5212_v60, 0.0 }
 0x1c9   :  { %v5370_v61 = vmax.f32 %v2969_v5, %v2987_v15  ;;  %v2988_v8 = vmax.f32 %v2470_v44, 0.0  ;;  %2176 = vmatmul.mubr.bf16.gmra.mrb[196].mxu0 %v4324_v33  ;;  %3988 = vmatmul.mubr.msk.bf16.gmra.mrb[196].mxu1 %vm1534_vm0, %v4325_v9  ;;  %v1877_v44 = vadd.f32 %v5200_v40, %v5055_v17  ;;  %v4331_v17 = vld [vmem:[%s6174_s0 + $0x4cc] ss:$12 sps:$4 sm:$0xff]   ;;  %v2973_v5 = vmax.f32 %v5256_v19, 0.0 }
 0x1ca   :  { %2183 = vmatprep.mubr.bf16.mxu0 %v4326_v21  ;;  %3991 = vmatprep.mubr.msk.bf16.mxu1 %vm1534_vm0, %v4328_v23  ;;  %v4333_v23 = vld [vmem:[%s6174_s0 + $0x638] ss:$12 sps:$4 sm:$0xff]   ;;  %v1890_v60 = vadd.f32 %v5200_v40, %v5089_v27  ;;  %v4334_v27 = vld [vmem:[%s6174_s0 + $0x4c8] ss:$12 sps:$4 sm:$0xff]  }
 0x1cb   :  { %v5376_v62 = vmax.f32 %v2970_v52, %v2988_v8  ;;  %v4330_v8 = vld [vmem:[%s6174_s0 + $0x620] ss:$12 sps:$4 sm:$0xff]  }
 0x1cc   :  { %v5380_v38 = vpop.f32.mrb[92].mxu0  ;;  %v3885_v16 = vpop.f32.mrb[92].mxu1 }
 0x1cd   :  { %6213 = vst [vmem:[#allocation38_spill] sm:$0xff] %v5376_v62  ;;  %v2483_v41 = vadd.f32 %v3885_v16, %v1874_v3  ;;  %v1971_v33 = vpop.f32.mrb[93].mxu0  ;;  %v2474_v9 = vpop.f32.mrb[93].mxu1 }
 0x1ce   :  { %v2475_v63 = vadd.f32 %v2474_v9, %v1866_v26  ;;  %v5392_v37 = vpop.f32.mrb[94].mxu0  ;;  %v3886_v21 = vpop.f32.mrb[94].mxu1  ;;  %v2974_v9 = vmax.f32 %v5268_v56, 0.0  ;;  %v1882_v56 = vadd.f32 %v5200_v40, %v5067_v39 }
 0x1cf   :  { %v2991_v15 = vmax.f32 %v2483_v41, 0.0  ;;  %v2486_v52 = vadd.f32 %v3886_v21, %v1877_v44  ;;  %v1974_v3 = vpop.f32.mrb[95].mxu0  ;;  %v2477_v16 = vpop.f32.mrb[95].mxu1 }
 0x1d0   :  { %v2989_v26 = vmax.f32 %v2475_v63, 0.0  ;;  %v2478_v33 = vadd.f32 %v2477_v16, %v1869_v35 }
 0x1d1   :  { %v5403_v20 = vmax.f32 %v2973_v5, %v2991_v15  ;;  %v2992_v2 = vmax.f32 %v2486_v52, 0.0  ;;  %2184 = vmatmul.mubr.bf16.gmra.mrb[200].mxu0 %v4329_v51  ;;  %3992 = vmatmul.mubr.msk.bf16.gmra.mrb[200].mxu1 %vm1534_vm0, %v4330_v8  ;;  %v4338_v5 = vld [vmem:[%s6174_s0 + $0x668] ss:$12 sps:$4 sm:$0xff]   ;;  %v2977_v15 = vmax.f32 %v5290_v54, 0.0 }
 0x1d2   :  { %v5407_v62 = vmax.f32 %v2971_v47, %v2989_v26  ;;  %v2990_v19 = vmax.f32 %v2478_v33, 0.0  ;;  %2191 = vmatprep.mubr.bf16.mxu0 %v4331_v17  ;;  %3995 = vmatprep.mubr.msk.bf16.mxu1 %vm1534_vm0, %v4333_v23 }
 0x1d3   :  { %v5412_v44 = vmax.f32 %v2974_v9, %v2992_v2  ;;  %v4335_v2 = vld [vmem:[%s6174_s0 + $0x650] ss:$12 sps:$4 sm:$0xff]   ;;  %v2978_v9 = vmax.f32 %v5302_v50, 0.0  ;;  %v1898_v50 = vadd.f32 %v5200_v40, %v5111_v29  ;;  %v1901_v29 = vadd.f32 %v5200_v40, %v5121_v45 }
 0x1d4   :  { %v5416_v41 = vmax.f32 %v2972_v14, %v2990_v19  ;;  %v5418_v51 = vpop.f32.mrb[96].mxu0  ;;  %v3889_v8 = vpop.f32.mrb[96].mxu1  ;;  %v1885_v14 = vadd.f32 %v5200_v40, %v5077_v57  ;;  %v2975_v57 = vmax.f32 %v5246_v42, 0.0  ;;  %v1906_v42 = vadd.f32 %v5200_v40, %v5133_v12  ;;  %v4339_v12 = vld [vmem:[%s6174_s0 + $0x4e0] ss:$12 sps:$4 sm:$0xff]  }
 0x1d5   :  { %v2499_v35 = vadd.f32 %v3889_v8, %v1890_v60  ;;  %v1979_v63 = vpop.f32.mrb[97].mxu0  ;;  %v2490_v21 = vpop.f32.mrb[97].mxu1  ;;  %v2979_v45 = vmax.f32 %v5280_v34, 0.0  ;;  %v1922_v34 = vadd.f32 %v5200_v40, %v5177_v28  ;;  %v4344_v28 = vld [vmem:[%s6174_s0 + $0x4f8] ss:$12 sps:$4 sm:$0xff]  }
 0x1d6   :  { %v2491_v39 = vadd.f32 %v2490_v21, %v1882_v56  ;;  %v5430_v17 = vpop.f32.mrb[98].mxu0  ;;  %v3890_v23 = vpop.f32.mrb[98].mxu1  ;;  %v2976_v56 = vmax.f32 %v5266_v0, 0.0  ;;  %v1909_v0 = vadd.f32 %v5200_v40, %v5143_v58  ;;  %v4341_v58 = vld [vmem:[%s6174_s0 + $0x4fc] ss:$12 sps:$4 sm:$0xff]  }
 0x1d7   :  { %v2995_v52 = vmax.f32 %v2499_v35, 0.0  ;;  %v2502_v3 = vadd.f32 %v3890_v23, %v1893_v22  ;;  %v1982_v16 = vpop.f32.mrb[99].mxu0  ;;  %v2493_v47 = vpop.f32.mrb[99].mxu1 }
 0x1d8   :  { %v2993_v26 = vmax.f32 %v2491_v39, 0.0  ;;  %v2494_v33 = vadd.f32 %v2493_v47, %v1885_v14  ;;  %v4340_v39 = vld [vmem:[%s6174_s0 + $0x680] ss:$12 sps:$4 sm:$0xff]  }
 0x1d9   :  { %v5441_v19 = vmax.f32 %v2977_v15, %v2995_v52  ;;  %v2996_v60 = vmax.f32 %v2502_v3, 0.0  ;;  %2192 = vmatmul.mubr.bf16.gmra.mrb[204].mxu0 %v4334_v27  ;;  %3996 = vmatmul.mubr.msk.bf16.gmra.mrb[204].mxu1 %vm1534_vm0, %v4335_v2  ;;  %v4343_v15 = vld [vmem:[%s6174_s0 + $0x698] ss:$12 sps:$4 sm:$0xff]   ;;  %v2981_v52 = vmax.f32 %v5324_v11, 0.0 }
 0x1da   :  { %v5445_v8 = vmax.f32 %v2975_v57, %v2993_v26  ;;  %v2994_v54 = vmax.f32 %v2494_v33, 0.0  ;;  %2199 = vmatprep.mubr.bf16.mxu0 %v4336_v53  ;;  %3999 = vmatprep.mubr.msk.bf16.mxu1 %vm1534_vm0, %v4338_v5 }
 0x1db   :  { %v5450_v22 = vmax.f32 %v2978_v9, %v2996_v60  ;;  %v2982_v9 = vmax.f32 %v5336_v32, 0.0  ;;  %v1914_v32 = vadd.f32 %v5200_v40, %v5155_v4  ;;  %v1917_v4 = vadd.f32 %v5200_v40, %v5165_v18 }
 0x1dc   :  { %v5454_v35 = vmax.f32 %v2976_v56, %v2994_v54  ;;  %v5456_v63 = vpop.f32.mrb[100].mxu0  ;;  %v3893_v21 = vpop.f32.mrb[100].mxu1  ;;  %v2980_v54 = vmax.f32 %v5300_v24, 0.0  ;;  %v1925_v24 = vadd.f32 %v5200_v40, %v5187_v48  ;;  %v2985_v48 = vmax.f32 %v5356_v13, 0.0 }
 0x1dd   :  { %v2515_v27 = vadd.f32 %v3893_v21, %v1906_v42  ;;  %v1987_v2 = vpop.f32.mrb[101].mxu0  ;;  %v2506_v14 = vpop.f32.mrb[101].mxu1  ;;  %v2984_v18 = vmax.f32 %v5334_v43, 0.0 }
 0x1de   :  { %v2507_v23 = vadd.f32 %v2506_v14, %v1898_v50  ;;  %v5468_v53 = vpop.f32.mrb[102].mxu0  ;;  %v3894_v5 = vpop.f32.mrb[102].mxu1 }
 0x1df   :  { %v2999_v3 = vmax.f32 %v2515_v27, 0.0  ;;  %v2518_v16 = vadd.f32 %v3894_v5, %v1909_v0  ;;  %v1990_v47 = vpop.f32.mrb[103].mxu0  ;;  %v2509_v57 = vpop.f32.mrb[103].mxu1 }
 0x1e0   :  { %v2997_v26 = vmax.f32 %v2507_v23, 0.0  ;;  %v2510_v33 = vadd.f32 %v2509_v57, %v1901_v29 }
 0x1e1   :  { %v5479_v60 = vmax.f32 %v2981_v52, %v2999_v3  ;;  %v3000_v56 = vmax.f32 %v2518_v16, 0.0  ;;  %2200 = vmatmul.mubr.bf16.gmra.mrb[208].mxu0 %v4339_v12  ;;  %4000 = vmatmul.mubr.msk.bf16.gmra.mrb[208].mxu1 %vm1534_vm0, %v4340_v39  ;;  %v4345_v39 = vld [vmem:[%s6174_s0 + $0x6b0] ss:$12 sps:$4 sm:$0xff]   ;;  %v2983_v16 = vmax.f32 %v5314_v6, 0.0  ;;  %v1930_v6 = vadd.f32 %v5200_v40, %v5208_v10 }
 0x1e2   :  { %v5483_v42 = vmax.f32 %v2979_v45, %v2997_v26  ;;  %v2998_v11 = vmax.f32 %v2510_v33, 0.0  ;;  %2207 = vmatprep.mubr.bf16.mxu0 %v4341_v58  ;;  %4003 = vmatprep.mubr.msk.bf16.mxu1 %vm1534_vm0, %v4343_v15  ;;  %v2986_v45 = vmax.f32 %v5367_v59, 0.0 }
 0x1e3   :  { %v5488_v50 = vmax.f32 %v2982_v9, %v3000_v56  ;;  %v1938_v56 = vadd.f32 %v5200_v40, %v5242_v30 }
 0x1e4   :  { %v5492_v21 = vmax.f32 %v2980_v54, %v2998_v11  ;;  %v5494_v0 = vpop.f32.mrb[104].mxu0  ;;  %v3897_v27 = vpop.f32.mrb[104].mxu1 }
 0x1e5   :  { %v2531_v2 = vadd.f32 %v3897_v27, %v1922_v34  ;;  %v1995_v14 = vpop.f32.mrb[105].mxu0  ;;  %v2522_v12 = vpop.f32.mrb[105].mxu1 }
 0x1e6   :  { %v2523_v29 = vadd.f32 %v2522_v12, %v1914_v32  ;;  %v5506_v23 = vpop.f32.mrb[106].mxu0  ;;  %v3898_v5 = vpop.f32.mrb[106].mxu1  ;;  %v1941_v32 = vadd.f32 %v5200_v40, %v5258_v46  ;;  %v1954_v46 = vadd.f32 %v5200_v40, %v5310_v25 }
 0x1e7   :  { %v3003_v58 = vmax.f32 %v2531_v2, 0.0  ;;  %v2534_v15 = vadd.f32 %v3898_v5, %v1925_v24  ;;  %v1998_v52 = vpop.f32.mrb[107].mxu0  ;;  %v2525_v3 = vpop.f32.mrb[107].mxu1  ;;  %v1933_v2 = vadd.f32 %v5200_v40, %v5224_v36  ;;  %v1957_v36 = vadd.f32 %v5200_v40, %v5326_v31 }
 0x1e8   :  { %v3001_v47 = vmax.f32 %v2523_v29, 0.0  ;;  %v2526_v57 = vadd.f32 %v2525_v3, %v1917_v4  ;;  %v1946_v29 = vadd.f32 %v5200_v40, %v5276_v1  ;;  %v1949_v3 = vadd.f32 %v5200_v40, %v5292_v7 }
 0x1e9   :  { %v5511_v26 = vmax.f32 %v2985_v48, %v3003_v58  ;;  %v3004_v33 = vmax.f32 %v2534_v15, 0.0  ;;  %2208 = vmatmul.mubr.bf16.gmra.mrb[212].mxu0 %v4344_v28  ;;  %4004 = vmatmul.mubr.msk.bf16.gmra.mrb[212].mxu1 %vm1534_vm0, %v4345_v39  ;;  %v1970_v31 = vadd.f32 %v5200_v40, %v5380_v38  ;;  %v1973_v7 = vadd.f32 %v5200_v40, %v5392_v37 }
 0x1ea   :  { %v5515_v9 = vmax.f32 %v2983_v16, %v3001_v47  ;;  %v3002_v13 = vmax.f32 %v2526_v57, 0.0  ;;  %v1986_v37 = vadd.f32 %v5200_v40, %v5456_v63 }
 0x1eb   :  { %v5519_v54 = vmax.f32 %v2986_v45, %v3004_v33 }
 0x1ec   :  { %v5523_v59 = vmax.f32 %v2984_v18, %v3002_v13  ;;  %v2001_v11 = vpop.f32.mrb[108].mxu0  ;;  %v3901_v34 = vpop.f32.mrb[108].mxu1  ;;  %v1962_v18 = vadd.f32 %v5200_v40, %v5344_v49 }
 0x1ed   :  { %v5527_v27 = vadd.f32 %v3901_v34, %v1938_v56  ;;  %v2003_v43 = vpop.f32.mrb[109].mxu0  ;;  %v2538_v24 = vpop.f32.mrb[109].mxu1 }
 0x1ee   :  { %v5531_v30 = vadd.f32 %v2538_v24, %v1930_v6  ;;  %v2004_v14 = vpop.f32.mrb[110].mxu0  ;;  %v3902_v12 = vpop.f32.mrb[110].mxu1  ;;  %v1965_v43 = vadd.f32 %v5200_v40, %v5358_v55  ;;  %v1989_v55 = vadd.f32 %v5200_v40, %v5468_v53  ;;  %v2002_v53 = vadd.f32 %v5200_v40, %v2001_v11 }
 0x1ef   :  { %v5533_v28 = vadd.f32 %v3902_v12, %v1941_v32  ;;  %v2006_v10 = vpop.f32.mrb[111].mxu0  ;;  %v2541_v39 = vpop.f32.mrb[111].mxu1 }
 0x1f0   :  { %v5535_v4 = vadd.f32 %v2541_v39, %v1933_v2 }
 0x1f4   :  { %v5541_v5 = vpop.f32.mrb[112].mxu0  ;;  %v3905_v48 = vpop.f32.mrb[112].mxu1 }
 0x1f5   :  { %v5545_v58 = vadd.f32 %v3905_v48, %v1954_v46  ;;  %v2011_v15 = vpop.f32.mrb[113].mxu0  ;;  %v2554_v52 = vpop.f32.mrb[113].mxu1  ;;  %v1978_v46 = vadd.f32 %v5200_v40, %v5418_v51 }
 0x1f6   :  { %v5549_v16 = vadd.f32 %v2554_v52, %v1946_v29  ;;  %v5551_v47 = vpop.f32.mrb[114].mxu0  ;;  %v3906_v25 = vpop.f32.mrb[114].mxu1 }
 0x1f7   :  { %v5553_v57 = vadd.f32 %v3906_v25, %v1957_v36  ;;  %v2014_v1 = vpop.f32.mrb[115].mxu0  ;;  %v2557_v45 = vpop.f32.mrb[115].mxu1 }
 0x1f8   :  { %v5555_v33 = vadd.f32 %v2557_v45, %v1949_v3  ;;  %v1981_v3 = vadd.f32 %v5200_v40, %v5430_v17  ;;  %v2005_v17 = vadd.f32 %v5200_v40, %v2004_v14  ;;  %v3006_v14 = vmax.f32 %v5535_v4, 0.0 }
 0x1fc   :  { %v2017_v13 = vpop.f32.mrb[116].mxu0  ;;  %v3909_v56 = vpop.f32.mrb[116].mxu1 }
 0x1fd   :  { %v5563_v6 = vadd.f32 %v3909_v56, %v1970_v31  ;;  %v2019_v34 = vpop.f32.mrb[117].mxu0  ;;  %v2570_v32 = vpop.f32.mrb[117].mxu1  ;;  %v1994_v56 = vadd.f32 %v5200_v40, %v5494_v0 }
 0x1fe   :  { %v5567_v24 = vadd.f32 %v2570_v32, %v1962_v18  ;;  %v2020_v2 = vpop.f32.mrb[118].mxu0  ;;  %v3910_v12 = vpop.f32.mrb[118].mxu1 }
 0x1ff   :  { %v5569_v38 = vadd.f32 %v3910_v12, %v1973_v7  ;;  %v2022_v10 = vpop.f32.mrb[119].mxu0  ;;  %v2573_v49 = vpop.f32.mrb[119].mxu1 }
 0x200   :  { %v5571_v39 = vadd.f32 %v2573_v49, %v1965_v43  ;;  %v1997_v10 = vadd.f32 %v5200_v40, %v5506_v23 }
 0x204   :  { %v5577_v29 = vpop.f32.mrb[120].mxu0  ;;  %v3913_v48 = vpop.f32.mrb[120].mxu1 }
 0x205   :  { %v5581_v36 = vadd.f32 %v3913_v48, %v1986_v37  ;;  %v2027_v15 = vpop.f32.mrb[121].mxu0  ;;  %v2586_v52 = vpop.f32.mrb[121].mxu1  ;;  %v3005_v48 = vmax.f32 %v5531_v30, 0.0 }
 0x206   :  { %v5585_v25 = vadd.f32 %v2586_v52, %v1978_v46  ;;  %v5587_v1 = vpop.f32.mrb[122].mxu0  ;;  %v3914_v63 = vpop.f32.mrb[122].mxu1 }
 0x207   :  { %v5589_v45 = vadd.f32 %v3914_v63, %v1989_v55  ;;  %v2030_v51 = vpop.f32.mrb[123].mxu0  ;;  %v2589_v31 = vpop.f32.mrb[123].mxu1 }
 0x208   :  { %v5591_v18 = vadd.f32 %v2589_v31, %v1981_v3  ;;  %v2018_v51 = vadd.f32 %v5200_v40, %v2017_v13  ;;  %v2013_v13 = vadd.f32 %v5200_v40, %v5551_v47 }
 0x20c   :  { %v2033_v7 = vpop.f32.mrb[124].mxu0  ;;  %v3917_v34 = vpop.f32.mrb[124].mxu1 }
 0x20d   :  { %v2611_v32 = vadd.f32 %v3917_v34, %v2002_v53  ;;  %v2035_v43 = vpop.f32.mrb[125].mxu0  ;;  %v2602_v12 = vpop.f32.mrb[125].mxu1  ;;  %v2010_v53 = vadd.f32 %v5200_v40, %v5541_v5  ;;  %v2021_v34 = vadd.f32 %v5200_v40, %v2020_v2  ;;  %v3009_v5 = vmax.f32 %v5549_v16, 0.0 }
 0x20e   :  { %v5599_v49 = vadd.f32 %v2602_v12, %v1994_v56  ;;  %v2036_v37 = vpop.f32.mrb[126].mxu0  ;;  %v3918_v46 = vpop.f32.mrb[126].mxu1 }
 0x20f   :  { %v3023_v11 = vmax.f32 %v2611_v32, 0.0  ;;  %v2614_v55 = vadd.f32 %v3918_v46, %v2005_v17  ;;  %v2038_v15 = vpop.f32.mrb[127].mxu0  ;;  %v2605_v0 = vpop.f32.mrb[127].mxu1  ;;  %v6214_v32 = vld [vmem:[#allocation38_spill] sm:$0xff] }
 0x210   :  { %v5602_v52 = vadd.f32 %v2605_v0, %v1997_v10 }
 0x211   :  { %v3149_v3 = vmax.f32 %v3005_v48, %v3023_v11  ;;  %v3024_v63 = vmax.f32 %v2614_v55, 0.0 }
 0x213   :  { %v3185_v23 = vmax.f32 %v5370_v61, %v3149_v3  ;;  %v3150_v31 = vmax.f32 %v3006_v14, %v3024_v63  ;;  %v3007_v14 = vmax.f32 %v5527_v27, 0.0  ;;  %v3010_v63 = vmax.f32 %v5555_v33, 0.0 }
 0x214   :  { %v5609_v30 = vpop.f32.mrb[128].mxu0  ;;  %v3921_v56 = vpop.f32.mrb[128].mxu1 }
 0x215   :  { %v3749_v17 = vpack.c.bf16 %v3185_v23, %v3185_v23  ;;  %v3186_v43 = vmax.f32 %v6214_v32, %v3150_v31  ;;  %v2627_v4 = vadd.f32 %v3921_v56, %v2018_v51  ;;  %v2043_v12 = vpop.f32.mrb[129].mxu0  ;;  %v2618_v10 = vpop.f32.mrb[129].mxu1  ;;  %v3008_v23 = vmax.f32 %v5533_v28, 0.0 }
 0x216   :  { %v2619_v61 = vadd.f32 %v2618_v10, %v2010_v53  ;;  %v5615_v46 = vpop.f32.mrb[130].mxu0  ;;  %v3922_v48 = vpop.f32.mrb[130].mxu1  ;;  %v2034_v56 = vadd.f32 %v5200_v40, %v2033_v7  ;;  %v2037_v12 = vadd.f32 %v5200_v40, %v2036_v37 }
 0x217   :  { %3366 = vst.msk [vmem:[%s6176_s3] sm:$0xf] %vm3365_vm1, %v3749_v17  ;;  %v3750_v2 = vpack.c.bf16 %v3186_v43, %v3186_v43  ;;  %v3027_v11 = vmax.f32 %v2627_v4, 0.0  ;;  %v2630_v55 = vadd.f32 %v3922_v48, %v2021_v34  ;;  %v2046_v15 = vpop.f32.mrb[131].mxu0  ;;  %v2621_v0 = vpop.f32.mrb[131].mxu1  ;;  %v2026_v17 = vadd.f32 %v5200_v40, %v5577_v29 }
 0x218   :  { %v3025_v3 = vmax.f32 %v2619_v61, 0.0  ;;  %v2622_v47 = vadd.f32 %v2621_v0, %v2013_v13 }
 0x219   :  { %3367 = vst.msk [vmem:[%s6176_s3 + $0x4] sm:$0xf] %vm3365_vm1, %v3750_v2  ;;  %v3153_v16 = vmax.f32 %v3009_v5, %v3027_v11  ;;  %v3028_v51 = vmax.f32 %v2630_v55, 0.0  ;;  %v3013_v11 = vmax.f32 %v5567_v24, 0.0 }
 0x21a   :  { %v3151_v31 = vmax.f32 %v3007_v14, %v3025_v3  ;;  %v3026_v53 = vmax.f32 %v2622_v47, 0.0  ;;  %v3014_v3 = vmax.f32 %v5571_v39, 0.0 }
 0x21b   :  { %v3189_v34 = vmax.f32 %v5403_v20, %v3153_v16  ;;  %v3154_v27 = vmax.f32 %v3010_v63, %v3028_v51  ;;  %v2029_v20 = vadd.f32 %v5200_v40, %v5587_v1  ;;  %v3011_v1 = vmax.f32 %v5545_v58, 0.0 }
 0x21c   :  { %v3187_v33 = vmax.f32 %v5407_v62, %v3151_v31  ;;  %v3152_v32 = vmax.f32 %v3008_v23, %v3026_v53  ;;  %v2049_v43 = vpop.f32.mrb[132].mxu0  ;;  %v3925_v4 = vpop.f32.mrb[132].mxu1  ;;  %v3012_v16 = vmax.f32 %v5553_v57, 0.0  ;;  %v2042_v53 = vadd.f32 %v5200_v40, %v5609_v30 }
 0x21d   :  { %v3753_v10 = vpack.c.bf16 %v3189_v34, %v3189_v34  ;;  %v3190_v28 = vmax.f32 %v5412_v44, %v3154_v27  ;;  %v2643_v13 = vadd.f32 %v3925_v4, %v2034_v56  ;;  %v2051_v61 = vpop.f32.mrb[133].mxu0  ;;  %v2634_v48 = vpop.f32.mrb[133].mxu1  ;;  %v2050_v23 = vadd.f32 %v5200_v40, %v2049_v43 }
 0x21e   :  { %v3751_v7 = vpack.c.bf16 %v3187_v33, %v3187_v33  ;;  %v3188_v5 = vmax.f32 %v5416_v41, %v3152_v32  ;;  %v2635_v29 = vadd.f32 %v2634_v48, %v2026_v17  ;;  %v2052_v2 = vpop.f32.mrb[134].mxu0  ;;  %v3926_v62 = vpop.f32.mrb[134].mxu1  ;;  %v3017_v61 = vmax.f32 %v5585_v25, 0.0 }
 0x21f   :  { %3370 = vst.msk [vmem:[%s6176_s3 + $0x10] sm:$0xf] %vm3365_vm1, %v3753_v10  ;;  %v3754_v44 = vpack.c.bf16 %v3190_v28, %v3190_v28  ;;  %v3031_v37 = vmax.f32 %v2643_v13, 0.0  ;;  %v2646_v55 = vadd.f32 %v3926_v62, %v2037_v12  ;;  %v2054_v15 = vpop.f32.mrb[135].mxu0  ;;  %v2637_v0 = vpop.f32.mrb[135].mxu1  ;;  %v2053_v33 = vadd.f32 %v5200_v40, %v2052_v2 }
 0x220   :  { %3368 = vst.msk [vmem:[%s6176_s3 + $0x8] sm:$0xf] %vm3365_vm1, %v3751_v7  ;;  %v3752_v41 = vpack.c.bf16 %v3188_v5, %v3188_v5  ;;  %v3029_v14 = vmax.f32 %v2635_v29, 0.0  ;;  %v2638_v24 = vadd.f32 %v2637_v0, %v2029_v20  ;;  %v3018_v2 = vmax.f32 %v5591_v18, 0.0 }
 0x221   :  { %3371 = vst.msk [vmem:[%s6176_s3 + $0x14] sm:$0xf] %vm3365_vm1, %v3754_v44  ;;  %v3157_v47 = vmax.f32 %v3013_v11, %v3031_v37  ;;  %v3032_v63 = vmax.f32 %v2646_v55, 0.0  ;;  %v3016_v44 = vmax.f32 %v5569_v38, 0.0 }
 0x222   :  { %3369 = vst.msk [vmem:[%s6176_s3 + $0xc] sm:$0xf] %vm3365_vm1, %v3752_v41  ;;  %v3155_v58 = vmax.f32 %v3011_v1, %v3029_v14  ;;  %v3030_v51 = vmax.f32 %v2638_v24, 0.0 }
 0x223   :  { %v3193_v39 = vmax.f32 %v5441_v19, %v3157_v47  ;;  %v3158_v31 = vmax.f32 %v3014_v3, %v3032_v63  ;;  %v2045_v19 = vadd.f32 %v5200_v40, %v5615_v46  ;;  %v3015_v46 = vmax.f32 %v5563_v6, 0.0 }
 0x224   :  { %v3191_v56 = vmax.f32 %v5445_v8, %v3155_v58  ;;  %v3156_v34 = vmax.f32 %v3012_v16, %v3030_v51  ;;  %v2057_v27 = vpop.f32.mrb[136].mxu0  ;;  %v3929_v57 = vpop.f32.mrb[136].mxu1 }
 0x225   :  { %v3757_v17 = vpack.c.bf16 %v3193_v39, %v3193_v39  ;;  %v3194_v32 = vmax.f32 %v5450_v22, %v3158_v31  ;;  %v2659_v4 = vadd.f32 %v3929_v57, %v2050_v23  ;;  %v2059_v12 = vpop.f32.mrb[137].mxu0  ;;  %v2650_v10 = vpop.f32.mrb[137].mxu1  ;;  %v2058_v18 = vadd.f32 %v5200_v40, %v2057_v27 }
 0x226   :  { %v3755_v43 = vpack.c.bf16 %v3191_v56, %v3191_v56  ;;  %v3192_v28 = vmax.f32 %v5454_v35, %v3156_v34  ;;  %v2651_v30 = vadd.f32 %v2650_v10, %v2042_v53  ;;  %v2060_v13 = vpop.f32.mrb[138].mxu0  ;;  %v3930_v8 = vpop.f32.mrb[138].mxu1  ;;  %v3019_v34 = vmax.f32 %v5581_v36, 0.0 }
 0x227   :  { %3374 = vst.msk [vmem:[%s6176_s3 + $0x20] sm:$0xf] %vm3365_vm1, %v3757_v17  ;;  %v3758_v22 = vpack.c.bf16 %v3194_v32, %v3194_v32  ;;  %v3035_v48 = vmax.f32 %v2659_v4, 0.0  ;;  %v2662_v20 = vadd.f32 %v3930_v8, %v2053_v33  ;;  %v2062_v7 = vpop.f32.mrb[139].mxu0  ;;  %v2653_v5 = vpop.f32.mrb[139].mxu1  ;;  %v2061_v58 = vadd.f32 %v5200_v40, %v2060_v13 }
 0x228   :  { %3372 = vst.msk [vmem:[%s6176_s3 + $0x18] sm:$0xf] %vm3365_vm1, %v3755_v43  ;;  %v3756_v35 = vpack.c.bf16 %v3192_v28, %v3192_v28  ;;  %v3033_v29 = vmax.f32 %v2651_v30, 0.0  ;;  %v2654_v25 = vadd.f32 %v2653_v5, %v2045_v19  ;;  %v3021_v17 = vmax.f32 %v5599_v49, 0.0 }
 0x229   :  { %3375 = vst.msk [vmem:[%s6176_s3 + $0x24] sm:$0xf] %vm3365_vm1, %v3758_v22  ;;  %v3161_v62 = vmax.f32 %v3017_v61, %v3035_v48  ;;  %v3036_v11 = vmax.f32 %v2662_v20, 0.0  ;;  %v3020_v32 = vmax.f32 %v5589_v45, 0.0  ;;  %v3022_v12 = vmax.f32 %v5602_v52, 0.0 }
 0x22a   :  { %3373 = vst.msk [vmem:[%s6176_s3 + $0x1c] sm:$0xf] %vm3365_vm1, %v3756_v35  ;;  %v3159_v6 = vmax.f32 %v3015_v46, %v3033_v29  ;;  %v3034_v37 = vmax.f32 %v2654_v25, 0.0  ;;  %v5722_v45 = vld [vmem:[%s6175_s2] ss:$0 sm:$0xff] }
 0x22b   :  { %v3197_v55 = vmax.f32 %v5479_v60, %v3161_v62  ;;  %v3162_v15 = vmax.f32 %v3018_v2, %v3036_v11 }
 0x22c   :  { %v3195_v0 = vmax.f32 %v5483_v42, %v3159_v6  ;;  %v3160_v1 = vmax.f32 %v3016_v44, %v3034_v37  ;;  %v2065_v41 = vpop.f32.mrb[140].mxu0  ;;  %v3933_v14 = vpop.f32.mrb[140].mxu1 }
 0x22d   :  { %v3761_v24 = vpack.c.bf16 %v3197_v55, %v3197_v55  ;;  %v3198_v38 = vmax.f32 %v5488_v50, %v3162_v15  ;;  %v2066_v3 = vadd.f32 %v5200_v40, %v2065_v41  ;;  %v2067_v47 = vpop.f32.mrb[141].mxu0  ;;  %v2666_v63 = vpop.f32.mrb[141].mxu1 }
 0x22e   :  { %v3759_v16 = vpack.c.bf16 %v3195_v0, %v3195_v0  ;;  %v3196_v60 = vmax.f32 %v5492_v21, %v3160_v1  ;;  %v2667_v51 = vadd.f32 %v2666_v63, %v2058_v18  ;;  %v2068_v23 = vpop.f32.mrb[142].mxu0  ;;  %v3934_v39 = vpop.f32.mrb[142].mxu1 }
 0x22f   :  { %3378 = vst.msk [vmem:[%s6176_s3 + $0x30] sm:$0xf] %vm3365_vm1, %v3761_v24  ;;  %v3762_v42 = vpack.c.bf16 %v3198_v38, %v3198_v38  ;;  %v2675_v31 = vadd.f32 %v3933_v14, %v2066_v3  ;;  %v2069_v50 = vadd.f32 %v5200_v40, %v2068_v23  ;;  %v2070_v53 = vpop.f32.mrb[143].mxu0  ;;  %v2669_v56 = vpop.f32.mrb[143].mxu1 }
 0x230   :  { %3376 = vst.msk [vmem:[%s6176_s3 + $0x28] sm:$0xf] %vm3365_vm1, %v3759_v16  ;;  %v3760_v21 = vpack.c.bf16 %v3196_v60, %v3196_v60  ;;  %v3037_v27 = vmax.f32 %v2667_v51, 0.0  ;;  %v2670_v57 = vadd.f32 %v2669_v56, %v2061_v58 }
 0x231   :  { %3379 = vst.msk [vmem:[%s6176_s3 + $0x34] sm:$0xf] %vm3365_vm1, %v3762_v42  ;;  %v3039_v40 = vmax.f32 %v2675_v31, 0.0  ;;  %v2678_v33 = vadd.f32 %v3934_v39, %v2069_v50 }
 0x232   :  { %3377 = vst.msk [vmem:[%s6176_s3 + $0x2c] sm:$0xf] %vm3365_vm1, %v3760_v21  ;;  %v3163_v36 = vmax.f32 %v3019_v34, %v3037_v27  ;;  %v3038_v4 = vmax.f32 %v2670_v57, 0.0 }
 0x233   :  { %v3165_v10 = vmax.f32 %v3021_v17, %v3039_v40  ;;  %v3040_v49 = vmax.f32 %v2678_v33, 0.0 }
 0x234   :  { %v3199_v19 = vmax.f32 %v5515_v9, %v3163_v36  ;;  %v3164_v43 = vmax.f32 %v3020_v32, %v3038_v4  ;;  %v2073_v28 = vpop.f32.mrb[144].mxu0  ;;  %v3937_v30 = vpop.f32.mrb[144].mxu1 }
 0x235   :  { %v3201_v13 = vmax.f32 %v5511_v26, %v3165_v10  ;;  %v3166_v8 = vmax.f32 %v3022_v12, %v3040_v49  ;;  %v2074_v61 = vadd.f32 %v5722_v45, %v2073_v28  ;;  %v2075_v22 = vpop.f32.mrb[145].mxu0  ;;  %v2682_v48 = vpop.f32.mrb[145].mxu1 }
 0x236   :  { %v3763_v52 = vpack.c.bf16 %v3199_v19, %v3199_v19  ;;  %v3200_v20 = vmax.f32 %v5523_v59, %v3164_v43  ;;  %v2076_v7 = vpop.f32.mrb[146].mxu0  ;;  %v3938_v9 = vpop.f32.mrb[146].mxu1 }
 0x237   :  { %v3765_v5 = vpack.c.bf16 %v3201_v13, %v3201_v13  ;;  %v3202_v46 = vmax.f32 %v5519_v54, %v3166_v8  ;;  %v5727_v35 = vadd.f32 %v2682_v48, %v2074_v61  ;;  %v2077_v26 = vadd.f32 %v5722_v45, %v2076_v7  ;;  %v2078_v29 = vpop.f32.mrb[147].mxu0  ;;  %v2685_v25 = vpop.f32.mrb[147].mxu1 }
 0x238   :  { %3380 = vst.msk [vmem:[%s6176_s3 + $0x38] sm:$0xf] %vm3365_vm1, %v3763_v52  ;;  %v3764_v2 = vpack.c.bf16 %v3200_v20, %v3200_v20 }
 0x239   :  { %3382 = vst.msk [vmem:[%s6176_s3 + $0x40] sm:$0xf] %vm3365_vm1, %v3765_v5  ;;  %v3766_v59 = vpack.c.bf16 %v3202_v46, %v3202_v46  ;;  %v5738_v62 = vadd.f32 %v2685_v25, %v2077_v26 }
 0x23a   :  { %3381 = vst.msk [vmem:[%s6176_s3 + $0x3c] sm:$0xf] %vm3365_vm1, %v3764_v2 }
 0x23b   :  { %3383 = vst.msk [vmem:[%s6176_s3 + $0x44] sm:$0xf] %vm3365_vm1, %v3766_v59 }
 0x23c   :  { %v2081_v54 = vpop.f32.mrb[148].mxu0  ;;  %v3941_v11 = vpop.f32.mrb[148].mxu1 }
 0x23d   :  { %v2082_v44 = vadd.f32 %v5722_v45, %v2081_v54  ;;  %v2083_v6 = vpop.f32.mrb[149].mxu0  ;;  %v2698_v37 = vpop.f32.mrb[149].mxu1 }
 0x23e   :  { %v2084_v55 = vpop.f32.mrb[150].mxu0  ;;  %v3942_v15 = vpop.f32.mrb[150].mxu1 }
 0x23f   :  { %v5749_v18 = vadd.f32 %v3937_v30, %v2082_v44  ;;  %v2085_v0 = vadd.f32 %v5722_v45, %v2084_v55  ;;  %v2086_v1 = vpop.f32.mrb[151].mxu0  ;;  %v2701_v41 = vpop.f32.mrb[151].mxu1 }
 0x241   :  { %v5752_v14 = vadd.f32 %v3938_v9, %v2085_v0 }
 0x244   :  { %v2089_v24 = vpop.f32.mrb[152].mxu0  ;;  %v3945_v38 = vpop.f32.mrb[152].mxu1 }
 0x245   :  { %v2090_v3 = vadd.f32 %v5722_v45, %v2089_v24  ;;  %v2091_v47 = vpop.f32.mrb[153].mxu0  ;;  %v2714_v63 = vpop.f32.mrb[153].mxu1 }
 0x246   :  { %v2092_v16 = vpop.f32.mrb[154].mxu0  ;;  %v3946_v58 = vpop.f32.mrb[154].mxu1 }
 0x247   :  { %v5755_v60 = vadd.f32 %v2698_v37, %v2090_v3  ;;  %v2093_v51 = vadd.f32 %v5722_v45, %v2092_v16  ;;  %v2094_v23 = vpop.f32.mrb[155].mxu0  ;;  %v2717_v39 = vpop.f32.mrb[155].mxu1 }
 0x249   :  { %v5758_v42 = vadd.f32 %v2701_v41, %v2093_v51 }
 0x24c   :  { %v2097_v31 = vpop.f32.mrb[156].mxu0  ;;  %v3949_v50 = vpop.f32.mrb[156].mxu1 }
 0x24d   :  { %v2098_v53 = vadd.f32 %v5722_v45, %v2097_v31  ;;  %v2099_v56 = vpop.f32.mrb[157].mxu0  ;;  %v2730_v34 = vpop.f32.mrb[157].mxu1 }
 0x24e   :  { %v2100_v21 = vpop.f32.mrb[158].mxu0  ;;  %v3950_v27 = vpop.f32.mrb[158].mxu1 }
 0x24f   :  { %v5761_v57 = vadd.f32 %v3941_v11, %v2098_v53  ;;  %v2101_v17 = vadd.f32 %v5722_v45, %v2100_v21  ;;  %v2102_v40 = vpop.f32.mrb[159].mxu0  ;;  %v2733_v33 = vpop.f32.mrb[159].mxu1 }
 0x251   :  { %v5764_v32 = vadd.f32 %v3942_v15, %v2101_v17 }
 0x254   :  { %v2105_v36 = vpop.f32.mrb[160].mxu0  ;;  %v5766_v4 = vpop.f32.mrb[160].mxu1 }
 0x255   :  { %v2106_v12 = vadd.f32 %v5722_v45, %v2105_v36  ;;  %v2107_v10 = vpop.f32.mrb[161].mxu0  ;;  %v2746_v49 = vpop.f32.mrb[161].mxu1 }
 0x256   :  { %v2108_v19 = vpop.f32.mrb[162].mxu0  ;;  %v5769_v43 = vpop.f32.mrb[162].mxu1 }
 0x257   :  { %v5771_v28 = vadd.f32 %v2714_v63, %v2106_v12  ;;  %v2109_v30 = vadd.f32 %v5722_v45, %v2108_v19  ;;  %v2110_v13 = vpop.f32.mrb[163].mxu0  ;;  %v2749_v8 = vpop.f32.mrb[163].mxu1 }
 0x258   :  { %v6221_v13 = vld [vmem:[#allocation4_spill] sm:$0xff] }
 0x259   :  { %v5774_v61 = vadd.f32 %v2717_v39, %v2109_v30 }
 0x25c   :  { %v2113_v22 = vpop.f32.mrb[164].mxu0  ;;  %v5776_v48 = vpop.f32.mrb[164].mxu1 }
 0x25d   :  { %v2114_v52 = vadd.f32 %v5722_v45, %v2113_v22  ;;  %v2115_v20 = vpop.f32.mrb[165].mxu0  ;;  %v5779_v7 = vpop.f32.mrb[165].mxu1  ;;  %v2226_v22 = vadd.f32 %v5722_v45, %v6221_v13 }
 0x25e   :  { %v2116_v9 = vpop.f32.mrb[166].mxu0  ;;  %v5781_v5 = vpop.f32.mrb[166].mxu1 }
 0x25f   :  { %v5783_v46 = vadd.f32 %v3945_v38, %v2114_v52  ;;  %v2117_v26 = vadd.f32 %v5722_v45, %v2116_v9  ;;  %v2118_v29 = vpop.f32.mrb[167].mxu0  ;;  %v5786_v25 = vpop.f32.mrb[167].mxu1  ;;  %v6222_v52 = vld [vmem:[#allocation2_spill] sm:$0xff] }
 0x260   :  { %v2218_v20 = vadd.f32 %v5722_v45, %v6222_v52  ;;  %v6223_v29 = vld [vmem:[#allocation5_spill] sm:$0xff] }
 0x261   :  { %v5788_v2 = vadd.f32 %v3946_v58, %v2117_v26 }
 0x264   :  { %v2121_v59 = vpop.f32.mrb[168].mxu0  ;;  %v5790_v54 = vpop.f32.mrb[168].mxu1 }
 0x265   :  { %v2122_v11 = vadd.f32 %v5722_v45, %v2121_v59  ;;  %v2123_v44 = vpop.f32.mrb[169].mxu0  ;;  %v5793_v6 = vpop.f32.mrb[169].mxu1  ;;  %v2229_v59 = vadd.f32 %v5722_v45, %v6223_v29 }
 0x266   :  { %v2124_v37 = vpop.f32.mrb[170].mxu0  ;;  %v5795_v55 = vpop.f32.mrb[170].mxu1 }
 0x267   :  { %v5797_v15 = vadd.f32 %v2730_v34, %v2122_v11  ;;  %v2125_v0 = vadd.f32 %v5722_v45, %v2124_v37  ;;  %v2126_v1 = vpop.f32.mrb[171].mxu0  ;;  %v5800_v41 = vpop.f32.mrb[171].mxu1 }
 0x269   :  { %v5802_v24 = vadd.f32 %v2733_v33, %v2125_v0  ;;  %v6224_v0 = vld [vmem:[#allocation3_spill] sm:$0xff] }
 0x26c   :  { %v2129_v38 = vpop.f32.mrb[172].mxu0  ;;  %v5804_v3 = vpop.f32.mrb[172].mxu1 }
 0x26d   :  { %v2130_v47 = vadd.f32 %v5722_v45, %v2129_v38  ;;  %v2131_v63 = vpop.f32.mrb[173].mxu0  ;;  %v5807_v16 = vpop.f32.mrb[173].mxu1 }
 0x26e   :  { %v2132_v58 = vpop.f32.mrb[174].mxu0  ;;  %v5809_v51 = vpop.f32.mrb[174].mxu1 }
 0x26f   :  { %v5811_v23 = vadd.f32 %v3949_v50, %v2130_v47  ;;  %v2133_v39 = vadd.f32 %v5722_v45, %v2132_v58  ;;  %v2134_v31 = vpop.f32.mrb[175].mxu0  ;;  %v5814_v53 = vpop.f32.mrb[175].mxu1 }
 0x271   :  { %v5816_v56 = vadd.f32 %v3950_v27, %v2133_v39 }
 0x274   :  { %v2137_v34 = vpop.f32.mrb[176].mxu0  ;;  %v5818_v21 = vpop.f32.mrb[176].mxu1 }
 0x275   :  { %6215 = vst [vmem:[#allocation38_spill] sm:$0xff] %v5818_v21  ;;  %v2138_v17 = vadd.f32 %v5722_v45, %v2137_v34  ;;  %v2139_v40 = vpop.f32.mrb[177].mxu0  ;;  %v5821_v33 = vpop.f32.mrb[177].mxu1  ;;  %v6254_v21 = vld [vmem:[#allocation31_spill] sm:$0xff] }
 0x276   :  { %6216 = vst [vmem:[#allocation39_spill] sm:$0xff] %v5821_v33  ;;  %v2140_v36 = vpop.f32.mrb[178].mxu0  ;;  %v5823_v12 = vpop.f32.mrb[178].mxu1  ;;  %v3041_v40 = vmax.f32 %v5727_v35, 0.0  ;;  %v6260_v33 = vld [vmem:[#allocation34_spill] sm:$0xff] }
 0x277   :  { %6217 = vst [vmem:[#allocation40_spill] sm:$0xff] %v5823_v12  ;;  %v5825_v50 = vadd.f32 %v2746_v49, %v2138_v17  ;;  %v2141_v10 = vadd.f32 %v5722_v45, %v2140_v36  ;;  %v2142_v19 = vpop.f32.mrb[179].mxu0  ;;  %v5828_v30 = vpop.f32.mrb[179].mxu1  ;;  %v6252_v12 = vld [vmem:[#allocation30_spill] sm:$0xff] }
 0x278   :  { %6219 = vst [vmem:[#allocation42_spill] sm:$0xff] %v5828_v30  ;;  %v6225_v19 = vld [vmem:[#allocation8_spill] sm:$0xff] }
 0x279   :  { %6218 = vst [vmem:[#allocation41_spill] sm:$0xff] %v5825_v50  ;;  %v5830_v27 = vadd.f32 %v2749_v8, %v2141_v10  ;;  %v2221_v8 = vadd.f32 %v5722_v45, %v6224_v0  ;;  %v2242_v13 = vadd.f32 %v5722_v45, %v6225_v19  ;;  %v3043_v19 = vmax.f32 %v5749_v18, 0.0 }
 0x27b   :  { %6220 = vst [vmem:[#allocation43_spill] sm:$0xff] %v5830_v27 }
 0x27c   :  { %v2145_v9 = vpop.f32.mrb[180].mxu0  ;;  %v3973_v26 = vpop.f32.mrb[180].mxu1 }
 0x27d   :  { %v2146_v49 = vadd.f32 %v5722_v45, %v2145_v9  ;;  %v5839_v11 = vadd.f32 %v3973_v26, %v2226_v22  ;;  %v2147_v44 = vpop.f32.mrb[181].mxu0  ;;  %v2826_v37 = vpop.f32.mrb[181].mxu1  ;;  %v3042_v22 = vmax.f32 %v5738_v62, 0.0  ;;  %v6228_v62 = vld [vmem:[#allocation7_spill] sm:$0xff] }
 0x27e   :  { %v5843_v1 = vadd.f32 %v2826_v37, %v2218_v20  ;;  %v2148_v38 = vpop.f32.mrb[182].mxu0  ;;  %v3974_v47 = vpop.f32.mrb[182].mxu1  ;;  %v6226_v20 = vld [vmem:[#allocation6_spill] sm:$0xff] }
 0x27f   :  { %v2755_v63 = vadd.f32 %v5766_v4, %v2146_v49  ;;  %v2149_v58 = vadd.f32 %v5722_v45, %v2148_v38  ;;  %v5847_v39 = vadd.f32 %v3974_v47, %v2229_v59  ;;  %v2150_v31 = vpop.f32.mrb[183].mxu0  ;;  %v2829_v34 = vpop.f32.mrb[183].mxu1  ;;  %v2234_v9 = vadd.f32 %v5722_v45, %v6226_v20  ;;  %v6227_v59 = vld [vmem:[#allocation9_spill] sm:$0xff] }
 0x280   :  { %v5849_v17 = vadd.f32 %v2829_v34, %v2221_v8  ;;  %v2245_v49 = vadd.f32 %v5722_v45, %v6227_v59  ;;  %v2237_v8 = vadd.f32 %v5722_v45, %v6228_v62 }
 0x281   :  { %v3059_v36 = vmax.f32 %v2755_v63, 0.0  ;;  %v2758_v10 = vadd.f32 %v5769_v43, %v2149_v58 }
 0x283   :  { %v5856_v52 = vmax.f32 %v3041_v40, %v3059_v36  ;;  %v3060_v4 = vmax.f32 %v2758_v10, 0.0 }
 0x284   :  { %v2153_v26 = vpop.f32.mrb[184].mxu0  ;;  %v3977_v29 = vpop.f32.mrb[184].mxu1 }
 0x285   :  { %v5862_v35 = vmax.f32 %v3042_v22, %v3060_v4  ;;  %v2154_v43 = vadd.f32 %v5722_v45, %v2153_v26  ;;  %v5865_v44 = vadd.f32 %v3977_v29, %v2242_v13  ;;  %v2155_v37 = vpop.f32.mrb[185].mxu0  ;;  %v2842_v0 = vpop.f32.mrb[185].mxu1  ;;  %v6229_v4 = vld [vmem:[#allocation12_spill] sm:$0xff]  ;;  %v6230_v29 = vld [vmem:[#allocation10_spill] sm:$0xff] }
 0x286   :  { %v5869_v38 = vadd.f32 %v2842_v0, %v2234_v9  ;;  %v2156_v47 = vpop.f32.mrb[186].mxu0  ;;  %v3978_v63 = vpop.f32.mrb[186].mxu1  ;;  %v2258_v20 = vadd.f32 %v5722_v45, %v6229_v4  ;;  %v3044_v9 = vmax.f32 %v5752_v14, 0.0  ;;  %v2250_v59 = vadd.f32 %v5722_v45, %v6230_v29  ;;  %v6231_v37 = vld [vmem:[#allocation13_spill] sm:$0xff]  ;;  %v6232_v14 = vld [vmem:[#allocation11_spill] sm:$0xff] }
 0x287   :  { %v2763_v58 = vadd.f32 %v5779_v7, %v2154_v43  ;;  %v2157_v31 = vadd.f32 %v5722_v45, %v2156_v47  ;;  %v5873_v34 = vadd.f32 %v3978_v63, %v2245_v49  ;;  %v2158_v40 = vpop.f32.mrb[187].mxu0  ;;  %v2845_v36 = vpop.f32.mrb[187].mxu1  ;;  %v2261_v0 = vadd.f32 %v5722_v45, %v6231_v37 }
 0x288   :  { %v5875_v10 = vadd.f32 %v2845_v36, %v2237_v8  ;;  %v2253_v63 = vadd.f32 %v5722_v45, %v6232_v14  ;;  %v6236_v14 = vld [vmem:[#allocation17_spill] sm:$0xff] }
 0x289   :  { %v3061_v13 = vmax.f32 %v2763_v58, 0.0  ;;  %v2766_v22 = vadd.f32 %v5786_v25, %v2157_v31 }
 0x28b   :  { %v5882_v26 = vmax.f32 %v3043_v19, %v3061_v13  ;;  %v3062_v7 = vmax.f32 %v2766_v22, 0.0 }
 0x28c   :  { %v2161_v49 = vpop.f32.mrb[188].mxu0  ;;  %v3981_v43 = vpop.f32.mrb[188].mxu1 }
 0x28d   :  { %v5888_v18 = vmax.f32 %v3044_v9, %v3062_v7  ;;  %v2162_v25 = vadd.f32 %v5722_v45, %v2161_v49  ;;  %v5891_v62 = vadd.f32 %v3981_v43, %v2258_v20  ;;  %v2163_v8 = vpop.f32.mrb[189].mxu0  ;;  %v2858_v47 = vpop.f32.mrb[189].mxu1  ;;  %v3045_v20 = vmax.f32 %v5755_v60, 0.0  ;;  %v6234_v49 = vld [vmem:[#allocation16_spill] sm:$0xff] }
 0x28e   :  { %v5895_v58 = vadd.f32 %v2858_v47, %v2250_v59  ;;  %v2164_v31 = vpop.f32.mrb[190].mxu0  ;;  %v3982_v40 = vpop.f32.mrb[190].mxu1  ;;  %v2274_v59 = vadd.f32 %v5722_v45, %v6234_v49  ;;  %v3046_v43 = vmax.f32 %v5758_v42, 0.0  ;;  %v6238_v42 = vld [vmem:[#allocation15_spill] sm:$0xff] }
 0x28f   :  { %v2771_v36 = vadd.f32 %v5776_v48, %v2162_v25  ;;  %v2165_v19 = vadd.f32 %v5722_v45, %v2164_v31  ;;  %v5899_v13 = vadd.f32 %v3982_v40, %v2261_v0  ;;  %v2166_v22 = vpop.f32.mrb[191].mxu0  ;;  %v2861_v4 = vpop.f32.mrb[191].mxu1  ;;  %v6235_v25 = vld [vmem:[#allocation14_spill] sm:$0xff]  ;;  %v6240_v49 = vld [vmem:[#allocation19_spill] sm:$0xff] }
 0x290   :  { %v5901_v9 = vadd.f32 %v2861_v4, %v2253_v63  ;;  %v2266_v0 = vadd.f32 %v5722_v45, %v6235_v25  ;;  %v2277_v63 = vadd.f32 %v5722_v45, %v6236_v14  ;;  %v6239_v22 = vld [vmem:[#allocation18_spill] sm:$0xff]  ;;  %v6242_v14 = vld [vmem:[#allocation20_spill] sm:$0xff] }
 0x291   :  { %6233 = vst [vmem:[#allocation4_spill] sm:$0xff] %v5899_v13  ;;  %v3063_v7 = vmax.f32 %v2771_v36, 0.0  ;;  %v2774_v29 = vadd.f32 %v5781_v5, %v2165_v19  ;;  %v2269_v19 = vadd.f32 %v5722_v45, %v6238_v42  ;;  %v2282_v4 = vadd.f32 %v5722_v45, %v6239_v22  ;;  %v6243_v42 = vld [vmem:[#allocation21_spill] sm:$0xff] }
 0x293   :  { %v5908_v37 = vmax.f32 %v3045_v20, %v3063_v7  ;;  %v3064_v48 = vmax.f32 %v2774_v29, 0.0 }
 0x294   :  { %v2169_v8 = vpop.f32.mrb[192].mxu0  ;;  %v3985_v47 = vpop.f32.mrb[192].mxu1 }
 0x295   :  { %v5914_v60 = vmax.f32 %v3046_v43, %v3064_v48  ;;  %v2170_v5 = vadd.f32 %v5722_v45, %v2169_v8  ;;  %v5917_v31 = vadd.f32 %v3985_v47, %v2274_v59  ;;  %v2171_v40 = vpop.f32.mrb[193].mxu0  ;;  %v2874_v36 = vpop.f32.mrb[193].mxu1  ;;  %v2285_v43 = vadd.f32 %v5722_v45, %v6240_v49  ;;  %v6245_v49 = vld [vmem:[#allocation23_spill] sm:$0xff] }
 0x296   :  { %v5923_v20 = vadd.f32 %v2874_v36, %v2266_v0  ;;  %v2172_v7 = vpop.f32.mrb[194].mxu0  ;;  %v3986_v29 = vpop.f32.mrb[194].mxu1  ;;  %v2290_v40 = vadd.f32 %v5722_v45, %v6242_v14  ;;  %v2293_v0 = vadd.f32 %v5722_v45, %v6243_v42  ;;  %v6244_v36 = vld [vmem:[#allocation22_spill] sm:$0xff]  ;;  %v6247_v14 = vld [vmem:[#allocation25_spill] sm:$0xff] }
 0x297   :  { %6237 = vst [vmem:[#allocation2_spill] sm:$0xff] %v5917_v31  ;;  %v2779_v48 = vadd.f32 %v5793_v6, %v2170_v5  ;;  %v2173_v59 = vadd.f32 %v5722_v45, %v2172_v7  ;;  %v5929_v25 = vadd.f32 %v3986_v29, %v2277_v63  ;;  %v2174_v8 = vpop.f32.mrb[195].mxu0  ;;  %v2877_v47 = vpop.f32.mrb[195].mxu1  ;;  %v5937_v22 = vadd.f32 %v5722_v45, %v6244_v36  ;;  %v6246_v29 = vld [vmem:[#allocation24_spill] sm:$0xff]  ;;  %v6248_v36 = vld [vmem:[#allocation26_spill] sm:$0xff] }
 0x298   :  { %v5939_v27 = vadd.f32 %v2877_v47, %v2269_v19  ;;  %v5943_v6 = vadd.f32 %v5722_v45, %v6245_v49  ;;  %v3047_v63 = vmax.f32 %v5761_v57, 0.0  ;;  %v2306_v8 = vadd.f32 %v5722_v45, %v6246_v29  ;;  %v6249_v47 = vld [vmem:[#allocation27_spill] sm:$0xff]  ;;  %v6251_v29 = vld [vmem:[#allocation29_spill] sm:$0xff]  ;;  %v6256_v31 = vld [vmem:[#allocation32_spill] sm:$0xff] }
 0x299   :  { %6241 = vst [vmem:[#allocation5_spill] sm:$0xff] %v5929_v25  ;;  %v3065_v5 = vmax.f32 %v2779_v48, 0.0  ;;  %v2782_v7 = vadd.f32 %v5800_v41, %v2173_v59  ;;  %v5951_v42 = vadd.f32 %v5722_v45, %v6247_v14  ;;  %v5955_v19 = vadd.f32 %v5722_v45, %v6248_v36  ;;  %v6250_v25 = vld [vmem:[#allocation28_spill] sm:$0xff] }
 0x29a   :  { %v5959_v49 = vadd.f32 %v5722_v45, %v6249_v47  ;;  %v5963_v57 = vadd.f32 %v5722_v45, %v6250_v25  ;;  %v3048_v41 = vmax.f32 %v5764_v32, 0.0  ;;  %v5970_v14 = vadd.f32 %v5722_v45, %v6251_v29 }
 0x29b   :  { %v5966_v48 = vmax.f32 %v3047_v63, %v3065_v5  ;;  %v3066_v59 = vmax.f32 %v2782_v7, 0.0  ;;  %v5974_v36 = vadd.f32 %v5722_v45, %v6252_v12  ;;  %v5978_v47 = vadd.f32 %v5722_v45, %v6254_v21  ;;  %v6258_v5 = vld [vmem:[#allocation33_spill] sm:$0xff] }
 0x29c   :  { %v5982_v25 = vadd.f32 %v5722_v45, %v6256_v31  ;;  %v2177_v32 = vpop.f32.mrb[196].mxu0  ;;  %v3989_v63 = vpop.f32.mrb[196].mxu1  ;;  %v5986_v7 = vadd.f32 %v5722_v45, %v6258_v5  ;;  %v5993_v21 = vadd.f32 %v5722_v45, %v6260_v33  ;;  %v6264_v33 = vld [vmem:[#allocation36_spill] sm:$0xff] }
 0x29d   :  { %6253 = vst [vmem:[#allocation3_spill] sm:$0xff] %v5974_v36  ;;  %6255 = vst [vmem:[#allocation8_spill] sm:$0xff] %v5978_v47  ;;  %v5988_v29 = vmax.f32 %v3048_v41, %v3066_v59  ;;  %v2178_v13 = vadd.f32 %v5722_v45, %v2177_v32  ;;  %v2899_v12 = vadd.f32 %v3989_v63, %v2290_v40  ;;  %v2179_v50 = vpop.f32.mrb[197].mxu0  ;;  %v2890_v30 = vpop.f32.mrb[197].mxu1  ;;  %v6262_v47 = vld [vmem:[#allocation35_spill] sm:$0xff]  ;;  %v3077_v36 = vmax.f32 %v5843_v1, 0.0 }
 0x29e   :  { %6257 = vst [vmem:[#allocation6_spill] sm:$0xff] %v5982_v25  ;;  %6259 = vst [vmem:[#allocation9_spill] sm:$0xff] %v5986_v7  ;;  %v5997_v31 = vadd.f32 %v5722_v45, %v6262_v47  ;;  %v6000_v25 = vadd.f32 %v2890_v30, %v2282_v4  ;;  %v2180_v5 = vpop.f32.mrb[198].mxu0  ;;  %v3990_v41 = vpop.f32.mrb[198].mxu1  ;;  %v3049_v47 = vmax.f32 %v5771_v28, 0.0  ;;  %v3078_v1 = vmax.f32 %v5849_v17, 0.0 }
 0x29f   :  { %6261 = vst [vmem:[#allocation7_spill] sm:$0xff] %v5993_v21  ;;  %v2787_v59 = vadd.f32 %v5790_v54, %v2178_v13  ;;  %v3095_v32 = vmax.f32 %v2899_v12, 0.0  ;;  %v2181_v50 = vadd.f32 %v5722_v45, %v2180_v5  ;;  %v2902_v40 = vadd.f32 %v3990_v41, %v2293_v0  ;;  %v2182_v63 = vpop.f32.mrb[199].mxu0  ;;  %v2893_v7 = vpop.f32.mrb[199].mxu1  ;;  %v6265_v12 = vld [vmem:[#allocation37_spill] sm:$0xff] }
 0x2a0   :  { %6263 = vst [vmem:[#allocation12_spill] sm:$0xff] %v5997_v31  ;;  %v6006_v21 = vadd.f32 %v5722_v45, %v6264_v33  ;;  %v6010_v30 = vadd.f32 %v2893_v7, %v2285_v43  ;;  %v6015_v0 = vadd.f32 %v5722_v45, %v6265_v12  ;;  %v3050_v5 = vmax.f32 %v5774_v61, 0.0 }
 0x2a1   :  { %v3067_v4 = vmax.f32 %v2787_v59, 0.0  ;;  %v3167_v31 = vmax.f32 %v3077_v36, %v3095_v32  ;;  %v2790_v54 = vadd.f32 %v5795_v55, %v2181_v50  ;;  %v3096_v13 = vmax.f32 %v2902_v40, 0.0 }
 0x2a2   :  { %v3051_v41 = vmax.f32 %v5783_v46, 0.0  ;;  %v3052_v63 = vmax.f32 %v5788_v2, 0.0  ;;  %v3053_v36 = vmax.f32 %v5797_v15, 0.0  ;;  %v3054_v55 = vmax.f32 %v5802_v24, 0.0  ;;  %v6268_v24 = vld [vmem:[#allocation39_spill] sm:$0xff] }
 0x2a3   :  { %v6020_v28 = vmax.f32 %v3049_v47, %v3067_v4  ;;  %v3203_v17 = vmax.f32 %v5856_v52, %v3167_v31  ;;  %v3068_v43 = vmax.f32 %v2790_v54, 0.0  ;;  %v3168_v7 = vmax.f32 %v3078_v1, %v3096_v13 }
 0x2a4   :  { %v3055_v59 = vmax.f32 %v5811_v23, 0.0  ;;  %v3056_v32 = vmax.f32 %v5816_v56, 0.0  ;;  %v2185_v50 = vpop.f32.mrb[200].mxu0  ;;  %v3993_v61 = vpop.f32.mrb[200].mxu1  ;;  %v3079_v47 = vmax.f32 %v5839_v11, 0.0  ;;  %v3080_v1 = vmax.f32 %v5847_v39, 0.0 }
 0x2a5   :  { %v3767_v40 = vpack.c.bf16 %v3203_v17, %v3203_v17  ;;  %v6027_v46 = vmax.f32 %v3050_v5, %v3068_v43  ;;  %v3204_v2 = vmax.f32 %v5862_v35, %v3168_v7  ;;  %v2186_v33 = vadd.f32 %v5722_v45, %v2185_v50  ;;  %v2187_v52 = vpop.f32.mrb[201].mxu0  ;;  %v2906_v31 = vpop.f32.mrb[201].mxu1 }
 0x2a6   :  { %v2915_v4 = vadd.f32 %v3993_v61, %v2306_v8  ;;  %v2907_v54 = vadd.f32 %v2906_v31, %v5937_v22  ;;  %v2188_v13 = vpop.f32.mrb[202].mxu0  ;;  %v3994_v12 = vpop.f32.mrb[202].mxu1  ;;  %v3081_v39 = vmax.f32 %v5869_v38, 0.0  ;;  %v3082_v61 = vmax.f32 %v5875_v10, 0.0 }
 0x2a7   :  { %3384 = vst.msk [vmem:[%s6176_s3 + $0x48] sm:$0xf] %vm3365_vm1, %v3767_v40  ;;  %v3768_v5 = vpack.c.bf16 %v3204_v2, %v3204_v2  ;;  %v2795_v35 = vadd.f32 %v5807_v16, %v2186_v33  ;;  %v2189_v17 = vadd.f32 %v5722_v45, %v2188_v13  ;;  %v2918_v43 = vadd.f32 %v3994_v12, %v5951_v42  ;;  %v2190_v11 = vpop.f32.mrb[203].mxu0  ;;  %v2909_v7 = vpop.f32.mrb[203].mxu1 }
 0x2a8   :  { %v3099_v8 = vmax.f32 %v2915_v4, 0.0  ;;  %v3097_v22 = vmax.f32 %v2907_v54, 0.0  ;;  %v2910_v50 = vadd.f32 %v2909_v7, %v5943_v6  ;;  %v3083_v42 = vmax.f32 %v5865_v44, 0.0 }
 0x2a9   :  { %3385 = vst.msk [vmem:[%s6176_s3 + $0x4c] sm:$0xf] %vm3365_vm1, %v3768_v5  ;;  %v3069_v16 = vmax.f32 %v2795_v35, 0.0  ;;  %v2798_v40 = vadd.f32 %v5814_v53, %v2189_v17  ;;  %v3100_v2 = vmax.f32 %v2918_v43, 0.0  ;;  %v3084_v31 = vmax.f32 %v5873_v34, 0.0 }
 0x2aa   :  { %v3171_v33 = vmax.f32 %v3081_v39, %v3099_v8  ;;  %v3169_v52 = vmax.f32 %v3079_v47, %v3097_v22  ;;  %v3098_v38 = vmax.f32 %v2910_v50, 0.0  ;;  %v3085_v54 = vmax.f32 %v5895_v58, 0.0 }
 0x2ab   :  { %v6051_v4 = vmax.f32 %v3051_v41, %v3069_v16  ;;  %v3070_v6 = vmax.f32 %v2798_v40, 0.0  ;;  %v3172_v10 = vmax.f32 %v3082_v61, %v3100_v2  ;;  %v3087_v61 = vmax.f32 %v5891_v62, 0.0 }
 0x2ac   :  { %v3207_v13 = vmax.f32 %v5908_v37, %v3171_v33  ;;  %v3205_v12 = vmax.f32 %v5882_v26, %v3169_v52  ;;  %v3170_v5 = vmax.f32 %v3080_v1, %v3098_v38  ;;  %v2193_v53 = vpop.f32.mrb[204].mxu0  ;;  %v3997_v35 = vpop.f32.mrb[204].mxu1  ;;  %v3086_v33 = vmax.f32 %v5901_v9, 0.0 }
 0x2ad   :  { %v6056_v17 = vmax.f32 %v3052_v63, %v3070_v6  ;;  %v3208_v44 = vmax.f32 %v5914_v60, %v3172_v10  ;;  %v2194_v47 = vadd.f32 %v5722_v45, %v2193_v53  ;;  %v2931_v34 = vadd.f32 %v3997_v35, %v5963_v57  ;;  %v2195_v41 = vpop.f32.mrb[205].mxu0  ;;  %v2922_v43 = vpop.f32.mrb[205].mxu1  ;;  %v6266_v35 = vld [vmem:[#allocation6_spill] sm:$0xff] }
 0x2ae   :  { %v3771_v11 = vpack.c.bf16 %v3207_v13, %v3207_v13  ;;  %v3769_v7 = vpack.c.bf16 %v3205_v12, %v3205_v12  ;;  %v3206_v58 = vmax.f32 %v5888_v18, %v3170_v5  ;;  %v2923_v37 = vadd.f32 %v2922_v43, %v5955_v19  ;;  %v2196_v26 = vpop.f32.mrb[206].mxu0  ;;  %v3998_v1 = vpop.f32.mrb[206].mxu1 }
 0x2af   :  { %v3772_v39 = vpack.c.bf16 %v3208_v44, %v3208_v44  ;;  %v2803_v63 = vadd.f32 %v5804_v3, %v2194_v47  ;;  %v3103_v8 = vmax.f32 %v2931_v34, 0.0  ;;  %v2197_v60 = vadd.f32 %v5722_v45, %v2196_v26  ;;  %v2198_v22 = vpop.f32.mrb[207].mxu0  ;;  %v2925_v50 = vpop.f32.mrb[207].mxu1 }
 0x2b0   :  { %3388 = vst.msk [vmem:[%s6176_s3 + $0x58] sm:$0xf] %vm3365_vm1, %v3771_v11  ;;  %3386 = vst.msk [vmem:[%s6176_s3 + $0x50] sm:$0xf] %vm3365_vm1, %v3769_v7  ;;  %v3770_v18 = vpack.c.bf16 %v3206_v58, %v3206_v58  ;;  %v3101_v19 = vmax.f32 %v2923_v37, 0.0  ;;  %v2934_v57 = vadd.f32 %v3998_v1, %v5970_v14  ;;  %v2926_v3 = vadd.f32 %v2925_v50, %v5959_v49  ;;  %v6269_v7 = vld [vmem:[#allocation9_spill] sm:$0xff] }
 0x2b1   :  { %3389 = vst.msk [vmem:[%s6176_s3 + $0x5c] sm:$0xf] %vm3365_vm1, %v3772_v39  ;;  %v3071_v16 = vmax.f32 %v2803_v63, 0.0  ;;  %v3175_v40 = vmax.f32 %v3085_v54, %v3103_v8  ;;  %v2806_v2 = vadd.f32 %v5809_v51, %v2197_v60  ;;  %v3089_v62 = vmax.f32 %v5923_v20, 0.0  ;;  %v6270_v39 = vld [vmem:[#allocation8_spill] sm:$0xff]  ;;  %v6271_v22 = vld [vmem:[#allocation42_spill] sm:$0xff] }
 0x2b2   :  { %3387 = vst.msk [vmem:[%s6176_s3 + $0x54] sm:$0xf] %vm3365_vm1, %v3770_v18  ;;  %v3173_v14 = vmax.f32 %v3083_v42, %v3101_v19  ;;  %v3104_v49 = vmax.f32 %v2934_v57, 0.0  ;;  %v3102_v52 = vmax.f32 %v2926_v3, 0.0  ;;  %v3090_v51 = vmax.f32 %v5939_v27, 0.0  ;;  %v6272_v19 = vld [vmem:[#allocation41_spill] sm:$0xff] }
 0x2b3   :  { %v3143_v38 = vmax.f32 %v3053_v36, %v3071_v16  ;;  %v3211_v6 = vmax.f32 %v6020_v28, %v3175_v40  ;;  %v3072_v10 = vmax.f32 %v2806_v2, 0.0  ;;  %v3057_v57 = vmax.f32 %v6272_v19, 0.0  ;;  %v6273_v3 = vld [vmem:[#allocation4_spill] sm:$0xff] }
 0x2b4   :  { %v3209_v9 = vmax.f32 %v5966_v48, %v3173_v14  ;;  %v3176_v54 = vmax.f32 %v3086_v33, %v3104_v49  ;;  %v3174_v13 = vmax.f32 %v3084_v31, %v3102_v52  ;;  %v2201_v12 = vpop.f32.mrb[208].mxu0  ;;  %v4001_v5 = vpop.f32.mrb[208].mxu1  ;;  %v6267_v48 = vld [vmem:[#allocation3_spill] sm:$0xff]  ;;  %v3088_v16 = vmax.f32 %v6273_v3, 0.0 }
 0x2b5   :  { %v3775_v53 = vpack.c.bf16 %v3211_v6, %v3211_v6  ;;  %v3144_v42 = vmax.f32 %v3054_v55, %v3072_v10  ;;  %v2202_v20 = vadd.f32 %v5722_v45, %v2201_v12  ;;  %v2947_v15 = vadd.f32 %v4001_v5, %v6266_v35  ;;  %v2203_v36 = vpop.f32.mrb[209].mxu0  ;;  %v2938_v44 = vpop.f32.mrb[209].mxu1 }
 0x2b6   :  { %v3773_v28 = vpack.c.bf16 %v3209_v9, %v3209_v9  ;;  %v3212_v47 = vmax.f32 %v6027_v46, %v3176_v54  ;;  %v3210_v27 = vmax.f32 %v5988_v29, %v3174_v13  ;;  %v2939_v34 = vadd.f32 %v2938_v44, %v6267_v48  ;;  %v2204_v31 = vpop.f32.mrb[210].mxu0  ;;  %v4002_v41 = vpop.f32.mrb[210].mxu1 }
 0x2b7   :  { %3392 = vst.msk [vmem:[%s6176_s3 + $0x68] sm:$0xf] %vm3365_vm1, %v3775_v53  ;;  %v2811_v55 = vadd.f32 %v6268_v24, %v2202_v20  ;;  %v3107_v43 = vmax.f32 %v2947_v15, 0.0  ;;  %v2205_v11 = vadd.f32 %v5722_v45, %v2204_v31  ;;  %v2950_v58 = vadd.f32 %v4002_v41, %v6269_v7  ;;  %v2206_v37 = vpop.f32.mrb[211].mxu0  ;;  %v2941_v46 = vpop.f32.mrb[211].mxu1 }
 0x2b8   :  { %3390 = vst.msk [vmem:[%s6176_s3 + $0x60] sm:$0xf] %vm3365_vm1, %v3773_v28  ;;  %v3776_v29 = vpack.c.bf16 %v3212_v47, %v3212_v47  ;;  %v3774_v26 = vpack.c.bf16 %v3210_v27, %v3210_v27  ;;  %v3105_v1 = vmax.f32 %v2939_v34, 0.0  ;;  %v2942_v63 = vadd.f32 %v2941_v46, %v6270_v39  ;;  %v6277_v34 = vld [vmem:[#allocation12_spill] sm:$0xff] }
 0x2b9   :  { %v3073_v8 = vmax.f32 %v2811_v55, 0.0  ;;  %v3179_v60 = vmax.f32 %v3089_v62, %v3107_v43  ;;  %v2814_v50 = vadd.f32 %v6271_v22, %v2205_v11  ;;  %v3108_v18 = vmax.f32 %v2950_v58, 0.0  ;;  %v6274_v62 = vld [vmem:[#allocation2_spill] sm:$0xff]  ;;  %v6279_v43 = vld [vmem:[#allocation5_spill] sm:$0xff] }
 0x2ba   :  { %3393 = vst.msk [vmem:[%s6176_s3 + $0x6c] sm:$0xf] %vm3365_vm1, %v3776_v29  ;;  %3391 = vst.msk [vmem:[%s6176_s3 + $0x64] sm:$0xf] %vm3365_vm1, %v3774_v26  ;;  %v3177_v40 = vmax.f32 %v3087_v61, %v3105_v1  ;;  %v3106_v2 = vmax.f32 %v2942_v63, 0.0  ;;  %v3091_v6 = vmax.f32 %v6274_v62, 0.0 }
 0x2bb   :  { %v3145_v33 = vmax.f32 %v3055_v59, %v3073_v8  ;;  %v3215_v14 = vmax.f32 %v3143_v38, %v3179_v60  ;;  %v3074_v49 = vmax.f32 %v2814_v50, 0.0  ;;  %v3180_v52 = vmax.f32 %v3090_v51, %v3108_v18 }
 0x2bc   :  { %v3093_v10 = vmax.f32 %v6000_v25, 0.0  ;;  %v3213_v9 = vmax.f32 %v6051_v4, %v3177_v40  ;;  %v3178_v54 = vmax.f32 %v3088_v16, %v3106_v2  ;;  %v2209_v13 = vpop.f32.mrb[212].mxu0  ;;  %v4005_v12 = vpop.f32.mrb[212].mxu1  ;;  %v6275_v25 = vld [vmem:[#allocation7_spill] sm:$0xff]  ;;  %v3094_v41 = vmax.f32 %v6010_v30, 0.0 }
 0x2bd   :  { %v3779_v5 = vpack.c.bf16 %v3215_v14, %v3215_v14  ;;  %v3146_v61 = vmax.f32 %v3056_v32, %v3074_v49  ;;  %v3216_v53 = vmax.f32 %v3144_v42, %v3180_v52  ;;  %v2210_v23 = vadd.f32 %v5722_v45, %v2209_v13  ;;  %v2211_v59 = vpop.f32.mrb[213].mxu0  ;;  %v2954_v38 = vpop.f32.mrb[213].mxu1  ;;  %v6276_v32 = vld [vmem:[#allocation38_spill] sm:$0xff]  ;;  %v6280_v30 = vld [vmem:[#allocation43_spill] sm:$0xff] }
 0x2be   :  { %v3777_v20 = vpack.c.bf16 %v3213_v9, %v3213_v9  ;;  %v3214_v51 = vmax.f32 %v6056_v17, %v3178_v54  ;;  %v2963_v35 = vadd.f32 %v4005_v12, %v6006_v21  ;;  %v2955_v15 = vadd.f32 %v2954_v38, %v6275_v25  ;;  %v2212_v4 = vpop.f32.mrb[214].mxu0  ;;  %v4006_v36 = vpop.f32.mrb[214].mxu1 }
 0x2bf   :  { %3396 = vst.msk [vmem:[%s6176_s3 + $0x78] sm:$0xf] %vm3365_vm1, %v3779_v5  ;;  %v3780_v56 = vpack.c.bf16 %v3216_v53, %v3216_v53  ;;  %v2819_v42 = vadd.f32 %v6276_v32, %v2210_v23  ;;  %v2213_v44 = vadd.f32 %v5722_v45, %v2212_v4  ;;  %v2966_v28 = vadd.f32 %v4006_v36, %v6015_v0  ;;  %v2214_v47 = vpop.f32.mrb[215].mxu0  ;;  %v2957_v17 = vpop.f32.mrb[215].mxu1  ;;  %v6278_v0 = vld [vmem:[#allocation40_spill] sm:$0xff] }
 0x2c0   :  { %3394 = vst.msk [vmem:[%s6176_s3 + $0x70] sm:$0xf] %vm3365_vm1, %v3777_v20  ;;  %v3778_v21 = vpack.c.bf16 %v3214_v51, %v3214_v51  ;;  %v3111_v27 = vmax.f32 %v2963_v35, 0.0  ;;  %v3109_v48 = vmax.f32 %v2955_v15, 0.0  ;;  %v2958_v31 = vadd.f32 %v2957_v17, %v6277_v34 }
 0x2c1   :  { %3397 = vst.msk [vmem:[%s6176_s3 + $0x7c] sm:$0xf] %vm3365_vm1, %v3780_v56  ;;  %v3075_v45 = vmax.f32 %v2819_v42, 0.0  ;;  %v2822_v24 = vadd.f32 %v6278_v0, %v2213_v44  ;;  %v3112_v55 = vmax.f32 %v2966_v28, 0.0  ;;  %v3092_v11 = vmax.f32 %v6279_v43, 0.0 }
 0x2c2   :  { %3395 = vst.msk [vmem:[%s6176_s3 + $0x74] sm:$0xf] %vm3365_vm1, %v3778_v21  ;;  %v3183_v7 = vmax.f32 %v3093_v10, %v3111_v27  ;;  %v3181_v58 = vmax.f32 %v3091_v6, %v3109_v48  ;;  %v3110_v37 = vmax.f32 %v2958_v31, 0.0  ;;  %v3058_v46 = vmax.f32 %v6280_v30, 0.0 }
 0x2c3   :  { %v3147_v29 = vmax.f32 %v3057_v57, %v3075_v45  ;;  %v3076_v26 = vmax.f32 %v2822_v24, 0.0  ;;  %v3184_v1 = vmax.f32 %v3094_v41, %v3112_v55 }
 0x2c4   :  { %v3217_v39 = vmax.f32 %v3145_v33, %v3181_v58  ;;  %v3182_v63 = vmax.f32 %v3092_v11, %v3110_v37 }
 0x2c5   :  { %v3219_v8 = vmax.f32 %v3147_v29, %v3183_v7  ;;  %v3148_v60 = vmax.f32 %v3058_v46, %v3076_v26 }
 0x2c6   :  { %v3781_v22 = vpack.c.bf16 %v3217_v39, %v3217_v39  ;;  %v3218_v50 = vmax.f32 %v3146_v61, %v3182_v63 }
 0x2c7   :  { %v3783_v18 = vpack.c.bf16 %v3219_v8, %v3219_v8  ;;  %v3220_v19 = vmax.f32 %v3148_v60, %v3184_v1 }
 0x2c8   :  { %3398 = vst.msk [vmem:[%s6176_s3 + $0x80] sm:$0xf] %vm3365_vm1, %v3781_v22  ;;  %v3782_v3 = vpack.c.bf16 %v3218_v50, %v3218_v50 }
 0x2c9   :  { %3400 = vst.msk [vmem:[%s6176_s3 + $0x88] sm:$0xf] %vm3365_vm1, %v3783_v18  ;;  %v3784_v57 = vpack.c.bf16 %v3220_v19, %v3220_v19 }
 0x2ca   :  { %3399 = vst.msk [vmem:[%s6176_s3 + $0x84] sm:$0xf] %vm3365_vm1, %v3782_v3 }
 0x2cb   :  { %3401 = vst.msk [vmem:[%s6176_s3 + $0x8c] sm:$0xf] %vm3365_vm1, %v3784_v57 }

// kernel: net_forward.5
= control target key start
LH: loop header
LB: loop body
LE: loop exit
PB: predicated region body
PF: predicated region fallthrough
CT: control target
= control target key end

     0   :  { %v1203_v28 = vlaneseq  ;;  %v8781_v36 = vmov 1966171168   ;;  %s10746_s0 = inlined_call_operand.vmem [shape: bf16[2,9216], index: 0, kind: input, shape index: {}]   ;;  %s10747_s1 = inlined_call_operand.vmem [shape: bf16[9216,128], index: 1, kind: input, shape index: {}]   ;;  %s10748_s2 = inlined_call_operand.vmem [shape: f32[1,128], index: 2, kind: input, shape index: {}]   ;;  %s10749_s3 = inlined_call_operand.vmem [shape: bf16[128,10], index: 3, kind: input, shape index: {}]   ;;  %s10750_s4 = inlined_call_operand.vmem [shape: f32[1,10], index: 4, kind: input, shape index: {}]   ;;  %s10751_s5 = inlined_call_operand.hbm [shape: f32[2,10], index: 5, kind: output, shape index: {}]  }
   0x1   :  { %v8160_v0 = vld [vmem:[%s10747_s1 + $0x40] sm:$0xff]   ;;  %v8164_v4 = vld [vmem:[%s10747_s1 + $0x48] sm:$0xff]   ;;  %v8168_v8 = vld [vmem:[%s10747_s1 + $0x50] sm:$0xff]   ;;  %v1201_v37 = vunpack.c.l.s4 %v8781_v36 }
   0x2   :  { %v8161_v1 = vld [vmem:[%s10747_s1 + $0xc0] sm:$0xff]   ;;  %7335 = vmatprep.subr.bf16.mxu0 %v8160_v0  ;;  %v8165_v5 = vld [vmem:[%s10747_s1 + $0xc8] sm:$0xff]   ;;  %v8169_v9 = vld [vmem:[%s10747_s1 + $0xd0] sm:$0xff]   ;;  %v1204_v33 = vshrl.u32 %v1203_v28, 7 }
   0x3   :  { %v8162_v2 = vld [vmem:[%s10747_s1] sm:$0xff]   ;;  %7357 = vmatprep.subr.bf16.mxu1 %v8161_v1  ;;  %v8166_v6 = vld [vmem:[%s10747_s1 + $0x8] sm:$0xff]   ;;  %v8170_v10 = vld [vmem:[%s10747_s1 + $0x10] sm:$0xff]   ;;  %v1202_v40 = vunpack.c.0.s8 %v1201_v37 }
   0x4   :  { %v8163_v3 = vld [vmem:[%s10747_s1 + $0x80] sm:$0xff]   ;;  %7336 = vmatpush3.bf16.msra.mxu0 %v8162_v2  ;;  %v8167_v7 = vld [vmem:[%s10747_s1 + $0x88] sm:$0xff]   ;;  %v8171_v11 = vld [vmem:[%s10747_s1 + $0x90] sm:$0xff]  }
   0x5   :  { %7358 = vmatpush3.bf16.msra.mxu1 %v8163_v3  ;;  %7337 = vmatprep.subr.bf16.mxu0 %v8164_v4  ;;  %v8172_v12 = vld [vmem:[%s10747_s1 + $0x58] sm:$0xff]   ;;  %v8176_v16 = vld [vmem:[%s10747_s1 + $0x60] sm:$0xff]   ;;  %v8180_v20 = vld [vmem:[%s10747_s1 + $0x68] sm:$0xff]   ;;  %v8920_v41 = vsub.s32 %v1202_v40, %v1204_v33 }
   0x6   :  { %7359 = vmatprep.subr.bf16.mxu1 %v8165_v5  ;;  %v8173_v13 = vld [vmem:[%s10747_s1 + $0xd8] sm:$0xff]   ;;  %v8177_v17 = vld [vmem:[%s10747_s1 + $0xe0] sm:$0xff]   ;;  %v8181_v21 = vld [vmem:[%s10747_s1 + $0xe8] sm:$0xff]  }
   0x7   :  { %v8174_v14 = vld [vmem:[%s10747_s1 + $0x18] sm:$0xff]   ;;  %v8178_v18 = vld [vmem:[%s10747_s1 + $0x20] sm:$0xff]   ;;  %v8182_v22 = vld [vmem:[%s10747_s1 + $0x28] sm:$0xff]  }
   0x8   :  { %7338 = vmatpush3.bf16.msra.mxu0 %v8166_v6  ;;  %v8175_v15 = vld [vmem:[%s10747_s1 + $0x98] sm:$0xff]   ;;  %v8179_v19 = vld [vmem:[%s10747_s1 + $0xa0] sm:$0xff]   ;;  %v8183_v23 = vld [vmem:[%s10747_s1 + $0xa8] sm:$0xff]  }
   0x9   :  { %7360 = vmatpush3.bf16.msra.mxu1 %v8167_v7  ;;  %7339 = vmatprep.subr.bf16.mxu0 %v8168_v8  ;;  %v8184_v24 = vld [vmem:[%s10747_s1 + $0x70] sm:$0xff]   ;;  %v8188_v29 = vld [vmem:[%s10747_s1 + $0x78] sm:$0xff]   ;;  %v22_v34 = vld [vmem:[%s10746_s0] sm:$0xff] }
   0xa   :  { %7361 = vmatprep.subr.bf16.mxu1 %v8169_v9  ;;  %v8185_v25 = vld [vmem:[%s10747_s1 + $0xf0] sm:$0xff]   ;;  %v8189_v30 = vld [vmem:[%s10747_s1 + $0xf8] sm:$0xff]   ;;  %v8193_v35 = vld [vmem:[%s10747_s1 + $0x140] sm:$0xff]   ;;  %v1199_v39 = vcombine.high %v22_v34, %v22_v34  ;;  %v1206_v42 = vrot.slane %v22_v34, %v8920_v41 }
   0xb   :  { %v8186_v26 = vld [vmem:[%s10747_s1 + $0x30] sm:$0xff]   ;;  %v8190_v31 = vld [vmem:[%s10747_s1 + $0x38] sm:$0xff]   ;;  %v8194_v38 = vld [vmem:[%s10747_s1 + $0x1c0] sm:$0xff]  }
   0xc   :  { %7340 = vmatpush3.bf16.msra.mxu0 %v8170_v10  ;;  %v8187_v27 = vld [vmem:[%s10747_s1 + $0xb0] sm:$0xff]   ;;  %v8191_v32 = vld [vmem:[%s10747_s1 + $0xb8] sm:$0xff]   ;;  %v8924_v43 = vrot.slane %v1199_v39, %v8920_v41  ;;  %v1214_v44 = vcombine.high %v1206_v42, %v1206_v42  ;;  %v1222_v45 = vrot.slane %v1206_v42, %v8920_v41  ;;  %v8195_v47 = vld [vmem:[%s10747_s1 + $0x100] sm:$0xff]  }
   0xd   :  { %7362 = vmatpush3.bf16.msra.mxu1 %v8171_v11  ;;  %7341 = vmatprep.subr.bf16.mxu0 %v8172_v12  ;;  %v8196_v49 = vld [vmem:[%s10747_s1 + $0x180] sm:$0xff]   ;;  %v8197_v52 = vld [vmem:[%s10747_s1 + $0x148] sm:$0xff]   ;;  %v8201_v58 = vld [vmem:[%s10747_s1 + $0x150] sm:$0xff]  }
   0xe   :  { %7363 = vmatprep.subr.bf16.mxu1 %v8173_v13  ;;  %v1215_v46 = vcombine.high %v8924_v43, %v8924_v43  ;;  %v1236_v48 = vrot.slane %v1214_v44, %v8920_v41  ;;  %v1244_v51 = vcombine.high %v1222_v45, %v1222_v45  ;;  %v8198_v54 = vld [vmem:[%s10747_s1 + $0x1c8] sm:$0xff]   ;;  %v8202_v59 = vld [vmem:[%s10747_s1 + $0x1d0] sm:$0xff]   ;;  %v8205_v62 = vld [vmem:[%s10747_s1 + $0x158] sm:$0xff]  }
   0xf   :  { %v8199_v55 = vld [vmem:[%s10747_s1 + $0x108] sm:$0xff]   ;;  %v8203_v60 = vld [vmem:[%s10747_s1 + $0x110] sm:$0xff]   ;;  %v8206_v63 = vld [vmem:[%s10747_s1 + $0x1d8] sm:$0xff]  }
  0x10   :  { %7342 = vmatpush3.bf16.msra.mxu0 %v8174_v14  ;;  %v1243_v50 = vrot.slane %v1215_v46, %v8920_v41  ;;  %5200 = vmatprep.mubr.bf16.mxu0 %v1236_v48  ;;  %v1246_v53 = vcombine.high %v1236_v48, %v1236_v48  ;;  %v8200_v57 = vld [vmem:[%s10747_s1 + $0x188] sm:$0xff]   ;;  %v8204_v61 = vld [vmem:[%s10747_s1 + $0x190] sm:$0xff]   ;;  %v8207_v0 = vld [vmem:[%s10747_s1 + $0x118] sm:$0xff]  }
  0x11   :  { %7364 = vmatpush3.bf16.msra.mxu1 %v8175_v15  ;;  %7343 = vmatprep.subr.bf16.mxu0 %v8176_v16  ;;  %v8208_v1 = vld [vmem:[%s10747_s1 + $0x198] sm:$0xff]   ;;  %v8209_v2 = vld [vmem:[%s10747_s1 + $0x160] sm:$0xff]   ;;  %v8213_v6 = vld [vmem:[%s10747_s1 + $0x168] sm:$0xff]  }
  0x12   :  { %7365 = vmatprep.subr.bf16.mxu1 %v8177_v17  ;;  %v1247_v56 = vcombine.high %v1243_v50, %v1243_v50  ;;  %5240 = vmatprep.mubr.bf16.mxu1 %v1246_v53  ;;  %v8210_v3 = vld [vmem:[%s10747_s1 + $0x1e0] sm:$0xff]   ;;  %v8214_v7 = vld [vmem:[%s10747_s1 + $0x1e8] sm:$0xff]   ;;  %v8217_v10 = vld [vmem:[%s10747_s1 + $0x170] sm:$0xff]  }
  0x13   :  { %v8211_v4 = vld [vmem:[%s10747_s1 + $0x120] sm:$0xff]   ;;  %v8215_v8 = vld [vmem:[%s10747_s1 + $0x128] sm:$0xff]   ;;  %v8218_v11 = vld [vmem:[%s10747_s1 + $0x1f0] sm:$0xff]  }
  0x14   :  { %7344 = vmatpush3.bf16.msra.mxu0 %v8178_v18  ;;  %v8212_v5 = vld [vmem:[%s10747_s1 + $0x1a0] sm:$0xff]   ;;  %v8216_v9 = vld [vmem:[%s10747_s1 + $0x1a8] sm:$0xff]   ;;  %v8219_v12 = vld [vmem:[%s10747_s1 + $0x130] sm:$0xff]   ;;  %v1229_v18 = vrot.slane %v8924_v43, %v8920_v41 }
  0x15   :  { %7366 = vmatpush3.bf16.msra.mxu1 %v8179_v19  ;;  %7345 = vmatprep.subr.bf16.mxu0 %v8180_v20  ;;  %v8220_v13 = vld [vmem:[%s10747_s1 + $0x1b0] sm:$0xff]   ;;  %v8221_v14 = vld [vmem:[%s10747_s1 + $0x178] sm:$0xff]   ;;  %v8225_v19 = vld [vmem:[%s10747_s1 + $0x240] sm:$0xff]  }
  0x16   :  { %7367 = vmatprep.subr.bf16.mxu1 %v8181_v21  ;;  %v8222_v15 = vld [vmem:[%s10747_s1 + $0x1f8] sm:$0xff]   ;;  %v8226_v20 = vld [vmem:[%s10747_s1 + $0x2c0] sm:$0xff]   ;;  %v8233_v28 = vld [vmem:[%s10747_s1 + $0x250] sm:$0xff]  }
  0x17   :  { %v8223_v16 = vld [vmem:[%s10747_s1 + $0x138] sm:$0xff]   ;;  %v8227_v21 = vld [vmem:[%s10747_s1 + $0x200] sm:$0xff]   ;;  %v8245_v40 = vld [vmem:[%s10747_s1 + $0x268] sm:$0xff]  }
  0x18   :  { %7346 = vmatpush3.bf16.msra.mxu0 %v8182_v22  ;;  %v8224_v17 = vld [vmem:[%s10747_s1 + $0x1b8] sm:$0xff]   ;;  %v8228_v22 = vld [vmem:[%s10747_s1 + $0x280] sm:$0xff]   ;;  %v8246_v42 = vld [vmem:[%s10747_s1 + $0x2e8] sm:$0xff]  }
  0x19   :  { %7368 = vmatpush3.bf16.msra.mxu1 %v8183_v23  ;;  %7347 = vmatprep.subr.bf16.mxu0 %v8184_v24  ;;  %v1245_v23 = vcombine.high %v1229_v18, %v1229_v18  ;;  %v8229_v24 = vld [vmem:[%s10747_s1 + $0x248] sm:$0xff]   ;;  %v8238_v33 = vld [vmem:[%s10747_s1 + $0x2d8] sm:$0xff]   ;;  %v8241_v36 = vld [vmem:[%s10747_s1 + $0x260] sm:$0xff]  }
  0x1a   :  { %7369 = vmatprep.subr.bf16.mxu1 %v8185_v25  ;;  %v8230_v25 = vld [vmem:[%s10747_s1 + $0x2c8] sm:$0xff]   ;;  %v8239_v34 = vld [vmem:[%s10747_s1 + $0x218] sm:$0xff]   ;;  %v8242_v37 = vld [vmem:[%s10747_s1 + $0x2e0] sm:$0xff]  }
  0x1b   :  { %v8244_v39 = vld [vmem:[%s10747_s1 + $0x2a0] sm:$0xff]   ;;  %v8247_v43 = vld [vmem:[%s10747_s1 + $0x228] sm:$0xff]  }
  0x1c   :  { %7348 = vmatpush3.bf16.msra.mxu0 %v8186_v26  ;;  %v8231_v26 = vld [vmem:[%s10747_s1 + $0x208] sm:$0xff]  }
  0x1d   :  { %7370 = vmatpush3.bf16.msra.mxu1 %v8187_v27  ;;  %7349 = vmatprep.subr.bf16.mxu0 %v8188_v29  ;;  %v8232_v27 = vld [vmem:[%s10747_s1 + $0x288] sm:$0xff]   ;;  %v8234_v29 = vld [vmem:[%s10747_s1 + $0x2d0] sm:$0xff]  }
  0x1e   :  { %7371 = vmatprep.subr.bf16.mxu1 %v8189_v30  ;;  %v8235_v30 = vld [vmem:[%s10747_s1 + $0x210] sm:$0xff]   ;;  %v8248_v44 = vld [vmem:[%s10747_s1 + $0x2a8] sm:$0xff]  }
  0x1f   :  { %v23_v46 = vld [vmem:[%s10746_s0 + $0x8] sm:$0xff] }
  0x20   :  { %7350 = vmatpush3.bf16.msra.mxu0 %v8190_v31  ;;  %v8236_v31 = vld [vmem:[%s10747_s1 + $0x290] sm:$0xff]   ;;  %v1255_v48 = vrot.slane %v23_v46, %v8920_v41 }
  0x21   :  { %7372 = vmatpush3.bf16.msra.mxu1 %v8191_v32  ;;  %7379 = vmatprep.subr.bf16.mxu0 %v8193_v35  ;;  %v8237_v32 = vld [vmem:[%s10747_s1 + $0x258] sm:$0xff]  }
  0x22   :  { %7401 = vmatprep.subr.bf16.mxu1 %v8194_v38  ;;  %v8240_v35 = vld [vmem:[%s10747_s1 + $0x298] sm:$0xff]   ;;  %v8243_v38 = vld [vmem:[%s10747_s1 + $0x220] sm:$0xff]  }
  0x23   :  { %5201 = vmatmul.mubr.bf16.vlgmr.msra.gmra.mrb[0].mxu0 %v1222_v45  ;;  %v8249_v45 = vld [vmem:[%s10747_s1 + $0x270] sm:$0xff]  }
  0x24   :  { %7380 = vmatpush3.bf16.msra.mxu0 %v8195_v47  ;;  %5241 = vmatmul.mubr.bf16.vlgmr.msra.gmra.mrb[0].mxu1 %v1244_v51  ;;  %v8250_v47 = vld [vmem:[%s10747_s1 + $0x2f0] sm:$0xff]  }
  0x25   :  { %7381 = vmatprep.subr.bf16.mxu0 %v8197_v52  ;;  %7402 = vmatpush3.bf16.msra.mxu1 %v8196_v49  ;;  %v1248_v49 = vcombine.high %v23_v46, %v23_v46  ;;  %v8252_v51 = vld [vmem:[%s10747_s1 + $0x2b0] sm:$0xff]   ;;  %v1263_v52 = vcombine.high %v1255_v48, %v1255_v48 }
  0x26   :  { %5280 = vmatprep.mubr.bf16.mxu0 %v1243_v50  ;;  %7403 = vmatprep.subr.bf16.mxu1 %v8198_v54  ;;  %v8251_v50 = vld [vmem:[%s10747_s1 + $0x230] sm:$0xff]   ;;  %v8253_v54 = vld [vmem:[%s10747_s1 + $0x278] sm:$0xff]  }
  0x27   :  { %5320 = vmatprep.mubr.bf16.mxu1 %v1247_v56  ;;  %v9112_v53 = vrot.slane %v1248_v49, %v8920_v41  ;;  %v1285_v56 = vrot.slane %v1263_v52, %v8920_v41  ;;  %v8300_v46 = vld [vmem:[%s10747_s1 + $0x410] sm:$0xff]   ;;  %v8303_v49 = vld [vmem:[%s10747_s1 + $0x4d8] sm:$0xff]   ;;  %v8306_v52 = vld [vmem:[%s10747_s1 + $0x460] sm:$0xff]  }
  0x28   :  { %7382 = vmatpush3.bf16.msra.mxu0 %v8199_v55  ;;  %v8254_v55 = vld [vmem:[%s10747_s1 + $0x2f8] sm:$0xff]  }
  0x29   :  { %7383 = vmatprep.subr.bf16.mxu0 %v8201_v58  ;;  %7404 = vmatpush3.bf16.msra.mxu1 %v8200_v57  ;;  %v1264_v57 = vcombine.high %v9112_v53, %v9112_v53  ;;  %v8255_v58 = vld [vmem:[%s10747_s1 + $0x238] sm:$0xff]  }
  0x2a   :  { %7405 = vmatprep.subr.bf16.mxu1 %v8202_v59  ;;  %v8256_v59 = vld [vmem:[%s10747_s1 + $0x2b8] sm:$0xff]  }
  0x2c   :  { %7384 = vmatpush3.bf16.msra.mxu0 %v8203_v60  ;;  %v1295_v60 = vcombine.high %v1285_v56, %v1285_v56 }
  0x2d   :  { %7385 = vmatprep.subr.bf16.mxu0 %v8205_v62  ;;  %7406 = vmatpush3.bf16.msra.mxu1 %v8204_v61  ;;  %v1271_v61 = vrot.slane %v1255_v48, %v8920_v41  ;;  %v8257_v62 = vld [vmem:[%s10747_s1 + $0x340] sm:$0xff]   ;;  %v8302_v48 = vld [vmem:[%s10747_s1 + $0x458] sm:$0xff]  }
  0x2e   :  { %7407 = vmatprep.subr.bf16.mxu1 %v8206_v63  ;;  %v8258_v63 = vld [vmem:[%s10747_s1 + $0x3c0] sm:$0xff]  }
  0x30   :  { %7386 = vmatpush3.bf16.msra.mxu0 %v8207_v0  ;;  %v1292_v0 = vrot.slane %v1264_v57, %v8920_v41  ;;  %v8311_v57 = vld [vmem:[%s10747_s1 + $0x4e8] sm:$0xff]  }
  0x31   :  { %7387 = vmatprep.subr.bf16.mxu0 %v8209_v2  ;;  %7408 = vmatpush3.bf16.msra.mxu1 %v8208_v1  ;;  %v8259_v1 = vld [vmem:[%s10747_s1 + $0x300] sm:$0xff]  }
  0x32   :  { %7409 = vmatprep.subr.bf16.mxu1 %v8210_v3  ;;  %v8260_v2 = vld [vmem:[%s10747_s1 + $0x380] sm:$0xff]   ;;  %v1293_v3 = vcombine.high %v1271_v61, %v1271_v61 }
  0x34   :  { %7388 = vmatpush3.bf16.msra.mxu0 %v8211_v4  ;;  %v8261_v4 = vld [vmem:[%s10747_s1 + $0x348] sm:$0xff]  }
  0x35   :  { %7389 = vmatprep.subr.bf16.mxu0 %v8213_v6  ;;  %7410 = vmatpush3.bf16.msra.mxu1 %v8212_v5  ;;  %v8262_v5 = vld [vmem:[%s10747_s1 + $0x3c8] sm:$0xff]   ;;  %v1296_v6 = vcombine.high %v1292_v0, %v1292_v0 }
  0x36   :  { %7411 = vmatprep.subr.bf16.mxu1 %v8214_v7  ;;  %v8263_v7 = vld [vmem:[%s10747_s1 + $0x308] sm:$0xff]  }
  0x38   :  { %7390 = vmatpush3.bf16.msra.mxu0 %v8215_v8  ;;  %v8264_v8 = vld [vmem:[%s10747_s1 + $0x388] sm:$0xff]  }
  0x39   :  { %7391 = vmatprep.subr.bf16.mxu0 %v8217_v10  ;;  %7412 = vmatpush3.bf16.msra.mxu1 %v8216_v9  ;;  %v8265_v9 = vld [vmem:[%s10747_s1 + $0x350] sm:$0xff]  }
  0x3a   :  { %7413 = vmatprep.subr.bf16.mxu1 %v8218_v11  ;;  %v8266_v10 = vld [vmem:[%s10747_s1 + $0x3d0] sm:$0xff]  }
  0x3b   :  { %v8267_v11 = vld [vmem:[%s10747_s1 + $0x310] sm:$0xff]  }
  0x3c   :  { %7392 = vmatpush3.bf16.msra.mxu0 %v8219_v12  ;;  %v8268_v12 = vld [vmem:[%s10747_s1 + $0x390] sm:$0xff]  }
  0x3d   :  { %7393 = vmatprep.subr.bf16.mxu0 %v8221_v14  ;;  %7414 = vmatpush3.bf16.msra.mxu1 %v8220_v13  ;;  %v8269_v13 = vld [vmem:[%s10747_s1 + $0x358] sm:$0xff]  }
  0x3e   :  { %7415 = vmatprep.subr.bf16.mxu1 %v8222_v15  ;;  %v8270_v14 = vld [vmem:[%s10747_s1 + $0x3d8] sm:$0xff]  }
  0x3f   :  { %v8271_v15 = vld [vmem:[%s10747_s1 + $0x318] sm:$0xff]  }
  0x40   :  { %7394 = vmatpush3.bf16.msra.mxu0 %v8223_v16  ;;  %v8272_v16 = vld [vmem:[%s10747_s1 + $0x398] sm:$0xff]  }
  0x41   :  { %7423 = vmatprep.subr.bf16.mxu0 %v8225_v19  ;;  %7416 = vmatpush3.bf16.msra.mxu1 %v8224_v17  ;;  %v8273_v17 = vld [vmem:[%s10747_s1 + $0x360] sm:$0xff]  }
  0x42   :  { %7445 = vmatprep.subr.bf16.mxu1 %v8226_v20  ;;  %v8275_v19 = vld [vmem:[%s10747_s1 + $0x320] sm:$0xff]  }
  0x43   :  { %5281 = vmatmul.mubr.bf16.vlgmr.msra.gmra.mrb[4].mxu0 %v1229_v18  ;;  %v8274_v18 = vld [vmem:[%s10747_s1 + $0x3e0] sm:$0xff]  }
  0x44   :  { %7424 = vmatpush3.bf16.msra.mxu0 %v8227_v21  ;;  %5321 = vmatmul.mubr.bf16.vlgmr.msra.gmra.mrb[4].mxu1 %v1245_v23  ;;  %v8276_v20 = vld [vmem:[%s10747_s1 + $0x3a0] sm:$0xff]   ;;  %v8277_v21 = vld [vmem:[%s10747_s1 + $0x368] sm:$0xff]  }
  0x45   :  { %7425 = vmatprep.subr.bf16.mxu0 %v8229_v24  ;;  %7446 = vmatpush3.bf16.msra.mxu1 %v8228_v22  ;;  %v8278_v22 = vld [vmem:[%s10747_s1 + $0x3e8] sm:$0xff]  }
  0x46   :  { %7447 = vmatprep.subr.bf16.mxu1 %v8230_v25  ;;  %5360 = vmatprep.mubr.bf16.mxu0 %v1285_v56  ;;  %v8279_v23 = vld [vmem:[%s10747_s1 + $0x328] sm:$0xff]   ;;  %v8281_v25 = vld [vmem:[%s10747_s1 + $0x370] sm:$0xff]  }
  0x47   :  { %5400 = vmatprep.mubr.bf16.mxu1 %v1295_v60  ;;  %v8280_v24 = vld [vmem:[%s10747_s1 + $0x3a8] sm:$0xff]   ;;  %v8314_v60 = vld [vmem:[%s10747_s1 + $0x470] sm:$0xff]  }
  0x48   :  { %7426 = vmatpush3.bf16.msra.mxu0 %v8231_v26  ;;  %v8282_v26 = vld [vmem:[%s10747_s1 + $0x3f0] sm:$0xff]   ;;  %v8310_v56 = vld [vmem:[%s10747_s1 + $0x468] sm:$0xff]  }
  0x49   :  { %7427 = vmatprep.subr.bf16.mxu0 %v8233_v28  ;;  %7448 = vmatpush3.bf16.msra.mxu1 %v8232_v27  ;;  %v8283_v27 = vld [vmem:[%s10747_s1 + $0x330] sm:$0xff]  }
  0x4a   :  { %7449 = vmatprep.subr.bf16.mxu1 %v8234_v29  ;;  %v8284_v28 = vld [vmem:[%s10747_s1 + $0x3b0] sm:$0xff]   ;;  %v8285_v29 = vld [vmem:[%s10747_s1 + $0x378] sm:$0xff]  }
  0x4c   :  { %7428 = vmatpush3.bf16.msra.mxu0 %v8235_v30  ;;  %v8286_v30 = vld [vmem:[%s10747_s1 + $0x3f8] sm:$0xff]  }
  0x4d   :  { %7429 = vmatprep.subr.bf16.mxu0 %v8237_v32  ;;  %7450 = vmatpush3.bf16.msra.mxu1 %v8236_v31  ;;  %v8287_v31 = vld [vmem:[%s10747_s1 + $0x338] sm:$0xff]  }
  0x4e   :  { %7451 = vmatprep.subr.bf16.mxu1 %v8238_v33  ;;  %v8288_v32 = vld [vmem:[%s10747_s1 + $0x3b8] sm:$0xff]   ;;  %v1278_v33 = vrot.slane %v9112_v53, %v8920_v41  ;;  %v8307_v53 = vld [vmem:[%s10747_s1 + $0x4e0] sm:$0xff]  }
  0x50   :  { %7430 = vmatpush3.bf16.msra.mxu0 %v8239_v34  ;;  %v8290_v34 = vld [vmem:[%s10747_s1 + $0x440] sm:$0xff]  }
  0x51   :  { %7431 = vmatprep.subr.bf16.mxu0 %v8241_v36  ;;  %7452 = vmatpush3.bf16.msra.mxu1 %v8240_v35  ;;  %v8291_v35 = vld [vmem:[%s10747_s1 + $0x4c0] sm:$0xff]  }
  0x52   :  { %7453 = vmatprep.subr.bf16.mxu1 %v8242_v37  ;;  %v8292_v36 = vld [vmem:[%s10747_s1 + $0x400] sm:$0xff]  }
  0x53   :  { %v8293_v37 = vld [vmem:[%s10747_s1 + $0x480] sm:$0xff]  }
  0x54   :  { %7432 = vmatpush3.bf16.msra.mxu0 %v8243_v38  ;;  %v1294_v38 = vcombine.high %v1278_v33, %v1278_v33 }
  0x55   :  { %7433 = vmatprep.subr.bf16.mxu0 %v8245_v40  ;;  %7454 = vmatpush3.bf16.msra.mxu1 %v8244_v39  ;;  %v8294_v39 = vld [vmem:[%s10747_s1 + $0x448] sm:$0xff]  }
  0x56   :  { %7455 = vmatprep.subr.bf16.mxu1 %v8246_v42  ;;  %v8295_v40 = vld [vmem:[%s10747_s1 + $0x4c8] sm:$0xff]  }
  0x57   :  { %v8296_v42 = vld [vmem:[%s10747_s1 + $0x408] sm:$0xff]  }
  0x58   :  { %7434 = vmatpush3.bf16.msra.mxu0 %v8247_v43  ;;  %v8297_v43 = vld [vmem:[%s10747_s1 + $0x488] sm:$0xff]  }
  0x59   :  { %7435 = vmatprep.subr.bf16.mxu0 %v8249_v45  ;;  %7456 = vmatpush3.bf16.msra.mxu1 %v8248_v44  ;;  %v8298_v44 = vld [vmem:[%s10747_s1 + $0x450] sm:$0xff]  }
  0x5a   :  { %7457 = vmatprep.subr.bf16.mxu1 %v8250_v47  ;;  %v8299_v45 = vld [vmem:[%s10747_s1 + $0x4d0] sm:$0xff]  }
  0x5b   :  { %v8301_v47 = vld [vmem:[%s10747_s1 + $0x490] sm:$0xff]  }
  0x5c   :  { %7436 = vmatpush3.bf16.msra.mxu0 %v8251_v50  ;;  %v8304_v50 = vld [vmem:[%s10747_s1 + $0x418] sm:$0xff]  }
  0x5d   :  { %7437 = vmatprep.subr.bf16.mxu0 %v8253_v54  ;;  %7458 = vmatpush3.bf16.msra.mxu1 %v8252_v51  ;;  %v8305_v51 = vld [vmem:[%s10747_s1 + $0x498] sm:$0xff]   ;;  %v8308_v54 = vld [vmem:[%s10747_s1 + $0x420] sm:$0xff]  }
  0x5e   :  { %7459 = vmatprep.subr.bf16.mxu1 %v8254_v55  ;;  %v8309_v55 = vld [vmem:[%s10747_s1 + $0x4a0] sm:$0xff]  }
  0x60   :  { %7438 = vmatpush3.bf16.msra.mxu0 %v8255_v58  ;;  %v8312_v58 = vld [vmem:[%s10747_s1 + $0x428] sm:$0xff]  }
  0x61   :  { %7467 = vmatprep.subr.bf16.mxu0 %v8257_v62  ;;  %7460 = vmatpush3.bf16.msra.mxu1 %v8256_v59  ;;  %v8313_v59 = vld [vmem:[%s10747_s1 + $0x4a8] sm:$0xff]   ;;  %v8315_v62 = vld [vmem:[%s10747_s1 + $0x4f0] sm:$0xff]  }
  0x62   :  { %7489 = vmatprep.subr.bf16.mxu1 %v8258_v63 }
  0x63   :  { %5361 = vmatmul.mubr.bf16.vlgmr.msra.gmra.mrb[8].mxu0 %v1271_v61  ;;  %v24_v61 = vld [vmem:[%s10746_s0 + $0x10] sm:$0xff] }
  0x64   :  { %7468 = vmatpush3.bf16.msra.mxu0 %v8259_v1  ;;  %5440 = vmatprep.mubr.bf16.mxu0 %v1292_v0  ;;  %v1304_v63 = vrot.slane %v24_v61, %v8920_v41  ;;  %v1297_v0 = vcombine.high %v24_v61, %v24_v61  ;;  %v8316_v1 = vld [vmem:[%s10747_s1 + $0x430] sm:$0xff]  }
  0x65   :  { %5401 = vmatmul.mubr.bf16.vlgmr.msra.gmra.mrb[8].mxu1 %v1293_v3  ;;  %7469 = vmatprep.subr.bf16.mxu0 %v8261_v4  ;;  %v8365_v61 = vld [vmem:[%s10747_s1 + $0x610] sm:$0xff]  }
  0x66   :  { %7490 = vmatpush3.bf16.msra.mxu1 %v8260_v2  ;;  %5480 = vmatprep.mubr.bf16.mxu1 %v1296_v6  ;;  %v8317_v2 = vld [vmem:[%s10747_s1 + $0x4b0] sm:$0xff]   ;;  %v1312_v3 = vcombine.high %v1304_v63, %v1304_v63  ;;  %v9318_v4 = vrot.slane %v1297_v0, %v8920_v41  ;;  %v8319_v6 = vld [vmem:[%s10747_s1 + $0x4f8] sm:$0xff]  }
  0x67   :  { %7491 = vmatprep.subr.bf16.mxu1 %v8262_v5  ;;  %v8318_v5 = vld [vmem:[%s10747_s1 + $0x478] sm:$0xff]  }
  0x68   :  { %7470 = vmatpush3.bf16.msra.mxu0 %v8263_v7  ;;  %v1334_v7 = vrot.slane %v1312_v3, %v8920_v41  ;;  %v8368_v0 = vld [vmem:[%s10747_s1 + $0x6d8] sm:$0xff]   ;;  %v8371_v3 = vld [vmem:[%s10747_s1 + $0x660] sm:$0xff]  }
  0x69   :  { %7471 = vmatprep.subr.bf16.mxu0 %v8265_v9  ;;  %v8320_v9 = vld [vmem:[%s10747_s1 + $0x438] sm:$0xff]  }
  0x6a   :  { %7492 = vmatpush3.bf16.msra.mxu1 %v8264_v8  ;;  %v1313_v8 = vcombine.high %v9318_v4, %v9318_v4 }
  0x6b   :  { %7493 = vmatprep.subr.bf16.mxu1 %v8266_v10  ;;  %v8321_v10 = vld [vmem:[%s10747_s1 + $0x4b8] sm:$0xff]  }
  0x6c   :  { %7472 = vmatpush3.bf16.msra.mxu0 %v8267_v11  ;;  %v1344_v11 = vcombine.high %v1334_v7, %v1334_v7 }
  0x6d   :  { %7473 = vmatprep.subr.bf16.mxu0 %v8269_v13  ;;  %v8322_v13 = vld [vmem:[%s10747_s1 + $0x540] sm:$0xff]  }
  0x6e   :  { %7494 = vmatpush3.bf16.msra.mxu1 %v8268_v12  ;;  %v1320_v12 = vrot.slane %v1304_v63, %v8920_v41  ;;  %v8367_v63 = vld [vmem:[%s10747_s1 + $0x658] sm:$0xff]  }
  0x6f   :  { %7495 = vmatprep.subr.bf16.mxu1 %v8270_v14  ;;  %v8323_v14 = vld [vmem:[%s10747_s1 + $0x5c0] sm:$0xff]  }
  0x70   :  { %7474 = vmatpush3.bf16.msra.mxu0 %v8271_v15  ;;  %v1341_v15 = vrot.slane %v1313_v8, %v8920_v41  ;;  %v8376_v8 = vld [vmem:[%s10747_s1 + $0x6e8] sm:$0xff]  }
  0x71   :  { %7475 = vmatprep.subr.bf16.mxu0 %v8273_v17  ;;  %v8325_v17 = vld [vmem:[%s10747_s1 + $0x580] sm:$0xff]  }
  0x72   :  { %7496 = vmatpush3.bf16.msra.mxu1 %v8272_v16  ;;  %v8324_v16 = vld [vmem:[%s10747_s1 + $0x500] sm:$0xff]  }
  0x73   :  { %7497 = vmatprep.subr.bf16.mxu1 %v8274_v18  ;;  %v1342_v18 = vcombine.high %v1320_v12, %v1320_v12 }
  0x74   :  { %7476 = vmatpush3.bf16.msra.mxu0 %v8275_v19  ;;  %v8326_v19 = vld [vmem:[%s10747_s1 + $0x548] sm:$0xff]  }
  0x75   :  { %7477 = vmatprep.subr.bf16.mxu0 %v8277_v21  ;;  %v1345_v21 = vcombine.high %v1341_v15, %v1341_v15 }
  0x76   :  { %7498 = vmatpush3.bf16.msra.mxu1 %v8276_v20  ;;  %v8327_v20 = vld [vmem:[%s10747_s1 + $0x5c8] sm:$0xff]  }
  0x77   :  { %7499 = vmatprep.subr.bf16.mxu1 %v8278_v22  ;;  %v8328_v22 = vld [vmem:[%s10747_s1 + $0x508] sm:$0xff]  }
  0x78   :  { %7478 = vmatpush3.bf16.msra.mxu0 %v8279_v23  ;;  %v8329_v23 = vld [vmem:[%s10747_s1 + $0x588] sm:$0xff]  }
  0x79   :  { %7479 = vmatprep.subr.bf16.mxu0 %v8281_v25  ;;  %v8331_v25 = vld [vmem:[%s10747_s1 + $0x5d0] sm:$0xff]  }
  0x7a   :  { %7500 = vmatpush3.bf16.msra.mxu1 %v8280_v24  ;;  %v8330_v24 = vld [vmem:[%s10747_s1 + $0x550] sm:$0xff]  }
  0x7b   :  { %7501 = vmatprep.subr.bf16.mxu1 %v8282_v26  ;;  %v8332_v26 = vld [vmem:[%s10747_s1 + $0x510] sm:$0xff]  }
  0x7c   :  { %7480 = vmatpush3.bf16.msra.mxu0 %v8283_v27  ;;  %v8333_v27 = vld [vmem:[%s10747_s1 + $0x590] sm:$0xff]  }
  0x7d   :  { %7481 = vmatprep.subr.bf16.mxu0 %v8285_v29  ;;  %v8335_v29 = vld [vmem:[%s10747_s1 + $0x5d8] sm:$0xff]  }
  0x7e   :  { %7502 = vmatpush3.bf16.msra.mxu1 %v8284_v28  ;;  %v8334_v28 = vld [vmem:[%s10747_s1 + $0x558] sm:$0xff]  }
  0x7f   :  { %7503 = vmatprep.subr.bf16.mxu1 %v8286_v30  ;;  %v8336_v30 = vld [vmem:[%s10747_s1 + $0x518] sm:$0xff]  }
  0x80   :  { %7482 = vmatpush3.bf16.msra.mxu0 %v8287_v31  ;;  %v8337_v31 = vld [vmem:[%s10747_s1 + $0x598] sm:$0xff]  }
  0x81   :  { %7511 = vmatprep.subr.bf16.mxu0 %v8290_v34  ;;  %v8340_v34 = vld [vmem:[%s10747_s1 + $0x520] sm:$0xff]  }
  0x82   :  { %7504 = vmatpush3.bf16.msra.mxu1 %v8288_v32  ;;  %v8338_v32 = vld [vmem:[%s10747_s1 + $0x560] sm:$0xff]  }
  0x83   :  { %5441 = vmatmul.mubr.bf16.vlgmr.msra.gmra.mrb[12].mxu0 %v1278_v33  ;;  %7533 = vmatprep.subr.bf16.mxu1 %v8291_v35  ;;  %v8339_v33 = vld [vmem:[%s10747_s1 + $0x5e0] sm:$0xff]  }
  0x84   :  { %7512 = vmatpush3.bf16.msra.mxu0 %v8292_v36  ;;  %5520 = vmatprep.mubr.bf16.mxu0 %v1334_v7  ;;  %v8341_v35 = vld [vmem:[%s10747_s1 + $0x5a0] sm:$0xff]   ;;  %v8342_v36 = vld [vmem:[%s10747_s1 + $0x568] sm:$0xff]  }
  0x85   :  { %5481 = vmatmul.mubr.bf16.vlgmr.msra.gmra.mrb[12].mxu1 %v1294_v38  ;;  %7513 = vmatprep.subr.bf16.mxu0 %v8294_v39  ;;  %v8344_v38 = vld [vmem:[%s10747_s1 + $0x528] sm:$0xff]  }
  0x86   :  { %7534 = vmatpush3.bf16.msra.mxu1 %v8293_v37  ;;  %5560 = vmatprep.mubr.bf16.mxu1 %v1344_v11  ;;  %v8343_v37 = vld [vmem:[%s10747_s1 + $0x5e8] sm:$0xff]   ;;  %v8379_v11 = vld [vmem:[%s10747_s1 + $0x670] sm:$0xff]  }
  0x87   :  { %7535 = vmatprep.subr.bf16.mxu1 %v8295_v40  ;;  %v8345_v39 = vld [vmem:[%s10747_s1 + $0x5a8] sm:$0xff]   ;;  %v8346_v40 = vld [vmem:[%s10747_s1 + $0x570] sm:$0xff]  }
  0x88   :  { %7514 = vmatpush3.bf16.msra.mxu0 %v8296_v42  ;;  %v8347_v42 = vld [vmem:[%s10747_s1 + $0x5f0] sm:$0xff]   ;;  %v8375_v7 = vld [vmem:[%s10747_s1 + $0x668] sm:$0xff]  }
  0x89   :  { %7515 = vmatprep.subr.bf16.mxu0 %v8298_v44  ;;  %v8349_v44 = vld [vmem:[%s10747_s1 + $0x5b0] sm:$0xff]  }
  0x8a   :  { %7536 = vmatpush3.bf16.msra.mxu1 %v8297_v43  ;;  %v8348_v43 = vld [vmem:[%s10747_s1 + $0x530] sm:$0xff]  }
  0x8b   :  { %7537 = vmatprep.subr.bf16.mxu1 %v8299_v45  ;;  %v8350_v45 = vld [vmem:[%s10747_s1 + $0x578] sm:$0xff]  }
  0x8c   :  { %7516 = vmatpush3.bf16.msra.mxu0 %v8300_v46  ;;  %v8351_v46 = vld [vmem:[%s10747_s1 + $0x5f8] sm:$0xff]  }
  0x8d   :  { %7517 = vmatprep.subr.bf16.mxu0 %v8302_v48  ;;  %v8353_v48 = vld [vmem:[%s10747_s1 + $0x5b8] sm:$0xff]  }
  0x8e   :  { %7538 = vmatpush3.bf16.msra.mxu1 %v8301_v47  ;;  %v8352_v47 = vld [vmem:[%s10747_s1 + $0x538] sm:$0xff]  }
  0x8f   :  { %7539 = vmatprep.subr.bf16.mxu1 %v8303_v49  ;;  %v1327_v49 = vrot.slane %v9318_v4, %v8920_v41  ;;  %v8372_v4 = vld [vmem:[%s10747_s1 + $0x6e0] sm:$0xff]  }
  0x90   :  { %7518 = vmatpush3.bf16.msra.mxu0 %v8304_v50  ;;  %v8355_v50 = vld [vmem:[%s10747_s1 + $0x640] sm:$0xff]  }
  0x91   :  { %7519 = vmatprep.subr.bf16.mxu0 %v8306_v52  ;;  %v8357_v52 = vld [vmem:[%s10747_s1 + $0x600] sm:$0xff]  }
  0x92   :  { %7540 = vmatpush3.bf16.msra.mxu1 %v8305_v51  ;;  %v8356_v51 = vld [vmem:[%s10747_s1 + $0x6c0] sm:$0xff]  }
  0x93   :  { %7541 = vmatprep.subr.bf16.mxu1 %v8307_v53  ;;  %v8358_v53 = vld [vmem:[%s10747_s1 + $0x680] sm:$0xff]  }
  0x94   :  { %7520 = vmatpush3.bf16.msra.mxu0 %v8308_v54  ;;  %v1343_v54 = vcombine.high %v1327_v49, %v1327_v49 }
  0x95   :  { %7521 = vmatprep.subr.bf16.mxu0 %v8310_v56  ;;  %v8360_v56 = vld [vmem:[%s10747_s1 + $0x6c8] sm:$0xff]  }
  0x96   :  { %7542 = vmatpush3.bf16.msra.mxu1 %v8309_v55  ;;  %v8359_v55 = vld [vmem:[%s10747_s1 + $0x648] sm:$0xff]  }
  0x97   :  { %7543 = vmatprep.subr.bf16.mxu1 %v8311_v57  ;;  %v8361_v57 = vld [vmem:[%s10747_s1 + $0x608] sm:$0xff]  }
  0x98   :  { %7522 = vmatpush3.bf16.msra.mxu0 %v8312_v58  ;;  %v8362_v58 = vld [vmem:[%s10747_s1 + $0x688] sm:$0xff]  }
  0x99   :  { %7523 = vmatprep.subr.bf16.mxu0 %v8314_v60  ;;  %v8364_v60 = vld [vmem:[%s10747_s1 + $0x6d0] sm:$0xff]  }
  0x9a   :  { %7544 = vmatpush3.bf16.msra.mxu1 %v8313_v59  ;;  %v8363_v59 = vld [vmem:[%s10747_s1 + $0x650] sm:$0xff]  }
  0x9b   :  { %7545 = vmatprep.subr.bf16.mxu1 %v8315_v62  ;;  %v8366_v62 = vld [vmem:[%s10747_s1 + $0x690] sm:$0xff]  }
  0x9c   :  { %7524 = vmatpush3.bf16.msra.mxu0 %v8316_v1  ;;  %v8369_v1 = vld [vmem:[%s10747_s1 + $0x618] sm:$0xff]  }
  0x9d   :  { %7525 = vmatprep.subr.bf16.mxu0 %v8318_v5  ;;  %v8373_v5 = vld [vmem:[%s10747_s1 + $0x620] sm:$0xff]  }
  0x9e   :  { %7546 = vmatpush3.bf16.msra.mxu1 %v8317_v2  ;;  %v8370_v2 = vld [vmem:[%s10747_s1 + $0x698] sm:$0xff]  }
  0x9f   :  { %7547 = vmatprep.subr.bf16.mxu1 %v8319_v6  ;;  %v8374_v6 = vld [vmem:[%s10747_s1 + $0x6a0] sm:$0xff]  }
  0xa0   :  { %7526 = vmatpush3.bf16.msra.mxu0 %v8320_v9  ;;  %v8377_v9 = vld [vmem:[%s10747_s1 + $0x628] sm:$0xff]  }
  0xa1   :  { %7555 = vmatprep.subr.bf16.mxu0 %v8322_v13  ;;  %v8380_v13 = vld [vmem:[%s10747_s1 + $0x6f0] sm:$0xff]  }
  0xa2   :  { %7548 = vmatpush3.bf16.msra.mxu1 %v8321_v10  ;;  %v8378_v10 = vld [vmem:[%s10747_s1 + $0x6a8] sm:$0xff]  }
  0xa3   :  { %5521 = vmatmul.mubr.bf16.vlgmr.msra.gmra.mrb[16].mxu0 %v1320_v12  ;;  %7577 = vmatprep.subr.bf16.mxu1 %v8323_v14  ;;  %v25_v12 = vld [vmem:[%s10746_s0 + $0x18] sm:$0xff] }
  0xa4   :  { %7556 = vmatpush3.bf16.msra.mxu0 %v8324_v16  ;;  %5600 = vmatprep.mubr.bf16.mxu0 %v1341_v15  ;;  %v1353_v14 = vrot.slane %v25_v12, %v8920_v41  ;;  %v1346_v15 = vcombine.high %v25_v12, %v25_v12  ;;  %v8381_v16 = vld [vmem:[%s10747_s1 + $0x630] sm:$0xff]   ;;  %v8418_v12 = vld [vmem:[%s10747_s1 + $0x7b8] sm:$0xff]  }
  0xa5   :  { %5561 = vmatmul.mubr.bf16.vlgmr.msra.gmra.mrb[16].mxu1 %v1342_v18  ;;  %7557 = vmatprep.subr.bf16.mxu0 %v8326_v19 }
  0xa6   :  { %7578 = vmatpush3.bf16.msra.mxu1 %v8325_v17  ;;  %5640 = vmatprep.mubr.bf16.mxu1 %v1345_v21  ;;  %v8383_v17 = vld [vmem:[%s10747_s1 + $0x678] sm:$0xff]   ;;  %v1361_v18 = vcombine.high %v1353_v14, %v1353_v14  ;;  %v9524_v19 = vrot.slane %v1346_v15, %v8920_v41  ;;  %v8421_v15 = vld [vmem:[%s10747_s1 + $0x8c0] sm:$0xff]  }
  0xa7   :  { %7579 = vmatprep.subr.bf16.mxu1 %v8327_v20  ;;  %v8382_v20 = vld [vmem:[%s10747_s1 + $0x6b0] sm:$0xff]   ;;  %v8384_v21 = vld [vmem:[%s10747_s1 + $0x6f8] sm:$0xff]  }
  0xa8   :  { %7558 = vmatpush3.bf16.msra.mxu0 %v8328_v22  ;;  %v1383_v22 = vrot.slane %v1361_v18, %v8920_v41 }
  0xa9   :  { %7559 = vmatprep.subr.bf16.mxu0 %v8330_v24  ;;  %v8385_v24 = vld [vmem:[%s10747_s1 + $0x638] sm:$0xff]  }
  0xaa   :  { %7580 = vmatpush3.bf16.msra.mxu1 %v8329_v23  ;;  %v1362_v23 = vcombine.high %v9524_v19, %v9524_v19 }
  0xab   :  { %7581 = vmatprep.subr.bf16.mxu1 %v8331_v25  ;;  %v1393_v25 = vcombine.high %v1383_v22, %v1383_v22 }
  0xac   :  { %7560 = vmatpush3.bf16.msra.mxu0 %v8332_v26  ;;  %v1369_v26 = vrot.slane %v1353_v14, %v8920_v41  ;;  %v8420_v14 = vld [vmem:[%s10747_s1 + $0x840] sm:$0xff]  }
  0xad   :  { %7561 = vmatprep.subr.bf16.mxu0 %v8334_v28  ;;  %v8386_v28 = vld [vmem:[%s10747_s1 + $0x6b8] sm:$0xff]  }
  0xae   :  { %7582 = vmatpush3.bf16.msra.mxu1 %v8333_v27  ;;  %v8387_v27 = vld [vmem:[%s10747_s1 + $0x740] sm:$0xff]  }
  0xaf   :  { %7583 = vmatprep.subr.bf16.mxu1 %v8335_v29  ;;  %v1390_v29 = vrot.slane %v1362_v23, %v8920_v41  ;;  %v8428_v23 = vld [vmem:[%s10747_s1 + $0x850] sm:$0xff]  }
  0xb0   :  { %7562 = vmatpush3.bf16.msra.mxu0 %v8336_v30  ;;  %v8388_v30 = vld [vmem:[%s10747_s1 + $0x7c0] sm:$0xff]  }
  0xb1   :  { %7563 = vmatprep.subr.bf16.mxu0 %v8338_v32  ;;  %v1391_v32 = vcombine.high %v1369_v26, %v1369_v26 }
  0xb2   :  { %7584 = vmatpush3.bf16.msra.mxu1 %v8337_v31  ;;  %v8389_v31 = vld [vmem:[%s10747_s1 + $0x700] sm:$0xff]  }
  0xb3   :  { %7585 = vmatprep.subr.bf16.mxu1 %v8339_v33  ;;  %v8391_v33 = vld [vmem:[%s10747_s1 + $0x748] sm:$0xff]  }
  0xb4   :  { %7564 = vmatpush3.bf16.msra.mxu0 %v8340_v34  ;;  %v8390_v34 = vld [vmem:[%s10747_s1 + $0x780] sm:$0xff]  }
  0xb5   :  { %7565 = vmatprep.subr.bf16.mxu0 %v8342_v36  ;;  %v8392_v36 = vld [vmem:[%s10747_s1 + $0x7c8] sm:$0xff]  }
  0xb6   :  { %7586 = vmatpush3.bf16.msra.mxu1 %v8341_v35  ;;  %v1394_v35 = vcombine.high %v1390_v29, %v1390_v29 }
  0xb7   :  { %7587 = vmatprep.subr.bf16.mxu1 %v8343_v37  ;;  %v8393_v37 = vld [vmem:[%s10747_s1 + $0x708] sm:$0xff]  }
  0xb8   :  { %7566 = vmatpush3.bf16.msra.mxu0 %v8344_v38  ;;  %v8395_v38 = vld [vmem:[%s10747_s1 + $0x750] sm:$0xff]  }
  0xb9   :  { %7567 = vmatprep.subr.bf16.mxu0 %v8346_v40  ;;  %v8396_v40 = vld [vmem:[%s10747_s1 + $0x7d0] sm:$0xff]  }
  0xba   :  { %7588 = vmatpush3.bf16.msra.mxu1 %v8345_v39  ;;  %v8394_v39 = vld [vmem:[%s10747_s1 + $0x788] sm:$0xff]  }
  0xbb   :  { %7589 = vmatprep.subr.bf16.mxu1 %v8347_v42  ;;  %v8397_v42 = vld [vmem:[%s10747_s1 + $0x710] sm:$0xff]  }
  0xbc   :  { %7568 = vmatpush3.bf16.msra.mxu0 %v8348_v43  ;;  %v8399_v43 = vld [vmem:[%s10747_s1 + $0x758] sm:$0xff]  }
  0xbd   :  { %7569 = vmatprep.subr.bf16.mxu0 %v8350_v45  ;;  %v8400_v45 = vld [vmem:[%s10747_s1 + $0x7d8] sm:$0xff]  }
  0xbe   :  { %7590 = vmatpush3.bf16.msra.mxu1 %v8349_v44  ;;  %v8398_v44 = vld [vmem:[%s10747_s1 + $0x790] sm:$0xff]  }
  0xbf   :  { %7591 = vmatprep.subr.bf16.mxu1 %v8351_v46  ;;  %v8401_v46 = vld [vmem:[%s10747_s1 + $0x718] sm:$0xff]  }
  0xc0   :  { %7570 = vmatpush3.bf16.msra.mxu0 %v8352_v47  ;;  %v8402_v47 = vld [vmem:[%s10747_s1 + $0x798] sm:$0xff]  }
  0xc1   :  { %7599 = vmatprep.subr.bf16.mxu0 %v8355_v50  ;;  %v8405_v50 = vld [vmem:[%s10747_s1 + $0x720] sm:$0xff]  }
  0xc2   :  { %7592 = vmatpush3.bf16.msra.mxu1 %v8353_v48  ;;  %v8403_v48 = vld [vmem:[%s10747_s1 + $0x760] sm:$0xff]  }
  0xc3   :  { %5601 = vmatmul.mubr.bf16.vlgmr.msra.gmra.mrb[20].mxu0 %v1327_v49  ;;  %7621 = vmatprep.subr.bf16.mxu1 %v8356_v51  ;;  %v8404_v49 = vld [vmem:[%s10747_s1 + $0x7e0] sm:$0xff]  }
  0xc4   :  { %7600 = vmatpush3.bf16.msra.mxu0 %v8357_v52  ;;  %5680 = vmatprep.mubr.bf16.mxu0 %v1383_v22  ;;  %v8406_v51 = vld [vmem:[%s10747_s1 + $0x7a0] sm:$0xff]   ;;  %v8407_v52 = vld [vmem:[%s10747_s1 + $0x768] sm:$0xff]  }
  0xc5   :  { %5641 = vmatmul.mubr.bf16.vlgmr.msra.gmra.mrb[20].mxu1 %v1343_v54  ;;  %7601 = vmatprep.subr.bf16.mxu0 %v8359_v55  ;;  %v8409_v54 = vld [vmem:[%s10747_s1 + $0x728] sm:$0xff]  }
  0xc6   :  { %7622 = vmatpush3.bf16.msra.mxu1 %v8358_v53  ;;  %5720 = vmatprep.mubr.bf16.mxu1 %v1393_v25  ;;  %v8408_v53 = vld [vmem:[%s10747_s1 + $0x7e8] sm:$0xff]   ;;  %v8430_v25 = vld [vmem:[%s10747_s1 + $0x810] sm:$0xff]  }
  0xc7   :  { %7623 = vmatprep.subr.bf16.mxu1 %v8360_v56  ;;  %v8410_v55 = vld [vmem:[%s10747_s1 + $0x7a8] sm:$0xff]   ;;  %v6749_v56 = vld [vmem:[%s10748_s2] ss:$0 sm:$0xff] }
  0xc8   :  { %7602 = vmatpush3.bf16.msra.mxu0 %v8361_v57  ;;  %v8411_v57 = vld [vmem:[%s10747_s1 + $0x770] sm:$0xff]   ;;  %v8427_v22 = vld [vmem:[%s10747_s1 + $0x888] sm:$0xff]  }
  0xc9   :  { %7603 = vmatprep.subr.bf16.mxu0 %v8363_v59  ;;  %v8412_v59 = vld [vmem:[%s10747_s1 + $0x7f0] sm:$0xff]  }
  0xca   :  { %7624 = vmatpush3.bf16.msra.mxu1 %v8362_v58 }
  0xcb   :  { %7625 = vmatprep.subr.bf16.mxu1 %v8364_v60 }
  0xcc   :  { %7604 = vmatpush3.bf16.msra.mxu0 %v8365_v61  ;;  %v8413_v61 = vld [vmem:[%s10747_s1 + $0x730] sm:$0xff]  }
  0xcd   :  { %7605 = vmatprep.subr.bf16.mxu0 %v8367_v63 }
  0xce   :  { %7626 = vmatpush3.bf16.msra.mxu1 %v8366_v62 }
  0xcf   :  { %7627 = vmatprep.subr.bf16.mxu1 %v8368_v0 }
  0xd0   :  { %7606 = vmatpush3.bf16.msra.mxu0 %v8369_v1  ;;  %v8414_v1 = vld [vmem:[%s10747_s1 + $0x7b0] sm:$0xff]  }
  0xd1   :  { %7607 = vmatprep.subr.bf16.mxu0 %v8371_v3 }
  0xd2   :  { %7628 = vmatpush3.bf16.msra.mxu1 %v8370_v2  ;;  %v8415_v2 = vld [vmem:[%s10747_s1 + $0x778] sm:$0xff]  }
  0xd3   :  { %7629 = vmatprep.subr.bf16.mxu1 %v8372_v4 }
  0xd4   :  { %7608 = vmatpush3.bf16.msra.mxu0 %v8373_v5 }
  0xd5   :  { %7609 = vmatprep.subr.bf16.mxu0 %v8375_v7 }
  0xd6   :  { %7630 = vmatpush3.bf16.msra.mxu1 %v8374_v6 }
  0xd7   :  { %7631 = vmatprep.subr.bf16.mxu1 %v8376_v8  ;;  %v8416_v8 = vld [vmem:[%s10747_s1 + $0x7f8] sm:$0xff]  }
  0xd8   :  { %7610 = vmatpush3.bf16.msra.mxu0 %v8377_v9 }
  0xd9   :  { %7611 = vmatprep.subr.bf16.mxu0 %v8379_v11 }
  0xda   :  { %7632 = vmatpush3.bf16.msra.mxu1 %v8378_v10  ;;  %v8417_v10 = vld [vmem:[%s10747_s1 + $0x738] sm:$0xff]  }
  0xdb   :  { %7633 = vmatprep.subr.bf16.mxu1 %v8380_v13  ;;  %v1376_v13 = vrot.slane %v9524_v19, %v8920_v41  ;;  %v8424_v19 = vld [vmem:[%s10747_s1 + $0x848] sm:$0xff]  }
  0xdc   :  { %7612 = vmatpush3.bf16.msra.mxu0 %v8381_v16  ;;  %v8422_v16 = vld [vmem:[%s10747_s1 + $0x800] sm:$0xff]  }
  0xdd   :  { %7613 = vmatprep.subr.bf16.mxu0 %v8383_v17  ;;  %v8423_v17 = vld [vmem:[%s10747_s1 + $0x880] sm:$0xff]   ;;  %v1392_v18 = vcombine.high %v1376_v13, %v1376_v13 }
  0xde   :  { %7634 = vmatpush3.bf16.msra.mxu1 %v8382_v20  ;;  %v8425_v20 = vld [vmem:[%s10747_s1 + $0x8c8] sm:$0xff]  }
  0xdf   :  { %7635 = vmatprep.subr.bf16.mxu1 %v8384_v21  ;;  %v8426_v21 = vld [vmem:[%s10747_s1 + $0x808] sm:$0xff]  }
  0xe0   :  { %7614 = vmatpush3.bf16.msra.mxu0 %v8385_v24  ;;  %v8429_v24 = vld [vmem:[%s10747_s1 + $0x8d0] sm:$0xff]  }
  0xe1   :  { %7643 = vmatprep.subr.bf16.mxu0 %v8387_v27  ;;  %v8432_v27 = vld [vmem:[%s10747_s1 + $0x858] sm:$0xff]  }
  0xe2   :  { %7636 = vmatpush3.bf16.msra.mxu1 %v8386_v28  ;;  %v8433_v28 = vld [vmem:[%s10747_s1 + $0x8d8] sm:$0xff]  }
  0xe3   :  { %5681 = vmatmul.mubr.bf16.vlgmr.msra.gmra.mrb[24].mxu0 %v1369_v26  ;;  %7665 = vmatprep.subr.bf16.mxu1 %v8388_v30  ;;  %v8431_v26 = vld [vmem:[%s10747_s1 + $0x890] sm:$0xff]   ;;  %v8435_v30 = vld [vmem:[%s10747_s1 + $0x898] sm:$0xff]  }
  0xe4   :  { %7644 = vmatpush3.bf16.msra.mxu0 %v8389_v31  ;;  %5760 = vmatprep.mubr.bf16.mxu0 %v1390_v29  ;;  %v8434_v29 = vld [vmem:[%s10747_s1 + $0x818] sm:$0xff]   ;;  %v8436_v31 = vld [vmem:[%s10747_s1 + $0x860] sm:$0xff]  }
  0xe5   :  { %5721 = vmatmul.mubr.bf16.vlgmr.msra.gmra.mrb[24].mxu1 %v1391_v32  ;;  %7645 = vmatprep.subr.bf16.mxu0 %v8391_v33  ;;  %v8437_v32 = vld [vmem:[%s10747_s1 + $0x8e0] sm:$0xff]  }
  0xe6   :  { %7666 = vmatpush3.bf16.msra.mxu1 %v8390_v34  ;;  %5800 = vmatprep.mubr.bf16.mxu1 %v1394_v35  ;;  %v8438_v33 = vld [vmem:[%s10747_s1 + $0x820] sm:$0xff]   ;;  %v8440_v35 = vld [vmem:[%s10747_s1 + $0x868] sm:$0xff]  }
  0xe7   :  { %7667 = vmatprep.subr.bf16.mxu1 %v8392_v36  ;;  %v8439_v34 = vld [vmem:[%s10747_s1 + $0x8a0] sm:$0xff]   ;;  %v8441_v36 = vld [vmem:[%s10747_s1 + $0x8e8] sm:$0xff]  }
  0xe8   :  { %7646 = vmatpush3.bf16.msra.mxu0 %v8393_v37  ;;  %v8442_v37 = vld [vmem:[%s10747_s1 + $0x828] sm:$0xff]  }
  0xe9   :  { %7647 = vmatprep.subr.bf16.mxu0 %v8395_v38  ;;  %v8443_v38 = vld [vmem:[%s10747_s1 + $0x8a8] sm:$0xff]  }
  0xea   :  { %7668 = vmatpush3.bf16.msra.mxu1 %v8394_v39  ;;  %v8444_v39 = vld [vmem:[%s10747_s1 + $0x870] sm:$0xff]  }
  0xeb   :  { %7669 = vmatprep.subr.bf16.mxu1 %v8396_v40  ;;  %v8445_v40 = vld [vmem:[%s10747_s1 + $0x8f0] sm:$0xff]  }
  0xec   :  { %7648 = vmatpush3.bf16.msra.mxu0 %v8397_v42 }
  0xed   :  { %7649 = vmatprep.subr.bf16.mxu0 %v8399_v43  ;;  %v8446_v43 = vld [vmem:[%s10747_s1 + $0x830] sm:$0xff]  }
  0xee   :  { %7670 = vmatpush3.bf16.msra.mxu1 %v8398_v44 }
  0xef   :  { %7671 = vmatprep.subr.bf16.mxu1 %v8400_v45  ;;  %v26_v45 = vld [vmem:[%s10746_s0 + $0x20] sm:$0xff] }
  0xf0   :  { %7650 = vmatpush3.bf16.msra.mxu0 %v8401_v46 }
  0xf1   :  { %7651 = vmatprep.subr.bf16.mxu0 %v8403_v48 }
  0xf2   :  { %7672 = vmatpush3.bf16.msra.mxu1 %v8402_v47 }
  0xf3   :  { %7673 = vmatprep.subr.bf16.mxu1 %v8404_v49  ;;  %v8447_v49 = vld [vmem:[%s10747_s1 + $0x8b0] sm:$0xff]  }
  0xf4   :  { %7652 = vmatpush3.bf16.msra.mxu0 %v8405_v50  ;;  %v8448_v50 = vld [vmem:[%s10747_s1 + $0x878] sm:$0xff]  }
  0xf5   :  { %7653 = vmatprep.subr.bf16.mxu0 %v8407_v52  ;;  %v1395_v52 = vcombine.high %v26_v45, %v26_v45 }
  0xf6   :  { %7674 = vmatpush3.bf16.msra.mxu1 %v8406_v51  ;;  %v7351_v58 = vpop.f32.mrb[0].mxu0  ;;  %v1402_v51 = vrot.slane %v26_v45, %v8920_v41 }
  0xf7   :  { %v7352_v60 = vpop.f32.mrb[1].mxu0  ;;  %7675 = vmatprep.subr.bf16.mxu1 %v8408_v53  ;;  %v7373_v62 = vpop.f32.mrb[0].mxu1 }
  0xf8   :  { %v7353_v63 = vadd.f32 %v7352_v60, %v7351_v58  ;;  %v7354_v0 = vpop.f32.mrb[2].mxu0  ;;  %7654 = vmatpush3.bf16.msra.mxu0 %v8409_v54  ;;  %v7374_v3 = vpop.f32.mrb[1].mxu1  ;;  %v8449_v58 = vld [vmem:[%s10747_s1 + $0x8f8] sm:$0xff]  }
  0xf9   :  { %v7355_v4 = vpop.f32.mrb[3].mxu0  ;;  %7655 = vmatprep.subr.bf16.mxu0 %v8411_v57  ;;  %v7375_v6 = vadd.f32 %v7374_v3, %v7373_v62  ;;  %v7376_v7 = vpop.f32.mrb[2].mxu1  ;;  %v9745_v62 = vrot.slane %v1395_v52, %v8920_v41  ;;  %v8451_v0 = vld [vmem:[%s10747_s1 + $0x8b8] sm:$0xff]   ;;  %v8452_v3 = vld [vmem:[%s10747_s1 + $0x940] sm:$0xff]  }
  0xfa   :  { %v5203_v5 = vadd.f32 %v7353_v63, %v6749_v56  ;;  %7676 = vmatpush3.bf16.msra.mxu1 %v8410_v55  ;;  %v7377_v9 = vpop.f32.mrb[3].mxu1  ;;  %v8454_v7 = vld [vmem:[%s10747_s1 + $0x900] sm:$0xff]   ;;  %v8483_v52 = vld [vmem:[%s10747_s1 + $0x9b8] sm:$0xff]  }
  0xfb   :  { %7677 = vmatprep.subr.bf16.mxu1 %v8412_v59  ;;  %v1410_v59 = vcombine.high %v1402_v51, %v1402_v51  ;;  %v1411_v4 = vcombine.high %v9745_v62, %v9745_v62  ;;  %v8455_v9 = vld [vmem:[%s10747_s1 + $0x980] sm:$0xff]  }
  0xfc   :  { %v9639_v11 = vadd.f32 %v7375_v6, %v5203_v5  ;;  %7656 = vmatpush3.bf16.msra.mxu0 %v8413_v61  ;;  %v8450_v61 = vld [vmem:[%s10747_s1 + $0x838] sm:$0xff]   ;;  %v8453_v6 = vld [vmem:[%s10747_s1 + $0x9c0] sm:$0xff]  }
  0xfd   :  { %7657 = vmatprep.subr.bf16.mxu0 %v8415_v2  ;;  %v1418_v2 = vrot.slane %v1402_v51, %v8920_v41 }
  0xfe   :  { %7678 = vmatpush3.bf16.msra.mxu1 %v8414_v1  ;;  %v1432_v1 = vrot.slane %v1410_v59, %v8920_v41  ;;  %v8489_v59 = vld [vmem:[%s10747_s1 + $0xa48] sm:$0xff]  }
  0xff   :  { %7679 = vmatprep.subr.bf16.mxu1 %v8416_v8  ;;  %v1439_v8 = vrot.slane %v1411_v4, %v8920_v41  ;;  %v8498_v4 = vld [vmem:[%s10747_s1 + $0xad8] sm:$0xff]  }
 0x100   :  { %7658 = vmatpush3.bf16.msra.mxu0 %v8417_v10  ;;  %v1442_v5 = vcombine.high %v1432_v1, %v1432_v1  ;;  %v1440_v10 = vcombine.high %v1418_v2, %v1418_v2 }
 0x101   :  { %7687 = vmatprep.subr.bf16.mxu0 %v8420_v14  ;;  %v8458_v14 = vld [vmem:[%s10747_s1 + $0x908] sm:$0xff]  }
 0x102   :  { %7680 = vmatpush3.bf16.msra.mxu1 %v8418_v12  ;;  %v8457_v12 = vld [vmem:[%s10747_s1 + $0x9c8] sm:$0xff]  }
 0x103   :  { %5761 = vmatmul.mubr.bf16.vlgmr.msra.gmra.mrb[28].mxu0 %v1376_v13  ;;  %7709 = vmatprep.subr.bf16.mxu1 %v8421_v15  ;;  %v1443_v13 = vcombine.high %v1439_v8, %v1439_v8  ;;  %v8459_v15 = vld [vmem:[%s10747_s1 + $0x988] sm:$0xff]  }
 0x104   :  { %7688 = vmatpush3.bf16.msra.mxu0 %v8422_v16  ;;  %5840 = vmatprep.mubr.bf16.mxu0 %v1432_v1  ;;  %v8460_v16 = vld [vmem:[%s10747_s1 + $0x950] sm:$0xff]  }
 0x105   :  { %5801 = vmatmul.mubr.bf16.vlgmr.msra.gmra.mrb[28].mxu1 %v1392_v18  ;;  %7689 = vmatprep.subr.bf16.mxu0 %v8424_v19  ;;  %v8462_v18 = vld [vmem:[%s10747_s1 + $0x910] sm:$0xff]  }
 0x106   :  { %7710 = vmatpush3.bf16.msra.mxu1 %v8423_v17  ;;  %5880 = vmatprep.mubr.bf16.mxu1 %v1442_v5  ;;  %v8461_v17 = vld [vmem:[%s10747_s1 + $0x9d0] sm:$0xff]   ;;  %v8499_v5 = vld [vmem:[%s10747_s1 + $0xa18] sm:$0xff]  }
 0x107   :  { %7711 = vmatprep.subr.bf16.mxu1 %v8425_v20  ;;  %v8463_v19 = vld [vmem:[%s10747_s1 + $0x990] sm:$0xff]   ;;  %v8464_v20 = vld [vmem:[%s10747_s1 + $0x958] sm:$0xff]  }
 0x108   :  { %7690 = vmatpush3.bf16.msra.mxu0 %v8426_v21  ;;  %v8465_v21 = vld [vmem:[%s10747_s1 + $0x9d8] sm:$0xff]   ;;  %v8495_v1 = vld [vmem:[%s10747_s1 + $0xa10] sm:$0xff]  }
 0x109   :  { %7691 = vmatprep.subr.bf16.mxu0 %v8428_v23  ;;  %v8467_v23 = vld [vmem:[%s10747_s1 + $0x998] sm:$0xff]  }
 0x10a   :  { %7712 = vmatpush3.bf16.msra.mxu1 %v8427_v22  ;;  %v8466_v22 = vld [vmem:[%s10747_s1 + $0x918] sm:$0xff]  }
 0x10b   :  { %7713 = vmatprep.subr.bf16.mxu1 %v8429_v24  ;;  %v8468_v24 = vld [vmem:[%s10747_s1 + $0x960] sm:$0xff]  }
 0x10c   :  { %7692 = vmatpush3.bf16.msra.mxu0 %v8430_v25  ;;  %v8469_v25 = vld [vmem:[%s10747_s1 + $0x9e0] sm:$0xff]  }
 0x10d   :  { %7693 = vmatprep.subr.bf16.mxu0 %v8432_v27  ;;  %v8471_v27 = vld [vmem:[%s10747_s1 + $0x9a0] sm:$0xff]  }
 0x10e   :  { %7714 = vmatpush3.bf16.msra.mxu1 %v8431_v26  ;;  %v8470_v26 = vld [vmem:[%s10747_s1 + $0x920] sm:$0xff]  }
 0x10f   :  { %7715 = vmatprep.subr.bf16.mxu1 %v8433_v28  ;;  %v8472_v28 = vld [vmem:[%s10747_s1 + $0x968] sm:$0xff]  }
 0x110   :  { %7694 = vmatpush3.bf16.msra.mxu0 %v8434_v29  ;;  %v8473_v29 = vld [vmem:[%s10747_s1 + $0x9e8] sm:$0xff]  }
 0x111   :  { %7695 = vmatprep.subr.bf16.mxu0 %v8436_v31  ;;  %v8475_v31 = vld [vmem:[%s10747_s1 + $0x9a8] sm:$0xff]  }
 0x112   :  { %7716 = vmatpush3.bf16.msra.mxu1 %v8435_v30  ;;  %v8474_v30 = vld [vmem:[%s10747_s1 + $0x928] sm:$0xff]  }
 0x113   :  { %7717 = vmatprep.subr.bf16.mxu1 %v8437_v32  ;;  %v8476_v32 = vld [vmem:[%s10747_s1 + $0x970] sm:$0xff]  }
 0x114   :  { %7696 = vmatpush3.bf16.msra.mxu0 %v8438_v33 }
 0x115   :  { %7697 = vmatprep.subr.bf16.mxu0 %v8440_v35 }
 0x116   :  { %7718 = vmatpush3.bf16.msra.mxu1 %v8439_v34  ;;  %v7395_v42 = vpop.f32.mrb[4].mxu0  ;;  %v8477_v34 = vld [vmem:[%s10747_s1 + $0x9f0] sm:$0xff]  }
 0x117   :  { %v7396_v44 = vpop.f32.mrb[5].mxu0  ;;  %7719 = vmatprep.subr.bf16.mxu1 %v8441_v36  ;;  %v7417_v46 = vpop.f32.mrb[4].mxu1  ;;  %v8478_v36 = vld [vmem:[%s10747_s1 + $0x930] sm:$0xff]  }
 0x118   :  { %v7397_v47 = vadd.f32 %v7396_v44, %v7395_v42  ;;  %v7398_v48 = vpop.f32.mrb[6].mxu0  ;;  %7698 = vmatpush3.bf16.msra.mxu0 %v8442_v37  ;;  %v7418_v53 = vpop.f32.mrb[5].mxu1  ;;  %v8480_v42 = vld [vmem:[%s10747_s1 + $0x978] sm:$0xff]  }
 0x119   :  { %v7399_v54 = vpop.f32.mrb[7].mxu0  ;;  %7699 = vmatprep.subr.bf16.mxu0 %v8444_v39  ;;  %v7419_v56 = vadd.f32 %v7418_v53, %v7417_v46  ;;  %v7420_v57 = vpop.f32.mrb[6].mxu1  ;;  %v8481_v48 = vld [vmem:[%s10747_s1 + $0x9f8] sm:$0xff]   ;;  %v1425_v53 = vrot.slane %v9745_v62, %v8920_v41  ;;  %v8492_v62 = vld [vmem:[%s10747_s1 + $0xa88] sm:$0xff]  }
 0x11a   :  { %v5283_v55 = vadd.f32 %v7397_v47, %v9639_v11  ;;  %7720 = vmatpush3.bf16.msra.mxu1 %v8443_v38  ;;  %v7421_v60 = vpop.f32.mrb[7].mxu1  ;;  %v8456_v11 = vld [vmem:[%s10747_s1 + $0x948] sm:$0xff]   ;;  %v8485_v54 = vld [vmem:[%s10747_s1 + $0xa40] sm:$0xff]  }
 0x11b   :  { %7721 = vmatprep.subr.bf16.mxu1 %v8445_v40  ;;  %v8479_v40 = vld [vmem:[%s10747_s1 + $0x9b0] sm:$0xff]   ;;  %v8488_v57 = vld [vmem:[%s10747_s1 + $0xa80] sm:$0xff]   ;;  %v8490_v60 = vld [vmem:[%s10747_s1 + $0xac8] sm:$0xff]  }
 0x11c   :  { %v9747_v63 = vadd.f32 %v7419_v56, %v5283_v55  ;;  %7700 = vmatpush3.bf16.msra.mxu0 %v8446_v43  ;;  %v8486_v55 = vld [vmem:[%s10747_s1 + $0xac0] sm:$0xff]  }
 0x11d   :  { %7701 = vmatprep.subr.bf16.mxu0 %v8448_v50  ;;  %v8482_v50 = vld [vmem:[%s10747_s1 + $0x938] sm:$0xff]   ;;  %v8487_v56 = vld [vmem:[%s10747_s1 + $0xa00] sm:$0xff]  }
 0x11e   :  { %7722 = vmatpush3.bf16.msra.mxu1 %v8447_v49 }
 0x11f   :  { %7723 = vmatprep.subr.bf16.mxu1 %v8449_v58  ;;  %v1441_v58 = vcombine.high %v1425_v53, %v1425_v53 }
 0x120   :  { %7702 = vmatpush3.bf16.msra.mxu0 %v8450_v61  ;;  %v8491_v61 = vld [vmem:[%s10747_s1 + $0xa08] sm:$0xff]  }
 0x121   :  { %7731 = vmatprep.subr.bf16.mxu0 %v8452_v3  ;;  %v8497_v3 = vld [vmem:[%s10747_s1 + $0xa58] sm:$0xff]  }
 0x122   :  { %7724 = vmatpush3.bf16.msra.mxu1 %v8451_v0  ;;  %v8494_v0 = vld [vmem:[%s10747_s1 + $0xad0] sm:$0xff]  }
 0x123   :  { %5841 = vmatmul.mubr.bf16.vlgmr.msra.gmra.mrb[32].mxu0 %v1418_v2  ;;  %7753 = vmatprep.subr.bf16.mxu1 %v8453_v6  ;;  %v8496_v2 = vld [vmem:[%s10747_s1 + $0xa90] sm:$0xff]   ;;  %v8500_v6 = vld [vmem:[%s10747_s1 + $0xa98] sm:$0xff]  }
 0x124   :  { %7732 = vmatpush3.bf16.msra.mxu0 %v8454_v7  ;;  %5920 = vmatprep.mubr.bf16.mxu0 %v1439_v8  ;;  %v8501_v7 = vld [vmem:[%s10747_s1 + $0xa60] sm:$0xff]  }
 0x125   :  { %5881 = vmatmul.mubr.bf16.vlgmr.msra.gmra.mrb[32].mxu1 %v1440_v10  ;;  %7733 = vmatprep.subr.bf16.mxu0 %v8456_v11  ;;  %v8502_v8 = vld [vmem:[%s10747_s1 + $0xae0] sm:$0xff]   ;;  %v8505_v11 = vld [vmem:[%s10747_s1 + $0xa68] sm:$0xff]  }
 0x126   :  { %7754 = vmatpush3.bf16.msra.mxu1 %v8455_v9  ;;  %5960 = vmatprep.mubr.bf16.mxu1 %v1443_v13  ;;  %v8503_v9 = vld [vmem:[%s10747_s1 + $0xa20] sm:$0xff]   ;;  %v8507_v13 = vld [vmem:[%s10747_s1 + $0xa28] sm:$0xff]  }
 0x127   :  { %7755 = vmatprep.subr.bf16.mxu1 %v8457_v12  ;;  %v8504_v10 = vld [vmem:[%s10747_s1 + $0xaa0] sm:$0xff]   ;;  %v8506_v12 = vld [vmem:[%s10747_s1 + $0xae8] sm:$0xff]  }
 0x128   :  { %7734 = vmatpush3.bf16.msra.mxu0 %v8458_v14  ;;  %v8508_v14 = vld [vmem:[%s10747_s1 + $0xaa8] sm:$0xff]  }
 0x129   :  { %7735 = vmatprep.subr.bf16.mxu0 %v8460_v16 }
 0x12a   :  { %7756 = vmatpush3.bf16.msra.mxu1 %v8459_v15  ;;  %v8509_v15 = vld [vmem:[%s10747_s1 + $0xa70] sm:$0xff]  }
 0x12b   :  { %7757 = vmatprep.subr.bf16.mxu1 %v8461_v17  ;;  %v8510_v17 = vld [vmem:[%s10747_s1 + $0xaf0] sm:$0xff]  }
 0x12c   :  { %7736 = vmatpush3.bf16.msra.mxu0 %v8462_v18 }
 0x12d   :  { %7737 = vmatprep.subr.bf16.mxu0 %v8464_v20 }
 0x12e   :  { %7758 = vmatpush3.bf16.msra.mxu1 %v8463_v19  ;;  %v8511_v19 = vld [vmem:[%s10747_s1 + $0xa30] sm:$0xff]  }
 0x12f   :  { %7759 = vmatprep.subr.bf16.mxu1 %v8465_v21 }
 0x130   :  { %7738 = vmatpush3.bf16.msra.mxu0 %v8466_v22 }
 0x131   :  { %7739 = vmatprep.subr.bf16.mxu0 %v8468_v24  ;;  %v8513_v24 = vld [vmem:[%s10747_s1 + $0xa78] sm:$0xff]  }
 0x132   :  { %7760 = vmatpush3.bf16.msra.mxu1 %v8467_v23  ;;  %v8512_v23 = vld [vmem:[%s10747_s1 + $0xab0] sm:$0xff]  }
 0x133   :  { %7761 = vmatprep.subr.bf16.mxu1 %v8469_v25  ;;  %v27_v25 = vld [vmem:[%s10746_s0 + $0x28] sm:$0xff] }
 0x134   :  { %7740 = vmatpush3.bf16.msra.mxu0 %v8470_v26 }
 0x135   :  { %7741 = vmatprep.subr.bf16.mxu0 %v8472_v28  ;;  %v1451_v28 = vrot.slane %v27_v25, %v8920_v41 }
 0x136   :  { %7762 = vmatpush3.bf16.msra.mxu1 %v8471_v27  ;;  %v7439_v33 = vpop.f32.mrb[8].mxu0 }
 0x137   :  { %v7440_v35 = vpop.f32.mrb[9].mxu0  ;;  %7763 = vmatprep.subr.bf16.mxu1 %v8473_v29  ;;  %v1444_v29 = vcombine.high %v27_v25, %v27_v25  ;;  %v8547_v25 = vld [vmem:[%s10747_s1 + $0xb38] sm:$0xff]  }
 0x138   :  { %v7461_v37 = vpop.f32.mrb[8].mxu1  ;;  %v7441_v38 = vadd.f32 %v7440_v35, %v7439_v33  ;;  %v7442_v39 = vpop.f32.mrb[10].mxu0  ;;  %7742 = vmatpush3.bf16.msra.mxu0 %v8474_v30  ;;  %v8514_v33 = vld [vmem:[%s10747_s1 + $0xaf8] sm:$0xff]  }
 0x139   :  { %v7462_v43 = vpop.f32.mrb[9].mxu1  ;;  %v7443_v44 = vpop.f32.mrb[11].mxu0  ;;  %7743 = vmatprep.subr.bf16.mxu0 %v8476_v32  ;;  %v8515_v35 = vld [vmem:[%s10747_s1 + $0xa38] sm:$0xff]  }
 0x13a   :  { %v5363_v45 = vadd.f32 %v7441_v38, %v9747_v63  ;;  %v7463_v46 = vadd.f32 %v7462_v43, %v7461_v37  ;;  %v7464_v47 = vpop.f32.mrb[10].mxu1  ;;  %7764 = vmatpush3.bf16.msra.mxu1 %v8475_v31  ;;  %v8493_v63 = vld [vmem:[%s10747_s1 + $0xa50] sm:$0xff]   ;;  %v9957_v37 = vrot.slane %v1444_v29, %v8920_v41  ;;  %v8516_v39 = vld [vmem:[%s10747_s1 + $0xab8] sm:$0xff]   ;;  %v8517_v43 = vld [vmem:[%s10747_s1 + $0xb40] sm:$0xff]  }
 0x13b   :  { %v7465_v49 = vpop.f32.mrb[11].mxu1  ;;  %7765 = vmatprep.subr.bf16.mxu1 %v8477_v34  ;;  %v8519_v47 = vld [vmem:[%s10747_s1 + $0xb00] sm:$0xff]  }
 0x13c   :  { %v9851_v51 = vadd.f32 %v7463_v46, %v5363_v45  ;;  %7744 = vmatpush3.bf16.msra.mxu0 %v8478_v36  ;;  %v1459_v36 = vcombine.high %v1451_v28, %v1451_v28  ;;  %v1460_v44 = vcombine.high %v9957_v37, %v9957_v37  ;;  %v8518_v45 = vld [vmem:[%s10747_s1 + $0xbc0] sm:$0xff]  }
 0x13d   :  { %7745 = vmatprep.subr.bf16.mxu0 %v8480_v42  ;;  %v1467_v42 = vrot.slane %v1451_v28, %v8920_v41  ;;  %v8520_v49 = vld [vmem:[%s10747_s1 + $0xb80] sm:$0xff]   ;;  %v1474_v28 = vrot.slane %v9957_v37, %v8920_v41  ;;  %v8557_v37 = vld [vmem:[%s10747_s1 + $0xc88] sm:$0xff]  }
 0x13e   :  { %7766 = vmatpush3.bf16.msra.mxu1 %v8479_v40  ;;  %v1481_v40 = vrot.slane %v1459_v36, %v8920_v41  ;;  %v8550_v29 = vld [vmem:[%s10747_s1 + $0xc40] sm:$0xff]   ;;  %v8556_v36 = vld [vmem:[%s10747_s1 + $0xc08] sm:$0xff]  }
 0x13f   :  { %7767 = vmatprep.subr.bf16.mxu1 %v8481_v48  ;;  %v1488_v48 = vrot.slane %v1460_v44, %v8920_v41  ;;  %v8563_v44 = vld [vmem:[%s10747_s1 + $0xcd8] sm:$0xff]  }
 0x140   :  { %7746 = vmatpush3.bf16.msra.mxu0 %v8482_v50  ;;  %v1491_v46 = vcombine.high %v1481_v40, %v1481_v40  ;;  %v1489_v50 = vcombine.high %v1467_v42, %v1467_v42 }
 0x141   :  { %7775 = vmatprep.subr.bf16.mxu0 %v8485_v54  ;;  %v8523_v54 = vld [vmem:[%s10747_s1 + $0xb08] sm:$0xff]  }
 0x142   :  { %7768 = vmatpush3.bf16.msra.mxu1 %v8483_v52  ;;  %v8522_v52 = vld [vmem:[%s10747_s1 + $0xbc8] sm:$0xff]  }
 0x143   :  { %5921 = vmatmul.mubr.bf16.vlgmr.msra.gmra.mrb[36].mxu0 %v1425_v53  ;;  %7797 = vmatprep.subr.bf16.mxu1 %v8486_v55  ;;  %v1492_v53 = vcombine.high %v1488_v48, %v1488_v48  ;;  %v8524_v55 = vld [vmem:[%s10747_s1 + $0xb88] sm:$0xff]  }
 0x144   :  { %7776 = vmatpush3.bf16.msra.mxu0 %v8487_v56  ;;  %6000 = vmatprep.mubr.bf16.mxu0 %v1481_v40  ;;  %v8525_v56 = vld [vmem:[%s10747_s1 + $0xb50] sm:$0xff]  }
 0x145   :  { %5961 = vmatmul.mubr.bf16.vlgmr.msra.gmra.mrb[36].mxu1 %v1441_v58  ;;  %7777 = vmatprep.subr.bf16.mxu0 %v8489_v59  ;;  %v8527_v58 = vld [vmem:[%s10747_s1 + $0xb10] sm:$0xff]  }
 0x146   :  { %7798 = vmatpush3.bf16.msra.mxu1 %v8488_v57  ;;  %6040 = vmatprep.mubr.bf16.mxu1 %v1491_v46  ;;  %v8526_v57 = vld [vmem:[%s10747_s1 + $0xbd0] sm:$0xff]   ;;  %v8565_v46 = vld [vmem:[%s10747_s1 + $0xc98] sm:$0xff]  }
 0x147   :  { %7799 = vmatprep.subr.bf16.mxu1 %v8490_v60  ;;  %v8528_v59 = vld [vmem:[%s10747_s1 + $0xb90] sm:$0xff]   ;;  %v8529_v60 = vld [vmem:[%s10747_s1 + $0xb58] sm:$0xff]  }
 0x148   :  { %7778 = vmatpush3.bf16.msra.mxu0 %v8491_v61  ;;  %v8530_v61 = vld [vmem:[%s10747_s1 + $0xbd8] sm:$0xff]   ;;  %v8560_v40 = vld [vmem:[%s10747_s1 + $0xc10] sm:$0xff]  }
 0x149   :  { %7779 = vmatprep.subr.bf16.mxu0 %v8493_v63  ;;  %v8532_v63 = vld [vmem:[%s10747_s1 + $0xb98] sm:$0xff]  }
 0x14a   :  { %7800 = vmatpush3.bf16.msra.mxu1 %v8492_v62  ;;  %v8531_v62 = vld [vmem:[%s10747_s1 + $0xb18] sm:$0xff]  }
 0x14b   :  { %7801 = vmatprep.subr.bf16.mxu1 %v8494_v0  ;;  %v8533_v0 = vld [vmem:[%s10747_s1 + $0xb60] sm:$0xff]  }
 0x14c   :  { %7780 = vmatpush3.bf16.msra.mxu0 %v8495_v1  ;;  %v8534_v1 = vld [vmem:[%s10747_s1 + $0xbe0] sm:$0xff]  }
 0x14d   :  { %7781 = vmatprep.subr.bf16.mxu0 %v8497_v3  ;;  %v8536_v3 = vld [vmem:[%s10747_s1 + $0xba0] sm:$0xff]  }
 0x14e   :  { %7802 = vmatpush3.bf16.msra.mxu1 %v8496_v2  ;;  %v8535_v2 = vld [vmem:[%s10747_s1 + $0xb20] sm:$0xff]  }
 0x14f   :  { %7803 = vmatprep.subr.bf16.mxu1 %v8498_v4  ;;  %v8537_v4 = vld [vmem:[%s10747_s1 + $0xb68] sm:$0xff]  }
 0x150   :  { %7782 = vmatpush3.bf16.msra.mxu0 %v8499_v5  ;;  %v8538_v5 = vld [vmem:[%s10747_s1 + $0xbe8] sm:$0xff]  }
 0x151   :  { %7783 = vmatprep.subr.bf16.mxu0 %v8501_v7  ;;  %v8540_v7 = vld [vmem:[%s10747_s1 + $0xba8] sm:$0xff]  }
 0x152   :  { %7804 = vmatpush3.bf16.msra.mxu1 %v8500_v6  ;;  %v8539_v6 = vld [vmem:[%s10747_s1 + $0xb28] sm:$0xff]  }
 0x153   :  { %7805 = vmatprep.subr.bf16.mxu1 %v8502_v8  ;;  %v8541_v8 = vld [vmem:[%s10747_s1 + $0xb70] sm:$0xff]  }
 0x154   :  { %7784 = vmatpush3.bf16.msra.mxu0 %v8503_v9 }
 0x155   :  { %7785 = vmatprep.subr.bf16.mxu0 %v8505_v11 }
 0x156   :  { %7806 = vmatpush3.bf16.msra.mxu1 %v8504_v10  ;;  %v7483_v16 = vpop.f32.mrb[12].mxu0  ;;  %v8542_v10 = vld [vmem:[%s10747_s1 + $0xbf0] sm:$0xff]  }
 0x157   :  { %v7484_v18 = vpop.f32.mrb[13].mxu0  ;;  %7807 = vmatprep.subr.bf16.mxu1 %v8506_v12  ;;  %v8543_v12 = vld [vmem:[%s10747_s1 + $0xb30] sm:$0xff]  }
 0x158   :  { %v7505_v20 = vpop.f32.mrb[12].mxu1  ;;  %v7485_v21 = vadd.f32 %v7484_v18, %v7483_v16  ;;  %v7486_v22 = vpop.f32.mrb[14].mxu0  ;;  %7786 = vmatpush3.bf16.msra.mxu0 %v8507_v13  ;;  %v8544_v16 = vld [vmem:[%s10747_s1 + $0xbb0] sm:$0xff]  }
 0x159   :  { %v7506_v26 = vpop.f32.mrb[13].mxu1  ;;  %v7487_v27 = vpop.f32.mrb[15].mxu0  ;;  %7787 = vmatprep.subr.bf16.mxu0 %v8509_v15 }
 0x15a   :  { %v5443_v30 = vadd.f32 %v7485_v21, %v9851_v51  ;;  %v7507_v31 = vadd.f32 %v7506_v26, %v7505_v20  ;;  %v7508_v32 = vpop.f32.mrb[14].mxu1  ;;  %7808 = vmatpush3.bf16.msra.mxu1 %v8508_v14  ;;  %v8521_v51 = vld [vmem:[%s10747_s1 + $0xb48] sm:$0xff]   ;;  %v8548_v27 = vld [vmem:[%s10747_s1 + $0xbb8] sm:$0xff]  }
 0x15b   :  { %v7509_v34 = vpop.f32.mrb[15].mxu1  ;;  %7809 = vmatprep.subr.bf16.mxu1 %v8510_v17  ;;  %v8545_v17 = vld [vmem:[%s10747_s1 + $0xb78] sm:$0xff]   ;;  %v8553_v32 = vld [vmem:[%s10747_s1 + $0xc80] sm:$0xff]  }
 0x15c   :  { %v9959_v38 = vadd.f32 %v7507_v31, %v5443_v30  ;;  %7788 = vmatpush3.bf16.msra.mxu0 %v8511_v19  ;;  %v8551_v30 = vld [vmem:[%s10747_s1 + $0xcc0] sm:$0xff]   ;;  %v8554_v34 = vld [vmem:[%s10747_s1 + $0xc48] sm:$0xff]  }
 0x15d   :  { %7789 = vmatprep.subr.bf16.mxu0 %v8513_v24  ;;  %v8552_v31 = vld [vmem:[%s10747_s1 + $0xc00] sm:$0xff]  }
 0x15e   :  { %7810 = vmatpush3.bf16.msra.mxu1 %v8512_v23  ;;  %v8546_v23 = vld [vmem:[%s10747_s1 + $0xbf8] sm:$0xff]  }
 0x15f   :  { %7811 = vmatprep.subr.bf16.mxu1 %v8514_v33  ;;  %v1490_v33 = vcombine.high %v1474_v28, %v1474_v28 }
 0x160   :  { %7790 = vmatpush3.bf16.msra.mxu0 %v8515_v35  ;;  %v8555_v35 = vld [vmem:[%s10747_s1 + $0xcc8] sm:$0xff]  }
 0x161   :  { %7819 = vmatprep.subr.bf16.mxu0 %v8517_v43  ;;  %v8562_v43 = vld [vmem:[%s10747_s1 + $0xc58] sm:$0xff]  }
 0x162   :  { %7812 = vmatpush3.bf16.msra.mxu1 %v8516_v39  ;;  %v8559_v39 = vld [vmem:[%s10747_s1 + $0xcd0] sm:$0xff]  }
 0x163   :  { %6001 = vmatmul.mubr.bf16.vlgmr.msra.gmra.mrb[40].mxu0 %v1467_v42  ;;  %7841 = vmatprep.subr.bf16.mxu1 %v8518_v45  ;;  %v8561_v42 = vld [vmem:[%s10747_s1 + $0xc90] sm:$0xff]   ;;  %v8564_v45 = vld [vmem:[%s10747_s1 + $0xc18] sm:$0xff]  }
 0x164   :  { %7820 = vmatpush3.bf16.msra.mxu0 %v8519_v47  ;;  %6080 = vmatprep.mubr.bf16.mxu0 %v1488_v48  ;;  %v8566_v47 = vld [vmem:[%s10747_s1 + $0xc60] sm:$0xff]  }
 0x165   :  { %6041 = vmatmul.mubr.bf16.vlgmr.msra.gmra.mrb[40].mxu1 %v1489_v50  ;;  %7821 = vmatprep.subr.bf16.mxu0 %v8521_v51  ;;  %v8567_v48 = vld [vmem:[%s10747_s1 + $0xce0] sm:$0xff]   ;;  %v8570_v51 = vld [vmem:[%s10747_s1 + $0xc68] sm:$0xff]  }
 0x166   :  { %7842 = vmatpush3.bf16.msra.mxu1 %v8520_v49  ;;  %6120 = vmatprep.mubr.bf16.mxu1 %v1492_v53  ;;  %v8568_v49 = vld [vmem:[%s10747_s1 + $0xc20] sm:$0xff]   ;;  %v8572_v53 = vld [vmem:[%s10747_s1 + $0xc28] sm:$0xff]  }
 0x167   :  { %7843 = vmatprep.subr.bf16.mxu1 %v8522_v52  ;;  %v8569_v50 = vld [vmem:[%s10747_s1 + $0xca0] sm:$0xff]   ;;  %v8571_v52 = vld [vmem:[%s10747_s1 + $0xce8] sm:$0xff]  }
 0x168   :  { %7822 = vmatpush3.bf16.msra.mxu0 %v8523_v54  ;;  %v8573_v54 = vld [vmem:[%s10747_s1 + $0xca8] sm:$0xff]  }
 0x169   :  { %7823 = vmatprep.subr.bf16.mxu0 %v8525_v56 }
 0x16a   :  { %7844 = vmatpush3.bf16.msra.mxu1 %v8524_v55  ;;  %v8574_v55 = vld [vmem:[%s10747_s1 + $0xc70] sm:$0xff]  }
 0x16b   :  { %7845 = vmatprep.subr.bf16.mxu1 %v8526_v57  ;;  %v8575_v57 = vld [vmem:[%s10747_s1 + $0xcf0] sm:$0xff]  }
 0x16c   :  { %7824 = vmatpush3.bf16.msra.mxu0 %v8527_v58 }
 0x16d   :  { %7825 = vmatprep.subr.bf16.mxu0 %v8529_v60 }
 0x16e   :  { %7846 = vmatpush3.bf16.msra.mxu1 %v8528_v59  ;;  %v8576_v59 = vld [vmem:[%s10747_s1 + $0xc30] sm:$0xff]  }
 0x16f   :  { %7847 = vmatprep.subr.bf16.mxu1 %v8530_v61 }
 0x170   :  { %7826 = vmatpush3.bf16.msra.mxu0 %v8531_v62 }
 0x171   :  { %7827 = vmatprep.subr.bf16.mxu0 %v8533_v0 }
 0x172   :  { %7848 = vmatpush3.bf16.msra.mxu1 %v8532_v63  ;;  %v8577_v63 = vld [vmem:[%s10747_s1 + $0xcb0] sm:$0xff]  }
 0x173   :  { %7849 = vmatprep.subr.bf16.mxu1 %v8534_v1 }
 0x174   :  { %7828 = vmatpush3.bf16.msra.mxu0 %v8535_v2  ;;  %v8578_v2 = vld [vmem:[%s10747_s1 + $0xc78] sm:$0xff]  }
 0x175   :  { %7829 = vmatprep.subr.bf16.mxu0 %v8537_v4 }
 0x176   :  { %7850 = vmatpush3.bf16.msra.mxu1 %v8536_v3  ;;  %v7527_v9 = vpop.f32.mrb[16].mxu0  ;;  %v28_v3 = vld [vmem:[%s10746_s0 + $0x30] sm:$0xff] }
 0x177   :  { %v7528_v11 = vpop.f32.mrb[17].mxu0  ;;  %7851 = vmatprep.subr.bf16.mxu1 %v8538_v5 }
 0x178   :  { %v7549_v13 = vpop.f32.mrb[16].mxu1  ;;  %v7529_v14 = vadd.f32 %v7528_v11, %v7527_v9  ;;  %v7530_v15 = vpop.f32.mrb[18].mxu0  ;;  %7830 = vmatpush3.bf16.msra.mxu0 %v8539_v6  ;;  %v1493_v9 = vcombine.high %v28_v3, %v28_v3  ;;  %v8580_v11 = vld [vmem:[%s10747_s1 + $0xc38] sm:$0xff]  }
 0x179   :  { %v7550_v18 = vpop.f32.mrb[17].mxu1  ;;  %v7531_v19 = vpop.f32.mrb[19].mxu0  ;;  %7831 = vmatprep.subr.bf16.mxu0 %v8541_v8  ;;  %v1500_v8 = vrot.slane %v28_v3, %v8920_v41  ;;  %v8613_v3 = vld [vmem:[%s10747_s1 + $0xdb8] sm:$0xff]  }
 0x17a   :  { %v5523_v20 = vadd.f32 %v7529_v14, %v9959_v38  ;;  %v7551_v21 = vadd.f32 %v7550_v18, %v7549_v13  ;;  %v7552_v22 = vpop.f32.mrb[18].mxu1  ;;  %7852 = vmatpush3.bf16.msra.mxu1 %v8540_v7  ;;  %v8558_v38 = vld [vmem:[%s10747_s1 + $0xc50] sm:$0xff]   ;;  %v8579_v7 = vld [vmem:[%s10747_s1 + $0xcf8] sm:$0xff]   ;;  %v10174_v15 = vrot.slane %v1493_v9, %v8920_v41  ;;  %v8583_v19 = vld [vmem:[%s10747_s1 + $0xdc0] sm:$0xff]  }
 0x17b   :  { %v7553_v24 = vpop.f32.mrb[19].mxu1  ;;  %7853 = vmatprep.subr.bf16.mxu1 %v8542_v10  ;;  %v8581_v13 = vld [vmem:[%s10747_s1 + $0xcb8] sm:$0xff]   ;;  %v1508_v14 = vcombine.high %v1500_v8, %v1500_v8 }
 0x17c   :  { %v10063_v26 = vadd.f32 %v7551_v21, %v5523_v20  ;;  %7832 = vmatpush3.bf16.msra.mxu0 %v8543_v12  ;;  %v1509_v20 = vcombine.high %v10174_v15, %v10174_v15  ;;  %v8584_v21 = vld [vmem:[%s10747_s1 + $0xd00] sm:$0xff]  }
 0x17d   :  { %7833 = vmatprep.subr.bf16.mxu0 %v8545_v17  ;;  %v8582_v17 = vld [vmem:[%s10747_s1 + $0xd40] sm:$0xff]   ;;  %v1530_v18 = vrot.slane %v1508_v14, %v8920_v41  ;;  %v8623_v14 = vld [vmem:[%s10747_s1 + $0xe50] sm:$0xff]  }
 0x17e   :  { %7854 = vmatpush3.bf16.msra.mxu1 %v8544_v16  ;;  %v1516_v16 = vrot.slane %v1500_v8, %v8920_v41  ;;  %v1537_v24 = vrot.slane %v1509_v20, %v8920_v41  ;;  %v8618_v8 = vld [vmem:[%s10747_s1 + $0xe80] sm:$0xff]   ;;  %v8629_v20 = vld [vmem:[%s10747_s1 + $0xe18] sm:$0xff]  }
 0x17f   :  { %7855 = vmatprep.subr.bf16.mxu1 %v8546_v23  ;;  %v1540_v22 = vcombine.high %v1530_v18, %v1530_v18  ;;  %v8585_v23 = vld [vmem:[%s10747_s1 + $0xd80] sm:$0xff]  }
 0x180   :  { %7834 = vmatpush3.bf16.msra.mxu0 %v8547_v25  ;;  %v1538_v25 = vcombine.high %v1516_v16, %v1516_v16 }
 0x181   :  { %7863 = vmatprep.subr.bf16.mxu0 %v8550_v29  ;;  %v8588_v29 = vld [vmem:[%s10747_s1 + $0xd08] sm:$0xff]  }
 0x182   :  { %7856 = vmatpush3.bf16.msra.mxu1 %v8548_v27  ;;  %v8587_v27 = vld [vmem:[%s10747_s1 + $0xdc8] sm:$0xff]  }
 0x183   :  { %6081 = vmatmul.mubr.bf16.vlgmr.msra.gmra.mrb[44].mxu0 %v1474_v28  ;;  %7885 = vmatprep.subr.bf16.mxu1 %v8551_v30  ;;  %v1541_v28 = vcombine.high %v1537_v24, %v1537_v24  ;;  %v8589_v30 = vld [vmem:[%s10747_s1 + $0xd88] sm:$0xff]  }
 0x184   :  { %7864 = vmatpush3.bf16.msra.mxu0 %v8552_v31  ;;  %6160 = vmatprep.mubr.bf16.mxu0 %v1530_v18  ;;  %v8590_v31 = vld [vmem:[%s10747_s1 + $0xd50] sm:$0xff]   ;;  %v8627_v18 = vld [vmem:[%s10747_s1 + $0xe58] sm:$0xff]  }
 0x185   :  { %6121 = vmatmul.mubr.bf16.vlgmr.msra.gmra.mrb[44].mxu1 %v1490_v33  ;;  %7865 = vmatprep.subr.bf16.mxu0 %v8554_v34  ;;  %v8592_v33 = vld [vmem:[%s10747_s1 + $0xd10] sm:$0xff]  }
 0x186   :  { %7886 = vmatpush3.bf16.msra.mxu1 %v8553_v32  ;;  %6200 = vmatprep.mubr.bf16.mxu1 %v1540_v22  ;;  %v8591_v32 = vld [vmem:[%s10747_s1 + $0xdd0] sm:$0xff]   ;;  %v8631_v22 = vld [vmem:[%s10747_s1 + $0xe60] sm:$0xff]  }
 0x187   :  { %7887 = vmatprep.subr.bf16.mxu1 %v8555_v35  ;;  %v8593_v34 = vld [vmem:[%s10747_s1 + $0xd90] sm:$0xff]   ;;  %v8594_v35 = vld [vmem:[%s10747_s1 + $0xd58] sm:$0xff]  }
 0x188   :  { %7866 = vmatpush3.bf16.msra.mxu0 %v8556_v36  ;;  %v8595_v36 = vld [vmem:[%s10747_s1 + $0xdd8] sm:$0xff]  }
 0x189   :  { %7867 = vmatprep.subr.bf16.mxu0 %v8558_v38  ;;  %v8597_v38 = vld [vmem:[%s10747_s1 + $0xd98] sm:$0xff]  }
 0x18a   :  { %7888 = vmatpush3.bf16.msra.mxu1 %v8557_v37  ;;  %v8596_v37 = vld [vmem:[%s10747_s1 + $0xd18] sm:$0xff]  }
 0x18b   :  { %7889 = vmatprep.subr.bf16.mxu1 %v8559_v39  ;;  %v8598_v39 = vld [vmem:[%s10747_s1 + $0xd60] sm:$0xff]  }
 0x18c   :  { %7868 = vmatpush3.bf16.msra.mxu0 %v8560_v40  ;;  %v8599_v40 = vld [vmem:[%s10747_s1 + $0xde0] sm:$0xff]  }
 0x18d   :  { %7869 = vmatprep.subr.bf16.mxu0 %v8562_v43  ;;  %v8601_v43 = vld [vmem:[%s10747_s1 + $0xda0] sm:$0xff]  }
 0x18e   :  { %7890 = vmatpush3.bf16.msra.mxu1 %v8561_v42  ;;  %v8600_v42 = vld [vmem:[%s10747_s1 + $0xd20] sm:$0xff]  }
 0x18f   :  { %7891 = vmatprep.subr.bf16.mxu1 %v8563_v44  ;;  %v8602_v44 = vld [vmem:[%s10747_s1 + $0xd68] sm:$0xff]  }
 0x190   :  { %7870 = vmatpush3.bf16.msra.mxu0 %v8564_v45  ;;  %v8603_v45 = vld [vmem:[%s10747_s1 + $0xde8] sm:$0xff]  }
 0x191   :  { %7871 = vmatprep.subr.bf16.mxu0 %v8566_v47  ;;  %v8605_v47 = vld [vmem:[%s10747_s1 + $0xda8] sm:$0xff]  }
 0x192   :  { %7892 = vmatpush3.bf16.msra.mxu1 %v8565_v46  ;;  %v8604_v46 = vld [vmem:[%s10747_s1 + $0xd28] sm:$0xff]  }
 0x193   :  { %7893 = vmatprep.subr.bf16.mxu1 %v8567_v48  ;;  %v8606_v48 = vld [vmem:[%s10747_s1 + $0xd70] sm:$0xff]  }
 0x194   :  { %7872 = vmatpush3.bf16.msra.mxu0 %v8568_v49 }
 0x195   :  { %7873 = vmatprep.subr.bf16.mxu0 %v8570_v51 }
 0x196   :  { %7894 = vmatpush3.bf16.msra.mxu1 %v8569_v50  ;;  %v7571_v56 = vpop.f32.mrb[20].mxu0  ;;  %v8607_v50 = vld [vmem:[%s10747_s1 + $0xdf0] sm:$0xff]  }
 0x197   :  { %v7572_v58 = vpop.f32.mrb[21].mxu0  ;;  %7895 = vmatprep.subr.bf16.mxu1 %v8571_v52  ;;  %v8608_v52 = vld [vmem:[%s10747_s1 + $0xd30] sm:$0xff]  }
 0x198   :  { %v7593_v60 = vpop.f32.mrb[20].mxu1  ;;  %v7573_v61 = vadd.f32 %v7572_v58, %v7571_v56  ;;  %v7574_v62 = vpop.f32.mrb[22].mxu0  ;;  %7874 = vmatpush3.bf16.msra.mxu0 %v8572_v53  ;;  %v8609_v56 = vld [vmem:[%s10747_s1 + $0xdb0] sm:$0xff]  }
 0x199   :  { %v7594_v0 = vpop.f32.mrb[21].mxu1  ;;  %v7575_v1 = vpop.f32.mrb[23].mxu0  ;;  %7875 = vmatprep.subr.bf16.mxu0 %v8574_v55 }
 0x19a   :  { %v5603_v4 = vadd.f32 %v7573_v61, %v10063_v26  ;;  %v7595_v5 = vadd.f32 %v7594_v0, %v7593_v60  ;;  %v7596_v6 = vpop.f32.mrb[22].mxu1  ;;  %7896 = vmatpush3.bf16.msra.mxu1 %v8573_v54  ;;  %v8586_v26 = vld [vmem:[%s10747_s1 + $0xd48] sm:$0xff]   ;;  %v8612_v1 = vld [vmem:[%s10747_s1 + $0xd38] sm:$0xff]  }
 0x19b   :  { %v7597_v10 = vpop.f32.mrb[23].mxu1  ;;  %7897 = vmatprep.subr.bf16.mxu1 %v8575_v57  ;;  %v8610_v57 = vld [vmem:[%s10747_s1 + $0xd78] sm:$0xff]   ;;  %v8616_v6 = vld [vmem:[%s10747_s1 + $0xec0] sm:$0xff]  }
 0x19c   :  { %v10168_v12 = vadd.f32 %v7595_v5, %v5603_v4  ;;  %7876 = vmatpush3.bf16.msra.mxu0 %v8576_v59  ;;  %v1523_v4 = vrot.slane %v10174_v15, %v8920_v41  ;;  %v8615_v5 = vld [vmem:[%s10747_s1 + $0xe40] sm:$0xff]   ;;  %v8619_v10 = vld [vmem:[%s10747_s1 + $0xe48] sm:$0xff]   ;;  %v8624_v15 = vld [vmem:[%s10747_s1 + $0xed0] sm:$0xff]  }
 0x19d   :  { %7877 = vmatprep.subr.bf16.mxu0 %v8578_v2 }
 0x19e   :  { %7898 = vmatpush3.bf16.msra.mxu1 %v8577_v63  ;;  %v8611_v63 = vld [vmem:[%s10747_s1 + $0xdf8] sm:$0xff]   ;;  %v1539_v9 = vcombine.high %v1523_v4, %v1523_v4 }
 0x19f   :  { %7899 = vmatprep.subr.bf16.mxu1 %v8579_v7  ;;  %v8617_v7 = vld [vmem:[%s10747_s1 + $0xe00] sm:$0xff]  }
 0x1a0   :  { %7878 = vmatpush3.bf16.msra.mxu0 %v8580_v11  ;;  %v8620_v11 = vld [vmem:[%s10747_s1 + $0xec8] sm:$0xff]  }
 0x1a1   :  { %7907 = vmatprep.subr.bf16.mxu0 %v8582_v17  ;;  %v8626_v17 = vld [vmem:[%s10747_s1 + $0xe90] sm:$0xff]  }
 0x1a2   :  { %7900 = vmatpush3.bf16.msra.mxu1 %v8581_v13  ;;  %v8622_v13 = vld [vmem:[%s10747_s1 + $0xe88] sm:$0xff]  }
 0x1a3   :  { %6161 = vmatmul.mubr.bf16.vlgmr.msra.gmra.mrb[48].mxu0 %v1516_v16  ;;  %7929 = vmatprep.subr.bf16.mxu1 %v8583_v19  ;;  %v8625_v16 = vld [vmem:[%s10747_s1 + $0xe10] sm:$0xff]   ;;  %v8628_v19 = vld [vmem:[%s10747_s1 + $0xed8] sm:$0xff]  }
 0x1a4   :  { %7908 = vmatpush3.bf16.msra.mxu0 %v8584_v21  ;;  %6240 = vmatprep.mubr.bf16.mxu0 %v1537_v24  ;;  %v8630_v21 = vld [vmem:[%s10747_s1 + $0xe98] sm:$0xff]   ;;  %v8633_v24 = vld [vmem:[%s10747_s1 + $0xe20] sm:$0xff]  }
 0x1a5   :  { %6201 = vmatmul.mubr.bf16.vlgmr.msra.gmra.mrb[48].mxu1 %v1538_v25  ;;  %7909 = vmatprep.subr.bf16.mxu0 %v8586_v26  ;;  %v8634_v25 = vld [vmem:[%s10747_s1 + $0xea0] sm:$0xff]   ;;  %v8635_v26 = vld [vmem:[%s10747_s1 + $0xe68] sm:$0xff]  }
 0x1a6   :  { %7930 = vmatpush3.bf16.msra.mxu1 %v8585_v23  ;;  %6280 = vmatprep.mubr.bf16.mxu1 %v1541_v28  ;;  %v8632_v23 = vld [vmem:[%s10747_s1 + $0xee0] sm:$0xff]   ;;  %v8637_v28 = vld [vmem:[%s10747_s1 + $0xe28] sm:$0xff]  }
 0x1a7   :  { %7931 = vmatprep.subr.bf16.mxu1 %v8587_v27  ;;  %v8636_v27 = vld [vmem:[%s10747_s1 + $0xee8] sm:$0xff]  }
 0x1a8   :  { %7910 = vmatpush3.bf16.msra.mxu0 %v8588_v29  ;;  %v8638_v29 = vld [vmem:[%s10747_s1 + $0xea8] sm:$0xff]  }
 0x1a9   :  { %7911 = vmatprep.subr.bf16.mxu0 %v8590_v31 }
 0x1aa   :  { %7932 = vmatpush3.bf16.msra.mxu1 %v8589_v30  ;;  %v8639_v30 = vld [vmem:[%s10747_s1 + $0xe70] sm:$0xff]  }
 0x1ab   :  { %7933 = vmatprep.subr.bf16.mxu1 %v8591_v32  ;;  %v8640_v32 = vld [vmem:[%s10747_s1 + $0xef0] sm:$0xff]  }
 0x1ac   :  { %7912 = vmatpush3.bf16.msra.mxu0 %v8592_v33 }
 0x1ad   :  { %7913 = vmatprep.subr.bf16.mxu0 %v8594_v35 }
 0x1ae   :  { %7934 = vmatpush3.bf16.msra.mxu1 %v8593_v34  ;;  %v8641_v34 = vld [vmem:[%s10747_s1 + $0xe30] sm:$0xff]  }
 0x1af   :  { %7935 = vmatprep.subr.bf16.mxu1 %v8595_v36 }
 0x1b0   :  { %7914 = vmatpush3.bf16.msra.mxu0 %v8596_v37 }
 0x1b1   :  { %7915 = vmatprep.subr.bf16.mxu0 %v8598_v39 }
 0x1b2   :  { %7936 = vmatpush3.bf16.msra.mxu1 %v8597_v38  ;;  %v8642_v38 = vld [vmem:[%s10747_s1 + $0xeb0] sm:$0xff]  }
 0x1b3   :  { %7937 = vmatprep.subr.bf16.mxu1 %v8599_v40 }
 0x1b4   :  { %7916 = vmatpush3.bf16.msra.mxu0 %v8600_v42  ;;  %v8643_v42 = vld [vmem:[%s10747_s1 + $0xe78] sm:$0xff]  }
 0x1b5   :  { %7917 = vmatprep.subr.bf16.mxu0 %v8602_v44 }
 0x1b6   :  { %7938 = vmatpush3.bf16.msra.mxu1 %v8601_v43  ;;  %v7615_v49 = vpop.f32.mrb[24].mxu0  ;;  %v8644_v43 = vld [vmem:[%s10747_s1 + $0xef8] sm:$0xff]  }
 0x1b7   :  { %v7616_v51 = vpop.f32.mrb[25].mxu0  ;;  %7939 = vmatprep.subr.bf16.mxu1 %v8603_v45 }
 0x1b8   :  { %v7637_v53 = vpop.f32.mrb[24].mxu1  ;;  %v7617_v54 = vadd.f32 %v7616_v51, %v7615_v49  ;;  %v7618_v55 = vpop.f32.mrb[26].mxu0  ;;  %7918 = vmatpush3.bf16.msra.mxu0 %v8604_v46  ;;  %v8645_v49 = vld [vmem:[%s10747_s1 + $0xe38] sm:$0xff]  }
 0x1b9   :  { %v7638_v58 = vpop.f32.mrb[25].mxu1  ;;  %v7619_v59 = vpop.f32.mrb[27].mxu0  ;;  %7919 = vmatprep.subr.bf16.mxu0 %v8606_v48 }
 0x1ba   :  { %v5683_v60 = vadd.f32 %v7617_v54, %v10168_v12  ;;  %v7639_v61 = vadd.f32 %v7638_v58, %v7637_v53  ;;  %v7640_v62 = vpop.f32.mrb[26].mxu1  ;;  %7940 = vmatpush3.bf16.msra.mxu1 %v8605_v47  ;;  %v8621_v12 = vld [vmem:[%s10747_s1 + $0xe08] sm:$0xff]   ;;  %v29_v47 = vld [vmem:[%s10746_s0 + $0x38] sm:$0xff]  ;;  %v8648_v58 = vld [vmem:[%s10747_s1 + $0xfc0] sm:$0xff]  }
 0x1bb   :  { %v7641_v0 = vpop.f32.mrb[27].mxu1  ;;  %7941 = vmatprep.subr.bf16.mxu1 %v8607_v50  ;;  %v1549_v50 = vrot.slane %v29_v47, %v8920_v41  ;;  %v1542_v51 = vcombine.high %v29_v47, %v29_v47  ;;  %v8646_v53 = vld [vmem:[%s10747_s1 + $0xeb8] sm:$0xff]   ;;  %v8650_v62 = vld [vmem:[%s10747_s1 + $0xf80] sm:$0xff]  }
 0x1bc   :  { %v10275_v2 = vadd.f32 %v7639_v61, %v5683_v60  ;;  %7920 = vmatpush3.bf16.msra.mxu0 %v8608_v52  ;;  %v8649_v60 = vld [vmem:[%s10747_s1 + $0xf00] sm:$0xff]  }
 0x1bd   :  { %7921 = vmatprep.subr.bf16.mxu0 %v8610_v57  ;;  %v1557_v54 = vcombine.high %v1549_v50, %v1549_v50  ;;  %v1565_v55 = vrot.slane %v1549_v50, %v8920_v41  ;;  %v10390_v57 = vrot.slane %v1542_v51, %v8920_v41  ;;  %v8682_v47 = vld [vmem:[%s10747_s1 + $0x1000] sm:$0xff]   ;;  %v8684_v50 = vld [vmem:[%s10747_s1 + $0x1048] sm:$0xff]  }
 0x1be   :  { %7942 = vmatpush3.bf16.msra.mxu1 %v8609_v56  ;;  %v8647_v56 = vld [vmem:[%s10747_s1 + $0xf40] sm:$0xff]   ;;  %v8685_v51 = vld [vmem:[%s10747_s1 + $0x10c8] sm:$0xff]  }
 0x1bf   :  { %7943 = vmatprep.subr.bf16.mxu1 %v8611_v63  ;;  %v1579_v59 = vrot.slane %v1557_v54, %v8920_v41  ;;  %v1558_v61 = vcombine.high %v10390_v57, %v10390_v57  ;;  %v1587_v0 = vcombine.high %v1565_v55, %v1565_v55  ;;  %v8688_v54 = vld [vmem:[%s10747_s1 + $0x1050] sm:$0xff]  }
 0x1c0   :  { %7922 = vmatpush3.bf16.msra.mxu0 %v8612_v1  ;;  %v8651_v1 = vld [vmem:[%s10747_s1 + $0xf48] sm:$0xff]  }
 0x1c1   :  { %7951 = vmatprep.subr.bf16.mxu0 %v8615_v5  ;;  %v1589_v63 = vcombine.high %v1579_v59, %v1579_v59 }
 0x1c2   :  { %7944 = vmatpush3.bf16.msra.mxu1 %v8613_v3  ;;  %v8652_v3 = vld [vmem:[%s10747_s1 + $0xfc8] sm:$0xff]  }
 0x1c3   :  { %6241 = vmatmul.mubr.bf16.vlgmr.msra.gmra.mrb[52].mxu0 %v1523_v4  ;;  %7973 = vmatprep.subr.bf16.mxu1 %v8616_v6  ;;  %v8653_v4 = vld [vmem:[%s10747_s1 + $0xf08] sm:$0xff]  }
 0x1c4   :  { %7952 = vmatpush3.bf16.msra.mxu0 %v8617_v7  ;;  %6320 = vmatprep.mubr.bf16.mxu0 %v1579_v59  ;;  %v8654_v6 = vld [vmem:[%s10747_s1 + $0xf88] sm:$0xff]   ;;  %v8655_v7 = vld [vmem:[%s10747_s1 + $0xf50] sm:$0xff]   ;;  %v8693_v59 = vld [vmem:[%s10747_s1 + $0x10d8] sm:$0xff]  }
 0x1c5   :  { %6281 = vmatmul.mubr.bf16.vlgmr.msra.gmra.mrb[52].mxu1 %v1539_v9  ;;  %7953 = vmatprep.subr.bf16.mxu0 %v8619_v10  ;;  %v8657_v9 = vld [vmem:[%s10747_s1 + $0xf10] sm:$0xff]  }
 0x1c6   :  { %7974 = vmatpush3.bf16.msra.mxu1 %v8618_v8  ;;  %6360 = vmatprep.mubr.bf16.mxu1 %v1589_v63  ;;  %v8656_v8 = vld [vmem:[%s10747_s1 + $0xfd0] sm:$0xff]   ;;  %v8697_v63 = vld [vmem:[%s10747_s1 + $0x10e0] sm:$0xff]  }
 0x1c7   :  { %7975 = vmatprep.subr.bf16.mxu1 %v8620_v11  ;;  %v8658_v10 = vld [vmem:[%s10747_s1 + $0xf90] sm:$0xff]   ;;  %v8659_v11 = vld [vmem:[%s10747_s1 + $0xf58] sm:$0xff]  }
 0x1c8   :  { %7954 = vmatpush3.bf16.msra.mxu0 %v8621_v12  ;;  %v8660_v12 = vld [vmem:[%s10747_s1 + $0xfd8] sm:$0xff]  }
 0x1c9   :  { %7955 = vmatprep.subr.bf16.mxu0 %v8623_v14  ;;  %v8662_v14 = vld [vmem:[%s10747_s1 + $0xf98] sm:$0xff]  }
 0x1ca   :  { %7976 = vmatpush3.bf16.msra.mxu1 %v8622_v13  ;;  %v8661_v13 = vld [vmem:[%s10747_s1 + $0xf18] sm:$0xff]  }
 0x1cb   :  { %7977 = vmatprep.subr.bf16.mxu1 %v8624_v15  ;;  %v8663_v15 = vld [vmem:[%s10747_s1 + $0xf60] sm:$0xff]  }
 0x1cc   :  { %7956 = vmatpush3.bf16.msra.mxu0 %v8625_v16  ;;  %v8664_v16 = vld [vmem:[%s10747_s1 + $0xfe0] sm:$0xff]  }
 0x1cd   :  { %7957 = vmatprep.subr.bf16.mxu0 %v8627_v18  ;;  %v8666_v18 = vld [vmem:[%s10747_s1 + $0xfa0] sm:$0xff]  }
 0x1ce   :  { %7978 = vmatpush3.bf16.msra.mxu1 %v8626_v17  ;;  %v8665_v17 = vld [vmem:[%s10747_s1 + $0xf20] sm:$0xff]  }
 0x1cf   :  { %7979 = vmatprep.subr.bf16.mxu1 %v8628_v19  ;;  %v8667_v19 = vld [vmem:[%s10747_s1 + $0xf68] sm:$0xff]  }
 0x1d0   :  { %7958 = vmatpush3.bf16.msra.mxu0 %v8629_v20  ;;  %v8668_v20 = vld [vmem:[%s10747_s1 + $0xfe8] sm:$0xff]  }
 0x1d1   :  { %7959 = vmatprep.subr.bf16.mxu0 %v8631_v22  ;;  %v8670_v22 = vld [vmem:[%s10747_s1 + $0xfa8] sm:$0xff]  }
 0x1d2   :  { %7980 = vmatpush3.bf16.msra.mxu1 %v8630_v21  ;;  %v8669_v21 = vld [vmem:[%s10747_s1 + $0xf28] sm:$0xff]  }
 0x1d3   :  { %7981 = vmatprep.subr.bf16.mxu1 %v8632_v23  ;;  %v8671_v23 = vld [vmem:[%s10747_s1 + $0xf70] sm:$0xff]  }
 0x1d4   :  { %7960 = vmatpush3.bf16.msra.mxu0 %v8633_v24 }
 0x1d5   :  { %7961 = vmatprep.subr.bf16.mxu0 %v8635_v26 }
 0x1d6   :  { %7982 = vmatpush3.bf16.msra.mxu1 %v8634_v25  ;;  %v7659_v31 = vpop.f32.mrb[28].mxu0  ;;  %v8672_v25 = vld [vmem:[%s10747_s1 + $0xff0] sm:$0xff]  }
 0x1d7   :  { %v7660_v33 = vpop.f32.mrb[29].mxu0  ;;  %7983 = vmatprep.subr.bf16.mxu1 %v8636_v27  ;;  %v8673_v27 = vld [vmem:[%s10747_s1 + $0xf30] sm:$0xff]  }
 0x1d8   :  { %v7681_v35 = vpop.f32.mrb[28].mxu1  ;;  %v7661_v36 = vadd.f32 %v7660_v33, %v7659_v31  ;;  %v7662_v37 = vpop.f32.mrb[30].mxu0  ;;  %7962 = vmatpush3.bf16.msra.mxu0 %v8637_v28  ;;  %v8674_v31 = vld [vmem:[%s10747_s1 + $0xfb0] sm:$0xff]  }
 0x1d9   :  { %v7682_v39 = vpop.f32.mrb[29].mxu1  ;;  %v7663_v40 = vpop.f32.mrb[31].mxu0  ;;  %7963 = vmatprep.subr.bf16.mxu0 %v8639_v30 }
 0x1da   :  { %v5763_v44 = vadd.f32 %v7661_v36, %v10275_v2  ;;  %v7683_v45 = vadd.f32 %v7682_v39, %v7681_v35  ;;  %v7684_v46 = vpop.f32.mrb[30].mxu1  ;;  %7984 = vmatpush3.bf16.msra.mxu1 %v8638_v29  ;;  %v1586_v2 = vrot.slane %v1558_v61, %v8920_v41  ;;  %v8677_v40 = vld [vmem:[%s10747_s1 + $0xf38] sm:$0xff]  }
 0x1db   :  { %v7685_v48 = vpop.f32.mrb[31].mxu1  ;;  %7985 = vmatprep.subr.bf16.mxu1 %v8640_v32  ;;  %v8675_v32 = vld [vmem:[%s10747_s1 + $0xf78] sm:$0xff]   ;;  %v8681_v46 = vld [vmem:[%s10747_s1 + $0x10c0] sm:$0xff]  }
 0x1dc   :  { %v10380_v52 = vadd.f32 %v7683_v45, %v5763_v44  ;;  %7964 = vmatpush3.bf16.msra.mxu0 %v8641_v34  ;;  %v1590_v5 = vcombine.high %v1586_v2, %v1586_v2  ;;  %v1572_v44 = vrot.slane %v10390_v57, %v8920_v41  ;;  %v8680_v45 = vld [vmem:[%s10747_s1 + $0x1040] sm:$0xff]   ;;  %v8691_v57 = vld [vmem:[%s10747_s1 + $0x1090] sm:$0xff]   ;;  %v8695_v61 = vld [vmem:[%s10747_s1 + $0x1098] sm:$0xff]  }
 0x1dd   :  { %7965 = vmatprep.subr.bf16.mxu0 %v8643_v42  ;;  %v8683_v48 = vld [vmem:[%s10747_s1 + $0x1080] sm:$0xff]  }
 0x1de   :  { %7986 = vmatpush3.bf16.msra.mxu1 %v8642_v38  ;;  %v8676_v38 = vld [vmem:[%s10747_s1 + $0xff8] sm:$0xff]  }
 0x1df   :  { %7987 = vmatprep.subr.bf16.mxu1 %v8644_v43  ;;  %v8678_v43 = vld [vmem:[%s10747_s1 + $0xfb8] sm:$0xff]  }
 0x1e0   :  { %7966 = vmatpush3.bf16.msra.mxu0 %v8645_v49  ;;  %v1588_v49 = vcombine.high %v1572_v44, %v1572_v44 }
 0x1e1   :  { %7995 = vmatprep.subr.bf16.mxu0 %v8647_v56  ;;  %v8690_v56 = vld [vmem:[%s10747_s1 + $0x1010] sm:$0xff]  }
 0x1e2   :  { %7988 = vmatpush3.bf16.msra.mxu1 %v8646_v53  ;;  %v8687_v53 = vld [vmem:[%s10747_s1 + $0x1088] sm:$0xff]  }
 0x1e3   :  { %6321 = vmatmul.mubr.bf16.vlgmr.msra.gmra.mrb[56].mxu0 %v1565_v55  ;;  %8017 = vmatprep.subr.bf16.mxu1 %v8648_v58  ;;  %v8689_v55 = vld [vmem:[%s10747_s1 + $0x10d0] sm:$0xff]   ;;  %v8692_v58 = vld [vmem:[%s10747_s1 + $0x1058] sm:$0xff]  }
 0x1e4   :  { %7996 = vmatpush3.bf16.msra.mxu0 %v8649_v60  ;;  %6400 = vmatprep.mubr.bf16.mxu0 %v1586_v2  ;;  %v8694_v60 = vld [vmem:[%s10747_s1 + $0x1018] sm:$0xff]   ;;  %v8700_v2 = vld [vmem:[%s10747_s1 + $0x1068] sm:$0xff]  }
 0x1e5   :  { %6361 = vmatmul.mubr.bf16.vlgmr.msra.gmra.mrb[56].mxu1 %v1587_v0  ;;  %7997 = vmatprep.subr.bf16.mxu0 %v8651_v1  ;;  %v8698_v0 = vld [vmem:[%s10747_s1 + $0x1020] sm:$0xff]  }
 0x1e6   :  { %8018 = vmatpush3.bf16.msra.mxu1 %v8650_v62  ;;  %6440 = vmatprep.mubr.bf16.mxu1 %v1590_v5  ;;  %v8696_v62 = vld [vmem:[%s10747_s1 + $0x1060] sm:$0xff]   ;;  %v8703_v5 = vld [vmem:[%s10747_s1 + $0x10a8] sm:$0xff]  }
 0x1e7   :  { %8019 = vmatprep.subr.bf16.mxu1 %v8652_v3  ;;  %v8699_v1 = vld [vmem:[%s10747_s1 + $0x10a0] sm:$0xff]   ;;  %v8701_v3 = vld [vmem:[%s10747_s1 + $0x10e8] sm:$0xff]  }
 0x1e8   :  { %7998 = vmatpush3.bf16.msra.mxu0 %v8653_v4  ;;  %v8702_v4 = vld [vmem:[%s10747_s1 + $0x1028] sm:$0xff]  }
 0x1e9   :  { %7999 = vmatprep.subr.bf16.mxu0 %v8655_v7 }
 0x1ea   :  { %8020 = vmatpush3.bf16.msra.mxu1 %v8654_v6  ;;  %v8704_v6 = vld [vmem:[%s10747_s1 + $0x1070] sm:$0xff]  }
 0x1eb   :  { %8021 = vmatprep.subr.bf16.mxu1 %v8656_v8  ;;  %v8705_v8 = vld [vmem:[%s10747_s1 + $0x10f0] sm:$0xff]  }
 0x1ec   :  { %8000 = vmatpush3.bf16.msra.mxu0 %v8657_v9 }
 0x1ed   :  { %8001 = vmatprep.subr.bf16.mxu0 %v8659_v11 }
 0x1ee   :  { %8022 = vmatpush3.bf16.msra.mxu1 %v8658_v10  ;;  %v8706_v10 = vld [vmem:[%s10747_s1 + $0x1030] sm:$0xff]  }
 0x1ef   :  { %8023 = vmatprep.subr.bf16.mxu1 %v8660_v12 }
 0x1f0   :  { %8002 = vmatpush3.bf16.msra.mxu0 %v8661_v13 }
 0x1f1   :  { %8003 = vmatprep.subr.bf16.mxu0 %v8663_v15 }
 0x1f2   :  { %8024 = vmatpush3.bf16.msra.mxu1 %v8662_v14  ;;  %v8707_v14 = vld [vmem:[%s10747_s1 + $0x10b0] sm:$0xff]  }
 0x1f3   :  { %8025 = vmatprep.subr.bf16.mxu1 %v8664_v16 }
 0x1f4   :  { %8004 = vmatpush3.bf16.msra.mxu0 %v8665_v17  ;;  %v8708_v17 = vld [vmem:[%s10747_s1 + $0x1078] sm:$0xff]  }
 0x1f5   :  { %8005 = vmatprep.subr.bf16.mxu0 %v8667_v19 }
 0x1f6   :  { %8026 = vmatpush3.bf16.msra.mxu1 %v8666_v18  ;;  %v7703_v24 = vpop.f32.mrb[32].mxu0  ;;  %v8709_v18 = vld [vmem:[%s10747_s1 + $0x10f8] sm:$0xff]  }
 0x1f7   :  { %v7704_v26 = vpop.f32.mrb[33].mxu0  ;;  %8027 = vmatprep.subr.bf16.mxu1 %v8668_v20 }
 0x1f8   :  { %v7725_v28 = vpop.f32.mrb[32].mxu1  ;;  %v7705_v29 = vadd.f32 %v7704_v26, %v7703_v24  ;;  %v7706_v30 = vpop.f32.mrb[34].mxu0  ;;  %8006 = vmatpush3.bf16.msra.mxu0 %v8669_v21  ;;  %v30_v24 = vld [vmem:[%s10746_s0 + $0x40] sm:$0xff]  ;;  %v8711_v26 = vld [vmem:[%s10747_s1 + $0x10b8] sm:$0xff]  }
 0x1f9   :  { %v7726_v33 = vpop.f32.mrb[33].mxu1  ;;  %v7707_v34 = vpop.f32.mrb[35].mxu0  ;;  %8007 = vmatprep.subr.bf16.mxu0 %v8671_v23 }
 0x1fa   :  { %v5843_v35 = vadd.f32 %v7705_v29, %v10380_v52  ;;  %v7727_v36 = vadd.f32 %v7726_v33, %v7725_v28  ;;  %v7728_v37 = vpop.f32.mrb[34].mxu1  ;;  %8028 = vmatpush3.bf16.msra.mxu1 %v8670_v22  ;;  %v8686_v52 = vld [vmem:[%s10747_s1 + $0x1008] sm:$0xff]   ;;  %v8710_v22 = vld [vmem:[%s10747_s1 + $0x1038] sm:$0xff]   ;;  %v1591_v28 = vcombine.high %v30_v24, %v30_v24  ;;  %v8712_v29 = vld [vmem:[%s10747_s1 + $0x1140] sm:$0xff]  }
 0x1fb   :  { %v7729_v39 = vpop.f32.mrb[35].mxu1  ;;  %8029 = vmatprep.subr.bf16.mxu1 %v8672_v25  ;;  %v8714_v34 = vld [vmem:[%s10747_s1 + $0x1100] sm:$0xff]  }
 0x1fc   :  { %v10487_v42 = vadd.f32 %v7727_v36, %v5843_v35  ;;  %8008 = vmatpush3.bf16.msra.mxu0 %v8673_v27  ;;  %v1598_v27 = vrot.slane %v30_v24, %v8920_v41  ;;  %v10605_v33 = vrot.slane %v1591_v28, %v8920_v41  ;;  %v8715_v36 = vld [vmem:[%s10747_s1 + $0x1180] sm:$0xff]   ;;  %v8716_v39 = vld [vmem:[%s10747_s1 + $0x1148] sm:$0xff]  }
 0x1fd   :  { %8009 = vmatprep.subr.bf16.mxu0 %v8675_v32  ;;  %v8713_v32 = vld [vmem:[%s10747_s1 + $0x11c0] sm:$0xff]  }
 0x1fe   :  { %8030 = vmatpush3.bf16.msra.mxu1 %v8674_v31  ;;  %v1606_v30 = vcombine.high %v1598_v27, %v1598_v27  ;;  %v1614_v31 = vrot.slane %v1598_v27, %v8920_v41  ;;  %v1607_v37 = vcombine.high %v10605_v33, %v10605_v33 }
 0x1ff   :  { %8031 = vmatprep.subr.bf16.mxu1 %v8676_v38 }
 0x200   :  { %8010 = vmatpush3.bf16.msra.mxu0 %v8677_v40  ;;  %v1628_v35 = vrot.slane %v1606_v30, %v8920_v41  ;;  %v1636_v38 = vcombine.high %v1614_v31, %v1614_v31 }
 0x201   :  { %8039 = vmatprep.subr.bf16.mxu0 %v8680_v45  ;;  %v8719_v45 = vld [vmem:[%s10747_s1 + $0x1188] sm:$0xff]  }
 0x202   :  { %8032 = vmatpush3.bf16.msra.mxu1 %v8678_v43  ;;  %v1638_v40 = vcombine.high %v1628_v35, %v1628_v35  ;;  %v1635_v43 = vrot.slane %v1607_v37, %v8920_v41 }
 0x203   :  { %6401 = vmatmul.mubr.bf16.vlgmr.msra.gmra.mrb[60].mxu0 %v1572_v44  ;;  %8061 = vmatprep.subr.bf16.mxu1 %v8681_v46  ;;  %v8718_v44 = vld [vmem:[%s10747_s1 + $0x1108] sm:$0xff]  }
 0x204   :  { %8040 = vmatpush3.bf16.msra.mxu0 %v8682_v47  ;;  %6480 = vmatprep.mubr.bf16.mxu0 %v1628_v35  ;;  %v1639_v46 = vcombine.high %v1635_v43, %v1635_v43  ;;  %v8720_v47 = vld [vmem:[%s10747_s1 + $0x1150] sm:$0xff]  }
 0x205   :  { %6441 = vmatmul.mubr.bf16.vlgmr.msra.gmra.mrb[60].mxu1 %v1588_v49  ;;  %8041 = vmatprep.subr.bf16.mxu0 %v8684_v50  ;;  %v8722_v49 = vld [vmem:[%s10747_s1 + $0x1110] sm:$0xff]  }
 0x206   :  { %8062 = vmatpush3.bf16.msra.mxu1 %v8683_v48  ;;  %6520 = vmatprep.mubr.bf16.mxu1 %v1638_v40  ;;  %v8721_v48 = vld [vmem:[%s10747_s1 + $0x11d0] sm:$0xff]  }
 0x207   :  { %8063 = vmatprep.subr.bf16.mxu1 %v8685_v51  ;;  %v8723_v50 = vld [vmem:[%s10747_s1 + $0x1190] sm:$0xff]   ;;  %v8724_v51 = vld [vmem:[%s10747_s1 + $0x1158] sm:$0xff]  }
 0x208   :  { %8042 = vmatpush3.bf16.msra.mxu0 %v8686_v52  ;;  %v8725_v52 = vld [vmem:[%s10747_s1 + $0x11d8] sm:$0xff]  }
 0x209   :  { %8043 = vmatprep.subr.bf16.mxu0 %v8688_v54  ;;  %v8727_v54 = vld [vmem:[%s10747_s1 + $0x1198] sm:$0xff]  }
 0x20a   :  { %8064 = vmatpush3.bf16.msra.mxu1 %v8687_v53  ;;  %v8726_v53 = vld [vmem:[%s10747_s1 + $0x1118] sm:$0xff]  }
 0x20b   :  { %8065 = vmatprep.subr.bf16.mxu1 %v8689_v55  ;;  %v8728_v55 = vld [vmem:[%s10747_s1 + $0x1160] sm:$0xff]  }
 0x20c   :  { %8044 = vmatpush3.bf16.msra.mxu0 %v8690_v56  ;;  %v8729_v56 = vld [vmem:[%s10747_s1 + $0x11e0] sm:$0xff]  }
 0x20d   :  { %8045 = vmatprep.subr.bf16.mxu0 %v8692_v58  ;;  %v8731_v58 = vld [vmem:[%s10747_s1 + $0x11a0] sm:$0xff]  }
 0x20e   :  { %8066 = vmatpush3.bf16.msra.mxu1 %v8691_v57  ;;  %v8730_v57 = vld [vmem:[%s10747_s1 + $0x1120] sm:$0xff]  }
 0x20f   :  { %8067 = vmatprep.subr.bf16.mxu1 %v8693_v59  ;;  %v8732_v59 = vld [vmem:[%s10747_s1 + $0x1168] sm:$0xff]  }
 0x210   :  { %8046 = vmatpush3.bf16.msra.mxu0 %v8694_v60  ;;  %v8733_v60 = vld [vmem:[%s10747_s1 + $0x11e8] sm:$0xff]  }
 0x211   :  { %8047 = vmatprep.subr.bf16.mxu0 %v8696_v62  ;;  %v8735_v62 = vld [vmem:[%s10747_s1 + $0x11a8] sm:$0xff]  }
 0x212   :  { %8068 = vmatpush3.bf16.msra.mxu1 %v8695_v61  ;;  %v8734_v61 = vld [vmem:[%s10747_s1 + $0x1128] sm:$0xff]  }
 0x213   :  { %8069 = vmatprep.subr.bf16.mxu1 %v8697_v63  ;;  %v8736_v63 = vld [vmem:[%s10747_s1 + $0x1170] sm:$0xff]  }
 0x214   :  { %8048 = vmatpush3.bf16.msra.mxu0 %v8698_v0 }
 0x215   :  { %8049 = vmatprep.subr.bf16.mxu0 %v8700_v2 }
 0x216   :  { %8070 = vmatpush3.bf16.msra.mxu1 %v8699_v1  ;;  %v7747_v7 = vpop.f32.mrb[36].mxu0  ;;  %v8737_v1 = vld [vmem:[%s10747_s1 + $0x11f0] sm:$0xff]  }
 0x217   :  { %v7748_v9 = vpop.f32.mrb[37].mxu0  ;;  %8071 = vmatprep.subr.bf16.mxu1 %v8701_v3  ;;  %v8738_v3 = vld [vmem:[%s10747_s1 + $0x1130] sm:$0xff]  }
 0x218   :  { %v7769_v11 = vpop.f32.mrb[36].mxu1  ;;  %v7749_v12 = vadd.f32 %v7748_v9, %v7747_v7  ;;  %v7750_v13 = vpop.f32.mrb[38].mxu0  ;;  %8050 = vmatpush3.bf16.msra.mxu0 %v8702_v4  ;;  %v8739_v7 = vld [vmem:[%s10747_s1 + $0x11b0] sm:$0xff]  }
 0x219   :  { %v7770_v15 = vpop.f32.mrb[37].mxu1  ;;  %v7751_v16 = vpop.f32.mrb[39].mxu0  ;;  %8051 = vmatprep.subr.bf16.mxu0 %v8704_v6 }
 0x21a   :  { %v5923_v19 = vadd.f32 %v7749_v12, %v10487_v42  ;;  %v7771_v20 = vadd.f32 %v7770_v15, %v7769_v11  ;;  %v7772_v21 = vpop.f32.mrb[38].mxu1  ;;  %8072 = vmatpush3.bf16.msra.mxu1 %v8703_v5  ;;  %v8717_v42 = vld [vmem:[%s10747_s1 + $0x11c8] sm:$0xff]   ;;  %v8742_v16 = vld [vmem:[%s10747_s1 + $0x1138] sm:$0xff]  }
 0x21b   :  { %v7773_v23 = vpop.f32.mrb[39].mxu1  ;;  %8073 = vmatprep.subr.bf16.mxu1 %v8705_v8  ;;  %v8740_v8 = vld [vmem:[%s10747_s1 + $0x1178] sm:$0xff]  }
 0x21c   :  { %v10591_v25 = vadd.f32 %v7771_v20, %v5923_v19  ;;  %8052 = vmatpush3.bf16.msra.mxu0 %v8706_v10  ;;  %v1621_v19 = vrot.slane %v10605_v33, %v8920_v41 }
 0x21d   :  { %8053 = vmatprep.subr.bf16.mxu0 %v8708_v17 }
 0x21e   :  { %8074 = vmatpush3.bf16.msra.mxu1 %v8707_v14  ;;  %v8741_v14 = vld [vmem:[%s10747_s1 + $0x11f8] sm:$0xff]   ;;  %v1637_v20 = vcombine.high %v1621_v19, %v1621_v19 }
 0x21f   :  { %8075 = vmatprep.subr.bf16.mxu1 %v8709_v18  ;;  %v8743_v18 = vld [vmem:[%s10747_s1 + $0x11b8] sm:$0xff]  }
 0x220   :  { %8054 = vmatpush3.bf16.msra.mxu0 %v8710_v22 }
 0x221   :  { %8083 = vmatprep.subr.bf16.mxu0 %v8712_v29 }
 0x222   :  { %8076 = vmatpush3.bf16.msra.mxu1 %v8711_v26 }
 0x223   :  { %6481 = vmatmul.mubr.bf16.vlgmr.msra.gmra.mrb[64].mxu0 %v1614_v31  ;;  %8105 = vmatprep.subr.bf16.mxu1 %v8713_v32 }
 0x224   :  { %8084 = vmatpush3.bf16.msra.mxu0 %v8714_v34  ;;  %6560 = vmatprep.mubr.bf16.mxu0 %v1635_v43 }
 0x225   :  { %6521 = vmatmul.mubr.bf16.vlgmr.msra.gmra.mrb[64].mxu1 %v1636_v38  ;;  %8085 = vmatprep.subr.bf16.mxu0 %v8716_v39 }
 0x226   :  { %8106 = vmatpush3.bf16.msra.mxu1 %v8715_v36  ;;  %6600 = vmatprep.mubr.bf16.mxu1 %v1639_v46 }
 0x227   :  { %8107 = vmatprep.subr.bf16.mxu1 %v8717_v42 }
 0x228   :  { %8086 = vmatpush3.bf16.msra.mxu0 %v8718_v44 }
 0x229   :  { %8087 = vmatprep.subr.bf16.mxu0 %v8720_v47 }
 0x22a   :  { %8108 = vmatpush3.bf16.msra.mxu1 %v8719_v45 }
 0x22b   :  { %8109 = vmatprep.subr.bf16.mxu1 %v8721_v48 }
 0x22c   :  { %8088 = vmatpush3.bf16.msra.mxu0 %v8722_v49 }
 0x22d   :  { %8089 = vmatprep.subr.bf16.mxu0 %v8724_v51 }
 0x22e   :  { %8110 = vmatpush3.bf16.msra.mxu1 %v8723_v50 }
 0x22f   :  { %8111 = vmatprep.subr.bf16.mxu1 %v8725_v52 }
 0x230   :  { %8090 = vmatpush3.bf16.msra.mxu0 %v8726_v53 }
 0x231   :  { %8091 = vmatprep.subr.bf16.mxu0 %v8728_v55 }
 0x232   :  { %8112 = vmatpush3.bf16.msra.mxu1 %v8727_v54 }
 0x233   :  { %8113 = vmatprep.subr.bf16.mxu1 %v8729_v56 }
 0x234   :  { %8092 = vmatpush3.bf16.msra.mxu0 %v8730_v57 }
 0x235   :  { %8093 = vmatprep.subr.bf16.mxu0 %v8732_v59 }
 0x236   :  { %8114 = vmatpush3.bf16.msra.mxu1 %v8731_v58  ;;  %v7791_v0 = vpop.f32.mrb[40].mxu0 }
 0x237   :  { %v7792_v2 = vpop.f32.mrb[41].mxu0  ;;  %8115 = vmatprep.subr.bf16.mxu1 %v8733_v60 }
 0x238   :  { %v7813_v4 = vpop.f32.mrb[40].mxu1  ;;  %v7793_v5 = vadd.f32 %v7792_v2, %v7791_v0  ;;  %v7794_v6 = vpop.f32.mrb[42].mxu0  ;;  %8094 = vmatpush3.bf16.msra.mxu0 %v8734_v61 }
 0x239   :  { %v7814_v9 = vpop.f32.mrb[41].mxu1  ;;  %v7795_v10 = vpop.f32.mrb[43].mxu0  ;;  %8095 = vmatprep.subr.bf16.mxu0 %v8736_v63 }
 0x23a   :  { %v6003_v11 = vadd.f32 %v7793_v5, %v10591_v25  ;;  %v7815_v12 = vadd.f32 %v7814_v9, %v7813_v4  ;;  %v7816_v13 = vpop.f32.mrb[42].mxu1  ;;  %8116 = vmatpush3.bf16.msra.mxu1 %v8735_v62 }
 0x23b   :  { %v7817_v15 = vpop.f32.mrb[43].mxu1  ;;  %8117 = vmatprep.subr.bf16.mxu1 %v8737_v1 }
 0x23c   :  { %v6043_v17 = vadd.f32 %v7815_v12, %v6003_v11  ;;  %8096 = vmatpush3.bf16.msra.mxu0 %v8738_v3 }
 0x23d   :  { %8097 = vmatprep.subr.bf16.mxu0 %v8740_v8 }
 0x23e   :  { %8118 = vmatpush3.bf16.msra.mxu1 %v8739_v7 }
 0x23f   :  { %8119 = vmatprep.subr.bf16.mxu1 %v8741_v14 }
 0x240   :  { %8098 = vmatpush3.bf16.msra.mxu0 %v8742_v16 }
 0x241   :  { %10 = vsyncpa [#allocation3], 0  ;;  %v8745_v45 = vld [vmem:[%s10749_s3] sm:$0xff]   ;;  %v8782_v46 = vmov 0.0   ;;  %v8746_v47 = vld [vmem:[%s10749_s3 + $0x8] sm:$0xff]   ;;  %vm8783_vm0 = vmmov 0  }
 0x242   :  { %8120 = vmatpush3.bf16.msra.mxu1 %v8743_v18  ;;  %8136 = vmatprep.subr.bf16.mxu0 %v8782_v46  ;;  %v8747_v48 = vld [vmem:[%s10749_s3 + $0x10] sm:$0xff]   ;;  %v8748_v49 = vld [vmem:[%s10749_s3 + $0x18] sm:$0xff]   ;;  %v8749_v50 = vld [vmem:[%s10749_s3 + $0x20] sm:$0xff]   ;;  %vm6721_vm1 = vcmask 74752  }
 0x243   :  { %6561 = vmatmul.mubr.bf16.vlgmr.msra.gmra.mrb[68].mxu0 %v1621_v19  ;;  %v8750_v53 = vld [vmem:[%s10749_s3 + $0x28] sm:$0xff]   ;;  %v8751_v63 = vld [vmem:[%s10749_s3 + $0x30] sm:$0xff]   ;;  %v8752_v1 = vld [vmem:[%s10749_s3 + $0x38] sm:$0xff]  }
 0x244   :  { %8137 = vmatpush3.bf16.msra.mxu0 %v8745_v45  ;;  %8152 = vmatprep.mubr.msk.bf16.mxu0 %vm8783_vm0, %v8782_v46 }
 0x245   :  { %6601 = vmatmul.mubr.bf16.vlgmr.msra.gmra.mrb[68].mxu1 %v1637_v20  ;;  %8138 = vmatprep.subr.bf16.mxu0 %v8782_v46 }
 0x248   :  { %8139 = vmatpush3.bf16.msra.mxu0 %v8746_v47 }
 0x249   :  { %8140 = vmatprep.subr.bf16.mxu0 %v8782_v46 }
 0x24c   :  { %8141 = vmatpush3.bf16.msra.mxu0 %v8747_v48 }
 0x24d   :  { %8142 = vmatprep.subr.bf16.mxu0 %v8782_v46 }
 0x250   :  { %8143 = vmatpush3.bf16.msra.mxu0 %v8748_v49 }
 0x251   :  { %8144 = vmatprep.subr.bf16.mxu0 %v8782_v46 }
 0x254   :  { %8145 = vmatpush3.bf16.msra.mxu0 %v8749_v50 }
 0x255   :  { %8146 = vmatprep.subr.bf16.mxu0 %v8782_v46 }
 0x256   :  { %v7835_v21 = vpop.f32.mrb[44].mxu0 }
 0x257   :  { %v7836_v22 = vpop.f32.mrb[45].mxu0 }
 0x258   :  { %v7857_v23 = vpop.f32.mrb[44].mxu1  ;;  %v7837_v24 = vadd.f32 %v7836_v22, %v7835_v21  ;;  %v7838_v25 = vpop.f32.mrb[46].mxu0  ;;  %8147 = vmatpush3.bf16.msra.mxu0 %v8750_v53 }
 0x259   :  { %v7858_v26 = vpop.f32.mrb[45].mxu1  ;;  %v7839_v27 = vpop.f32.mrb[47].mxu0  ;;  %8148 = vmatprep.subr.bf16.mxu0 %v8782_v46 }
 0x25a   :  { %v6083_v28 = vadd.f32 %v7837_v24, %v6043_v17  ;;  %v7859_v29 = vadd.f32 %v7858_v26, %v7857_v23  ;;  %v7860_v30 = vpop.f32.mrb[46].mxu1 }
 0x25b   :  { %v7861_v31 = vpop.f32.mrb[47].mxu1 }
 0x25c   :  { %v6123_v41 = vadd.f32 %v7859_v29, %v6083_v28  ;;  %8149 = vmatpush3.bf16.msra.mxu0 %v8751_v63 }
 0x25d   :  { %8150 = vmatprep.subr.bf16.mxu0 %v8782_v46 }
 0x260   :  { %8151 = vmatpush3.bf16.msra.mxu0 %v8752_v1 }
 0x276   :  { %v7879_v32 = vpop.f32.mrb[48].mxu0 }
 0x277   :  { %v7880_v33 = vpop.f32.mrb[49].mxu0 }
 0x278   :  { %v7901_v34 = vpop.f32.mrb[48].mxu1  ;;  %v7881_v35 = vadd.f32 %v7880_v33, %v7879_v32  ;;  %v7882_v36 = vpop.f32.mrb[50].mxu0 }
 0x279   :  { %v7902_v37 = vpop.f32.mrb[49].mxu1  ;;  %v7883_v38 = vpop.f32.mrb[51].mxu0 }
 0x27a   :  { %v6163_v39 = vadd.f32 %v7881_v35, %v6123_v41  ;;  %v7903_v40 = vadd.f32 %v7902_v37, %v7901_v34  ;;  %v7904_v42 = vpop.f32.mrb[50].mxu1 }
 0x27b   :  { %v7905_v43 = vpop.f32.mrb[51].mxu1 }
 0x27c   :  { %v6203_v44 = vadd.f32 %v7903_v40, %v6163_v39 }
 0x296   :  { %v7923_v51 = vpop.f32.mrb[52].mxu0 }
 0x297   :  { %v7924_v52 = vpop.f32.mrb[53].mxu0 }
 0x298   :  { %v7945_v54 = vpop.f32.mrb[52].mxu1  ;;  %v7925_v55 = vadd.f32 %v7924_v52, %v7923_v51  ;;  %v7926_v56 = vpop.f32.mrb[54].mxu0  ;;  %v7326_v52 = vld [vmem:[%s10750_s4] ss:$0 sm:$0xff]  ;;  %s8784_s4 = smov [#allocation2]  }
 0x299   :  { %v7946_v57 = vpop.f32.mrb[53].mxu1  ;;  %v7927_v58 = vpop.f32.mrb[55].mxu0  ;;  %s6741_s27 = sshll.u32 %s8784_s4, 4  ;;  %s6742_s27 = int_to_ptr.vmem [resolvable:$true] %s6741_s27 }
 0x29a   :  { %v6243_v59 = vadd.f32 %v7925_v55, %v6203_v44  ;;  %v7947_v60 = vadd.f32 %v7946_v57, %v7945_v54  ;;  %v7948_v61 = vpop.f32.mrb[54].mxu1  ;;  %s8757_s28 = scalar_lea.vmem %s6742_s27, 32  ;;  %p8762_p1 = scmp.lt.s32.totalorder %s6742_s27, %s6742_s27 }
 0x29b   :  { %v7949_v62 = vpop.f32.mrb[55].mxu1  ;;  %p8758_p0 = scmp.ne.s32.totalorder %s6742_s27, %s8757_s28  ;;  %p8763_p2 = scmp.lt.s32.totalorder %s8757_s28, %s8757_s28 }
 0x29c   :  { %v6283_v0 = vadd.f32 %v7947_v60, %v6243_v59 }
 0x29d   :  { %p8764_p3 = por %p8763_p2, %p8762_p1 }
 0x29f   :  { %p8765_p4 = pnand %p8764_p3, %p8758_p0 }
 0x2b6   :  { %v7967_v2 = vpop.f32.mrb[56].mxu0 }
 0x2b7   :  { %v7968_v3 = vpop.f32.mrb[57].mxu0 }
 0x2b8   :  { %v7989_v4 = vpop.f32.mrb[56].mxu1  ;;  %v7969_v5 = vadd.f32 %v7968_v3, %v7967_v2  ;;  %v7970_v6 = vpop.f32.mrb[58].mxu0 }
 0x2b9   :  { %v7990_v7 = vpop.f32.mrb[57].mxu1  ;;  %v7971_v8 = vpop.f32.mrb[59].mxu0 }
 0x2ba   :  { %v6323_v9 = vadd.f32 %v7969_v5, %v6283_v0  ;;  %v7991_v10 = vadd.f32 %v7990_v7, %v7989_v4  ;;  %v7992_v11 = vpop.f32.mrb[58].mxu1 }
 0x2bb   :  { %v7993_v12 = vpop.f32.mrb[59].mxu1 }
 0x2bc   :  { %v6363_v13 = vadd.f32 %v7991_v10, %v6323_v9 }
 0x2d6   :  { %v8011_v14 = vpop.f32.mrb[60].mxu0 }
 0x2d7   :  { %v8012_v15 = vpop.f32.mrb[61].mxu0 }
 0x2d8   :  { %v8033_v16 = vpop.f32.mrb[60].mxu1  ;;  %v8013_v17 = vadd.f32 %v8012_v15, %v8011_v14  ;;  %v8014_v18 = vpop.f32.mrb[62].mxu0 }
 0x2d9   :  { %v8034_v19 = vpop.f32.mrb[61].mxu1  ;;  %v8015_v20 = vpop.f32.mrb[63].mxu0 }
 0x2da   :  { %v6403_v21 = vadd.f32 %v8013_v17, %v6363_v13  ;;  %v8035_v22 = vadd.f32 %v8034_v19, %v8033_v16  ;;  %v8036_v23 = vpop.f32.mrb[62].mxu1 }
 0x2db   :  { %v8037_v24 = vpop.f32.mrb[63].mxu1 }
 0x2dc   :  { %v6443_v25 = vadd.f32 %v8035_v22, %v6403_v21 }
 0x2f6   :  { %v8055_v26 = vpop.f32.mrb[64].mxu0 }
 0x2f7   :  { %v8056_v27 = vpop.f32.mrb[65].mxu0 }
 0x2f8   :  { %v8077_v28 = vpop.f32.mrb[64].mxu1  ;;  %v8057_v29 = vadd.f32 %v8056_v27, %v8055_v26  ;;  %v8058_v30 = vpop.f32.mrb[66].mxu0 }
 0x2f9   :  { %v8078_v31 = vpop.f32.mrb[65].mxu1  ;;  %v8059_v41 = vpop.f32.mrb[67].mxu0 }
 0x2fa   :  { %v6483_v32 = vadd.f32 %v8057_v29, %v6443_v25  ;;  %v8079_v33 = vadd.f32 %v8078_v31, %v8077_v28  ;;  %v8080_v34 = vpop.f32.mrb[66].mxu1 }
 0x2fb   :  { %v8081_v35 = vpop.f32.mrb[67].mxu1 }
 0x2fc   :  { %v6523_v36 = vadd.f32 %v8079_v33, %v6483_v32 }
 0x316   :  { %v8099_v37 = vpop.f32.mrb[68].mxu0 }
 0x317   :  { %v8100_v38 = vpop.f32.mrb[69].mxu0 }
 0x318   :  { %v8121_v39 = vpop.f32.mrb[68].mxu1  ;;  %v8101_v40 = vadd.f32 %v8100_v38, %v8099_v37  ;;  %v8102_v42 = vpop.f32.mrb[70].mxu0 }
 0x319   :  { %v8122_v43 = vpop.f32.mrb[69].mxu1  ;;  %v8103_v44 = vpop.f32.mrb[71].mxu0 }
 0x31a   :  { %v6563_v45 = vadd.f32 %v8101_v40, %v6523_v36  ;;  %v8123_v46 = vadd.f32 %v8122_v43, %v8121_v39  ;;  %v8124_v47 = vpop.f32.mrb[70].mxu1 }
 0x31b   :  { %v8125_v48 = vpop.f32.mrb[71].mxu1 }
 0x31c   :  { %v6603_v49 = vadd.f32 %v8123_v46, %v6563_v45 }
 0x31e   :  { %v6608_v50 = vmax.f32 %v6603_v49, 0.0 }
 0x320   :  { %v6609_v51 = vpack.c.bf16 %v6608_v50, %v6608_v50 }
 0x322   :  { %8153 = vmatmul.mubr.bf16.vlgmr.msra.gmra.mrb[72].mxu0 %v6609_v51 }
 0x3f5   :  { %v6715_v53 = vpop.f32.mrb[72].mxu0 }
 0x3f6   :  { %v6716_v54 = vadd.f32 %v7326_v52, %v6715_v53  ;;  %v8154_v55 = vpop.f32.mrb[73].mxu0 }
 0x3f7   :  { %v6718_v56 = vpop.f32.mrb[74].mxu0 }
 0x3f8   :  { %v8155_v57 = vpop.f32.mrb[75].mxu0  ;;  %v6722_v58 = vsel %vm6721_vm1, %v6716_v54, -inf }
 0x3f9   :  { %6723 = vmax.xlane.f32.xlu0 %v6722_v58 }
 0x486   :  { %v6724_v59 = vpop.xlane.xlu0 %6723 }
 0x487   :  { %v6725_v60 = vsub.f32 %v6716_v54, %v6724_v59 }
 0x489   :  { %v6726_v61 = vmul.f32 1.442695, %v6725_v60 }
 0x48b   :  { %8753 = vpow2.f32 %v6726_v61 }
 0x495   :  { %v8754_v62 = vpop.eup %8753 }
 0x496   :  { %v6728_v63 = vsel %vm6721_vm1, %v8754_v62, 0.0 }
 0x497   :  { %6729 = vadd.xlane.f32.xlu0 %v6728_v63 }
 0x524   :  { %v6730_v0 = vpop.xlane.xlu0 %6729 }
 0x525   :  { %8755 = vlog2.f32 %v6730_v0 }
 0x52f   :  { %v8756_v1 = vpop.eup %8755 }
 0x530   :  { %v6732_v2 = vmul.f32 0.6931472, %v8756_v1 }
 0x532   :  { %v6733_v3 = vsub.f32 %v6725_v60, %v6732_v2 }
 0x534   :  { %6734 = vst.msk [vmem:[#allocation2] sm:$0x3] %vm6721_vm1, %v6733_v3 }
 0x535   :  { %8768 = shalt.err (!%p8765_p4)
}
 0x536   :  { %s8769_s2 = scalar_lea.hbm %s10751_s5, 32 }
 0x537   :  { %p8770_p5 = scmp.ne.s32.totalorder %s10751_s5, %s8769_s2  ;;  %p8773_p6 = scmp.lt.u32.totalorder %s8769_s2, %s10751_s5 }
 0x539   :  { %p8775_p7 = pnand %p8773_p6, %p8770_p5 }
 0x53b   :  { %8778 = shalt.err (!%p8775_p7)
}
 0x53c   :  { %6744 = dma.vmem_to_hbm [thread:$0]  %s6742_s27, 32, %s10751_s5, [#allocation3]  }
 0x53d   :  { %8779 = dma.done.wait [#allocation3], 32  }
 0x53e   :  { %8780 = vsyncadd [#allocation3], 4294967264 }
 0x53f   :  { %6748 = vsyncpa [#allocation3], 1 }

</bundles_post_ra>
